<compile_context>
chip_gen: v5e
topology: v5e:2x2
jax: 0.10.0
libtpu: 0.0.40
codegen_flags: <defaults>
</compile_context>

<pallas_src>
import jax
import jax.numpy as jnp
from jax.experimental import pallas as pl
from jax.experimental.pallas import tpu as pltpu


def _cascade_forward_kernel(x_ref, w1_ref, b1_ref, w2_ref, b2_ref, o_ref):
    # x_ref:  (BT, D)    VMEM tile of the batch
    # w1_ref: (D, HP)    resident, hidden padded to 128 lanes
    # b1_ref: (1, HP)    resident
    # w2_ref: (1, HP)    second-layer weights as a row (zero in padded lanes)
    # b2_ref: (1, 1)     SMEM scalar
    # o_ref:  (BT//128, 128) lane-dense output slab
    x = x_ref[...]                                                       # (BT, D)

    # Layer 1 on the MXU (f32 accumulation); bias + sigmoid on VPU/EUP, full 128 lanes.
    h = jnp.dot(x, w1_ref[...], preferred_element_type=jnp.float32)     # (BT, HP)
    h = jax.nn.sigmoid(h + b1_ref[...])                                 # (BT, HP)

    # Layer 2 (HP -> 1): VPU multiply + XLU cross-lane reduce. Padded lanes are
    # sigmoid(0) * 0 = 0, so the sum equals the unpadded H=10 projection exactly.
    y = jnp.sum(h * w2_ref[...], axis=-1)                               # (BT,)

    # Pack 128 batch rows per output row -> unmasked, lane-dense stores.
    y = y.reshape(o_ref.shape)                                          # (BT//128, 128)
    o_ref[...] = jax.nn.sigmoid(y + b2_ref[0, 0])


def _pick_block_rows(batch):
    # Biggest tile amortizes the ~0.35 us/step grid overhead; every choice keeps
    # BT//128 a multiple of 8 (f32 sublane) and the x tile <= 512 KiB.
    for bt in (8192, 4096, 2048, 1024):
        if batch >= bt:
            return bt
    return 1024


def cascade_forward(x, w1, b1, w2, b2):
    """x: (B, D) f32; w1: (D, 10); b1: (1, 10); w2: (10, 1); b2: (1, 1) -> (B, 1) f32."""
    B, D = x.shape
    H = w1.shape[1]
    HP = max(128, ((H + 127) // 128) * 128)   # lane-pad the hidden dim (weights only)

    BT = _pick_block_rows(B)
    B_pad = ((B + BT - 1) // BT) * BT
    if B_pad != B:
        # Zero-pad the batch to a whole number of tiles; padded rows are sliced off below.
        x = jnp.pad(x, ((0, B_pad - B), (0, 0)))

    GT = BT // 128                 # output slab rows per tile (multiple of 8)
    grid = (B_pad // BT,)

    # One-time weight/bias padding to 128 lanes (w1: (D, HP) f32 = a few KiB).
    w1p = jnp.pad(w1.astype(jnp.float32), ((0, 0), (0, HP - H)))
    b1p = jnp.pad(b1.reshape(1, H).astype(jnp.float32), ((0, 0), (0, HP - H)))
    w2p = jnp.pad(w2.reshape(1, H).astype(jnp.float32), ((0, 0), (0, HP - H)))
    b2s = b2.reshape(1, 1).astype(jnp.float32)

    out = pl.pallas_call(
        _cascade_forward_kernel,
        out_shape=jax.ShapeDtypeStruct((B_pad // 128, 128), jnp.float32),
        grid=grid,
        in_specs=[
            pl.BlockSpec((BT, D), lambda i: (i, 0)),                   # x: batch-tiled
            pl.BlockSpec((D, HP), lambda i: (0, 0)),                   # w1: resident
            pl.BlockSpec((1, HP), lambda i: (0, 0)),                   # b1: resident
            pl.BlockSpec((1, HP), lambda i: (0, 0)),                   # w2 row: resident
            pl.BlockSpec(memory_space=pltpu.MemorySpace.SMEM),         # b2: SMEM scalar
        ],
        out_specs=pl.BlockSpec((GT, 128), lambda i: (i, 0)),           # lane-dense slab
        compiler_params=pltpu.CompilerParams(
            dimension_semantics=("parallel",),   # shards batch grid across TCs on v7x
        ),
    )(x, w1p, b1p, w2p, b2s)

    # Free layout plumbing back to the PyTorch (B, 1) view.
    return out.reshape(B_pad, 1)[:B]


def init_params(key, input_size, hidden=10, out=1):
    # Deterministic init mimicking nn.Linear's U(-1/sqrt(fan_in), 1/sqrt(fan_in)).
    k1, k2, k3, k4 = jax.random.split(key, 4)
    bound1 = 1.0 / jnp.sqrt(jnp.float32(input_size))
    bound2 = 1.0 / jnp.sqrt(jnp.float32(hidden))
    w1 = jax.random.uniform(k1, (input_size, hidden), jnp.float32, -bound1, bound1)
    b1 = jax.random.uniform(k2, (1, hidden), jnp.float32, -bound1, bound1)
    w2 = jax.random.uniform(k3, (hidden, out), jnp.float32, -bound2, bound2)
    b2 = jax.random.uniform(k4, (1, out), jnp.float32, -bound2, bound2)
    return w1, b1, w2, b2


def reference_forward(x, w1, b1, w2, b2):
    h = jax.nn.sigmoid(x @ w1 + b1)
    return jax.nn.sigmoid(h @ w2 + b2)


if __name__ == "__main__":
    # TODO(synk): fit()/predict() (Adam, BCELoss, dynamic neuron growth) is host-side
    # training logic, not part of the forward kernel.
    batch, input_size = 8, 16
    key = jax.random.PRNGKey(0)
    kx, kp, kx2 = jax.random.split(key, 3)

    x = jax.random.normal(kx, (batch, input_size), jnp.float32)
    w1, b1, w2, b2 = init_params(kp, input_size)

    out = jax.block_until_ready(cascade_forward(x, w1, b1, w2, b2))
    ref = reference_forward(x, w1, b1, w2, b2)
    assert out.shape == (batch, 1) and out.dtype == jnp.float32
    assert jnp.allclose(out, ref, atol=1e-5, rtol=1e-5)

    # Exercise the multi-tile + batch-padding path (grid > 1), still small/fast.
    batch2 = 2065
    x2 = jax.random.normal(kx2, (batch2, input_size), jnp.float32)
    out2 = jax.block_until_ready(cascade_forward(x2, w1, b1, w2, b2))
    ref2 = reference_forward(x2, w1, b1, w2, b2)
    assert out2.shape == (batch2, 1) and out2.dtype == jnp.float32
    assert jnp.allclose(out2, ref2, atol=1e-5, rtol=1e-5)

    print("KERNEL_OK")
</pallas_src>

<mosaic_0001>
module attributes {stable_mosaic.version = 11 : i64} {
  func.func @_cascade_forward_kernel(%arg0: i32, %arg1: memref<1024x16xf32, #tpu.memory_space<vmem>>, %arg2: memref<16x128xf32, #tpu.memory_space<vmem>>, %arg3: memref<1x128xf32, #tpu.memory_space<vmem>>, %arg4: memref<1x128xf32, #tpu.memory_space<vmem>>, %arg5: memref<1x1xf32, #tpu.memory_space<smem>>, %arg6: memref<8x128xf32, #tpu.memory_space<vmem>>) attributes {dimension_semantics = [#tpu.dimension_semantics<parallel>], iteration_bounds = array<i64: 1>, scalar_prefetch = 0 : i64, scratch_operands = 0 : i64, tpu.core_type = #tpu.core_type<tc>, window_params = [{transform_indices = @transform_0, window_bounds = array<i64: 1024, 16>}, {pipeline_mode = #tpu.pipeline_mode<synchronous>, transform_indices = @transform_1, window_bounds = array<i64: 16, 128>}, {pipeline_mode = #tpu.pipeline_mode<synchronous>, transform_indices = @transform_2, window_bounds = array<i64: 1, 128>}, {pipeline_mode = #tpu.pipeline_mode<synchronous>, transform_indices = @transform_3, window_bounds = array<i64: 1, 128>}, {transform_indices = @transform_4, window_bounds = array<i64: 1, 1>}, {transform_indices = @transform_5, window_bounds = array<i64: 8, 128>}]} {
    %c0 = arith.constant 0 : index
    %c0_0 = arith.constant 0 : index
    %0 = vector.load %arg1[%c0, %c0_0] : memref<1024x16xf32, #tpu.memory_space<vmem>>, vector<1024x16xf32>
    %c0_1 = arith.constant 0 : index
    %c0_2 = arith.constant 0 : index
    %1 = vector.load %arg2[%c0_1, %c0_2] : memref<16x128xf32, #tpu.memory_space<vmem>>, vector<16x128xf32>
    %cst = arith.constant dense<0.000000e+00> : vector<1024x128xf32>
    %2 = tpu.matmul %0, %1, %cst {dimension_numbers = #tpu.dot_dimension_numbers<[1], [0], [0], [1], [0, 0, 1, 1], [], []>} : vector<1024x16xf32>, vector<16x128xf32>, vector<1024x128xf32> -> vector<1024x128xf32>
    %c0_3 = arith.constant 0 : index
    %c0_4 = arith.constant 0 : index
    %3 = vector.load %arg3[%c0_3, %c0_4] : memref<1x128xf32, #tpu.memory_space<vmem>>, vector<1x128xf32>
    %4 = vector.broadcast %3 : vector<1x128xf32> to vector<1024x128xf32>
    %5 = arith.addf %2, %4 : vector<1024x128xf32>
    %6 = arith.negf %5 : vector<1024x128xf32>
    %7 = math.exp %6 : vector<1024x128xf32>
    %cst_5 = arith.constant 1.000000e+00 : f32
    %8 = vector.broadcast %cst_5 : f32 to vector<1024x128xf32>
    %9 = arith.addf %8, %7 : vector<1024x128xf32>
    %10 = arith.divf %8, %9 : vector<1024x128xf32>
    %c0_6 = arith.constant 0 : index
    %c0_7 = arith.constant 0 : index
    %11 = vector.load %arg4[%c0_6, %c0_7] : memref<1x128xf32, #tpu.memory_space<vmem>>, vector<1x128xf32>
    %12 = vector.broadcast %11 : vector<1x128xf32> to vector<1024x128xf32>
    %13 = arith.mulf %10, %12 : vector<1024x128xf32>
    %cst_8 = arith.constant dense<0.000000e+00> : vector<1024xf32>
    %14 = vector.multi_reduction <add>, %13, %cst_8 [1] : vector<1024x128xf32> to vector<1024xf32>
    %15 = vector.shape_cast %14 : vector<1024xf32> to vector<8x128xf32>
    %c0_9 = arith.constant 0 : index
    %c0_10 = arith.constant 0 : index
    %16 = memref.load %arg5[%c0_9, %c0_10] : memref<1x1xf32, #tpu.memory_space<smem>>
    %17 = vector.broadcast %16 : f32 to vector<8x128xf32>
    %18 = arith.addf %15, %17 : vector<8x128xf32>
    %19 = arith.negf %18 : vector<8x128xf32>
    %20 = math.exp %19 : vector<8x128xf32>
    %cst_11 = arith.constant 1.000000e+00 : f32
    %21 = vector.broadcast %cst_11 : f32 to vector<8x128xf32>
    %22 = arith.addf %21, %20 : vector<8x128xf32>
    %23 = arith.divf %21, %22 : vector<8x128xf32>
    %c0_12 = arith.constant 0 : index
    %c0_13 = arith.constant 0 : index
    %24 = vector.load %arg6[%c0_12, %c0_13] : memref<8x128xf32, #tpu.memory_space<vmem>>, vector<8x128xf32>
    tpu.vector_store %arg6[%c0_12, %c0_13], %23 {strides = array<i32>} : memref<8x128xf32, #tpu.memory_space<vmem>>, vector<8x128xf32>,
    return
  }
  func.func @transform_0(%arg0: i32) -> (i32, i32) {
    %c0_i32 = arith.constant 0 : i32
    %c0_i32_0 = arith.constant 0 : i32
    return %arg0, %c0_i32 : i32, i32
  }
  func.func @transform_1(%arg0: i32) -> (i32, i32) {
    %c0_i32 = arith.constant 0 : i32
    %c0_i32_0 = arith.constant 0 : i32
    %c0_i32_1 = arith.constant 0 : i32
    return %c0_i32, %c0_i32_0 : i32, i32
  }
  func.func @transform_2(%arg0: i32) -> (i32, i32) {
    %c0_i32 = arith.constant 0 : i32
    %c0_i32_0 = arith.constant 0 : i32
    %c0_i32_1 = arith.constant 0 : i32
    return %c0_i32, %c0_i32_0 : i32, i32
  }
  func.func @transform_3(%arg0: i32) -> (i32, i32) {
    %c0_i32 = arith.constant 0 : i32
    %c0_i32_0 = arith.constant 0 : i32
    %c0_i32_1 = arith.constant 0 : i32
    return %c0_i32, %c0_i32_0 : i32, i32
  }
  func.func @transform_4(%arg0: i32) -> (i32, i32) {
    %c0_i32 = arith.constant 0 : i32
    %c0_i32_0 = arith.constant 0 : i32
    %c0_i32_1 = arith.constant 0 : i32
    return %c0_i32, %c0_i32_0 : i32, i32
  }
  func.func @transform_5(%arg0: i32) -> (i32, i32) {
    %c0_i32 = arith.constant 0 : i32
    %c0_i32_0 = arith.constant 0 : i32
    return %arg0, %c0_i32 : i32, i32
  }
}

</mosaic_0001>

<bundles_post_ra>
// kernel: tpu_custom_call.1
= control target key start
LH: loop header
LB: loop body
LE: loop exit
PB: predicated region body
PF: predicated region fallthrough
CT: control target
= control target key end

     0   :  { %vm156_vm0 = vcmask 130048   ;;  %s16116_s0 = inlined_call_operand.vmem [shape: f32[1024,16], index: 0, kind: input, shape index: {}]   ;;  %s16117_s1 = inlined_call_operand.vmem [shape: f32[16,128], index: 1, kind: input, shape index: {}]   ;;  %s16118_s2 = inlined_call_operand.vmem [shape: f32[1,128], index: 2, kind: input, shape index: {}]   ;;  %s16119_s3 = inlined_call_operand.vmem [shape: f32[1,128], index: 3, kind: input, shape index: {}]   ;;  %s16120_s4 = inlined_call_operand.<no memory space> [shape: f32[1,1], index: 4, kind: input, shape index: {}]   ;;  %s16121_s5 = inlined_call_operand.hbm [shape: f32[8,128], index: 5, kind: output, shape index: {}]  }
   0x1   :  { %v151_v0 = vld [vmem:[%s16117_s1 + $0x8] sm:$0xff]  ;;  %v150_v1 = vld [vmem:[%s16117_s1] sm:$0xff] }
   0x2   :  { %555 = vmatpush.msra.mxu0 %v151_v0  ;;  %7148 = vmatpush.msra.mxu1 %v151_v0  ;;  %v22_v2 = vld [vmem:[%s16116_s0] sm:$0xff] }
   0x3   :  { %7149 = vmatpush.msra.mxu2 %v151_v0  ;;  %7150 = vmatpush.msra.mxu3 %v151_v0  ;;  %v54_v3 = vld [vmem:[%s16116_s0 + $0x100] sm:$0xff] }
   0x4   :  { %556 = vmatpush.msra.mxu0 %v150_v1  ;;  %7151 = vmatpush.msra.mxu1 %v150_v1  ;;  %v86_v4 = vld [vmem:[%s16116_s0 + $0x200] sm:$0xff] }
   0x5   :  { %v118_v5 = vld [vmem:[%s16116_s0 + $0x300] sm:$0xff]  ;;  %7152 = vmatpush.msra.mxu2 %v150_v1  ;;  %7153 = vmatpush.msra.mxu3 %v150_v1 }
   0x6   :  { %6764 = vmatmul.msk.f32.vlgmr.msra.gmra.mxu0 %vm156_vm0, %v22_v2  ;;  %6796 = vmatmul.msk.f32.vlgmr.msra.gmra.mxu1 %vm156_vm0, %v54_v3 }
   0x7   :  { %6828 = vmatmul.msk.f32.vlgmr.msra.gmra.mxu2 %vm156_vm0, %v86_v4  ;;  %6860 = vmatmul.msk.f32.vlgmr.msra.gmra.mxu3 %vm156_vm0, %v118_v5 }
   0x8   :  { %11 = vsyncpa [#allocation4], 0  ;;  %v23_v6 = vld [vmem:[%s16116_s0 + $0x8] sm:$0xff]  ;;  %v24_v10 = vld [vmem:[%s16116_s0 + $0x10] sm:$0xff]  ;;  %s6755_s1 = sshll.u32 %s16121_s5, 4  ;;  %s6756_s1 = int_to_ptr.hbm [resolvable:$true] %s6755_s1 }
   0x9   :  { %v55_v7 = vld [vmem:[%s16116_s0 + $0x108] sm:$0xff]  ;;  %v56_v11 = vld [vmem:[%s16116_s0 + $0x110] sm:$0xff]  ;;  %v57_v14 = vld [vmem:[%s16116_s0 + $0x118] sm:$0xff] }
   0xa   :  { %v87_v8 = vld [vmem:[%s16116_s0 + $0x208] sm:$0xff]  ;;  %v88_v12 = vld [vmem:[%s16116_s0 + $0x210] sm:$0xff]  ;;  %v25_v15 = vld [vmem:[%s16116_s0 + $0x18] sm:$0xff] }
   0xb   :  { %v119_v9 = vld [vmem:[%s16116_s0 + $0x308] sm:$0xff]  ;;  %v120_v13 = vld [vmem:[%s16116_s0 + $0x310] sm:$0xff]  ;;  %v89_v16 = vld [vmem:[%s16116_s0 + $0x218] sm:$0xff] }
   0xc   :  { %v121_v17 = vld [vmem:[%s16116_s0 + $0x318] sm:$0xff]  ;;  %v58_v18 = vld [vmem:[%s16116_s0 + $0x120] sm:$0xff]  ;;  %v27_v22 = vld [vmem:[%s16116_s0 + $0x28] sm:$0xff] }
   0xd   :  { %v26_v19 = vld [vmem:[%s16116_s0 + $0x20] sm:$0xff]  ;;  %v59_v23 = vld [vmem:[%s16116_s0 + $0x128] sm:$0xff]  ;;  %v28_v26 = vld [vmem:[%s16116_s0 + $0x30] sm:$0xff] }
   0xe   :  { %6765 = vmatmul.msk.f32.gmra.mxu0 %vm156_vm0, %v23_v6  ;;  %6797 = vmatmul.msk.f32.gmra.mxu1 %vm156_vm0, %v55_v7  ;;  %v90_v20 = vld [vmem:[%s16116_s0 + $0x220] sm:$0xff]  ;;  %v91_v24 = vld [vmem:[%s16116_s0 + $0x228] sm:$0xff]  ;;  %v60_v27 = vld [vmem:[%s16116_s0 + $0x130] sm:$0xff] }
   0xf   :  { %6829 = vmatmul.msk.f32.gmra.mxu2 %vm156_vm0, %v87_v8  ;;  %6861 = vmatmul.msk.f32.gmra.mxu3 %vm156_vm0, %v119_v9  ;;  %v122_v21 = vld [vmem:[%s16116_s0 + $0x320] sm:$0xff]  ;;  %v123_v25 = vld [vmem:[%s16116_s0 + $0x328] sm:$0xff]  ;;  %v92_v28 = vld [vmem:[%s16116_s0 + $0x230] sm:$0xff] }
  0x10   :  { %v124_v29 = vld [vmem:[%s16116_s0 + $0x330] sm:$0xff]  ;;  %v61_v30 = vld [vmem:[%s16116_s0 + $0x138] sm:$0xff]  ;;  %v30_v34 = vld [vmem:[%s16116_s0 + $0x40] sm:$0xff] }
  0x11   :  { %v29_v31 = vld [vmem:[%s16116_s0 + $0x38] sm:$0xff]  ;;  %v62_v35 = vld [vmem:[%s16116_s0 + $0x140] sm:$0xff]  ;;  %v31_v38 = vld [vmem:[%s16116_s0 + $0x48] sm:$0xff] }
  0x12   :  { %v93_v32 = vld [vmem:[%s16116_s0 + $0x238] sm:$0xff]  ;;  %v94_v36 = vld [vmem:[%s16116_s0 + $0x240] sm:$0xff]  ;;  %v63_v39 = vld [vmem:[%s16116_s0 + $0x148] sm:$0xff] }
  0x13   :  { %v125_v33 = vld [vmem:[%s16116_s0 + $0x338] sm:$0xff]  ;;  %v126_v37 = vld [vmem:[%s16116_s0 + $0x340] sm:$0xff]  ;;  %v95_v40 = vld [vmem:[%s16116_s0 + $0x248] sm:$0xff] }
  0x14   :  { %v127_v41 = vld [vmem:[%s16116_s0 + $0x348] sm:$0xff]  ;;  %v64_v42 = vld [vmem:[%s16116_s0 + $0x150] sm:$0xff]  ;;  %v33_v46 = vld [vmem:[%s16116_s0 + $0x58] sm:$0xff] }
  0x15   :  { %v32_v43 = vld [vmem:[%s16116_s0 + $0x50] sm:$0xff]  ;;  %v65_v47 = vld [vmem:[%s16116_s0 + $0x158] sm:$0xff]  ;;  %v34_v50 = vld [vmem:[%s16116_s0 + $0x60] sm:$0xff] }
  0x16   :  { %6766 = vmatmul.msk.f32.gmra.mxu0 %vm156_vm0, %v24_v10  ;;  %6798 = vmatmul.msk.f32.gmra.mxu1 %vm156_vm0, %v56_v11  ;;  %v96_v44 = vld [vmem:[%s16116_s0 + $0x250] sm:$0xff]  ;;  %v97_v48 = vld [vmem:[%s16116_s0 + $0x258] sm:$0xff]  ;;  %v66_v51 = vld [vmem:[%s16116_s0 + $0x160] sm:$0xff] }
  0x17   :  { %6830 = vmatmul.msk.f32.gmra.mxu2 %vm156_vm0, %v88_v12  ;;  %6862 = vmatmul.msk.f32.gmra.mxu3 %vm156_vm0, %v120_v13  ;;  %v128_v45 = vld [vmem:[%s16116_s0 + $0x350] sm:$0xff]  ;;  %v129_v49 = vld [vmem:[%s16116_s0 + $0x358] sm:$0xff]  ;;  %v98_v52 = vld [vmem:[%s16116_s0 + $0x260] sm:$0xff] }
  0x18   :  { %v130_v53 = vld [vmem:[%s16116_s0 + $0x360] sm:$0xff]  ;;  %v67_v54 = vld [vmem:[%s16116_s0 + $0x168] sm:$0xff]  ;;  %v100_v58 = vld [vmem:[%s16116_s0 + $0x270] sm:$0xff] }
  0x19   :  { %v35_v55 = vld [vmem:[%s16116_s0 + $0x68] sm:$0xff]  ;;  %v132_v59 = vld [vmem:[%s16116_s0 + $0x370] sm:$0xff]  ;;  %v101_v62 = vld [vmem:[%s16116_s0 + $0x278] sm:$0xff] }
  0x1a   :  { %v99_v56 = vld [vmem:[%s16116_s0 + $0x268] sm:$0xff]  ;;  %v36_v60 = vld [vmem:[%s16116_s0 + $0x70] sm:$0xff]  ;;  %v8507_v63 = vld [vmem:[%s16118_s2] ss:$0 sm:$0xff] }
  0x1b   :  { %v131_v57 = vld [vmem:[%s16116_s0 + $0x368] sm:$0xff]  ;;  %v68_v61 = vld [vmem:[%s16116_s0 + $0x170] sm:$0xff]  ;;  %v37_v2 = vld [vmem:[%s16116_s0 + $0x78] sm:$0xff] }
  0x1c   :  { %v69_v3 = vld [vmem:[%s16116_s0 + $0x178] sm:$0xff] }
  0x1d   :  { %v133_v6 = vld [vmem:[%s16116_s0 + $0x378] sm:$0xff] }
  0x1e   :  { %6799 = vmatmul.msk.f32.gmra.mxu1 %vm156_vm0, %v57_v14  ;;  %6767 = vmatmul.msk.f32.gmra.mxu0 %vm156_vm0, %v25_v15  ;;  %v70_v15 = vld [vmem:[%s16116_s0 + $0x180] sm:$0xff] }
  0x1f   :  { %6831 = vmatmul.msk.f32.gmra.mxu2 %vm156_vm0, %v89_v16  ;;  %6863 = vmatmul.msk.f32.gmra.mxu3 %vm156_vm0, %v121_v17 }
  0x26   :  { %6800 = vmatmul.msk.f32.gmra.mxu1 %vm156_vm0, %v58_v18  ;;  %6768 = vmatmul.msk.f32.gmra.mxu0 %vm156_vm0, %v26_v19  ;;  %v38_v18 = vld [vmem:[%s16116_s0 + $0x80] sm:$0xff] }
  0x27   :  { %6832 = vmatmul.msk.f32.gmra.mxu2 %vm156_vm0, %v90_v20  ;;  %6864 = vmatmul.msk.f32.gmra.mxu3 %vm156_vm0, %v122_v21  ;;  %v102_v21 = vld [vmem:[%s16116_s0 + $0x280] sm:$0xff] }
  0x2e   :  { %6769 = vmatmul.msk.f32.gmra.mxu0 %vm156_vm0, %v27_v22  ;;  %6801 = vmatmul.msk.f32.gmra.mxu1 %vm156_vm0, %v59_v23  ;;  %v134_v22 = vld [vmem:[%s16116_s0 + $0x380] sm:$0xff] }
  0x2f   :  { %6833 = vmatmul.msk.f32.gmra.mxu2 %vm156_vm0, %v91_v24  ;;  %6865 = vmatmul.msk.f32.gmra.mxu3 %vm156_vm0, %v123_v25 }
  0x36   :  { %6770 = vmatmul.msk.f32.gmra.mxu0 %vm156_vm0, %v28_v26  ;;  %6802 = vmatmul.msk.f32.gmra.mxu1 %vm156_vm0, %v60_v27 }
  0x37   :  { %6834 = vmatmul.msk.f32.gmra.mxu2 %vm156_vm0, %v92_v28  ;;  %6866 = vmatmul.msk.f32.gmra.mxu3 %vm156_vm0, %v124_v29 }
  0x3e   :  { %6803 = vmatmul.msk.f32.gmra.mxu1 %vm156_vm0, %v61_v30  ;;  %6771 = vmatmul.msk.f32.gmra.mxu0 %vm156_vm0, %v29_v31 }
  0x3f   :  { %6835 = vmatmul.msk.f32.gmra.mxu2 %vm156_vm0, %v93_v32  ;;  %6867 = vmatmul.msk.f32.gmra.mxu3 %vm156_vm0, %v125_v33 }
  0x46   :  { %6772 = vmatmul.msk.f32.gmra.mxu0 %vm156_vm0, %v30_v34  ;;  %6804 = vmatmul.msk.f32.gmra.mxu1 %vm156_vm0, %v62_v35 }
  0x47   :  { %6836 = vmatmul.msk.f32.gmra.mxu2 %vm156_vm0, %v94_v36  ;;  %6868 = vmatmul.msk.f32.gmra.mxu3 %vm156_vm0, %v126_v37 }
  0x4e   :  { %6773 = vmatmul.msk.f32.gmra.mxu0 %vm156_vm0, %v31_v38  ;;  %6805 = vmatmul.msk.f32.gmra.mxu1 %vm156_vm0, %v63_v39 }
  0x4f   :  { %6837 = vmatmul.msk.f32.gmra.mxu2 %vm156_vm0, %v95_v40  ;;  %6869 = vmatmul.msk.f32.gmra.mxu3 %vm156_vm0, %v127_v41 }
  0x56   :  { %6806 = vmatmul.msk.f32.gmra.mxu1 %vm156_vm0, %v64_v42  ;;  %6774 = vmatmul.msk.f32.gmra.mxu0 %vm156_vm0, %v32_v43 }
  0x57   :  { %6838 = vmatmul.msk.f32.gmra.mxu2 %vm156_vm0, %v96_v44  ;;  %6870 = vmatmul.msk.f32.gmra.mxu3 %vm156_vm0, %v128_v45 }
  0x5e   :  { %6775 = vmatmul.msk.f32.gmra.mxu0 %vm156_vm0, %v33_v46  ;;  %6807 = vmatmul.msk.f32.gmra.mxu1 %vm156_vm0, %v65_v47 }
  0x5f   :  { %6839 = vmatmul.msk.f32.gmra.mxu2 %vm156_vm0, %v97_v48  ;;  %6871 = vmatmul.msk.f32.gmra.mxu3 %vm156_vm0, %v129_v49 }
  0x66   :  { %6776 = vmatmul.msk.f32.gmra.mxu0 %vm156_vm0, %v34_v50  ;;  %6808 = vmatmul.msk.f32.gmra.mxu1 %vm156_vm0, %v66_v51 }
  0x67   :  { %6840 = vmatmul.msk.f32.gmra.mxu2 %vm156_vm0, %v98_v52  ;;  %6872 = vmatmul.msk.f32.gmra.mxu3 %vm156_vm0, %v130_v53 }
  0x6e   :  { %6809 = vmatmul.msk.f32.gmra.mxu1 %vm156_vm0, %v67_v54  ;;  %6777 = vmatmul.msk.f32.gmra.mxu0 %vm156_vm0, %v35_v55 }
  0x6f   :  { %6841 = vmatmul.msk.f32.gmra.mxu2 %vm156_vm0, %v99_v56  ;;  %6873 = vmatmul.msk.f32.gmra.mxu3 %vm156_vm0, %v131_v57 }
  0x76   :  { %6778 = vmatmul.msk.f32.gmra.mxu0 %vm156_vm0, %v36_v60  ;;  %6810 = vmatmul.msk.f32.gmra.mxu1 %vm156_vm0, %v68_v61 }
  0x77   :  { %6842 = vmatmul.msk.f32.gmra.mxu2 %vm156_vm0, %v100_v58  ;;  %6874 = vmatmul.msk.f32.gmra.mxu3 %vm156_vm0, %v132_v59 }
  0x7e   :  { %6779 = vmatmul.msk.f32.gmra.mxu0 %vm156_vm0, %v37_v2  ;;  %6811 = vmatmul.msk.f32.gmra.mxu1 %vm156_vm0, %v69_v3 }
  0x7f   :  { %6843 = vmatmul.msk.f32.gmra.mxu2 %vm156_vm0, %v101_v62  ;;  %6875 = vmatmul.msk.f32.gmra.mxu3 %vm156_vm0, %v133_v6 }
  0x83   :  { %v558_v0 = vpop.f32.mrf.mxu0  ;;  %v654_v1 = vpop.f32.mrf.mxu1 }
  0x84   :  { %v559_v4 = vadd.f32 %v8507_v63, %v558_v0  ;;  %v655_v5 = vadd.f32 %v8507_v63, %v654_v1  ;;  %v71_v0 = vld [vmem:[%s16116_s0 + $0x188] sm:$0xff] }
  0x85   :  { %v103_v1 = vld [vmem:[%s16116_s0 + $0x288] sm:$0xff] }
  0x86   :  { %v6892_v7 = vmul.f32 -1.442695, %v559_v4  ;;  %v6924_v8 = vmul.f32 -1.442695, %v655_v5  ;;  %6812 = vmatmul.msk.f32.gmra.mxu1 %vm156_vm0, %v70_v15  ;;  %6780 = vmatmul.msk.f32.gmra.mxu0 %vm156_vm0, %v38_v18 }
  0x87   :  { %6844 = vmatmul.msk.f32.gmra.mxu2 %vm156_vm0, %v102_v21  ;;  %6876 = vmatmul.msk.f32.gmra.mxu3 %vm156_vm0, %v134_v22 }
  0x88   :  { %7157 = vpow2.f32 %v6892_v7 }
  0x89   :  { %7159 = vpow2.f32 %v6924_v8 }
  0x8a   :  { %v750_v9 = vpop.f32.mrf.mxu2  ;;  %v846_v10 = vpop.f32.mrf.mxu3 }
  0x8b   :  { %v751_v11 = vadd.f32 %v8507_v63, %v750_v9  ;;  %v847_v12 = vadd.f32 %v8507_v63, %v846_v10  ;;  %v561_v13 = vpop.f32.mrf.mxu0  ;;  %v657_v14 = vpop.f32.mrf.mxu1 }
  0x8c   :  { %v562_v16 = vadd.f32 %v8507_v63, %v561_v13  ;;  %v658_v17 = vadd.f32 %v8507_v63, %v657_v14 }
  0x8d   :  { %v6956_v19 = vmul.f32 -1.442695, %v751_v11  ;;  %v6988_v20 = vmul.f32 -1.442695, %v847_v12 }
  0x8e   :  { %v7158_v23 = vpop.eup %7157  ;;  %v6893_v26 = vmul.f32 -1.442695, %v562_v16  ;;  %v6925_v28 = vmul.f32 -1.442695, %v658_v17  ;;  %6813 = vmatmul.msk.f32.gmra.mxu1 %vm156_vm0, %v71_v0 }
  0x8f   :  { %v7160_v24 = vpop.eup %7159  ;;  %v8543_v25 = vadd.f32 1.0, %v7158_v23  ;;  %7161 = vpow2.f32 %v6956_v19  ;;  %6845 = vmatmul.msk.f32.gmra.mxu2 %vm156_vm0, %v103_v1 }
  0x90   :  { %v8545_v27 = vadd.f32 1.0, %v7160_v24  ;;  %7163 = vpow2.f32 %v6988_v20 }
  0x91   :  { %7165 = vrcp.f32 %v8543_v25  ;;  %v1465_v37 = vand.u32 2147483648, %v8543_v25  ;;  %v1463_v42 = vand.u32 2147483647, %v8543_v25  ;;  %vm1459_vm1 = vweird.f32 %v8543_v25 }
  0x92   :  { %7167 = vrcp.f32 %v8545_v27  ;;  %v753_v29 = vpop.f32.mrf.mxu2  ;;  %v849_v30 = vpop.f32.mrf.mxu3  ;;  %v1945_v36 = vand.u32 2147483648, %v8545_v27  ;;  %v1943_v41 = vand.u32 2147483647, %v8545_v27  ;;  %vm1939_vm2 = vweird.f32 %v8545_v27 }
  0x93   :  { %7169 = vpow2.f32 %v6893_v26  ;;  %v754_v31 = vadd.f32 %v8507_v63, %v753_v29  ;;  %v850_v32 = vadd.f32 %v8507_v63, %v849_v30  ;;  %v564_v33 = vpop.f32.mrf.mxu0  ;;  %v660_v34 = vpop.f32.mrf.mxu1  ;;  %v8572_v52 = vor.u32 1.1754944e-38, %v1465_v37  ;;  %v135_v29 = vld [vmem:[%s16116_s0 + $0x388] sm:$0xff] }
  0x94   :  { %7171 = vpow2.f32 %v6925_v28  ;;  %v565_v35 = vadd.f32 %v8507_v63, %v564_v33  ;;  %v661_v40 = vadd.f32 %v8507_v63, %v660_v34  ;;  %v8568_v50 = vor.u32 1.1754944e-38, %v1945_v36  ;;  %6877 = vmatmul.msk.f32.gmra.mxu3 %vm156_vm0, %v135_v29 }
  0x95   :  { %v7162_v38 = vpop.eup %7161  ;;  %v6957_v39 = vmul.f32 -1.442695, %v754_v31  ;;  %v6989_v45 = vmul.f32 -1.442695, %v850_v32  ;;  %vm8577_vm3 = vcmp.eq.f32.partialorder %v1943_v41, 8.507059e+37  ;;  %vm8582_vm5 = vcmp.eq.f32.partialorder %v1463_v42, 8.507059e+37 }
  0x96   :  { %v7164_v43 = vpop.eup %7163  ;;  %v8557_v44 = vadd.f32 1.0, %v7162_v38  ;;  %v6894_v48 = vmul.f32 -1.442695, %v565_v35  ;;  %v6926_v54 = vmul.f32 -1.442695, %v661_v40 }
  0x97   :  { %v8560_v46 = vpop.eup %7165  ;;  %v8562_v47 = vadd.f32 1.0, %v7164_v43  ;;  %7173 = vpow2.f32 %v6957_v39 }
  0x98   :  { %v8565_v49 = vpop.eup %7167  ;;  %7175 = vrcp.f32 %v8557_v44  ;;  %v1455_v51 = vmul.f32 %v8560_v46, %v8543_v25  ;;  %vm1460_vm4 = vweird.f32 %v8560_v46  ;;  %v2423_v17 = vand.u32 2147483647, %v8557_v44  ;;  %v8637_v25 = vld [vmem:[%s16119_s3] ss:$0 sm:$0xff] }
  0x99   :  { %v7170_v53 = vpop.eup %7169  ;;  %7177 = vrcp.f32 %v8562_v47  ;;  %v1935_v55 = vmul.f32 %v8565_v49, %v8545_v27  ;;  %vm1940_vm6 = vweird.f32 %v8565_v49  ;;  %vm8619_vm7 = vmor %vm1459_vm1, %vm1460_vm4  ;;  %vm2419_vm9 = vweird.f32 %v8557_v44 }
  0x9a   :  { %v7172_v58 = vpop.eup %7171  ;;  %v8586_v59 = vadd.f32 1.0, %v7170_v53  ;;  %7179 = vpow2.f32 %v6989_v45  ;;  %v756_v60 = vpop.f32.mrf.mxu2  ;;  %v1456_v62 = vsub.f32 1.0, %v1455_v51  ;;  %vm8630_vm8 = vmor %vm1939_vm2, %vm1940_vm6  ;;  %v2425_v28 = vand.u32 2147483648, %v8557_v44 }
  0x9b   :  { %v852_v61 = vpop.f32.mrf.mxu3  ;;  %v8595_v2 = vadd.f32 1.0, %v7172_v58  ;;  %7181 = vpow2.f32 %v6894_v48  ;;  %v757_v3 = vadd.f32 %v8507_v63, %v756_v60  ;;  %v663_v5 = vpop.f32.mrf.mxu1  ;;  %v1936_v9 = vsub.f32 1.0, %v1935_v55 }
  0x9c   :  { %v853_v4 = vadd.f32 %v8507_v63, %v852_v61  ;;  %v567_v6 = vpop.f32.mrf.mxu0  ;;  %7183 = vrcp.f32 %v8586_v59  ;;  %v664_v7 = vadd.f32 %v8507_v63, %v663_v5  ;;  %v1457_v13 = vmul.f32 %v8560_v46, %v1456_v62 }
  0x9d   :  { %v568_v8 = vadd.f32 %v8507_v63, %v567_v6  ;;  %v7174_v10 = vpop.eup %7173  ;;  %7185 = vrcp.f32 %v8595_v2  ;;  %v6958_v11 = vmul.f32 -1.442695, %v757_v3  ;;  %v1937_v19 = vmul.f32 %v8565_v49, %v1936_v9  ;;  %v39_v6 = vld [vmem:[%s16116_s0 + $0x88] sm:$0xff] }
  0x9e   :  { %v6990_v12 = vmul.f32 -1.442695, %v853_v4  ;;  %v8606_v14 = vpop.eup %7175  ;;  %v8608_v15 = vadd.f32 1.0, %v7174_v10  ;;  %7187 = vpow2.f32 %v6926_v54  ;;  %v6927_v16 = vmul.f32 -1.442695, %v664_v7  ;;  %v104_v7 = vld [vmem:[%s16116_s0 + $0x290] sm:$0xff]  ;;  %6781 = vmatmul.msk.f32.gmra.mxu0 %vm156_vm0, %v39_v6 }
  0x9f   :  { %v8611_v18 = vpop.eup %7177  ;;  %7189 = vpow2.f32 %v6958_v11  ;;  %v1458_v20 = vadd.f32 %v8560_v46, %v1457_v13  ;;  %v2415_v22 = vmul.f32 %v8606_v14, %v8557_v44  ;;  %v6895_v24 = vmul.f32 -1.442695, %v568_v8  ;;  %6846 = vmatmul.msk.f32.gmra.mxu2 %vm156_vm0, %v104_v7 }
  0xa0   :  { %v7180_v23 = vpop.eup %7179  ;;  %7191 = vrcp.f32 %v8608_v15  ;;  %v1938_v27 = vadd.f32 %v8565_v49, %v1937_v19  ;;  %vm2420_vm10 = vweird.f32 %v8606_v14  ;;  %vm8665_vm11 = vcmp.eq.f32.partialorder %v2423_v17, 8.507059e+37 }
  0xa1   :  { %v7182_v30 = vpop.eup %7181  ;;  %v8644_v31 = vadd.f32 1.0, %v7180_v23  ;;  %7193 = vpow2.f32 %v6990_v12  ;;  %v1462_v32 = vsel %vm8619_vm7, %v8560_v46, %v1458_v20  ;;  %v2416_v38 = vsub.f32 1.0, %v2415_v22  ;;  %vm2421_vm12 = vmor %vm2419_vm9, %vm2420_vm10 }
  0xa2   :  { %v8651_v33 = vpop.eup %7183  ;;  %v8653_v34 = vadd.f32 1.0, %v7182_v30  ;;  %7195 = vpow2.f32 %v6927_v16  ;;  %v759_v35 = vpop.f32.mrf.mxu2  ;;  %v1467_v37 = vsel %vm8582_vm5, %v8572_v52, %v1462_v32  ;;  %v1942_v42 = vsel %vm8630_vm8, %v8565_v49, %v1938_v27 }
  0xa3   :  { %v855_v36 = vpop.f32.mrf.mxu3  ;;  %v8658_v39 = vpop.eup %7185  ;;  %v760_v40 = vadd.f32 %v8507_v63, %v759_v35  ;;  %7197 = vrcp.f32 %v8644_v31  ;;  %v1947_v48 = vsel %vm8577_vm3, %v8568_v50, %v1942_v42  ;;  %v3378_v51 = vmul.f32 %v8637_v25, %v1467_v37 }
  0xa4   :  { %v666_v41 = vpop.f32.mrf.mxu1  ;;  %v7188_v45 = vpop.eup %7187  ;;  %7199 = vpow2.f32 %v6895_v24  ;;  %v856_v54 = vadd.f32 %v8507_v63, %v855_v36  ;;  %v3410_v60 = vmul.f32 %v8637_v25, %v1947_v48  ;;  %v2417_v50 = vmul.f32 %v8606_v14, %v2416_v38 }
  0xa5   :  { %v667_v46 = vadd.f32 %v8507_v63, %v666_v41  ;;  %v7190_v52 = vpop.eup %7189  ;;  %v8675_v53 = vadd.f32 1.0, %v7188_v45  ;;  %v6959_v49 = vmul.f32 -1.442695, %v760_v40  ;;  %v570_v55 = vpop.f32.mrf.mxu0  ;;  %7201 = vrcp.f32 %v8653_v34  ;;  %3506 = vadd.xlane.f32.xlu0 %v3378_v51 }
  0xa6   :  { %v8678_v57 = vpop.eup %7191  ;;  %v8681_v58 = vadd.f32 1.0, %v7190_v52  ;;  %v2426_v62 = vor.u32 1.1754944e-38, %v2425_v28  ;;  %v2895_v0 = vmul.f32 %v8611_v18, %v8562_v47  ;;  %3570 = vadd.xlane.f32.xlu2 %v3410_v60  ;;  %v2418_v4 = vadd.f32 %v8606_v14, %v2417_v50 }
  0xa7   :  { %v7194_v56 = vpop.eup %7193  ;;  %7203 = vrcp.f32 %v8675_v53  ;;  %v6928_v61 = vmul.f32 -1.442695, %v667_v46  ;;  %v571_v5 = vadd.f32 %v8507_v63, %v570_v55  ;;  %v6991_v8 = vmul.f32 -1.442695, %v856_v54 }
  0xa8   :  { %v7196_v1 = vpop.eup %7195  ;;  %7205 = vrcp.f32 %v8681_v58  ;;  %v8689_v3 = vadd.f32 1.0, %v7194_v56  ;;  %v2896_v9 = vsub.f32 1.0, %v2895_v0  ;;  %vm2900_vm13 = vweird.f32 %v8611_v18 }
  0xa9   :  { %7207 = vpow2.f32 %v6959_v49  ;;  %v8706_v10 = vpop.eup %7197  ;;  %v8709_v11 = vadd.f32 1.0, %v7196_v1  ;;  %v2422_v13 = vsel %vm2421_vm12, %v8606_v14, %v2418_v4  ;;  %v2903_v44 = vand.u32 2147483647, %v8562_v47 }
  0xaa   :  { %7209 = vrcp.f32 %v8689_v3  ;;  %v762_v12 = vpop.f32.mrf.mxu2  ;;  %v7200_v17 = vpop.eup %7199  ;;  %v2427_v20 = vsel %vm8665_vm11, %v2426_v62, %v2422_v13  ;;  %v2905_v22 = vand.u32 2147483648, %v8562_v47  ;;  %v6896_v26 = vmul.f32 -1.442695, %v571_v5 }
  0xab   :  { %v858_v16 = vpop.f32.mrf.mxu3  ;;  %v763_v19 = vadd.f32 %v8507_v63, %v762_v12  ;;  %v8718_v23 = vpop.eup %7201  ;;  %7211 = vpow2.f32 %v6928_v61  ;;  %v3442_v24 = vmul.f32 %v8637_v25, %v2427_v20  ;;  %v2897_v14 = vmul.f32 %v8611_v18, %v2896_v9 }
  0xac   :  { %v859_v21 = vadd.f32 %v8507_v63, %v858_v16  ;;  %v8724_v29 = vadd.f32 1.0, %v7200_v17  ;;  %7213 = vpow2.f32 %v6991_v8  ;;  %vm2899_vm14 = vweird.f32 %v8562_v47  ;;  %v669_v13 = vpop.f32.mrf.mxu1  ;;  %v40_v16 = vld [vmem:[%s16116_s0 + $0x90] sm:$0xff] }
  0xad   :  { %v8722_v28 = vpop.eup %7203  ;;  %v6960_v30 = vmul.f32 -1.442695, %v763_v19  ;;  %7215 = vrcp.f32 %v8709_v11  ;;  %3634 = vadd.xlane.f32.xlu1 %v3442_v24  ;;  %v2898_v32 = vadd.f32 %v8611_v18, %v2897_v14  ;;  %v2910_v35 = vmul.f32 %v8706_v10, %v8644_v31  ;;  %vm2901_vm15 = vmor %vm2899_vm14, %vm2900_vm13  ;;  %v573_v12 = vpop.f32.mrf.mxu0  ;;  %6782 = vmatmul.msk.f32.gmra.mxu0 %vm156_vm0, %v40_v16 }
  0xae   :  { %v8726_v27 = vpop.eup %7205  ;;  %v6992_v37 = vmul.f32 -1.442695, %v859_v21  ;;  %vm2904_vm1 = vcmp.eq.f32.partialorder %v2903_v44, 8.507059e+37  ;;  %v2906_v38 = vor.u32 1.1754944e-38, %v2905_v22  ;;  %v2918_v43 = vand.u32 2147483647, %v8644_v31 }
  0xaf   :  { %v7208_v36 = vpop.eup %7207  ;;  %7217 = vpow2.f32 %v6960_v30  ;;  %v2902_v41 = vsel %vm2901_vm15, %v8611_v18, %v2898_v32  ;;  %v2911_v42 = vsub.f32 1.0, %v2910_v35  ;;  %v2920_v45 = vand.u32 2147483648, %v8644_v31  ;;  %v72_v44 = vld [vmem:[%s16116_s0 + $0x190] sm:$0xff] }
  0xb0   :  { %v8735_v40 = vpop.eup %7209  ;;  %7219 = vpow2.f32 %v6896_v26  ;;  %v2907_v47 = vsel %vm2904_vm1, %v2906_v38, %v2902_v41  ;;  %vm2915_vm2 = vweird.f32 %v8706_v10  ;;  %v2430_v49 = vmul.f32 %v8678_v57, %v8608_v15  ;;  %6814 = vmatmul.msk.f32.gmra.mxu1 %vm156_vm0, %v72_v44  ;;  %v136_v21 = vld [vmem:[%s16116_s0 + $0x390] sm:$0xff] }
  0xb1   :  { %7221 = vrcp.f32 %v8724_v29  ;;  %v7212_v46 = vpop.eup %7211  ;;  %v3474_v48 = vmul.f32 %v8637_v25, %v2907_v47  ;;  %v2912_v52 = vmul.f32 %v8706_v10, %v2911_v42  ;;  %v8746_v54 = vadd.f32 1.0, %v7208_v36  ;;  %6878 = vmatmul.msk.f32.gmra.mxu3 %vm156_vm0, %v136_v21 }
  0xb2   :  { %v765_v51 = vpop.f32.mrf.mxu2  ;;  %v7214_v18 = vpop.eup %7213  ;;  %7223 = vpow2.f32 %v6992_v37  ;;  %vm2914_vm3 = vweird.f32 %v8644_v31  ;;  %v8752_v50 = vadd.f32 1.0, %v7212_v46  ;;  %vm8755_vm4 = vcmp.eq.f32.partialorder %v2918_v43, 8.507059e+37 }
  0xb3   :  { %v766_v55 = vadd.f32 %v8507_v63, %v765_v51  ;;  %v8750_v60 = vpop.eup %7215  ;;  %3698 = vadd.xlane.f32.xlu0 %v3474_v48  ;;  %v2913_v56 = vadd.f32 %v8706_v10, %v2912_v52  ;;  %v2431_v62 = vsub.f32 1.0, %v2430_v49  ;;  %v8759_v1 = vadd.f32 1.0, %v7214_v18  ;;  %vm8763_vm5 = vmor %vm2914_vm3, %vm2915_vm2  ;;  %v861_v14 = vpop.f32.mrf.mxu3 }
  0xb4   :  { %v2921_v31 = vor.u32 1.1754944e-38, %v2920_v45  ;;  %vm2434_vm6 = vweird.f32 %v8608_v15  ;;  %v2440_v5 = vand.u32 2147483648, %v8608_v15  ;;  %vm2435_vm7 = vweird.f32 %v8678_v57 }
  0xb5   :  { %v7218_v0 = vpop.eup %7217  ;;  %v2917_v7 = vsel %vm8763_vm5, %v8706_v10, %v2913_v56  ;;  %v2432_v8 = vmul.f32 %v8678_v57, %v2431_v62  ;;  %v2438_v9 = vand.u32 2147483647, %v8608_v15  ;;  %v105_v10 = vld [vmem:[%s16116_s0 + $0x298] sm:$0xff]  ;;  %7225 = vrcp.f32 %v8746_v54  ;;  %vm2436_vm8 = vmor %vm2434_vm6, %vm2435_vm7 }
  0xb6   :  { %v7220_v6 = vpop.eup %7219  ;;  %v6961_v19 = vmul.f32 -1.442695, %v766_v55  ;;  %v2922_v20 = vsel %vm8755_vm4, %v2921_v31, %v2917_v7  ;;  %7227 = vrcp.f32 %v8752_v50  ;;  %v8795_v22 = vadd.f32 1.0, %v7218_v0  ;;  %6847 = vmatmul.msk.f32.gmra.mxu2 %vm156_vm0, %v105_v10 }
  0xb7   :  { %v8784_v17 = vpop.eup %7221  ;;  %v3475_v24 = vmul.f32 %v8637_v25, %v2922_v20  ;;  %v2433_v26 = vadd.f32 %v8678_v57, %v2432_v8  ;;  %v8803_v32 = vadd.f32 1.0, %v7220_v6  ;;  %v2441_v35 = vor.u32 1.1754944e-38, %v2440_v5 }
  0xb8   :  { %v8801_v30 = vpop.eup %7223  ;;  %v574_v36 = vadd.f32 %v8507_v63, %v573_v12  ;;  %v670_v37 = vadd.f32 %v8507_v63, %v669_v13  ;;  %7229 = vrcp.f32 %v8759_v1  ;;  %vm2439_vm9 = vcmp.eq.f32.partialorder %v2438_v9, 8.507059e+37  ;;  %v576_v9 = vpop.f32.mrf.mxu0 }
  0xb9   :  { %3700 = vadd.xlane.f32.xlu1 %v3475_v24  ;;  %v2437_v38 = vsel %vm2436_vm8, %v8678_v57, %v2433_v26  ;;  %v1470_v41 = vmul.f32 %v8651_v33, %v8586_v59  ;;  %7231 = vpow2.f32 %v6961_v19  ;;  %v862_v15 = vadd.f32 %v8507_v63, %v861_v14  ;;  %v73_v26 = vld [vmem:[%s16116_s0 + $0x198] sm:$0xff] }
  0xba   :  { %v2442_v42 = vsel %vm2439_vm9, %v2441_v35, %v2437_v38  ;;  %v6897_v43 = vmul.f32 -1.442695, %v574_v36  ;;  %7233 = vrcp.f32 %v8795_v22  ;;  %v6929_v48 = vmul.f32 -1.442695, %v670_v37  ;;  %v137_v14 = vld [vmem:[%s16116_s0 + $0x398] sm:$0xff]  ;;  %6815 = vmatmul.msk.f32.gmra.mxu1 %vm156_vm0, %v73_v26 }
  0xbb   :  { %v3443_v47 = vmul.f32 %v8637_v25, %v2442_v42  ;;  %v1471_v45 = vsub.f32 1.0, %v1470_v41  ;;  %v8818_v46 = vpop.eup %7225  ;;  %7235 = vrcp.f32 %v8803_v32  ;;  %v1480_v57 = vand.u32 2147483648, %v8586_v59  ;;  %v672_v41 = vpop.f32.mrf.mxu1  ;;  %6879 = vmatmul.msk.f32.gmra.mxu3 %vm156_vm0, %v137_v14 }
  0xbc   :  { %v2925_v51 = vmul.f32 %v8735_v40, %v8689_v3  ;;  %v8824_v52 = vpop.eup %7227  ;;  %vm1474_vm10 = vweird.f32 %v8586_v59  ;;  %vm1475_vm11 = vweird.f32 %v8651_v33  ;;  %v1478_v18 = vand.u32 2147483647, %v8586_v59  ;;  %v768_v42 = vpop.f32.mrf.mxu2 }
  0xbd   :  { %3636 = vadd.xlane.f32.xlu2 %v3443_v47  ;;  %v1472_v49 = vmul.f32 %v8651_v33, %v1471_v45  ;;  %7237 = vpow2.f32 %v6897_v43  ;;  %v6993_v55 = vmul.f32 -1.442695, %v862_v15  ;;  %vm2929_vm12 = vweird.f32 %v8689_v3  ;;  %vm1476_vm14 = vmor %vm1474_vm10, %vm1475_vm11 }
  0xbe   :  { %v2926_v56 = vsub.f32 1.0, %v2925_v51  ;;  %v8830_v61 = vpop.eup %7229  ;;  %vm2930_vm13 = vweird.f32 %v8735_v40  ;;  %v2933_v0 = vand.u32 2147483647, %v8689_v3  ;;  %v1481_v31 = vor.u32 1.1754944e-38, %v1480_v57 }
  0xbf   :  { %v1473_v62 = vadd.f32 %v8651_v33, %v1472_v49  ;;  %v7232_v4 = vpop.eup %7231  ;;  %v2935_v59 = vand.u32 2147483648, %v8689_v3  ;;  %v1485_v6 = vmul.f32 %v8718_v23, %v8653_v34  ;;  %7239 = vpow2.f32 %v6929_v48  ;;  %vm8851_vm2 = vmor %vm2929_vm12, %vm2930_vm13  ;;  %v41_v3 = vld [vmem:[%s16116_s0 + $0x98] sm:$0xff] }
  0xc0   :  { %v2927_v5 = vmul.f32 %v8735_v40, %v2926_v56  ;;  %v8840_v7 = vpop.eup %7233  ;;  %vm1479_vm15 = vcmp.eq.f32.partialorder %v1478_v18, 8.507059e+37  ;;  %vm1489_vm1 = vweird.f32 %v8653_v34  ;;  %vm8857_vm3 = vcmp.eq.f32.partialorder %v2933_v0, 8.507059e+37  ;;  %6783 = vmatmul.msk.f32.gmra.mxu0 %vm156_vm0, %v41_v3 }
  0xc1   :  { %v1477_v8 = vsel %vm1476_vm14, %v8651_v33, %v1473_v62  ;;  %v8844_v12 = vpop.eup %7235  ;;  %v1486_v10 = vsub.f32 1.0, %v1485_v6  ;;  %v1493_v33 = vand.u32 2147483647, %v8653_v34  ;;  %v2936_v21 = vor.u32 1.1754944e-38, %v2935_v59 }
  0xc2   :  { %v1482_v13 = vsel %vm1479_vm15, %v1481_v31, %v1477_v8  ;;  %v2928_v16 = vadd.f32 %v8735_v40, %v2927_v5  ;;  %v1495_v24 = vand.u32 2147483648, %v8653_v34  ;;  %vm1490_vm4 = vweird.f32 %v8718_v23 }
  0xc3   :  { %v3379_v19 = vmul.f32 %v8637_v25, %v1482_v13  ;;  %v7238_v35 = vpop.eup %7237  ;;  %v1487_v37 = vmul.f32 %v8718_v23, %v1486_v10  ;;  %v577_v38 = vadd.f32 %v8507_v63, %v576_v9  ;;  %v8880_v43 = vadd.f32 1.0, %v8801_v30  ;;  %vm1491_vm6 = vmor %vm1489_vm1, %vm1490_vm4 }
  0xc4   :  { %v2932_v36 = vsel %vm8851_vm2, %v8735_v40, %v2928_v16  ;;  %7241 = vpow2.f32 %v6993_v55  ;;  %vm1494_vm5 = vcmp.eq.f32.partialorder %v1493_v33, 8.507059e+37  ;;  %v1496_v30 = vor.u32 1.1754944e-38, %v1495_v24 }
  0xc5   :  { %3508 = vadd.xlane.f32.xlu0 %v3379_v19  ;;  %v2937_v40 = vsel %vm8857_vm3, %v2936_v21, %v2932_v36  ;;  %v1488_v47 = vadd.f32 %v8718_v23, %v1487_v37  ;;  %v6898_v45 = vmul.f32 -1.442695, %v577_v38  ;;  %v7240_v48 = vpop.eup %7239  ;;  %v673_v57 = vadd.f32 %v8507_v63, %v672_v41  ;;  %v106_v36 = vld [vmem:[%s16116_s0 + $0x2a0] sm:$0xff] }
  0xc6   :  { %v3476_v15 = vmul.f32 %v8637_v25, %v2937_v40  ;;  %v769_v51 = vadd.f32 %v8507_v63, %v768_v42  ;;  %v1950_v49 = vmul.f32 %v8658_v39, %v8595_v2  ;;  %vm1954_vm7 = vweird.f32 %v8595_v2  ;;  %6848 = vmatmul.msk.f32.gmra.mxu2 %vm156_vm0, %v106_v36  ;;  %v138_v41 = vld [vmem:[%s16116_s0 + $0x3a0] sm:$0xff] }
  0xc7   :  { %v1492_v18 = vsel %vm1491_vm6, %v8718_v23, %v1488_v47  ;;  %7243 = vpow2.f32 %v6898_v45  ;;  %vm1955_vm8 = vweird.f32 %v8658_v39  ;;  %v6930_v56 = vmul.f32 -1.442695, %v673_v57  ;;  %v675_v45 = vpop.f32.mrf.mxu1  ;;  %6880 = vmatmul.msk.f32.gmra.mxu3 %vm156_vm0, %v138_v41 }
  0xc8   :  { %3702 = vadd.xlane.f32.xlu2 %v3476_v15  ;;  %v1497_v55 = vsel %vm1494_vm5, %v1496_v30, %v1492_v18  ;;  %v6962_v34 = vmul.f32 -1.442695, %v769_v51  ;;  %v1951_v62 = vsub.f32 1.0, %v1950_v49  ;;  %v1958_v31 = vand.u32 2147483647, %v8595_v2  ;;  %vm8911_vm10 = vmor %vm1954_vm7, %vm1955_vm8  ;;  %v771_v49 = vpop.f32.mrf.mxu2 }
  0xc9   :  { %v3380_v0 = vmul.f32 %v8637_v25, %v1497_v55  ;;  %v1960_v5 = vand.u32 2147483648, %v8595_v2  ;;  %v1980_v59 = vmul.f32 %v8750_v60, %v8709_v11  ;;  %v8903_v23 = vadd.f32 1.0, %v7232_v4 }
  0xca   :  { %v7242_v6 = vpop.eup %7241  ;;  %7245 = vpow2.f32 %v6930_v56  ;;  %v1952_v8 = vmul.f32 %v8658_v39, %v1951_v62  ;;  %vm1984_vm9 = vweird.f32 %v8709_v11  ;;  %vm8915_vm11 = vcmp.eq.f32.partialorder %v1958_v31, 8.507059e+37 }
  0xcb   :  { %3510 = vadd.xlane.f32.xlu1 %v3380_v0  ;;  %v1961_v4 = vor.u32 1.1754944e-38, %v1960_v5  ;;  %v1981_v16 = vsub.f32 1.0, %v1980_v59  ;;  %vm1985_vm12 = vweird.f32 %v8750_v60  ;;  %v1988_v10 = vand.u32 2147483647, %v8709_v11 }
  0xcc   :  { %v1953_v44 = vadd.f32 %v8658_v39, %v1952_v8  ;;  %v1990_v33 = vand.u32 2147483648, %v8709_v11  ;;  %v1965_v2 = vmul.f32 %v8722_v28, %v8675_v53  ;;  %v8925_v20 = vadd.f32 1.0, %v7238_v35  ;;  %vm8934_vm14 = vmor %vm1984_vm9, %vm1985_vm12  ;;  %v74_v35 = vld [vmem:[%s16116_s0 + $0x1a0] sm:$0xff] }
  0xcd   :  { %v7244_v19 = vpop.eup %7243  ;;  %7247 = vpow2.f32 %v6962_v34  ;;  %v1982_v21 = vmul.f32 %v8750_v60, %v1981_v16  ;;  %vm1969_vm13 = vweird.f32 %v8675_v53  ;;  %vm1970_vm15 = vweird.f32 %v8722_v28  ;;  %6816 = vmatmul.msk.f32.gmra.mxu1 %vm156_vm0, %v74_v35 }
  0xce   :  { %v1957_v24 = vsel %vm8911_vm10, %v8658_v39, %v1953_v44  ;;  %v1991_v26 = vor.u32 1.1754944e-38, %v1990_v33  ;;  %v1973_v14 = vand.u32 2147483647, %v8675_v53  ;;  %vm8949_vm1 = vcmp.eq.f32.partialorder %v1988_v10, 8.507059e+37  ;;  %vm8980_vm2 = vmor %vm1969_vm13, %vm1970_vm15 }
  0xcf   :  { %v1962_v39 = vsel %vm8915_vm11, %v1961_v4, %v1957_v24  ;;  %v1983_v11 = vadd.f32 %v8750_v60, %v1982_v21  ;;  %v1966_v38 = vsub.f32 1.0, %v1965_v2  ;;  %7249 = vrcp.f32 %v8880_v43  ;;  %v864_v2 = vpop.f32.mrf.mxu3 }
  0xd0   :  { %v7246_v42 = vpop.eup %7245  ;;  %v8959_v40 = vadd.f32 1.0, %v7240_v48  ;;  %v3411_v15 = vmul.f32 %v8637_v25, %v1962_v39  ;;  %v1975_v47 = vand.u32 2147483648, %v8675_v53  ;;  %7251 = vrcp.f32 %v8903_v23 }
  0xd1   :  { %v8965_v30 = vadd.f32 1.0, %v7242_v6  ;;  %v1987_v57 = vsel %vm8934_vm14, %v8750_v60, %v1983_v11  ;;  %v1967_v51 = vmul.f32 %v8722_v28, %v1966_v38  ;;  %7253 = vrcp.f32 %v8925_v20 }
  0xd2   :  { %v8972_v48 = vadd.f32 1.0, %v7244_v19  ;;  %3572 = vadd.xlane.f32.xlu0 %v3411_v15  ;;  %v1992_v18 = vsel %vm8949_vm1, %v1991_v26, %v1987_v57  ;;  %v1976_v60 = vor.u32 1.1754944e-38, %v1975_v47  ;;  %vm1974_vm3 = vcmp.eq.f32.partialorder %v1973_v14, 8.507059e+37  ;;  %v579_v19 = vpop.f32.mrf.mxu0  ;;  %v42_v15 = vld [vmem:[%s16116_s0 + $0xa0] sm:$0xff]  ;;  %v107_v47 = vld [vmem:[%s16116_s0 + $0x2a8] sm:$0xff] }
  0xd3   :  { %v7248_v56 = vpop.eup %7247  ;;  %v3413_v34 = vmul.f32 %v8637_v25, %v1992_v18  ;;  %v1968_v62 = vadd.f32 %v8722_v28, %v1967_v51  ;;  %v676_v0 = vadd.f32 %v8507_v63, %v675_v45  ;;  %7255 = vrcp.f32 %v8959_v40  ;;  %6784 = vmatmul.msk.f32.gmra.mxu0 %vm156_vm0, %v42_v15  ;;  %6849 = vmatmul.msk.f32.gmra.mxu2 %vm156_vm0, %v107_v47 }
  0xd4   :  { %v772_v31 = vadd.f32 %v8507_v63, %v771_v49  ;;  %v2445_v53 = vmul.f32 %v8726_v27, %v8681_v58  ;;  %7257 = vrcp.f32 %v8965_v30  ;;  %v8998_v6 = vadd.f32 1.0, %v7246_v42 }
  0xd5   :  { %3576 = vadd.xlane.f32.xlu2 %v3413_v34  ;;  %v1972_v5 = vsel %vm8980_vm2, %v8722_v28, %v1968_v62  ;;  %v8995_v59 = vpop.eup %7249  ;;  %7259 = vrcp.f32 %v8972_v48  ;;  %v9000_v8 = vadd.f32 1.0, %v7248_v56  ;;  %v6931_v16 = vmul.f32 -1.442695, %v676_v0 }
  0xd6   :  { %v1977_v9 = vsel %vm1974_vm3, %v1976_v60, %v1972_v5  ;;  %v9002_v13 = vpop.eup %7251  ;;  %v2446_v44 = vsub.f32 1.0, %v2445_v53  ;;  %v2453_v10 = vand.u32 2147483647, %v8681_v58  ;;  %v6963_v28 = vmul.f32 -1.442695, %v772_v31 }
  0xd7   :  { %v3412_v4 = vmul.f32 %v8637_v25, %v1977_v9  ;;  %v9006_v33 = vpop.eup %7253  ;;  %vm2449_vm4 = vweird.f32 %v8681_v58  ;;  %v2455_v21 = vand.u32 2147483648, %v8681_v58  ;;  %v2940_v24 = vmul.f32 %v8830_v61, %v8759_v1  ;;  %v774_v9 = vpop.f32.mrf.mxu2 }
  0xd8   :  { %v2447_v3 = vmul.f32 %v8726_v27, %v2446_v44  ;;  %vm2450_vm5 = vweird.f32 %v8726_v27  ;;  %vm2944_vm6 = vweird.f32 %v8759_v1  ;;  %vm2945_vm7 = vweird.f32 %v8830_v61 }
  0xd9   :  { %3574 = vadd.xlane.f32.xlu1 %v3412_v4  ;;  %v9016_v26 = vpop.eup %7255  ;;  %v2941_v14 = vsub.f32 1.0, %v2940_v24  ;;  %v2948_v35 = vand.u32 2147483647, %v8759_v1  ;;  %v2950_v36 = vand.u32 2147483648, %v8759_v1  ;;  %v1500_v39 = vmul.f32 %v8784_v17, %v8724_v29  ;;  %vm2451_vm9 = vmor %vm2449_vm4, %vm2450_vm5 }
  0xda   :  { %v9022_v11 = vpop.eup %7257  ;;  %v865_v37 = vadd.f32 %v8507_v63, %v864_v2  ;;  %v580_v38 = vadd.f32 %v8507_v63, %v579_v19  ;;  %v2448_v41 = vadd.f32 %v8726_v27, %v2447_v3  ;;  %vm9027_vm8 = vcmp.eq.f32.partialorder %v2453_v10, 8.507059e+37  ;;  %vm9053_vm12 = vmor %vm2944_vm6, %vm2945_vm7  ;;  %v867_v10 = vpop.f32.mrf.mxu3 }
  0xdb   :  { %v9037_v45 = vpop.eup %7259  ;;  %v2456_v57 = vor.u32 1.1754944e-38, %v2455_v21  ;;  %v2942_v51 = vmul.f32 %v8830_v61, %v2941_v14  ;;  %vm1504_vm10 = vweird.f32 %v8724_v29  ;;  %vm1505_vm11 = vweird.f32 %v8784_v17 }
  0xdc   :  { %v2452_v49 = vsel %vm2451_vm9, %v8726_v27, %v2448_v41  ;;  %v2951_v18 = vor.u32 1.1754944e-38, %v2950_v36  ;;  %v1501_v55 = vsub.f32 1.0, %v1500_v39  ;;  %v1508_v60 = vand.u32 2147483647, %v8724_v29  ;;  %vm9072_vm14 = vmor %vm1504_vm10, %vm1505_vm11 }
  0xdd   :  { %v2457_v56 = vsel %vm9027_vm8, %v2456_v57, %v2452_v49  ;;  %v2943_v34 = vadd.f32 %v8830_v61, %v2942_v51  ;;  %vm2949_vm13 = vcmp.eq.f32.partialorder %v2948_v35, 8.507059e+37  ;;  %v1510_v27 = vand.u32 2147483648, %v8724_v29  ;;  %v9092_v35 = vld [vmem:[%s16118_s2] ss:$0 sm:$0xff] }
  0xde   :  { %7261 = vpow2.f32 %v6931_v16  ;;  %v6994_v62 = vmul.f32 -1.442695, %v865_v37  ;;  %v3444_v1 = vmul.f32 %v8637_v25, %v2457_v56  ;;  %v1502_v0 = vmul.f32 %v8784_v17, %v1501_v55  ;;  %v582_v55 = vpop.f32.mrf.mxu0 }
  0xdf   :  { %7263 = vrcp.f32 %v8998_v6  ;;  %v2947_v31 = vsel %vm9053_vm12, %v8830_v61, %v2943_v34  ;;  %v1511_v5 = vor.u32 1.1754944e-38, %v1510_v27  ;;  %vm1509_vm15 = vcmp.eq.f32.partialorder %v1508_v60, 8.507059e+37 }
  0xe0   :  { %7265 = vrcp.f32 %v9000_v8  ;;  %3638 = vadd.xlane.f32.xlu0 %v3444_v1  ;;  %v2952_v4 = vsel %vm2949_vm13, %v2951_v18, %v2947_v31  ;;  %v1503_v16 = vadd.f32 %v8784_v17, %v1502_v0  ;;  %v6899_v44 = vmul.f32 -1.442695, %v580_v38  ;;  %v75_v1 = vld [vmem:[%s16116_s0 + $0x1a8] sm:$0xff] }
  0xe1   :  { %7267 = vpow2.f32 %v6963_v28  ;;  %v3477_v61 = vmul.f32 %v8637_v25, %v2952_v4  ;;  %v1995_v29 = vmul.f32 %v8824_v52, %v8752_v50  ;;  %v775_v19 = vadd.f32 %v8507_v63, %v774_v9  ;;  %6817 = vmatmul.msk.f32.gmra.mxu1 %vm156_vm0, %v75_v1 }
  0xe2   :  { %7269 = vpow2.f32 %v6994_v62  ;;  %v1507_v2 = vsel %vm9072_vm14, %v8784_v17, %v1503_v16  ;;  %vm1999_vm1 = vweird.f32 %v8752_v50  ;;  %vm2000_vm2 = vweird.f32 %v8824_v52  ;;  %v43_v62 = vld [vmem:[%s16116_s0 + $0xa8] sm:$0xff]  ;;  %v870_v41 = vpop.f32.mrf.mxu3 }
  0xe3   :  { %3704 = vadd.xlane.f32.xlu2 %v3477_v61  ;;  %v1512_v21 = vsel %vm1509_vm15, %v1511_v5, %v1507_v2  ;;  %v1996_v24 = vsub.f32 1.0, %v1995_v29  ;;  %v2003_v28 = vand.u32 2147483647, %v8752_v50  ;;  %v868_v17 = vadd.f32 %v9092_v35, %v867_v10  ;;  %vm9109_vm5 = vmor %vm1999_vm1, %vm2000_vm2  ;;  %6785 = vmatmul.msk.f32.gmra.mxu0 %vm156_vm0, %v43_v62 }
  0xe4   :  { %v7262_v3 = vpop.eup %7261  ;;  %v3381_v14 = vmul.f32 %v8637_v25, %v1512_v21  ;;  %v2005_v63 = vand.u32 2147483648, %v8752_v50  ;;  %v1515_v36 = vmul.f32 %v8844_v12, %v8803_v32  ;;  %7271 = vpow2.f32 %v6899_v44 }
  0xe5   :  { %v9098_v39 = vpop.eup %7263  ;;  %v1997_v37 = vmul.f32 %v8824_v52, %v1996_v24  ;;  %vm1519_vm3 = vweird.f32 %v8803_v32  ;;  %vm1520_vm4 = vweird.f32 %v8844_v12  ;;  %v1523_v47 = vand.u32 2147483647, %v8803_v32 }
  0xe6   :  { %v9103_v38 = vpop.eup %7265  ;;  %3512 = vadd.xlane.f32.xlu1 %v3381_v14  ;;  %v2006_v42 = vor.u32 1.1754944e-38, %v2005_v63  ;;  %v1516_v15 = vsub.f32 1.0, %v1515_v36  ;;  %v1525_v57 = vand.u32 2147483648, %v8803_v32  ;;  %v9115_v49 = vadd.f32 1.0, %v7262_v3  ;;  %vm9139_vm8 = vmor %vm1519_vm3, %vm1520_vm4  ;;  %v139_v32 = vld [vmem:[%s16116_s0 + $0x3a8] sm:$0xff] }
  0xe7   :  { %v7268_v51 = vpop.eup %7267  ;;  %v1998_v58 = vadd.f32 %v8824_v52, %v1997_v37  ;;  %vm9118_vm6 = vcmp.eq.f32.partialorder %v2003_v28, 8.507059e+37  ;;  %v2460_v50 = vmul.f32 %v8818_v46, %v8746_v54  ;;  %v6964_v56 = vmul.f32 -1.442695, %v775_v19  ;;  %6881 = vmatmul.msk.f32.gmra.mxu3 %vm156_vm0, %v139_v32 }
  0xe8   :  { %v7270_v60 = vpop.eup %7269  ;;  %v6995_v34 = vmul.f32 -1.442695, %v868_v17  ;;  %v1517_v27 = vmul.f32 %v8844_v12, %v1516_v15  ;;  %vm2464_vm7 = vweird.f32 %v8746_v54  ;;  %vm9143_vm9 = vcmp.eq.f32.partialorder %v1523_v47, 8.507059e+37  ;;  %v678_v17 = vpop.f32.mrf.mxu1 }
  0xe9   :  { %v2002_v0 = vsel %vm9109_vm5, %v8824_v52, %v1998_v58  ;;  %v1526_v5 = vor.u32 1.1754944e-38, %v1525_v57  ;;  %v2461_v9 = vsub.f32 1.0, %v2460_v50  ;;  %v108_v52 = vld [vmem:[%s16116_s0 + $0x2b0] sm:$0xff]  ;;  %v2470_v44 = vand.u32 2147483648, %v8746_v54 }
  0xea   :  { %v2007_v4 = vsel %vm9118_vm6, %v2006_v42, %v2002_v0  ;;  %v1518_v16 = vadd.f32 %v8844_v12, %v1517_v27  ;;  %v583_v61 = vadd.f32 %v9092_v35, %v582_v55  ;;  %6850 = vmatmul.msk.f32.gmra.mxu2 %vm156_vm0, %v108_v52  ;;  %v7272_v10 = vpop.eup %7271  ;;  %vm2465_vm10 = vweird.f32 %v8818_v46 }
  0xeb   :  { %v3414_v29 = vmul.f32 %v8637_v25, %v2007_v4  ;;  %v2462_v2 = vmul.f32 %v8818_v46, %v2461_v9  ;;  %v2468_v19 = vand.u32 2147483647, %v8746_v54  ;;  %7273 = vrcp.f32 %v9115_v49  ;;  %vm2466_vm11 = vmor %vm2464_vm7, %vm2465_vm10 }
  0xec   :  { %v9167_v21 = vadd.f32 1.0, %v7268_v51  ;;  %v1522_v24 = vsel %vm9139_vm8, %v8844_v12, %v1518_v16  ;;  %v9172_v28 = vadd.f32 1.0, %v7270_v60  ;;  %7275 = vpow2.f32 %v6964_v56  ;;  %v44_v16 = vld [vmem:[%s16116_s0 + $0xb0] sm:$0xff] }
  0xed   :  { %3578 = vadd.xlane.f32.xlu0 %v3414_v29  ;;  %v1527_v3 = vsel %vm9143_vm9, %v1526_v5, %v1522_v24  ;;  %v2463_v14 = vadd.f32 %v8818_v46, %v2462_v2  ;;  %v2471_v36 = vor.u32 1.1754944e-38, %v2470_v44  ;;  %v6900_v37 = vmul.f32 -1.442695, %v583_v61  ;;  %v76_v44 = vld [vmem:[%s16116_s0 + $0x1b0] sm:$0xff]  ;;  %6786 = vmatmul.msk.f32.gmra.mxu0 %vm156_vm0, %v44_v16 }
  0xee   :  { %v3382_v63 = vmul.f32 %v8637_v25, %v1527_v3  ;;  %v2490_v12 = vmul.f32 %v9002_v13, %v8903_v23  ;;  %v9182_v42 = vadd.f32 1.0, %v7272_v10  ;;  %7277 = vpow2.f32 %v6995_v34  ;;  %6818 = vmatmul.msk.f32.gmra.mxu1 %vm156_vm0, %v76_v44  ;;  %v140_v29 = vld [vmem:[%s16116_s0 + $0x3b0] sm:$0xff] }
  0xef   :  { %v2467_v15 = vsel %vm2466_vm11, %v8818_v46, %v2463_v14  ;;  %vm2469_vm12 = vcmp.eq.f32.partialorder %v2468_v19, 8.507059e+37  ;;  %v679_v57 = vadd.f32 %v9092_v35, %v678_v17  ;;  %v2498_v54 = vand.u32 2147483647, %v8903_v23  ;;  %6882 = vmatmul.msk.f32.gmra.mxu3 %vm156_vm0, %v140_v29 }
  0xf0   :  { %3514 = vadd.xlane.f32.xlu2 %v3382_v63  ;;  %v2472_v47 = vsel %vm2469_vm12, %v2471_v36, %v2467_v15  ;;  %v2491_v51 = vsub.f32 1.0, %v2490_v12  ;;  %v871_v18 = vadd.f32 %v9092_v35, %v870_v41  ;;  %v2500_v50 = vand.u32 2147483648, %v8903_v23 }
  0xf1   :  { %v3445_v58 = vmul.f32 %v8637_v25, %v2472_v47  ;;  %v2475_v55 = vmul.f32 %v8840_v7, %v8795_v22  ;;  %v9192_v60 = vpop.eup %7273  ;;  %7279 = vpow2.f32 %v6900_v37  ;;  %vm2494_vm13 = vweird.f32 %v8903_v23  ;;  %v585_v37 = vpop.f32.mrf.mxu0 }
  0xf2   :  { %v2492_v46 = vmul.f32 %v9002_v13, %v2491_v51  ;;  %vm2495_vm14 = vweird.f32 %v9002_v13  ;;  %v7276_v56 = vpop.eup %7275  ;;  %vm9197_vm15 = vcmp.eq.f32.partialorder %v2498_v54, 8.507059e+37  ;;  %vm2479_vm1 = vweird.f32 %v8795_v22 }
  0xf3   :  { %3640 = vadd.xlane.f32.xlu1 %v3445_v58  ;;  %v2476_v27 = vsub.f32 1.0, %v2475_v55  ;;  %vm2480_vm2 = vweird.f32 %v8840_v7  ;;  %v2501_v1 = vor.u32 1.1754944e-38, %v2500_v50  ;;  %v2485_v0 = vand.u32 2147483648, %v8795_v22  ;;  %vm2496_vm3 = vmor %vm2494_vm13, %vm2495_vm14 }
  0xf4   :  { %v2493_v62 = vadd.f32 %v9002_v13, %v2492_v46  ;;  %v2955_v23 = vmul.f32 %v8995_v59, %v8880_v43  ;;  %v7278_v31 = vpop.eup %7277  ;;  %v2483_v5 = vand.u32 2147483647, %v8795_v22  ;;  %vm2959_vm4 = vweird.f32 %v8880_v43  ;;  %vm2481_vm6 = vmor %vm2479_vm1, %vm2480_vm2 }
  0xf5   :  { %v2477_v53 = vmul.f32 %v8840_v7, %v2476_v27  ;;  %vm2960_vm5 = vweird.f32 %v8995_v59  ;;  %v2963_v32 = vand.u32 2147483647, %v8880_v43  ;;  %v2965_v4 = vand.u32 2147483648, %v8880_v43 }
  0xf6   :  { %v2497_v9 = vsel %vm2496_vm3, %v9002_v13, %v2493_v62  ;;  %v2956_v52 = vsub.f32 1.0, %v2955_v23  ;;  %7281 = vrcp.f32 %v9167_v21  ;;  %v6932_v61 = vmul.f32 -1.442695, %v679_v57  ;;  %vm9242_vm8 = vmor %vm2959_vm4, %vm2960_vm5 }
  0xf7   :  { %v2502_v10 = vsel %vm9197_vm15, %v2501_v1, %v2497_v9  ;;  %v2478_v13 = vadd.f32 %v8840_v7, %v2477_v53  ;;  %v7280_v2 = vpop.eup %7279  ;;  %v6996_v19 = vmul.f32 -1.442695, %v871_v18  ;;  %v2486_v3 = vor.u32 1.1754944e-38, %v2485_v0  ;;  %v777_v53 = vpop.f32.mrf.mxu2 }
  0xf8   :  { %v3447_v24 = vmul.f32 %v8637_v25, %v2502_v10  ;;  %v2957_v14 = vmul.f32 %v8995_v59, %v2956_v52  ;;  %7283 = vrcp.f32 %v9172_v28  ;;  %vm2484_vm7 = vcmp.eq.f32.partialorder %v2483_v5, 8.507059e+37 }
  0xf9   :  { %v2482_v17 = vsel %vm2481_vm6, %v8840_v7, %v2478_v13  ;;  %v2966_v22 = vor.u32 1.1754944e-38, %v2965_v4  ;;  %7285 = vrcp.f32 %v9182_v42  ;;  %vm2964_vm9 = vcmp.eq.f32.partialorder %v2963_v32, 8.507059e+37  ;;  %v9251_v7 = vld [vmem:[%s16119_s3] ss:$0 sm:$0xff] }
  0xfa   :  { %3644 = vadd.xlane.f32.xlu0 %v3447_v24  ;;  %v2487_v63 = vsel %vm2484_vm7, %v2486_v3, %v2482_v17  ;;  %v2958_v36 = vadd.f32 %v8995_v59, %v2957_v14  ;;  %7287 = vpow2.f32 %v6932_v61  ;;  %v2970_v41 = vmul.f32 %v9022_v11, %v8965_v30  ;;  %v77_v14 = vld [vmem:[%s16116_s0 + $0x1b8] sm:$0xff] }
  0xfb   :  { %v3446_v43 = vmul.f32 %v9251_v7, %v2487_v63  ;;  %v9256_v12 = vadd.f32 1.0, %v7276_v56  ;;  %v9258_v15 = vadd.f32 1.0, %v7278_v31  ;;  %7289 = vpow2.f32 %v6996_v19  ;;  %v681_v56 = vpop.f32.mrf.mxu1  ;;  %v141_v17 = vld [vmem:[%s16116_s0 + $0x3b8] sm:$0xff]  ;;  %6819 = vmatmul.msk.f32.gmra.mxu1 %vm156_vm0, %v77_v14 }
  0xfc   :  { %v2962_v47 = vsel %vm9242_vm8, %v8995_v59, %v2958_v36  ;;  %v9263_v57 = vpop.eup %7281  ;;  %v2971_v54 = vsub.f32 1.0, %v2970_v41  ;;  %vm2974_vm10 = vweird.f32 %v8965_v30  ;;  %vm2975_vm11 = vweird.f32 %v9022_v11  ;;  %6883 = vmatmul.msk.f32.gmra.mxu3 %vm156_vm0, %v141_v17 }
  0xfd   :  { %3642 = vadd.xlane.f32.xlu2 %v3446_v43  ;;  %v2967_v51 = vsel %vm2964_vm9, %v2966_v22, %v2962_v47  ;;  %v586_v18 = vadd.f32 %v9092_v35, %v585_v37  ;;  %v2978_v50 = vand.u32 2147483647, %v8965_v30  ;;  %v2980_v55 = vand.u32 2147483648, %v8965_v30  ;;  %vm9281_vm13 = vmor %vm2974_vm10, %vm2975_vm11 }
  0xfe   :  { %v3478_v58 = vmul.f32 %v9251_v7, %v2967_v51  ;;  %v9271_v46 = vpop.eup %7283  ;;  %v9273_v59 = vadd.f32 1.0, %v7280_v2  ;;  %v2972_v34 = vmul.f32 %v9022_v11, %v2971_v54  ;;  %v1530_v27 = vmul.f32 %v9006_v33, %v8925_v20 }
  0xff   :  { %vm1534_vm12 = vweird.f32 %v8925_v20  ;;  %v9279_v62 = vpop.eup %7285  ;;  %vm9285_vm14 = vcmp.eq.f32.partialorder %v2978_v50, 8.507059e+37  ;;  %v2981_v0 = vor.u32 1.1754944e-38, %v2980_v55  ;;  %vm1535_vm15 = vweird.f32 %v9006_v33 }
 0x100   :  { %3706 = vadd.xlane.f32.xlu1 %v3478_v58  ;;  %v1538_v23 = vand.u32 2147483647, %v8925_v20  ;;  %v7288_v31 = vpop.eup %7287  ;;  %v2973_v5 = vadd.f32 %v9022_v11, %v2972_v34  ;;  %v1531_v9 = vsub.f32 1.0, %v1530_v27  ;;  %v1540_v52 = vand.u32 2147483648, %v8925_v20  ;;  %vm9306_vm3 = vmor %vm1534_vm12, %vm1535_vm15  ;;  %v109_v20 = vld [vmem:[%s16116_s0 + $0x2b8] sm:$0xff] }
 0x101   :  { %v2010_v32 = vmul.f32 %v9016_v26, %v8959_v40  ;;  %v7290_v4 = vpop.eup %7289  ;;  %v6901_v16 = vmul.f32 -1.442695, %v586_v18  ;;  %v682_v44 = vadd.f32 %v9092_v35, %v681_v56  ;;  %vm2014_vm1 = vweird.f32 %v8959_v40  ;;  %6851 = vmatmul.msk.f32.gmra.mxu2 %vm156_vm0, %v109_v20 }
 0x102   :  { %vm2015_vm2 = vweird.f32 %v9016_v26  ;;  %v2977_v61 = vsel %vm9281_vm13, %v9022_v11, %v2973_v5  ;;  %v1532_v10 = vmul.f32 %v9006_v33, %v1531_v9  ;;  %v2018_v2 = vand.u32 2147483647, %v8959_v40 }
 0x103   :  { %v2011_v29 = vsub.f32 1.0, %v2010_v32  ;;  %v778_v19 = vadd.f32 %v9092_v35, %v777_v53  ;;  %v2982_v24 = vsel %vm9285_vm14, %v2981_v0, %v2977_v61  ;;  %v1541_v3 = vor.u32 1.1754944e-38, %v1540_v52  ;;  %vm9340_vm5 = vmor %vm2014_vm1, %vm2015_vm2  ;;  %v684_v0 = vpop.f32.mrf.mxu1 }
 0x104   :  { %v2020_v11 = vand.u32 2147483648, %v8959_v40  ;;  %v3479_v25 = vmul.f32 %v9251_v7, %v2982_v24  ;;  %v1533_v22 = vadd.f32 %v9006_v33, %v1532_v10  ;;  %vm9326_vm4 = vcmp.eq.f32.partialorder %v1538_v23, 8.507059e+37  ;;  %v45_v24 = vld [vmem:[%s16116_s0 + $0xb8] sm:$0xff] }
 0x105   :  { %v2012_v36 = vmul.f32 %v9016_v26, %v2011_v29  ;;  %7291 = vrcp.f32 %v9256_v12  ;;  %v9334_v43 = vadd.f32 1.0, %v7288_v31  ;;  %v6933_v37 = vmul.f32 -1.442695, %v682_v44  ;;  %6787 = vmatmul.msk.f32.gmra.mxu0 %vm156_vm0, %v45_v24 }
 0x106   :  { %v2021_v47 = vor.u32 1.1754944e-38, %v2020_v11  ;;  %7293 = vpow2.f32 %v6901_v16  ;;  %3708 = vadd.xlane.f32.xlu0 %v3479_v25  ;;  %v1537_v51 = vsel %vm9306_vm3, %v9006_v33, %v1533_v22  ;;  %vm2019_vm6 = vcmp.eq.f32.partialorder %v2018_v2, 8.507059e+37  ;;  %v780_v2 = vpop.f32.mrf.mxu2 }
 0x107   :  { %v2013_v54 = vadd.f32 %v9016_v26, %v2012_v36  ;;  %7295 = vrcp.f32 %v9258_v15  ;;  %v1542_v40 = vsel %vm9326_vm4, %v1541_v3, %v1537_v51  ;;  %v6965_v58 = vmul.f32 -1.442695, %v778_v19  ;;  %v110_v3 = vld [vmem:[%s16116_s0 + $0x2c0] sm:$0xff]  ;;  %v873_v51 = vpop.f32.mrf.mxu3 }
 0x108   :  { %7297 = vrcp.f32 %v9273_v59  ;;  %v3383_v18 = vmul.f32 %v9251_v7, %v1542_v40  ;;  %v1545_v55 = vmul.f32 %v9037_v45, %v8972_v48  ;;  %vm1549_vm7 = vweird.f32 %v8972_v48 }
 0x109   :  { %v2017_v50 = vsel %vm9340_vm5, %v9016_v26, %v2013_v54  ;;  %7299 = vrcp.f32 %v9334_v43  ;;  %vm1550_vm8 = vweird.f32 %v9037_v45  ;;  %v1553_v1 = vand.u32 2147483647, %v8972_v48  ;;  %6852 = vmatmul.msk.f32.gmra.mxu2 %vm156_vm0, %v110_v3 }
 0x10a   :  { %v2022_v33 = vsel %vm2019_vm6, %v2021_v47, %v2017_v50  ;;  %7301 = vpow2.f32 %v6933_v37  ;;  %3516 = vadd.xlane.f32.xlu2 %v3383_v18  ;;  %v1546_v27 = vsub.f32 1.0, %v1545_v55  ;;  %v9366_v30 = vadd.f32 1.0, %v7290_v4  ;;  %vm9383_vm11 = vmor %vm1549_vm7, %vm1550_vm8 }
 0x10b   :  { %v3415_v56 = vmul.f32 %v9251_v7, %v2022_v33  ;;  %v9361_v34 = vpop.eup %7291  ;;  %7303 = vpow2.f32 %v6965_v58  ;;  %v1555_v23 = vand.u32 2147483648, %v8972_v48  ;;  %v2025_v31 = vmul.f32 %v9098_v39, %v8998_v6 }
 0x10c   :  { %v7294_v26 = vpop.eup %7293  ;;  %v1547_v5 = vmul.f32 %v9037_v45, %v1546_v27  ;;  %vm2029_vm9 = vweird.f32 %v8998_v6  ;;  %vm2030_vm10 = vweird.f32 %v9098_v39  ;;  %v2033_v9 = vand.u32 2147483647, %v8998_v6 }
 0x10d   :  { %3580 = vadd.xlane.f32.xlu1 %v3415_v56  ;;  %v9371_v53 = vpop.eup %7295  ;;  %v1556_v4 = vor.u32 1.1754944e-38, %v1555_v23  ;;  %v2026_v16 = vsub.f32 1.0, %v2025_v31  ;;  %v2035_v44 = vand.u32 2147483648, %v8998_v6  ;;  %v2505_v61 = vmul.f32 %v9103_v38, %v9000_v8  ;;  %vm9418_vm15 = vmor %vm2029_vm9, %vm2030_vm10 }
 0x10e   :  { %v9377_v52 = vpop.eup %7297  ;;  %v9392_v13 = vadd.f32 1.0, %v7294_v26  ;;  %v685_v29 = vadd.f32 %v9092_v35, %v684_v0  ;;  %v1548_v48 = vadd.f32 %v9037_v45, %v1547_v5  ;;  %vm9396_vm12 = vcmp.eq.f32.partialorder %v1553_v1, 8.507059e+37 }
 0x10f   :  { %v9390_v10 = vpop.eup %7299  ;;  %v2027_v14 = vmul.f32 %v9098_v39, %v2026_v16  ;;  %v2506_v20 = vsub.f32 1.0, %v2505_v61  ;;  %vm2509_vm13 = vweird.f32 %v9000_v8  ;;  %vm2510_vm14 = vweird.f32 %v9103_v38 }
 0x110   :  { %v7302_v11 = vpop.eup %7301  ;;  %v1552_v17 = vsel %vm9383_vm11, %v9037_v45, %v1548_v48  ;;  %v2036_v22 = vor.u32 1.1754944e-38, %v2035_v44  ;;  %v2513_v63 = vand.u32 2147483647, %v9000_v8  ;;  %v2515_v36 = vand.u32 2147483648, %v9000_v8  ;;  %vm9441_vm2 = vmor %vm2509_vm13, %vm2510_vm14 }
 0x111   :  { %v7304_v37 = vpop.eup %7303  ;;  %v781_v41 = vadd.f32 %v9092_v35, %v780_v2  ;;  %v1557_v47 = vsel %vm9396_vm12, %v1556_v4, %v1552_v17  ;;  %v2028_v45 = vadd.f32 %v9098_v39, %v2027_v14  ;;  %vm2034_vm1 = vcmp.eq.f32.partialorder %v2033_v9, 8.507059e+37 }
 0x112   :  { %7305 = vrcp.f32 %v9366_v30  ;;  %v6934_v6 = vmul.f32 -1.442695, %v685_v29  ;;  %v3384_v54 = vmul.f32 %v9251_v7, %v1557_v47  ;;  %v2507_v40 = vmul.f32 %v9103_v38, %v2506_v20 }
 0x113   :  { %7307 = vrcp.f32 %v9392_v13  ;;  %v9432_v58 = vadd.f32 1.0, %v7302_v11  ;;  %v2032_v18 = vsel %vm9418_vm15, %v9098_v39, %v2028_v45  ;;  %v2516_v33 = vor.u32 1.1754944e-38, %v2515_v36  ;;  %v588_v39 = vpop.f32.mrf.mxu0  ;;  %v78_v36 = vld [vmem:[%s16116_s0 + $0x1c0] sm:$0xff] }
 0x114   :  { %v9445_v55 = vadd.f32 1.0, %v7304_v37  ;;  %3518 = vadd.xlane.f32.xlu0 %v3384_v54  ;;  %v2037_v56 = vsel %vm2034_vm1, %v2036_v22, %v2032_v18  ;;  %v2508_v27 = vadd.f32 %v9103_v38, %v2507_v40  ;;  %vm2514_vm3 = vcmp.eq.f32.partialorder %v2513_v63, 8.507059e+37  ;;  %v46_v63 = vld [vmem:[%s16116_s0 + $0xc0] sm:$0xff]  ;;  %6820 = vmatmul.msk.f32.gmra.mxu1 %vm156_vm0, %v78_v36  ;;  %v783_v40 = vpop.f32.mrf.mxu2 }
 0x115   :  { %v6966_v1 = vmul.f32 -1.442695, %v781_v41  ;;  %v874_v26 = vadd.f32 %v9092_v35, %v873_v51  ;;  %v3416_v0 = vmul.f32 %v9251_v7, %v2037_v56  ;;  %v2040_v8 = vmul.f32 %v9192_v60, %v9115_v49  ;;  %6788 = vmatmul.msk.f32.gmra.mxu0 %vm156_vm0, %v46_v63  ;;  %v687_v41 = vpop.f32.mrf.mxu1 }
 0x116   :  { %7309 = vpow2.f32 %v6934_v6  ;;  %v2512_v23 = vsel %vm9441_vm2, %v9103_v38, %v2508_v27  ;;  %vm2044_vm4 = vweird.f32 %v9115_v49  ;;  %vm2045_vm5 = vweird.f32 %v9192_v60  ;;  %v876_v27 = vpop.f32.mrf.mxu3 }
 0x117   :  { %3582 = vadd.xlane.f32.xlu2 %v3416_v0  ;;  %v2517_v31 = vsel %vm2514_vm3, %v2516_v33, %v2512_v23  ;;  %v2041_v5 = vsub.f32 1.0, %v2040_v8  ;;  %v2048_v9 = vand.u32 2147483647, %v9115_v49  ;;  %v2050_v32 = vand.u32 2147483648, %v9115_v49  ;;  %vm9474_vm7 = vmor %vm2044_vm4, %vm2045_vm5 }
 0x118   :  { %v9459_v4 = vpop.eup %7305  ;;  %7311 = vrcp.f32 %v9432_v58  ;;  %v589_v16 = vadd.f32 %v9092_v35, %v588_v39  ;;  %v3448_v44 = vmul.f32 %v9251_v7, %v2517_v31  ;;  %v2985_v38 = vmul.f32 %v9271_v46, %v9172_v28 }
 0x119   :  { %v9466_v61 = vpop.eup %7307  ;;  %7313 = vpow2.f32 %v6966_v1  ;;  %v2042_v29 = vmul.f32 %v9192_v60, %v2041_v5  ;;  %v2051_v2 = vor.u32 1.1754944e-38, %v2050_v32  ;;  %vm2989_vm6 = vweird.f32 %v9172_v28 }
 0x11a   :  { %3646 = vadd.xlane.f32.xlu1 %v3448_v44  ;;  %v2986_v19 = vsub.f32 1.0, %v2985_v38  ;;  %vm2990_vm8 = vweird.f32 %v9271_v46  ;;  %v2993_v24 = vand.u32 2147483647, %v9172_v28  ;;  %v2995_v3 = vand.u32 2147483648, %v9172_v28  ;;  %v142_v28 = vld [vmem:[%s16116_s0 + $0x3c0] sm:$0xff] }
 0x11b   :  { %v6997_v11 = vmul.f32 -1.442695, %v874_v26  ;;  %v2043_v14 = vadd.f32 %v9192_v60, %v2042_v29  ;;  %vm9482_vm9 = vcmp.eq.f32.partialorder %v2048_v9, 8.507059e+37  ;;  %v1560_v49 = vmul.f32 %v9279_v62, %v9182_v42  ;;  %vm9504_vm12 = vmor %vm2989_vm6, %vm2990_vm8  ;;  %6884 = vmatmul.msk.f32.gmra.mxu3 %vm156_vm0, %v142_v28 }
 0x11c   :  { %v7310_v17 = vpop.eup %7309  ;;  %v2987_v25 = vmul.f32 %v9271_v46, %v2986_v19  ;;  %v2996_v22 = vor.u32 1.1754944e-38, %v2995_v3  ;;  %vm1564_vm10 = vweird.f32 %v9182_v42  ;;  %vm1565_vm11 = vweird.f32 %v9279_v62 }
 0x11d   :  { %v2047_v37 = vsel %vm9474_vm7, %v9192_v60, %v2043_v14  ;;  %v1561_v47 = vsub.f32 1.0, %v1560_v49  ;;  %v1568_v45 = vand.u32 2147483647, %v9182_v42  ;;  %v1570_v6 = vand.u32 2147483648, %v9182_v42  ;;  %v111_v60 = vld [vmem:[%s16116_s0 + $0x2c8] sm:$0xff]  ;;  %vm9537_vm14 = vmor %vm1564_vm10, %vm1565_vm11 }
 0x11e   :  { %v9518_v51 = vpop.eup %7311  ;;  %v6902_v54 = vmul.f32 -1.442695, %v589_v16  ;;  %v2052_v18 = vsel %vm9482_vm9, %v2051_v2, %v2047_v37  ;;  %v2988_v50 = vadd.f32 %v9271_v46, %v2987_v25  ;;  %vm2994_vm13 = vcmp.eq.f32.partialorder %v2993_v24, 8.507059e+37  ;;  %6853 = vmatmul.msk.f32.gmra.mxu2 %vm156_vm0, %v111_v60  ;;  %v591_v24 = vpop.f32.mrf.mxu0 }
 0x11f   :  { %v7314_v33 = vpop.eup %7313  ;;  %7315 = vrcp.f32 %v9445_v55  ;;  %v9526_v56 = vadd.f32 1.0, %v7310_v17  ;;  %v3417_v1 = vmul.f32 %v9251_v7, %v2052_v18  ;;  %v1562_v26 = vmul.f32 %v9279_v62, %v1561_v47 }
 0x120   :  { %7317 = vpow2.f32 %v6997_v11  ;;  %v2992_v39 = vsel %vm9504_vm12, %v9271_v46, %v2988_v50  ;;  %v1571_v8 = vor.u32 1.1754944e-38, %v1570_v6  ;;  %v784_v23 = vadd.f32 %v9092_v35, %v783_v40 }
 0x121   :  { %3584 = vadd.xlane.f32.xlu0 %v3417_v1  ;;  %v2997_v31 = vsel %vm2994_vm13, %v2996_v22, %v2992_v39  ;;  %v1563_v5 = vadd.f32 %v9279_v62, %v1562_v26  ;;  %vm1569_vm15 = vcmp.eq.f32.partialorder %v1568_v45, 8.507059e+37  ;;  %7319 = vpow2.f32 %v6902_v54  ;;  %v143_v1 = vld [vmem:[%s16116_s0 + $0x3c8] sm:$0xff]  ;;  %v879_v39 = vpop.f32.mrf.mxu3 }
 0x122   :  { %v877_v9 = vadd.f32 %v9092_v35, %v876_v27  ;;  %v3480_v46 = vmul.f32 %v9251_v7, %v2997_v31  ;;  %v2535_v42 = vmul.f32 %v9361_v34, %v9256_v12  ;;  %7321 = vrcp.f32 %v9526_v56  ;;  %v79_v27 = vld [vmem:[%s16116_s0 + $0x1c8] sm:$0xff] }
 0x123   :  { %v9548_v32 = vadd.f32 1.0, %v7314_v33  ;;  %v1567_v16 = vsel %vm9537_vm14, %v9279_v62, %v1563_v5  ;;  %vm2539_vm1 = vweird.f32 %v9256_v12  ;;  %vm2540_vm2 = vweird.f32 %v9361_v34  ;;  %6821 = vmatmul.msk.f32.gmra.mxu1 %vm156_vm0, %v79_v27  ;;  %6885 = vmatmul.msk.f32.gmra.mxu3 %vm156_vm0, %v143_v1 }
 0x124   :  { %3710 = vadd.xlane.f32.xlu2 %v3480_v46  ;;  %v1572_v44 = vsel %vm1569_vm15, %v1571_v8, %v1567_v16  ;;  %v2536_v38 = vsub.f32 1.0, %v2535_v42  ;;  %v2543_v29 = vand.u32 2147483647, %v9256_v12  ;;  %v6967_v48 = vmul.f32 -1.442695, %v784_v23  ;;  %vm9567_vm5 = vmor %vm2539_vm1, %vm2540_vm2 }
 0x125   :  { %v9556_v2 = vpop.eup %7315  ;;  %v3385_v19 = vmul.f32 %v9251_v7, %v1572_v44  ;;  %v2545_v3 = vand.u32 2147483648, %v9256_v12  ;;  %v2520_v62 = vmul.f32 %v9263_v57, %v9167_v21  ;;  %v6998_v14 = vmul.f32 -1.442695, %v877_v9 }
 0x126   :  { %v7318_v11 = vpop.eup %7317  ;;  %v2537_v20 = vmul.f32 %v9361_v34, %v2536_v38  ;;  %vm2524_vm3 = vweird.f32 %v9167_v21  ;;  %vm2525_vm4 = vweird.f32 %v9263_v57  ;;  %v2528_v22 = vand.u32 2147483647, %v9167_v21 }
 0x127   :  { %3520 = vadd.xlane.f32.xlu1 %v3385_v19  ;;  %v2546_v17 = vor.u32 1.1754944e-38, %v2545_v3  ;;  %v2521_v25 = vsub.f32 1.0, %v2520_v62  ;;  %v2530_v63 = vand.u32 2147483648, %v9167_v21  ;;  %v9573_v36 = vpop.eup %7319  ;;  %v592_v37 = vadd.f32 %v9092_v35, %v591_v24  ;;  %vm9590_vm7 = vmor %vm2524_vm3, %vm2525_vm4  ;;  %v47_v21 = vld [vmem:[%s16116_s0 + $0xc8] sm:$0xff] }
 0x128   :  { %v2538_v47 = vadd.f32 %v9361_v34, %v2537_v20  ;;  %vm9577_vm6 = vcmp.eq.f32.partialorder %v2543_v29, 8.507059e+37  ;;  %v3000_v12 = vmul.f32 %v9371_v53, %v9258_v15  ;;  %v9583_v6 = vpop.eup %7321  ;;  %vm3004_vm8 = vweird.f32 %v9258_v15  ;;  %6789 = vmatmul.msk.f32.gmra.mxu0 %vm156_vm0, %v47_v21  ;;  %v594_v21 = vpop.f32.mrf.mxu0 }
 0x129   :  { %v2522_v60 = vmul.f32 %v9263_v57, %v2521_v25  ;;  %vm3005_vm9 = vweird.f32 %v9371_v53  ;;  %v3008_v54 = vand.u32 2147483647, %v9258_v15  ;;  %v2531_v18 = vor.u32 1.1754944e-38, %v2530_v63 }
 0x12a   :  { %v2542_v40 = vsel %vm9567_vm5, %v9361_v34, %v2538_v47  ;;  %v3001_v50 = vsub.f32 1.0, %v3000_v12  ;;  %v3010_v33 = vand.u32 2147483648, %v9258_v15  ;;  %v688_v26 = vadd.f32 %v9092_v35, %v687_v41  ;;  %vm9627_vm11 = vmor %vm3004_vm8, %vm3005_vm9 }
 0x12b   :  { %v2547_v34 = vsel %vm9577_vm6, %v2546_v17, %v2542_v40  ;;  %v2523_v0 = vadd.f32 %v9263_v57, %v2522_v60  ;;  %vm2529_vm10 = vcmp.eq.f32.partialorder %v2528_v22, 8.507059e+37  ;;  %7323 = vrcp.f32 %v9548_v32 }
 0x12c   :  { %v6903_v8 = vmul.f32 -1.442695, %v592_v37  ;;  %v3450_v23 = vmul.f32 %v9251_v7, %v2547_v34  ;;  %v3002_v31 = vmul.f32 %v9371_v53, %v3001_v50  ;;  %7325 = vpow2.f32 %v6967_v48 }
 0x12d   :  { %v2527_v5 = vsel %vm9590_vm7, %v9263_v57, %v2523_v0  ;;  %v3011_v46 = vor.u32 1.1754944e-38, %v3010_v33  ;;  %v880_v42 = vadd.f32 %v9092_v35, %v879_v39  ;;  %vm3009_vm12 = vcmp.eq.f32.partialorder %v3008_v54, 8.507059e+37  ;;  %v144_v39 = vld [vmem:[%s16116_s0 + $0x3d0] sm:$0xff] }
 0x12e   :  { %3650 = vadd.xlane.f32.xlu0 %v3450_v23  ;;  %v2532_v16 = vsel %vm2529_vm10, %v2531_v18, %v2527_v5  ;;  %v3003_v44 = vadd.f32 %v9371_v53, %v3002_v31  ;;  %7327 = vpow2.f32 %v6998_v14  ;;  %v6935_v38 = vmul.f32 -1.442695, %v688_v26  ;;  %6886 = vmatmul.msk.f32.gmra.mxu3 %vm156_vm0, %v144_v39 }
 0x12f   :  { %v3449_v57 = vmul.f32 %v9251_v7, %v2532_v16  ;;  %v3015_v29 = vmul.f32 %v9459_v4, %v9366_v30  ;;  %v9636_v15 = vadd.f32 1.0, %v7318_v11  ;;  %7329 = vpow2.f32 %v6903_v8 }
 0x130   :  { %v3007_v48 = vsel %vm9627_vm11, %v9371_v53, %v3003_v44  ;;  %vm3019_vm13 = vweird.f32 %v9366_v30  ;;  %vm3020_vm14 = vweird.f32 %v9459_v4  ;;  %v6999_v62 = vmul.f32 -1.442695, %v880_v42  ;;  %v690_v44 = vpop.f32.mrf.mxu1 }
 0x131   :  { %3648 = vadd.xlane.f32.xlu2 %v3449_v57  ;;  %v3012_v19 = vsel %vm3009_vm12, %v3011_v46, %v3007_v48  ;;  %v3016_v24 = vsub.f32 1.0, %v3015_v29  ;;  %v9643_v3 = vpop.eup %7323  ;;  %v3023_v11 = vand.u32 2147483647, %v9366_v30  ;;  %v3025_v20 = vand.u32 2147483648, %v9366_v30  ;;  %vm9652_vm1 = vmor %vm3019_vm13, %vm3020_vm14 }
 0x132   :  { %v3481_v14 = vmul.f32 %v9251_v7, %v3012_v19  ;;  %v7326_v49 = vpop.eup %7325  ;;  %7331 = vpow2.f32 %v6935_v38  ;;  %v1575_v17 = vmul.f32 %v9377_v52, %v9273_v59  ;;  %vm1579_vm15 = vweird.f32 %v9273_v59 }
 0x133   :  { %v3017_v53 = vmul.f32 %v9459_v4, %v3016_v24  ;;  %vm9656_vm2 = vcmp.eq.f32.partialorder %v3023_v11, 8.507059e+37  ;;  %v3026_v63 = vor.u32 1.1754944e-38, %v3025_v20  ;;  %vm1580_vm3 = vweird.f32 %v9377_v52  ;;  %v786_v24 = vpop.f32.mrf.mxu2 }
 0x134   :  { %3712 = vadd.xlane.f32.xlu1 %v3481_v14  ;;  %v1583_v30 = vand.u32 2147483647, %v9273_v59  ;;  %v7328_v37 = vpop.eup %7327  ;;  %v1576_v47 = vsub.f32 1.0, %v1575_v17  ;;  %v1585_v45 = vand.u32 2147483648, %v9273_v59  ;;  %v2055_v12 = vmul.f32 %v9390_v10, %v9334_v43  ;;  %vm9679_vm6 = vmor %vm1579_vm15, %vm1580_vm3  ;;  %v112_v59 = vld [vmem:[%s16116_s0 + $0x2d0] sm:$0xff] }
 0x135   :  { %v3018_v41 = vadd.f32 %v9459_v4, %v3017_v53  ;;  %v7330_v60 = vpop.eup %7329  ;;  %v9667_v28 = vadd.f32 1.0, %v9573_v36  ;;  %v9669_v54 = vadd.f32 1.0, %v7326_v49  ;;  %vm2059_vm4 = vweird.f32 %v9334_v43  ;;  %6854 = vmatmul.msk.f32.gmra.mxu2 %vm156_vm0, %v112_v59 }
 0x136   :  { %vm2060_vm5 = vweird.f32 %v9390_v10  ;;  %v1577_v18 = vmul.f32 %v9377_v52, %v1576_v47  ;;  %v2056_v36 = vsub.f32 1.0, %v2055_v12  ;;  %v2063_v33 = vand.u32 2147483647, %v9334_v43 }
 0x137   :  { %v3022_v40 = vsel %vm9652_vm1, %v9459_v4, %v3018_v41  ;;  %7333 = vpow2.f32 %v6999_v62  ;;  %v1586_v1 = vor.u32 1.1754944e-38, %v1585_v45  ;;  %v2065_v26 = vand.u32 2147483648, %v9334_v43  ;;  %v80_v4 = vld [vmem:[%s16116_s0 + $0x1d0] sm:$0xff]  ;;  %vm9714_vm8 = vmor %vm2059_vm4, %vm2060_vm5 }
 0x138   :  { %v3027_v27 = vsel %vm9656_vm2, %v3026_v63, %v3022_v40  ;;  %v7332_v34 = vpop.eup %7331  ;;  %v1578_v8 = vadd.f32 %v9377_v52, %v1577_v18  ;;  %vm9698_vm7 = vcmp.eq.f32.partialorder %v1583_v30, 8.507059e+37  ;;  %v2057_v31 = vmul.f32 %v9390_v10, %v2056_v36  ;;  %6822 = vmatmul.msk.f32.gmra.mxu1 %vm156_vm0, %v80_v4 }
 0x139   :  { %v3482_v0 = vmul.f32 %v9251_v7, %v3027_v27  ;;  %7335 = vrcp.f32 %v9636_v15  ;;  %v9706_v5 = vadd.f32 1.0, %v7328_v37  ;;  %v9708_v9 = vadd.f32 1.0, %v7330_v60  ;;  %v693_v27 = vpop.f32.mrf.mxu1 }
 0x13a   :  { %v2066_v42 = vor.u32 1.1754944e-38, %v2065_v26  ;;  %v595_v16 = vadd.f32 %v9092_v35, %v594_v21  ;;  %v1582_v38 = vsel %vm9679_vm6, %v9377_v52, %v1578_v8  ;;  %v2058_v57 = vadd.f32 %v9390_v10, %v2057_v31 }
 0x13b   :  { %3714 = vadd.xlane.f32.xlu0 %v3482_v0  ;;  %vm2064_vm9 = vcmp.eq.f32.partialorder %v2063_v33, 8.507059e+37  ;;  %7337 = vrcp.f32 %v9667_v28  ;;  %v1587_v43 = vsel %vm9698_vm7, %v1586_v1, %v1582_v38  ;;  %v9733_v52 = vadd.f32 1.0, %v7332_v34  ;;  %v48_v33 = vld [vmem:[%s16116_s0 + $0xd0] sm:$0xff]  ;;  %v789_v46 = vpop.f32.mrf.mxu2 }
 0x13c   :  { %7339 = vrcp.f32 %v9669_v54  ;;  %v3386_v29 = vmul.f32 %v9251_v7, %v1587_v43  ;;  %v2062_v48 = vsel %vm9714_vm8, %v9390_v10, %v2058_v57  ;;  %v1590_v14 = vmul.f32 %v9466_v61, %v9392_v13  ;;  %6790 = vmatmul.msk.f32.gmra.mxu0 %vm156_vm0, %v48_v33 }
 0x13d   :  { %v7334_v19 = vpop.eup %7333  ;;  %7341 = vrcp.f32 %v9706_v5  ;;  %v2067_v62 = vsel %vm2064_vm9, %v2066_v42, %v2062_v48  ;;  %v6904_v11 = vmul.f32 -1.442695, %v595_v16  ;;  %v691_v20 = vadd.f32 %v9092_v35, %v690_v44 }
 0x13e   :  { %7343 = vrcp.f32 %v9708_v9  ;;  %3522 = vadd.xlane.f32.xlu2 %v3386_v29  ;;  %v3418_v49 = vmul.f32 %v9251_v7, %v2067_v62  ;;  %v1591_v10 = vsub.f32 1.0, %v1590_v14  ;;  %vm1594_vm10 = vweird.f32 %v9392_v13 }
 0x13f   :  { %v9740_v53 = vpop.eup %7335  ;;  %vm1595_vm11 = vweird.f32 %v9466_v61  ;;  %v1598_v17 = vand.u32 2147483647, %v9392_v13  ;;  %v9745_v25 = vadd.f32 1.0, %v7334_v19  ;;  %v787_v22 = vadd.f32 %v9092_v35, %v786_v24 }
 0x140   :  { %3586 = vadd.xlane.f32.xlu1 %v3418_v49  ;;  %v1600_v63 = vand.u32 2147483648, %v9392_v13  ;;  %v2070_v30 = vmul.f32 %v9518_v51, %v9432_v58  ;;  %v1592_v41 = vmul.f32 %v9466_v61, %v1591_v10  ;;  %vm2074_vm12 = vweird.f32 %v9432_v58  ;;  %vm9759_vm14 = vmor %vm1594_vm10, %vm1595_vm11 }
 0x141   :  { %v9751_v37 = vpop.eup %7337  ;;  %vm2075_vm13 = vweird.f32 %v9518_v51  ;;  %v2078_v47 = vand.u32 2147483647, %v9432_v58  ;;  %v2080_v60 = vand.u32 2147483648, %v9432_v58  ;;  %v2550_v40 = vmul.f32 %v9556_v2, %v9445_v55  ;;  %v9796_v58 = vld [vmem:[%s16118_s2] ss:$0 sm:$0xff] }
 0x142   :  { %v9757_v45 = vpop.eup %7339  ;;  %v1601_v13 = vor.u32 1.1754944e-38, %v1600_v63  ;;  %v2071_v12 = vsub.f32 1.0, %v2070_v30  ;;  %7345 = vpow2.f32 %v6904_v11  ;;  %v6936_v50 = vmul.f32 -1.442695, %v691_v20  ;;  %vm9785_vm3 = vmor %vm2074_vm12, %vm2075_vm13 }
 0x143   :  { %v9766_v18 = vpop.eup %7341  ;;  %v1593_v36 = vadd.f32 %v9466_v61, %v1592_v41  ;;  %vm1599_vm15 = vcmp.eq.f32.partialorder %v1598_v17, 8.507059e+37  ;;  %v2551_v26 = vsub.f32 1.0, %v2550_v40  ;;  %vm2554_vm1 = vweird.f32 %v9445_v55 }
 0x144   :  { %v9772_v21 = vpop.eup %7343  ;;  %v2072_v1 = vmul.f32 %v9518_v51, %v2071_v12  ;;  %vm2555_vm2 = vweird.f32 %v9556_v2  ;;  %v2081_v39 = vor.u32 1.1754944e-38, %v2080_v60  ;;  %v2558_v34 = vand.u32 2147483647, %v9445_v55  ;;  %v113_v12 = vld [vmem:[%s16116_s0 + $0x2d8] sm:$0xff] }
 0x145   :  { %v1597_v4 = vsel %vm9759_vm14, %v9466_v61, %v1593_v36  ;;  %v2560_v0 = vand.u32 2147483648, %v9445_v55  ;;  %v6968_v8 = vmul.f32 -1.442695, %v787_v22  ;;  %vm2079_vm4 = vcmp.eq.f32.partialorder %v2078_v47, 8.507059e+37  ;;  %vm9809_vm5 = vmor %vm2554_vm1, %vm2555_vm2  ;;  %6855 = vmatmul.msk.f32.gmra.mxu2 %vm156_vm0, %v113_v12 }
 0x146   :  { %v1602_v23 = vsel %vm1599_vm15, %v1601_v13, %v1597_v4  ;;  %v2073_v31 = vadd.f32 %v9518_v51, %v2072_v1  ;;  %7347 = vrcp.f32 %v9733_v52  ;;  %v694_v61 = vadd.f32 %v9796_v58, %v693_v27  ;;  %v597_v1 = vpop.f32.mrf.mxu0  ;;  %v792_v4 = vpop.f32.mrf.mxu2 }
 0x147   :  { %v3387_v42 = vmul.f32 %v9251_v7, %v1602_v23  ;;  %v2552_v16 = vmul.f32 %v9556_v2, %v2551_v26  ;;  %7349 = vrcp.f32 %v9745_v25  ;;  %v2561_v57 = vor.u32 1.1754944e-38, %v2560_v0 }
 0x148   :  { %v2077_v44 = vsel %vm9785_vm3, %v9518_v51, %v2073_v31  ;;  %v7346_v43 = vpop.eup %7345  ;;  %7351 = vpow2.f32 %v6936_v50  ;;  %vm2559_vm6 = vcmp.eq.f32.partialorder %v2558_v34, 8.507059e+37  ;;  %v790_v19 = vadd.f32 %v9796_v58, %v789_v46  ;;  %v882_v51 = vpop.f32.mrf.mxu3 }
 0x149   :  { %3524 = vadd.xlane.f32.xlu0 %v3387_v42  ;;  %v2082_v29 = vsel %vm2079_vm4, %v2081_v39, %v2077_v44  ;;  %v2553_v48 = vadd.f32 %v9556_v2, %v2552_v16  ;;  %7353 = vpow2.f32 %v6968_v8  ;;  %v2085_v55 = vmul.f32 %v9583_v6, %v9526_v56 }
 0x14a   :  { %v3419_v24 = vmul.f32 %v9251_v7, %v2082_v29  ;;  %v6937_v62 = vmul.f32 -1.442695, %v694_v61  ;;  %vm2089_vm7 = vweird.f32 %v9526_v56  ;;  %vm2090_vm8 = vweird.f32 %v9583_v6 }
 0x14b   :  { %v2557_v14 = vsel %vm9809_vm5, %v9556_v2, %v2553_v48  ;;  %v2086_v20 = vsub.f32 1.0, %v2085_v55  ;;  %v2093_v49 = vand.u32 2147483647, %v9526_v56  ;;  %v2095_v10 = vand.u32 2147483648, %v9526_v56  ;;  %vm9844_vm10 = vmor %vm2089_vm7, %vm2090_vm8 }
 0x14c   :  { %3588 = vadd.xlane.f32.xlu2 %v3419_v24  ;;  %v2562_v11 = vsel %vm2559_vm6, %v2561_v57, %v2557_v14  ;;  %v9825_v17 = vpop.eup %7347  ;;  %v9827_v22 = vadd.f32 1.0, %v7346_v43  ;;  %v883_v63 = vadd.f32 %v9796_v58, %v882_v51  ;;  %v3030_v2 = vmul.f32 %v9740_v53, %v9636_v15 }
 0x14d   :  { %v3451_v30 = vmul.f32 %v9251_v7, %v2562_v11  ;;  %v9833_v41 = vpop.eup %7349  ;;  %v6969_v47 = vmul.f32 -1.442695, %v790_v19  ;;  %v2087_v35 = vmul.f32 %v9583_v6, %v2086_v20  ;;  %v2096_v13 = vor.u32 1.1754944e-38, %v2095_v10  ;;  %v3571_v11 = vpop.xlane.xlu2 %3570 }
 0x14e   :  { %vm3034_vm9 = vweird.f32 %v9636_v15  ;;  %v7352_v60 = vpop.eup %7351  ;;  %v3031_v50 = vsub.f32 1.0, %v3030_v2  ;;  %vm3035_vm11 = vweird.f32 %v9740_v53  ;;  %v3038_v36 = vand.u32 2147483647, %v9636_v15 }
 0x14f   :  { %3652 = vadd.xlane.f32.xlu1 %v3451_v30  ;;  %v3040_v33 = vand.u32 2147483648, %v9636_v15  ;;  %v7354_v27 = vpop.eup %7353  ;;  %7355 = vpow2.f32 %v6937_v62  ;;  %v2088_v26 = vadd.f32 %v9583_v6, %v2087_v35  ;;  %vm2094_vm12 = vcmp.eq.f32.partialorder %v2093_v49, 8.507059e+37  ;;  %vm9865_vm15 = vmor %vm3034_vm9, %vm3035_vm11 }
 0x150   :  { %v1605_v56 = vmul.f32 %v9751_v37, %v9667_v28  ;;  %v3032_v59 = vmul.f32 %v9740_v53, %v3031_v50  ;;  %vm1609_vm13 = vweird.f32 %v9667_v28  ;;  %vm1610_vm14 = vweird.f32 %v9751_v37  ;;  %v885_v20 = vpop.f32.mrf.mxu3 }
 0x151   :  { %v3041_v39 = vor.u32 1.1754944e-38, %v3040_v33  ;;  %v2092_v34 = vsel %vm9844_vm10, %v9583_v6, %v2088_v26  ;;  %v1613_v23 = vand.u32 2147483647, %v9667_v28  ;;  %v1615_v31 = vand.u32 2147483648, %v9667_v28  ;;  %vm9888_vm2 = vmor %vm1609_vm13, %vm1610_vm14 }
 0x152   :  { %v1606_v8 = vsub.f32 1.0, %v1605_v56  ;;  %v598_v61 = vadd.f32 %v9796_v58, %v597_v1  ;;  %v2097_v46 = vsel %vm2094_vm12, %v2096_v13, %v2092_v34  ;;  %v3033_v42 = vadd.f32 %v9740_v53, %v3032_v59 }
 0x153   :  { %vm3039_vm1 = vcmp.eq.f32.partialorder %v3038_v36, 8.507059e+37  ;;  %v9873_v6 = vadd.f32 1.0, %v7352_v60  ;;  %v793_v16 = vadd.f32 %v9796_v58, %v792_v4  ;;  %v3420_v15 = vmul.f32 %v9251_v7, %v2097_v46  ;;  %v600_v4 = vpop.f32.mrf.mxu0 }
 0x154   :  { %v1607_v44 = vmul.f32 %v9751_v37, %v1606_v8  ;;  %7357 = vrcp.f32 %v9827_v22  ;;  %v9879_v38 = vadd.f32 1.0, %v7354_v27  ;;  %v3037_v57 = vsel %vm9865_vm15, %v9740_v53, %v3033_v42 }
 0x155   :  { %v1616_v29 = vor.u32 1.1754944e-38, %v1615_v31  ;;  %v7356_v48 = vpop.eup %7355  ;;  %v7000_v19 = vmul.f32 -1.442695, %v883_v63  ;;  %3590 = vadd.xlane.f32.xlu0 %v3420_v15  ;;  %v3042_v51 = vsel %vm3039_vm1, %v3041_v39, %v3037_v57  ;;  %vm1614_vm3 = vcmp.eq.f32.partialorder %v1613_v23, 8.507059e+37  ;;  %v9906_v63 = vld [vmem:[%s16119_s3] ss:$0 sm:$0xff] }
 0x156   :  { %v1608_v24 = vadd.f32 %v9751_v37, %v1607_v44  ;;  %7359 = vpow2.f32 %v6969_v47  ;;  %v6905_v55 = vmul.f32 -1.442695, %v598_v61  ;;  %v3483_v53 = vmul.f32 %v9251_v7, %v3042_v51  ;;  %v3507_v47 = vpop.xlane.xlu0 %3506  ;;  %v696_v51 = vpop.f32.mrf.mxu1 }
 0x157   :  { %v2580_v62 = vmul.f32 %v9757_v45, %v9669_v54  ;;  %7361 = vrcp.f32 %v9873_v6  ;;  %v6970_v28 = vmul.f32 -1.442695, %v793_v16  ;;  %vm2584_vm4 = vweird.f32 %v9669_v54 }
 0x158   :  { %v1612_v14 = vsel %vm9888_vm2, %v9751_v37, %v1608_v24  ;;  %3716 = vadd.xlane.f32.xlu2 %v3483_v53  ;;  %vm2585_vm5 = vweird.f32 %v9757_v45  ;;  %v2588_v7 = vand.u32 2147483647, %v9669_v54  ;;  %7363 = vpow2.f32 %v7000_v19 }
 0x159   :  { %v1617_v49 = vsel %vm1614_vm3, %v1616_v29, %v1612_v14  ;;  %v2581_v10 = vsub.f32 1.0, %v2580_v62  ;;  %v2590_v37 = vand.u32 2147483648, %v9669_v54  ;;  %v9913_v2 = vstv %s16120_s4  ;;  %vm9926_vm6 = vmor %vm2584_vm4, %vm2585_vm5  ;;  %v49_v29 = vld [vmem:[%s16116_s0 + $0xd8] sm:$0xff] }
 0x15a   :  { %v3388_v30 = vmul.f32 %v9906_v63, %v1617_v49  ;;  %v9915_v35 = vpop.eup %7357  ;;  %v9917_v13 = vadd.f32 1.0, %v7356_v48  ;;  %7365 = vpow2.f32 %v6905_v55  ;;  %v3796_v60 = vadd.f32 %v9913_v2, %v3571_v11  ;;  %v81_v48 = vld [vmem:[%s16116_s0 + $0x1d8] sm:$0xff]  ;;  %6791 = vmatmul.msk.f32.gmra.mxu0 %vm156_vm0, %v49_v29  ;;  %v888_v11 = vpop.f32.mrf.mxu3 }
 0x15b   :  { %v2582_v12 = vmul.f32 %v9757_v45, %v2581_v10  ;;  %7367 = vpow2.f32 %v6970_v28  ;;  %v886_v40 = vadd.f32 %v9796_v58, %v885_v20  ;;  %v2591_v36 = vor.u32 1.1754944e-38, %v2590_v37  ;;  %6823 = vmatmul.msk.f32.gmra.mxu1 %vm156_vm0, %v81_v48  ;;  %v114_v28 = vld [vmem:[%s16116_s0 + $0x2e0] sm:$0xff]  ;;  %v145_v14 = vld [vmem:[%s16116_s0 + $0x3d8] sm:$0xff] }
 0x15c   :  { %3526 = vadd.xlane.f32.xlu1 %v3388_v30  ;;  %v2565_v33 = vmul.f32 %v9643_v3, %v9548_v32  ;;  %v7360_v27 = vpop.eup %7359  ;;  %vm9933_vm7 = vcmp.eq.f32.partialorder %v2588_v7, 8.507059e+37  ;;  %v3764_v56 = vadd.f32 %v9913_v2, %v3507_v47  ;;  %vm2569_vm8 = vweird.f32 %v9548_v32  ;;  %6856 = vmatmul.msk.f32.gmra.mxu2 %vm156_vm0, %v114_v28 }
 0x15d   :  { %v2583_v1 = vadd.f32 %v9757_v45, %v2582_v12  ;;  %v9939_v54 = vpop.eup %7361  ;;  %vm2570_vm9 = vweird.f32 %v9643_v3  ;;  %v2573_v39 = vand.u32 2147483647, %v9548_v32  ;;  %v2575_v34 = vand.u32 2147483648, %v9548_v32  ;;  %6887 = vmatmul.msk.f32.gmra.mxu3 %vm156_vm0, %v145_v14 }
 0x15e   :  { %v2566_v59 = vsub.f32 1.0, %v2565_v33  ;;  %7369 = vrcp.f32 %v9879_v38  ;;  %v7052_v8 = vmul.f32 -1.442695, %v3796_v60  ;;  %v3045_v23 = vmul.f32 %v9766_v18, %v9706_v5  ;;  %v7364_v31 = vpop.eup %7363  ;;  %vm9962_vm10 = vmor %vm2569_vm8, %vm2570_vm9  ;;  %v699_v55 = vpop.f32.mrf.mxu1 }
 0x15f   :  { %v2587_v0 = vsel %vm9926_vm6, %v9757_v45, %v2583_v1  ;;  %7371 = vrcp.f32 %v9917_v13  ;;  %v9951_v61 = vadd.f32 1.0, %v7360_v27  ;;  %v7001_v15 = vmul.f32 -1.442695, %v886_v40 }
 0x160   :  { %v2592_v46 = vsel %vm9933_vm7, %v2591_v36, %v2587_v0  ;;  %v2567_v42 = vmul.f32 %v9643_v3, %v2566_v59  ;;  %v7366_v16 = vpop.eup %7365  ;;  %v601_v44 = vadd.f32 %v9796_v58, %v600_v4  ;;  %v7020_v57 = vmul.f32 -1.442695, %v3764_v56  ;;  %v3635_v59 = vpop.xlane.xlu1 %3634 }
 0x161   :  { %v3453_v45 = vmul.f32 %v9906_v63, %v2592_v46  ;;  %v7368_v19 = vpop.eup %7367  ;;  %vm9973_vm11 = vcmp.eq.f32.partialorder %v2573_v39, 8.507059e+37  ;;  %v2576_v32 = vor.u32 1.1754944e-38, %v2575_v34  ;;  %v3046_v53 = vsub.f32 1.0, %v3045_v23 }
 0x162   :  { %v2568_v24 = vadd.f32 %v9643_v3, %v2567_v42  ;;  %v9979_v62 = vadd.f32 1.0, %v7364_v31  ;;  %7373 = vpow2.f32 %v7052_v8  ;;  %vm3049_vm12 = vweird.f32 %v9706_v5  ;;  %v3699_v8 = vpop.xlane.xlu0 %3698 }
 0x163   :  { %3656 = vadd.xlane.f32.xlu0 %v3453_v45  ;;  %vm3050_vm13 = vweird.f32 %v9766_v18  ;;  %v3047_v49 = vmul.f32 %v9766_v18, %v3046_v53  ;;  %v3053_v10 = vand.u32 2147483647, %v9706_v5  ;;  %v3055_v7 = vand.u32 2147483648, %v9706_v5 }
 0x164   :  { %v2572_v20 = vsel %vm9962_vm10, %v9643_v3, %v2568_v24  ;;  %v9997_v30 = vpop.eup %7369  ;;  %v9999_v37 = vadd.f32 1.0, %v7366_v16  ;;  %7375 = vpow2.f32 %v7001_v15  ;;  %v697_v47 = vadd.f32 %v9796_v58, %v696_v51  ;;  %vm10016_vm14 = vmor %vm3049_vm12, %vm3050_vm13  ;;  %v603_v15 = vpop.f32.mrf.mxu0 }
 0x165   :  { %v2577_v3 = vsel %vm9973_vm11, %v2576_v32, %v2572_v20  ;;  %v10004_v12 = vpop.eup %7371  ;;  %v6906_v60 = vmul.f32 -1.442695, %v601_v44  ;;  %7377 = vpow2.f32 %v7020_v57  ;;  %v3048_v50 = vadd.f32 %v9766_v18, %v3047_v49 }
 0x166   :  { %v3452_v40 = vmul.f32 %v9906_v63, %v2577_v3  ;;  %7379 = vrcp.f32 %v9951_v61  ;;  %v10009_v36 = vadd.f32 1.0, %v7368_v19  ;;  %v889_v33 = vadd.f32 %v9796_v58, %v888_v11 }
 0x167   :  { %v3056_v1 = vor.u32 1.1754944e-38, %v3055_v7  ;;  %7381 = vrcp.f32 %v9979_v62  ;;  %vm3054_vm15 = vcmp.eq.f32.partialorder %v3053_v10, 8.507059e+37  ;;  %v3060_v26 = vmul.f32 %v9833_v41, %v9745_v25 }
 0x168   :  { %3654 = vadd.xlane.f32.xlu2 %v3452_v40  ;;  %v7374_v56 = vpop.eup %7373  ;;  %7383 = vrcp.f32 %v9999_v37  ;;  %v6938_v4 = vmul.f32 -1.442695, %v697_v47  ;;  %v3052_v5 = vsel %vm10016_vm14, %v9766_v18, %v3048_v50  ;;  %v7002_v34 = vmul.f32 -1.442695, %v889_v33 }
 0x169   :  { %7385 = vpow2.f32 %v6906_v60  ;;  %v3057_v0 = vsel %vm3054_vm15, %v3056_v1, %v3052_v5  ;;  %v10028_v31 = vadd.f32 1.0, %v7374_v56  ;;  %v3061_v42 = vsub.f32 1.0, %v3060_v26 }
 0x16a   :  { %v7376_v39 = vpop.eup %7375  ;;  %7387 = vrcp.f32 %v10009_v36  ;;  %v3484_v46 = vmul.f32 %v9906_v63, %v3057_v0  ;;  %vm3064_vm1 = vweird.f32 %v9745_v25  ;;  %vm3065_vm2 = vweird.f32 %v9833_v41  ;;  %v50_v0 = vld [vmem:[%s16116_s0 + $0xe0] sm:$0xff] }
 0x16b   :  { %v7378_v23 = vpop.eup %7377  ;;  %v3068_v18 = vand.u32 2147483647, %v9745_v25  ;;  %v3070_v44 = vand.u32 2147483648, %v9745_v25  ;;  %v3828_v45 = vadd.f32 %v9913_v2, %v3635_v59  ;;  %7389 = vpow2.f32 %v6938_v4  ;;  %vm10054_vm3 = vmor %vm3064_vm1, %vm3065_vm2  ;;  %v795_v59 = vpop.f32.mrf.mxu2  ;;  %6792 = vmatmul.msk.f32.gmra.mxu0 %vm156_vm0, %v50_v0 }
 0x16c   :  { %v10032_v16 = vpop.eup %7379  ;;  %3718 = vadd.xlane.f32.xlu1 %v3484_v46  ;;  %v3062_v43 = vmul.f32 %v9833_v41, %v3061_v42  ;;  %v3860_v29 = vadd.f32 %v9913_v2, %v3699_v8  ;;  %v1620_v48 = vmul.f32 %v9772_v21, %v9708_v9  ;;  %v10046_v51 = vadd.f32 1.0, %v7376_v39  ;;  %v146_v42 = vld [vmem:[%s16116_s0 + $0x3e0] sm:$0xff] }
 0x16d   :  { %v10038_v57 = vpop.eup %7381  ;;  %7391 = vpow2.f32 %v7002_v34  ;;  %v10048_v24 = vadd.f32 1.0, %v7378_v23  ;;  %v3071_v53 = vor.u32 1.1754944e-38, %v3070_v44  ;;  %v604_v14 = vadd.f32 %v9796_v58, %v603_v15  ;;  %6888 = vmatmul.msk.f32.gmra.mxu3 %vm156_vm0, %v146_v42 }
 0x16e   :  { %v10044_v19 = vpop.eup %7383  ;;  %v3063_v11 = vadd.f32 %v9833_v41, %v3062_v43  ;;  %vm3069_vm4 = vcmp.eq.f32.partialorder %v3068_v18, 8.507059e+37  ;;  %v7084_v20 = vmul.f32 -1.442695, %v3828_v45  ;;  %7393 = vrcp.f32 %v10028_v31 }
 0x16f   :  { %v7386_v28 = vpop.eup %7385  ;;  %v7116_v10 = vmul.f32 -1.442695, %v3860_v29  ;;  %v1621_v7 = vsub.f32 1.0, %v1620_v48  ;;  %v700_v25 = vadd.f32 %v9796_v58, %v699_v55  ;;  %v6907_v33 = vmul.f32 -1.442695, %v604_v14 }
 0x170   :  { %v10060_v49 = vpop.eup %7387  ;;  %v3067_v47 = vsel %vm10054_vm3, %v9833_v41, %v3063_v11  ;;  %7395 = vpow2.f32 %v7084_v20  ;;  %v10067_v3 = vadd.f32 1.0, %v7386_v28  ;;  %vm1624_vm5 = vweird.f32 %v9708_v9 }
 0x171   :  { %7397 = vrcp.f32 %v10048_v24  ;;  %v3072_v60 = vsel %vm3069_vm4, %v3071_v53, %v3067_v47  ;;  %v1622_v40 = vmul.f32 %v9772_v21, %v1621_v7  ;;  %v7390_v50 = vpop.eup %7389  ;;  %v6939_v26 = vmul.f32 -1.442695, %v700_v25 }
 0x172   :  { %7399 = vrcp.f32 %v10046_v51  ;;  %v3485_v27 = vmul.f32 %v9906_v63, %v3072_v60  ;;  %vm1625_vm6 = vweird.f32 %v9772_v21  ;;  %v1628_v56 = vand.u32 2147483647, %v9708_v9 }
 0x173   :  { %v7392_v1 = vpop.eup %7391  ;;  %7401 = vpow2.f32 %v7116_v10  ;;  %v1623_v41 = vadd.f32 %v9772_v21, %v1622_v40  ;;  %v1630_v4 = vand.u32 2147483648, %v9708_v9  ;;  %vm10081_vm7 = vmor %vm1624_vm5, %vm1625_vm6  ;;  %v2100_v34 = vmul.f32 %v9825_v17, %v9733_v52  ;;  %v82_v9 = vld [vmem:[%s16116_s0 + $0x1e0] sm:$0xff] }
 0x174   :  { %3720 = vadd.xlane.f32.xlu0 %v3485_v27  ;;  %v10078_v5 = vpop.eup %7393  ;;  %7403 = vrcp.f32 %v10067_v3  ;;  %v10093_v23 = vadd.f32 1.0, %v7390_v50  ;;  %v6452_v46 = vlaneseq  ;;  %6824 = vmatmul.msk.f32.gmra.mxu1 %vm156_vm0, %v82_v9  ;;  %vm1629_vm8 = vcmp.eq.f32.partialorder %v1628_v56, 8.507059e+37 }
 0x175   :  { %7405 = vpow2.f32 %v6907_v33  ;;  %v1627_v44 = vsel %vm10081_vm7, %v9772_v21, %v1623_v41  ;;  %v1631_v45 = vor.u32 1.1754944e-38, %v1630_v4  ;;  %v10110_v29 = vadd.f32 1.0, %v7392_v1 }
 0x176   :  { %v7396_v8 = vpop.eup %7395  ;;  %7407 = vpow2.f32 %v6939_v26  ;;  %v796_v48 = vadd.f32 %v9796_v58, %v795_v59  ;;  %v2101_v55 = vsub.f32 1.0, %v2100_v34  ;;  %v4885_v53 = vmul.f32 %v10078_v5, %v10028_v31 }
 0x177   :  { %v10100_v15 = vpop.eup %7397  ;;  %v10102_v18 = vadd.f32 1.0, %v7396_v8  ;;  %vm2104_vm9 = vweird.f32 %v9733_v52  ;;  %vm2105_vm10 = vweird.f32 %v9825_v17  ;;  %v2108_v21 = vand.u32 2147483647, %v9733_v52 }
 0x178   :  { %v10108_v43 = vpop.eup %7399  ;;  %v4405_v28 = vmul.f32 %v10100_v15, %v10048_v24  ;;  %v1632_v11 = vsel %vm1629_vm8, %v1631_v45, %v1627_v44  ;;  %v2102_v20 = vmul.f32 %v9825_v17, %v2101_v55  ;;  %v2110_v7 = vand.u32 2147483648, %v9733_v52  ;;  %vm10133_vm11 = vmor %vm2104_vm9, %vm2105_vm10  ;;  %v3701_v45 = vpop.xlane.xlu1 %3700 }
 0x179   :  { %v7402_v32 = vpop.eup %7401  ;;  %7409 = vrcp.f32 %v10102_v18  ;;  %v3389_v10 = vmul.f32 %v9906_v63, %v1632_v11  ;;  %v10128_v47 = vand.u32 127, %v6452_v46  ;;  %v6971_v60 = vmul.f32 -1.442695, %v796_v48 }
 0x17a   :  { %v10120_v14 = vadd.f32 1.0, %v7402_v32  ;;  %v10123_v58 = vpop.eup %7403  ;;  %v2103_v50 = vadd.f32 %v9825_v17, %v2102_v20  ;;  %vm2109_vm12 = vcmp.eq.f32.partialorder %v2108_v21, 8.507059e+37  ;;  %v2111_v33 = vor.u32 1.1754944e-38, %v2110_v7 }
 0x17b   :  { %v7406_v25 = vpop.eup %7405  ;;  %3528 = vadd.xlane.f32.xlu2 %v3389_v10  ;;  %v4886_v1 = vsub.f32 1.0, %v4885_v53  ;;  %v4406_v41 = vsub.f32 1.0, %v4405_v28  ;;  %v1635_v26 = vmul.f32 %v9915_v35, %v9827_v22  ;;  %vm4889_vm13 = vweird.f32 %v10028_v31  ;;  %v3637_v28 = vpop.xlane.xlu2 %3636 }
 0x17c   :  { %7411 = vrcp.f32 %v10120_v14  ;;  %v7408_v27 = vpop.eup %7407  ;;  %v4895_v56 = vand.u32 2147483648, %v10028_v31  ;;  %v2107_v4 = vsel %vm10133_vm11, %v9825_v17, %v2103_v50  ;;  %vm4409_vm14 = vweird.f32 %v10048_v24 }
 0x17d   :  { %7413 = vrcp.f32 %v10093_v23  ;;  %v4413_v59 = vand.u32 2147483647, %v10048_v24  ;;  %v2112_v39 = vsel %vm2109_vm12, %v2111_v33, %v2107_v4  ;;  %v1636_v9 = vsub.f32 1.0, %v1635_v26 }
 0x17e   :  { %7415 = vrcp.f32 %v10110_v29  ;;  %v3421_v0 = vmul.f32 %v9906_v63, %v2112_v39  ;;  %vm1639_vm15 = vweird.f32 %v9827_v22  ;;  %vm1640_vm1 = vweird.f32 %v9915_v35  ;;  %v116_v39 = vld [vmem:[%s16116_s0 + $0x2f0] sm:$0xff] }
 0x17f   :  { %7417 = vpow2.f32 %v6971_v60  ;;  %v10150_v34 = vpop.eup %7409  ;;  %v4887_v46 = vmul.f32 %v10078_v5, %v4886_v1  ;;  %v4407_v17 = vmul.f32 %v10100_v15, %v4406_v41  ;;  %v1643_v42 = vand.u32 2147483647, %v9827_v22  ;;  %vm10180_vm3 = vmor %vm1639_vm15, %vm1640_vm1  ;;  %v3509_v60 = vpop.xlane.xlu0 %3508 }
 0x180   :  { %v1645_v44 = vand.u32 2147483648, %v9827_v22  ;;  %v10163_v55 = vor.u32 1.1754944e-38, %v4895_v56  ;;  %v4415_v32 = vand.u32 2147483648, %v10048_v24  ;;  %v10166_v53 = vadd.f32 1.0, %v7406_v25  ;;  %3592 = vadd.xlane.f32.xlu1 %v3421_v0 }
 0x181   :  { %v1637_v21 = vmul.f32 %v9915_v35, %v1636_v9  ;;  %vm4890_vm2 = vweird.f32 %v10078_v5  ;;  %v10172_v20 = vadd.f32 1.0, %v7408_v27  ;;  %v5365_v10 = vmul.f32 %v10150_v34, %v10102_v18 }
 0x182   :  { %v10155_v8 = vpop.eup %7411  ;;  %v1646_v25 = vor.u32 1.1754944e-38, %v1645_v44  ;;  %vm1644_vm4 = vcmp.eq.f32.partialorder %v1643_v42, 8.507059e+37  ;;  %v3861_v33 = vadd.f32 %v9913_v2, %v3701_v45  ;;  %v10189_v1 = vadd.f32 %v10078_v5, %v4887_v46  ;;  %vm10207_vm6 = vmor %vm4889_vm13, %vm4890_vm2 }
 0x183   :  { %v10161_v48 = vpop.eup %7413  ;;  %v5845_v40 = vmul.f32 %v10155_v8, %v10120_v14  ;;  %v1638_v50 = vadd.f32 %v9915_v35, %v1637_v21  ;;  %v10192_v22 = vadd.f32 %v10100_v15, %v4407_v17  ;;  %vm4410_vm5 = vweird.f32 %v10100_v15 }
 0x184   :  { %v10169_v11 = vpop.eup %7415  ;;  %v3829_v41 = vadd.f32 %v9913_v2, %v3637_v28  ;;  %7419 = vrcp.f32 %v10166_v53  ;;  %v3765_v56 = vadd.f32 %v9913_v2, %v3509_v60  ;;  %v2115_v4 = vmul.f32 %v9939_v54, %v9873_v6  ;;  %vm10216_vm7 = vmor %vm4409_vm14, %vm4410_vm5 }
 0x185   :  { %v7418_v27 = vpop.eup %7417  ;;  %v1642_v26 = vsel %vm10180_vm3, %v9915_v35, %v1638_v50  ;;  %v10211_v0 = vor.u32 1.1754944e-38, %v4415_v32  ;;  %7421 = vrcp.f32 %v10172_v20  ;;  %v5366_v9 = vsub.f32 1.0, %v5365_v10 }
 0x186   :  { %v1647_v46 = vsel %vm1644_vm4, %v1646_v25, %v1642_v26  ;;  %v10220_v17 = vadd.f32 1.0, %v7418_v27  ;;  %v5846_v42 = vsub.f32 1.0, %v5845_v40  ;;  %v7117_v45 = vmul.f32 -1.442695, %v3861_v33 }
 0x187   :  { %v3390_v44 = vmul.f32 %v9906_v63, %v1647_v46  ;;  %v4412_v21 = vsel %vm10216_vm7, %v10100_v15, %v10192_v22  ;;  %vm5369_vm8 = vweird.f32 %v10102_v18  ;;  %v7085_v28 = vmul.f32 -1.442695, %v3829_v41 }
 0x188   :  { %v7021_v10 = vmul.f32 -1.442695, %v3765_v56  ;;  %v2116_v7 = vsub.f32 1.0, %v2115_v4  ;;  %vm2119_vm9 = vweird.f32 %v9873_v6  ;;  %vm2120_vm10 = vweird.f32 %v9939_v54 }
 0x189   :  { %3530 = vadd.xlane.f32.xlu0 %v3390_v44  ;;  %v5367_v25 = vmul.f32 %v10150_v34, %v5366_v9  ;;  %v5375_v60 = vand.u32 2147483648, %v10102_v18  ;;  %v2123_v40 = vand.u32 2147483647, %v9873_v6  ;;  %v2125_v50 = vand.u32 2147483648, %v9873_v6  ;;  %vm10252_vm12 = vmor %vm2119_vm9, %vm2120_vm10  ;;  %v83_v9 = vld [vmem:[%s16116_s0 + $0x1e8] sm:$0xff] }
 0x18a   :  { %v10238_v33 = vpop.eup %7419  ;;  %vm10242_vm11 = vcmp.eq.f32.partialorder %v4413_v59, 8.507059e+37  ;;  %v5847_v41 = vmul.f32 %v10155_v8, %v5846_v42  ;;  %7423 = vpow2.f32 %v7117_v45  ;;  %v2117_v26 = vmul.f32 %v9939_v54, %v2116_v7  ;;  %6825 = vmatmul.msk.f32.gmra.mxu1 %vm156_vm0, %v83_v9  ;;  %v115_v44 = vld [vmem:[%s16116_s0 + $0x2e8] sm:$0xff] }
 0x18b   :  { %v2595_v56 = vmul.f32 %v9997_v30, %v9879_v38  ;;  %v10250_v4 = vpop.eup %7421  ;;  %7425 = vpow2.f32 %v7085_v28  ;;  %vm10256_vm13 = vcmp.eq.f32.partialorder %v2123_v40, 8.507059e+37  ;;  %v2126_v59 = vor.u32 1.1754944e-38, %v2125_v50  ;;  %6857 = vmatmul.msk.f32.gmra.mxu2 %vm156_vm0, %v115_v44 }
 0x18c   :  { %vm2599_vm14 = vweird.f32 %v9879_v38  ;;  %7427 = vpow2.f32 %v7021_v10  ;;  %v2118_v46 = vadd.f32 %v9939_v54, %v2117_v26  ;;  %vm2600_vm15 = vweird.f32 %v9997_v30  ;;  %v147_v10 = vld [vmem:[%s16116_s0 + $0x3e8] sm:$0xff] }
 0x18d   :  { %v2596_v42 = vsub.f32 1.0, %v2595_v56  ;;  %v5368_v45 = vadd.f32 %v10150_v34, %v5367_v25  ;;  %vm5370_vm1 = vweird.f32 %v10150_v34  ;;  %vm5850_vm2 = vweird.f32 %v10155_v8  ;;  %6889 = vmatmul.msk.f32.gmra.mxu3 %vm156_vm0, %v147_v10  ;;  %vm10294_vm4 = vmor %vm2599_vm14, %vm2600_vm15 }
 0x18e   :  { %v2605_v28 = vand.u32 2147483648, %v9879_v38  ;;  %v5848_v7 = vadd.f32 %v10155_v8, %v5847_v41  ;;  %v2122_v40 = vsel %vm10252_vm12, %v9939_v54, %v2118_v46  ;;  %v2603_v50 = vand.u32 2147483647, %v9879_v38  ;;  %vm10302_vm5 = vmor %vm5369_vm8, %vm5370_vm1 }
 0x18f   :  { %v2597_v25 = vmul.f32 %v9997_v30, %v2596_v42  ;;  %v5373_v26 = vand.u32 2147483647, %v10102_v18  ;;  %vm5849_vm3 = vweird.f32 %v10120_v14  ;;  %v5855_v56 = vand.u32 2147483648, %v10120_v14 }
 0x190   :  { %v2127_v9 = vsel %vm10256_vm13, %v2126_v59, %v2122_v40  ;;  %v7424_v41 = vpop.eup %7423  ;;  %v5853_v24 = vand.u32 2147483647, %v10120_v14  ;;  %v2130_v38 = vmul.f32 %v10004_v12, %v9917_v13  ;;  %v5372_v44 = vsel %vm10302_vm5, %v10150_v34, %v5368_v45  ;;  %vm10316_vm8 = vmor %vm5849_vm3, %vm5850_vm2 }
 0x191   :  { %v3422_v59 = vmul.f32 %v9906_v63, %v2127_v9  ;;  %v2598_v46 = vadd.f32 %v9997_v30, %v2597_v25  ;;  %v7426_v42 = vpop.eup %7425  ;;  %v5376_v10 = vor.u32 1.1754944e-38, %v5375_v60  ;;  %v10320_v14 = vadd.f32 1.0, %v7424_v41 }
 0x192   :  { %v2606_v40 = vor.u32 1.1754944e-38, %v2605_v28  ;;  %v7428_v9 = vpop.eup %7427  ;;  %v5852_v25 = vsel %vm10316_vm8, %v10155_v8, %v5848_v7  ;;  %v10325_v32 = vadd.f32 1.0, %v7426_v42  ;;  %vm2604_vm9 = vcmp.eq.f32.partialorder %v2603_v50, 8.507059e+37 }
 0x193   :  { %3594 = vadd.xlane.f32.xlu2 %v3422_v59  ;;  %v2602_v34 = vsel %vm10294_vm4, %v9997_v30, %v2598_v46  ;;  %v10338_v60 = vsel %vm10242_vm11, %v10211_v0, %v4412_v21  ;;  %vm5374_vm10 = vcmp.eq.f32.partialorder %v5373_v26, 8.507059e+37  ;;  %v5856_v8 = vor.u32 1.1754944e-38, %v5855_v56  ;;  %6858 = vmatmul.msk.f32.gmra.mxu2 %vm156_vm0, %v116_v39 }
 0x194   :  { %7429 = vrcp.f32 %v10320_v14  ;;  %v10341_v45 = vsel %vm5374_vm10, %v5376_v10, %v5372_v44  ;;  %vm5854_vm12 = vcmp.eq.f32.partialorder %v5853_v24, 8.507059e+37  ;;  %v2131_v30 = vsub.f32 1.0, %v2130_v38 }
 0x195   :  { %7431 = vrcp.f32 %v10325_v32  ;;  %v10344_v28 = vsel %vm5854_vm12, %v5856_v8, %v5852_v25  ;;  %v10346_v35 = vadd.f32 1.0, %v7428_v9  ;;  %v2607_v15 = vsel %vm2604_vm9, %v2606_v40, %v2602_v34  ;;  %v3703_v40 = vpop.xlane.xlu2 %3702  ;;  %v3511_v9 = vpop.xlane.xlu1 %3510 }
 0x196   :  { %vm2134_vm7 = vweird.f32 %v9917_v13  ;;  %v5868_v22 = vand.u32 2147483647, %v10320_v14  ;;  %v5870_v0 = vand.u32 2147483648, %v10320_v14  ;;  %v3454_v21 = vmul.f32 %v9906_v63, %v2607_v15 }
 0x197   :  { %vm2135_vm11 = vweird.f32 %v10004_v12  ;;  %v10354_v27 = vadd.s32 4294967288, %v10128_v47  ;;  %v5388_v7 = vand.u32 2147483647, %v10325_v32  ;;  %v5390_v50 = vand.u32 2147483648, %v10325_v32 }
 0x198   :  { %7433 = vrcp.f32 %v10346_v35  ;;  %v4430_v26 = vand.u32 2147483648, %v10346_v35  ;;  %3658 = vadd.xlane.f32.xlu1 %v3454_v21  ;;  %v2132_v56 = vmul.f32 %v10004_v12, %v2131_v30  ;;  %v2138_v54 = vand.u32 2147483647, %v9917_v13  ;;  %vm10373_vm15 = vmor %vm2134_vm7, %vm2135_vm11 }
 0x199   :  { %v2140_v41 = vand.u32 2147483648, %v9917_v13  ;;  %vm5864_vm13 = vweird.f32 %v10320_v14  ;;  %vm5384_vm14 = vweird.f32 %v10325_v32  ;;  %vm10378_vm1 = vcmp.eq.f32.partialorder %v5868_v22, 8.507059e+37 }
 0x19a   :  { %v7430_v6 = vpop.eup %7429  ;;  %v5871_v10 = vor.u32 1.1754944e-38, %v5870_v0  ;;  %v2133_v18 = vadd.f32 %v10004_v12, %v2132_v56  ;;  %vm6457_vm2 = vcmask 130112   ;;  %vm10384_vm3 = vcmp.eq.f32.partialorder %v5388_v7, 8.507059e+37 }
 0x19b   :  { %v7432_v38 = vpop.eup %7431  ;;  %v5860_v42 = vmul.f32 %v7430_v6, %v10320_v14  ;;  %v5391_v34 = vor.u32 1.1754944e-38, %v5390_v50  ;;  %v4428_v8 = vand.u32 2147483647, %v10346_v35  ;;  %vm2139_vm4 = vcmp.eq.f32.partialorder %v2138_v54, 8.507059e+37  ;;  %v3573_v50 = vpop.xlane.xlu0 %3572 }
 0x19c   :  { %v5380_v25 = vmul.f32 %v7432_v38, %v10325_v32  ;;  %vm4424_vm5 = vweird.f32 %v10346_v35  ;;  %v4431_v15 = vor.u32 1.1754944e-38, %v4430_v26  ;;  %v2137_v22 = vsel %vm10373_vm15, %v10004_v12, %v2133_v18 }
 0x19d   :  { %v5861_v30 = vsub.f32 1.0, %v5860_v42  ;;  %v2141_v0 = vor.u32 1.1754944e-38, %v2140_v41  ;;  %vm5865_vm8 = vweird.f32 %v7430_v6  ;;  %v3862_v7 = vadd.f32 %v9913_v2, %v3703_v40 }
 0x19e   :  { %v7434_v21 = vpop.eup %7433  ;;  %v5381_v56 = vsub.f32 1.0, %v5380_v25  ;;  %v3766_v24 = vadd.f32 %v9913_v2, %v3511_v9  ;;  %vm5385_vm9 = vweird.f32 %v7432_v38  ;;  %v3797_v25 = vadd.f32 %v9913_v2, %v3573_v50  ;;  %vm5866_vm7 = vmor %vm5864_vm13, %vm5865_vm8  ;;  %v702_v50 = vpop.f32.mrf.mxu1 }
 0x19f   :  { %v5862_v59 = vmul.f32 %v7430_v6, %v5861_v30  ;;  %v4420_v54 = vmul.f32 %v7434_v21, %v10346_v35  ;;  %v2142_v42 = vsel %vm2139_vm4, %v2141_v0, %v2137_v22  ;;  %vm4425_vm10 = vweird.f32 %v7434_v21  ;;  %vm5386_vm15 = vmor %vm5384_vm14, %vm5385_vm9 }
 0x1a0   :  { %v5382_v52 = vmul.f32 %v7432_v38, %v5381_v56  ;;  %v3423_v26 = vmul.f32 %v9906_v63, %v2142_v42  ;;  %v7118_v46 = vmul.f32 -1.442695, %v3862_v7  ;;  %v7022_v18 = vmul.f32 -1.442695, %v3766_v24  ;;  %vm4426_vm14 = vmor %vm4424_vm5, %vm4425_vm10 }
 0x1a1   :  { %v5863_v12 = vadd.f32 %v7430_v6, %v5862_v59  ;;  %v4421_v41 = vsub.f32 1.0, %v4420_v54  ;;  %v16329_v40 = vand.u32 2147483647, %v10028_v31  ;;  %v3075_v59 = vmul.f32 %v10038_v57, %v9979_v62 }
 0x1a2   :  { %v5383_v30 = vadd.f32 %v7432_v38, %v5382_v52  ;;  %3596 = vadd.xlane.f32.xlu0 %v3423_v26  ;;  %7435 = vpow2.f32 %v7118_v46  ;;  %vm3079_vm11 = vweird.f32 %v9979_v62  ;;  %v7053_v22 = vmul.f32 -1.442695, %v3797_v25 }
 0x1a3   :  { %vm10400_vm12 = vcmp.eq.f32.partialorder %v16329_v40, 8.507059e+37  ;;  %v5867_v24 = vsel %vm5866_vm7, %v7430_v6, %v5863_v12  ;;  %v4422_v31 = vmul.f32 %v7434_v21, %v4421_v41  ;;  %7437 = vpow2.f32 %v7022_v18  ;;  %v10452_v41 = vld [vmem:[%s16118_s2] ss:$0 sm:$0xff] }
 0x1a4   :  { %v5872_v14 = vsel %vm10378_vm1, %v5871_v10, %v5867_v24  ;;  %v5387_v0 = vsel %vm5386_vm15, %v7432_v38, %v5383_v30  ;;  %v3076_v52 = vsub.f32 1.0, %v3075_v59  ;;  %vm3080_vm13 = vweird.f32 %v10038_v57 }
 0x1a5   :  { %v6671_v56 = vperm.slane %v5872_v14, %v10354_v27  ;;  %v5392_v7 = vsel %vm10384_vm3, %v5391_v34, %v5387_v0  ;;  %v4423_v6 = vadd.f32 %v7434_v21, %v4422_v31  ;;  %7439 = vpow2.f32 %v7053_v22  ;;  %vm10434_vm3 = vmor %vm3079_vm11, %vm3080_vm13  ;;  %v606_v14 = vpop.f32.mrf.mxu0  ;;  %v798_v0 = vpop.f32.mrf.mxu2 }
 0x1a6   :  { %v6609_v32 = vperm.slane %v5392_v7, %v10354_v27  ;;  %v3077_v44 = vmul.f32 %v10038_v57, %v3076_v52  ;;  %v3083_v38 = vand.u32 2147483647, %v9979_v62  ;;  %v3085_v10 = vand.u32 2147483648, %v9979_v62 }
 0x1a7   :  { %v16332_v54 = vperm.slane %v10344_v28, %v10128_v47  ;;  %v4427_v34 = vsel %vm4426_vm14, %v7434_v21, %v4423_v6  ;;  %vm4429_vm1 = vcmp.eq.f32.partialorder %v4428_v8, 8.507059e+37  ;;  %v1650_v35 = vmul.f32 %v10044_v19, %v9999_v37 }
 0x1a8   :  { %v7436_v26 = vpop.eup %7435  ;;  %v6454_v46 = vperm.slane %v10338_v60, %v10128_v47  ;;  %v16335_v28 = vperm.slane %v10341_v45, %v10128_v47  ;;  %v4432_v8 = vsel %vm4429_vm1, %v4431_v15, %v4427_v34  ;;  %v3078_v62 = vadd.f32 %v10038_v57, %v3077_v44 }
 0x1a9   :  { %v10430_v13 = vsel %vm6457_vm2, %v6671_v56, %v16332_v54  ;;  %v7438_v21 = vpop.eup %7437  ;;  %v703_v18 = vadd.f32 %v10452_v41, %v702_v50  ;;  %v6456_v25 = vperm.slane %v4432_v8, %v10354_v27  ;;  %v10456_v60 = vadd.f32 1.0, %v7436_v26 }
 0x1aa   :  { %v10446_v12 = vsel %vm6457_vm2, %v6609_v32, %v16335_v28  ;;  %v3086_v40 = vor.u32 1.1754944e-38, %v3085_v10  ;;  %v10458_v45 = vadd.f32 1.0, %v7438_v21  ;;  %v3082_v15 = vsel %vm10434_vm3, %v10038_v57, %v3078_v62  ;;  %v51_v57 = vld [vmem:[%s16116_s0 + $0xe8] sm:$0xff] }
 0x1ab   :  { %vm3084_vm4 = vcmp.eq.f32.partialorder %v3083_v38, 8.507059e+37  ;;  %v1651_v30 = vsub.f32 1.0, %v1650_v35  ;;  %v7440_v59 = vpop.eup %7439  ;;  %v16336_v24 = vsel %vm10207_vm6, %v10078_v5, %v10189_v1  ;;  %v10474_v22 = vsel %vm6457_vm2, %v6456_v25, %v6454_v46  ;;  %6793 = vmatmul.msk.f32.gmra.mxu0 %vm156_vm0, %v51_v57 }
 0x1ac   :  { %v10471_v31 = vsel %vm10400_vm12, %v10163_v55, %v16336_v24  ;;  %7441 = vrcp.f32 %v10456_v60  ;;  %vm1654_vm5 = vweird.f32 %v9999_v37  ;;  %vm1655_vm6 = vweird.f32 %v10044_v19 }
 0x1ad   :  { %7443 = vrcp.f32 %v10458_v45  ;;  %v6940_v5 = vmul.f32 -1.442695, %v703_v18  ;;  %v10485_v55 = vadd.f32 1.0, %v7440_v59  ;;  %v3087_v1 = vsel %vm3084_vm4, %v3086_v40, %v3082_v15  ;;  %vm10506_vm8 = vmor %vm1654_vm5, %vm1655_vm6 }
 0x1ae   :  { %7445 = vrcp.f32 %v10220_v17  ;;  %v6546_v9 = vperm.slane %v10471_v31, %v10128_v47  ;;  %v3486_v52 = vmul.f32 %v9906_v63, %v3087_v1  ;;  %v1652_v56 = vmul.f32 %v10044_v19, %v1651_v30 }
 0x1af   :  { %v1658_v7 = vand.u32 2147483647, %v9999_v37  ;;  %v10497_v6 = vadd.f32 %v10452_v41, %v606_v14  ;;  %v5883_v50 = vand.u32 2147483647, %v10456_v60  ;;  %v5885_v32 = vand.u32 2147483648, %v10456_v60 }
 0x1b0   :  { %7447 = vrcp.f32 %v10485_v55  ;;  %v4443_v38 = vand.u32 2147483647, %v10458_v45  ;;  %v4445_v10 = vand.u32 2147483648, %v10458_v45  ;;  %3722 = vadd.xlane.f32.xlu2 %v3486_v52  ;;  %v1653_v54 = vadd.f32 %v10044_v19, %v1652_v56  ;;  %v3577_v56 = vpop.xlane.xlu2 %3576 }
 0x1b1   :  { %v1660_v34 = vand.u32 2147483648, %v9999_v37  ;;  %7449 = vpow2.f32 %v6940_v5  ;;  %v10515_v35 = vadd.f32 %v10452_v41, %v798_v0  ;;  %v10518_v26 = vadd.s32 4294967280, %v10128_v47 }
 0x1b2   :  { %v7442_v42 = vpop.eup %7441  ;;  %vm5879_vm9 = vweird.f32 %v10456_v60  ;;  %vm4439_vm10 = vweird.f32 %v10458_v45  ;;  %v1657_v8 = vsel %vm10506_vm8, %v10044_v19, %v1653_v54  ;;  %vm1659_vm12 = vcmp.eq.f32.partialorder %v1658_v7, 8.507059e+37  ;;  %v10544_v7 = vpop.f32.mrf.mxu3 }
 0x1b3   :  { %16339 = vst [vmem:[#allocation6_spill] sm:$0xff] %v10518_v26  ;;  %v7444_v46 = vpop.eup %7443  ;;  %v5875_v28 = vmul.f32 %v7442_v42, %v10456_v60  ;;  %vm16179_vm7 = vcmask 195712   ;;  %vm10528_vm11 = vcmp.eq.f32.partialorder %v5883_v50, 8.507059e+37  ;;  %v5886_v21 = vor.u32 1.1754944e-38, %v5885_v32  ;;  %v705_v54 = vpop.f32.mrf.mxu1 }
 0x1b4   :  { %v10526_v37 = vpop.eup %7445  ;;  %v4435_v18 = vmul.f32 %v7444_v46, %v10458_v45  ;;  %v1661_v25 = vor.u32 1.1754944e-38, %v1660_v34  ;;  %vm10533_vm15 = vcmp.eq.f32.partialorder %v4443_v38, 8.507059e+37  ;;  %v4446_v30 = vor.u32 1.1754944e-38, %v4445_v10 }
 0x1b5   :  { %v5876_v40 = vsub.f32 1.0, %v5875_v28  ;;  %v2625_v19 = vmul.f32 %v10060_v49, %v10009_v36  ;;  %vm5880_vm13 = vweird.f32 %v7442_v42  ;;  %vm4904_vm14 = vweird.f32 %v10485_v55 }
 0x1b6   :  { %v7448_v59 = vpop.eup %7447  ;;  %v4436_v24 = vsub.f32 1.0, %v4435_v18  ;;  %v1662_v57 = vsel %vm1659_vm12, %v1661_v25, %v1657_v8  ;;  %vm4440_vm1 = vweird.f32 %v7444_v46  ;;  %vm2629_vm3 = vweird.f32 %v10009_v36  ;;  %vm10549_vm5 = vmor %vm5879_vm9, %vm5880_vm13 }
 0x1b7   :  { %v5877_v14 = vmul.f32 %v7442_v42, %v5876_v40  ;;  %v4900_v5 = vmul.f32 %v7448_v59, %v10485_v55  ;;  %v3391_v1 = vmul.f32 %v9906_v63, %v1662_v57  ;;  %v7450_v39 = vpop.eup %7449  ;;  %v2626_v52 = vsub.f32 1.0, %v2625_v19  ;;  %vm10558_vm6 = vmor %vm4439_vm10, %vm4440_vm1  ;;  %v3575_v40 = vpop.xlane.xlu1 %3574 }
 0x1b8   :  { %v4437_v0 = vmul.f32 %v7444_v46, %v4436_v24  ;;  %vm2630_vm4 = vweird.f32 %v10060_v49  ;;  %v4908_v63 = vand.u32 2147483647, %v10485_v55  ;;  %v2633_v38 = vand.u32 2147483647, %v10009_v36 }
 0x1b9   :  { %v5878_v50 = vadd.f32 %v7442_v42, %v5877_v14  ;;  %v4901_v44 = vsub.f32 1.0, %v4900_v5  ;;  %3532 = vadd.xlane.f32.xlu1 %v3391_v1  ;;  %v4910_v60 = vand.u32 2147483648, %v10485_v55  ;;  %v2627_v34 = vmul.f32 %v10060_v49, %v2626_v52  ;;  %vm10571_vm9 = vmor %vm2629_vm3, %vm2630_vm4  ;;  %v3639_v52 = vpop.xlane.xlu0 %3638 }
 0x1ba   :  { %v4438_v10 = vadd.f32 %v7444_v46, %v4437_v0  ;;  %v2635_v28 = vand.u32 2147483648, %v10009_v36  ;;  %vm4905_vm8 = vweird.f32 %v7448_v59  ;;  %v3799_v25 = vadd.f32 %v9913_v2, %v3577_v56 }
 0x1bb   :  { %v5882_v8 = vsel %vm10549_vm5, %v7442_v42, %v5878_v50  ;;  %v4902_v18 = vmul.f32 %v7448_v59, %v4901_v44  ;;  %v2628_v42 = vadd.f32 %v10060_v49, %v2627_v34  ;;  %vm2634_vm10 = vcmp.eq.f32.partialorder %v2633_v38, 8.507059e+37  ;;  %vm4906_vm12 = vmor %vm4904_vm14, %vm4905_vm8 }
 0x1bc   :  { %v5887_v19 = vsel %vm10528_vm11, %v5886_v21, %v5882_v8  ;;  %v4442_v24 = vsel %vm10558_vm6, %v7444_v46, %v4438_v10  ;;  %v2636_v57 = vor.u32 1.1754944e-38, %v2635_v28  ;;  %v4911_v62 = vor.u32 1.1754944e-38, %v4910_v60 }
 0x1bd   :  { %v6673_v14 = vperm.slane %v5887_v19, %v10518_v26  ;;  %v4447_v36 = vsel %vm10533_vm15, %v4446_v30, %v4442_v24  ;;  %v4903_v5 = vadd.f32 %v7448_v59, %v4902_v18  ;;  %v2632_v46 = vsel %vm10571_vm9, %v10060_v49, %v2628_v42 }
 0x1be   :  { %v6460_v1 = vperm.slane %v4447_v36, %v10518_v26  ;;  %v3798_v21 = vadd.f32 %v9913_v2, %v3575_v40  ;;  %vm4909_vm11 = vcmp.eq.f32.partialorder %v4908_v63, 8.507059e+37  ;;  %v7055_v30 = vmul.f32 -1.442695, %v3799_v25  ;;  %v52_v36 = vld [vmem:[%s16116_s0 + $0xf0] sm:$0xff] }
 0x1bf   :  { %v10593_v0 = vsel %vm16179_vm7, %v6673_v14, %v10430_v13  ;;  %v4907_v15 = vsel %vm4906_vm12, %v7448_v59, %v4903_v5  ;;  %v6908_v56 = vmul.f32 -1.442695, %v10497_v6  ;;  %v2637_v32 = vsel %vm2634_vm10, %v2636_v57, %v2632_v46  ;;  %v10606_v13 = vld [vmem:[%s16119_s3] ss:$0 sm:$0xff]  ;;  %6794 = vmatmul.msk.f32.gmra.mxu0 %vm156_vm0, %v52_v36 }
 0x1c0   :  { %v10598_v55 = vsel %vm16179_vm7, %v6460_v1, %v10474_v22  ;;  %v4912_v50 = vsel %vm4909_vm11, %v4911_v62, %v4907_v15  ;;  %v10600_v44 = vadd.f32 1.0, %v7450_v39  ;;  %v3456_v59 = vmul.f32 %v10606_v13, %v2637_v32  ;;  %v894_v39 = vpop.f32.mrf.mxu3  ;;  %v84_v15 = vld [vmem:[%s16116_s0 + $0x1f0] sm:$0xff] }
 0x1c1   :  { %v6547_v49 = vperm.slane %v4912_v50, %v10354_v27  ;;  %v7054_v63 = vmul.f32 -1.442695, %v3798_v21  ;;  %v6972_v6 = vmul.f32 -1.442695, %v10515_v35  ;;  %v3830_v38 = vadd.f32 %v9913_v2, %v3639_v52  ;;  %6826 = vmatmul.msk.f32.gmra.mxu1 %vm156_vm0, %v84_v15 }
 0x1c2   :  { %v2610_v22 = vmul.f32 %v10032_v16, %v9951_v61  ;;  %vm2614_vm15 = vweird.f32 %v9951_v61  ;;  %3662 = vadd.xlane.f32.xlu0 %v3456_v59  ;;  %7451 = vpow2.f32 %v7055_v30  ;;  %vm2615_vm13 = vweird.f32 %v10032_v16 }
 0x1c3   :  { %v10618_v10 = vsel %vm6457_vm2, %v6547_v49, %v6546_v9  ;;  %v2618_v35 = vand.u32 2147483647, %v9951_v61  ;;  %7453 = vpow2.f32 %v7054_v63  ;;  %v7086_v60 = vmul.f32 -1.442695, %v3830_v38  ;;  %vm10631_vm14 = vmor %vm2614_vm15, %vm2615_vm13  ;;  %v148_v63 = vld [vmem:[%s16116_s0 + $0x3f0] sm:$0xff] }
 0x1c4   :  { %v2611_v34 = vsub.f32 1.0, %v2610_v22  ;;  %v2620_v28 = vand.u32 2147483648, %v9951_v61  ;;  %7455 = vpow2.f32 %v6908_v56  ;;  %v3090_v8 = vmul.f32 %v10108_v43, %v10046_v51  ;;  %6890 = vmatmul.msk.f32.gmra.mxu3 %vm156_vm0, %v148_v63 }
 0x1c5   :  { %v895_v31 = vadd.f32 %v10452_v41, %v894_v39  ;;  %7457 = vpow2.f32 %v7086_v60  ;;  %v706_v18 = vadd.f32 %v10452_v41, %v705_v54  ;;  %vm10636_vm1 = vcmp.eq.f32.partialorder %v2618_v35, 8.507059e+37 }
 0x1c6   :  { %v2612_v9 = vmul.f32 %v10032_v16, %v2611_v34  ;;  %7459 = vrcp.f32 %v10600_v44  ;;  %v2621_v25 = vor.u32 1.1754944e-38, %v2620_v28  ;;  %v3091_v40 = vsub.f32 1.0, %v3090_v8 }
 0x1c7   :  { %7461 = vpow2.f32 %v6972_v6  ;;  %vm3094_vm3 = vweird.f32 %v10046_v51  ;;  %vm3095_vm4 = vweird.f32 %v10108_v43  ;;  %v3100_v61 = vand.u32 2147483648, %v10046_v51 }
 0x1c8   :  { %v2613_v19 = vadd.f32 %v10032_v16, %v2612_v9  ;;  %v7452_v42 = vpop.eup %7451  ;;  %v3092_v57 = vmul.f32 %v10108_v43, %v3091_v40  ;;  %v3105_v14 = vmul.f32 %v10169_v11, %v10110_v29  ;;  %v7004_v1 = vmul.f32 -1.442695, %v895_v31  ;;  %vm10673_vm5 = vmor %vm3094_vm3, %vm3095_vm4 }
 0x1c9   :  { %v7454_v5 = vpop.eup %7453  ;;  %v10649_v62 = vadd.f32 1.0, %v7452_v42  ;;  %v3098_v21 = vand.u32 2147483647, %v10046_v51  ;;  %v6941_v52 = vmul.f32 -1.442695, %v706_v18  ;;  %v3101_v38 = vor.u32 1.1754944e-38, %v3100_v61 }
 0x1ca   :  { %v2617_v46 = vsel %vm10631_vm14, %v10032_v16, %v2613_v19  ;;  %v7456_v30 = vpop.eup %7455  ;;  %v10659_v56 = vadd.f32 1.0, %v7454_v5  ;;  %v3093_v32 = vadd.f32 %v10108_v43, %v3092_v57  ;;  %v117_v16 = vld [vmem:[%s16116_s0 + $0x2f8] sm:$0xff]  ;;  %v3106_v22 = vsub.f32 1.0, %v3105_v14  ;;  %v3705_v19 = vpop.xlane.xlu2 %3704 }
 0x1cb   :  { %v2622_v50 = vsel %vm10636_vm1, %v2621_v25, %v2617_v46  ;;  %v7458_v49 = vpop.eup %7457  ;;  %7463 = vrcp.f32 %v10649_v62  ;;  %6859 = vmatmul.msk.f32.gmra.mxu2 %vm156_vm0, %v117_v16  ;;  %vm3099_vm6 = vcmp.eq.f32.partialorder %v3098_v21, 8.507059e+37  ;;  %v4938_v54 = vand.u32 2147483647, %v10649_v62  ;;  %v3513_v14 = vpop.xlane.xlu1 %3512 }
 0x1cc   :  { %v10681_v6 = vpop.eup %7459  ;;  %7465 = vrcp.f32 %v10659_v56  ;;  %v10685_v51 = vadd.f32 1.0, %v7458_v49  ;;  %v3455_v35 = vmul.f32 %v10606_v13, %v2622_v50  ;;  %v3097_v60 = vsel %vm10673_vm5, %v10108_v43, %v3093_v32 }
 0x1cd   :  { %v7462_v39 = vpop.eup %7461  ;;  %7467 = vpow2.f32 %v7004_v1  ;;  %v10692_v34 = vadd.f32 1.0, %v7456_v30  ;;  %v4940_v28 = vand.u32 2147483648, %v10649_v62  ;;  %v4923_v8 = vand.u32 2147483647, %v10659_v56 }
 0x1ce   :  { %7469 = vpow2.f32 %v6941_v52  ;;  %3660 = vadd.xlane.f32.xlu2 %v3455_v35  ;;  %v10697_v31 = vadd.f32 1.0, %v7462_v39  ;;  %v4925_v9 = vand.u32 2147483648, %v10659_v56  ;;  %v3102_v18 = vsel %vm3099_vm6, %v3101_v38, %v3097_v60 }
 0x1cf   :  { %7471 = vrcp.f32 %v10685_v51  ;;  %v3107_v45 = vmul.f32 %v10169_v11, %v3106_v22  ;;  %v10702_v40 = vadd.s32 4294967272, %v10128_v47  ;;  %vm4934_vm8 = vweird.f32 %v10649_v62 }
 0x1d0   :  { %vm4919_vm9 = vweird.f32 %v10659_v56  ;;  %v3487_v43 = vmul.f32 %v10606_v13, %v3102_v18  ;;  %vm10708_vm10 = vcmp.eq.f32.partialorder %v4938_v54, 8.507059e+37  ;;  %vm3109_vm12 = vweird.f32 %v10110_v29 }
 0x1d1   :  { %v7464_v25 = vpop.eup %7463  ;;  %16356 = vst [vmem:[#allocation7_spill] sm:$0xff] %v10702_v40  ;;  %v3108_v61 = vadd.f32 %v10169_v11, %v3107_v45  ;;  %vm3110_vm11 = vweird.f32 %v10169_v11  ;;  %v4941_v5 = vor.u32 1.1754944e-38, %v4940_v28  ;;  %vm10718_vm15 = vcmp.eq.f32.partialorder %v4923_v8, 8.507059e+37 }
 0x1d2   :  { %v7466_v24 = vpop.eup %7465  ;;  %v4930_v42 = vmul.f32 %v7464_v25, %v10649_v62  ;;  %3724 = vadd.xlane.f32.xlu1 %v3487_v43  ;;  %v3113_v21 = vand.u32 2147483647, %v10110_v29  ;;  %v4926_v52 = vor.u32 1.1754944e-38, %v4925_v9  ;;  %v3115_v50 = vand.u32 2147483648, %v10110_v29  ;;  %vm10732_vm1 = vmor %vm3109_vm12, %vm3110_vm11  ;;  %v149_v62 = vld [vmem:[%s16116_s0 + $0x3f8] sm:$0xff] }
 0x1d3   :  { %v10715_v36 = vpop.eup %7467  ;;  %v4915_v1 = vmul.f32 %v7466_v24, %v10659_v56  ;;  %v3863_v32 = vadd.f32 %v9913_v2, %v3705_v19  ;;  %vm4935_vm13 = vweird.f32 %v7464_v25  ;;  %vm5399_vm14 = vweird.f32 %v10685_v51  ;;  %6891 = vmatmul.msk.f32.gmra.mxu3 %vm156_vm0, %v149_v62 }
 0x1d4   :  { %v10723_v15 = vpop.eup %7469  ;;  %v4931_v30 = vsub.f32 1.0, %v4930_v42  ;;  %v3767_v63 = vadd.f32 %v9913_v2, %v3513_v14  ;;  %v3112_v39 = vsel %vm10732_vm1, %v10169_v11, %v3108_v61  ;;  %vm3114_vm3 = vcmp.eq.f32.partialorder %v3113_v21, 8.507059e+37  ;;  %vm4936_vm5 = vmor %vm4934_vm8, %vm4935_vm13  ;;  %v3579_v11 = vpop.xlane.xlu0 %3578 }
 0x1d5   :  { %v7472_v16 = vpop.eup %7471  ;;  %v4916_v49 = vsub.f32 1.0, %v4915_v1  ;;  %vm4920_vm4 = vweird.f32 %v7466_v24  ;;  %v5403_v54 = vand.u32 2147483647, %v10685_v51  ;;  %v3116_v60 = vor.u32 1.1754944e-38, %v3115_v50 }
 0x1d6   :  { %v4932_v38 = vmul.f32 %v7464_v25, %v4931_v30  ;;  %v5395_v22 = vmul.f32 %v7472_v16, %v10685_v51  ;;  %v7119_v8 = vmul.f32 -1.442695, %v3863_v32  ;;  %v7023_v9 = vmul.f32 -1.442695, %v3767_v63  ;;  %vm4921_vm12 = vmor %vm4919_vm9, %vm4920_vm4 }
 0x1d7   :  { %v4917_v35 = vmul.f32 %v7466_v24, %v4916_v49  ;;  %vm5400_vm6 = vweird.f32 %v7472_v16  ;;  %v5405_v45 = vand.u32 2147483648, %v10685_v51  ;;  %v3117_v43 = vsel %vm3114_vm3, %v3116_v60, %v3112_v39 }
 0x1d8   :  { %v4933_v29 = vadd.f32 %v7464_v25, %v4932_v38  ;;  %v5396_v28 = vsub.f32 1.0, %v5395_v22  ;;  %v3488_v61 = vmul.f32 %v10606_v13, %v3117_v43  ;;  %7473 = vpow2.f32 %v7119_v8  ;;  %vm5401_vm8 = vmor %vm5399_vm14, %vm5400_vm6  ;;  %v609_v8 = vpop.f32.mrf.mxu0  ;;  %v897_v43 = vpop.f32.mrf.mxu3 }
 0x1d9   :  { %v4918_v18 = vadd.f32 %v7466_v24, %v4917_v35  ;;  %vm10751_vm11 = vcmp.eq.f32.partialorder %v5403_v54, 8.507059e+37  ;;  %7475 = vpow2.f32 %v7023_v9  ;;  %v3800_v30 = vadd.f32 %v9913_v2, %v3579_v11  ;;  %v85_v9 = vld [vmem:[%s16116_s0 + $0x1f8] sm:$0xff] }
 0x1da   :  { %v4937_v19 = vsel %vm4936_vm5, %v7464_v25, %v4933_v29  ;;  %v5397_v42 = vmul.f32 %v7472_v16, %v5396_v28  ;;  %3726 = vadd.xlane.f32.xlu0 %v3488_v61  ;;  %vm16122_vm9 = vcmask 261312   ;;  %v1665_v57 = vmul.f32 %v10123_v58, %v10067_v3  ;;  %6827 = vmatmul.msk.f32.gmra.mxu1 %vm156_vm0, %v85_v9 }
 0x1db   :  { %v4942_v14 = vsel %vm10708_vm10, %v4941_v5, %v4937_v19  ;;  %v4922_v1 = vsel %vm4921_vm12, %v7466_v24, %v4918_v18  ;;  %v5406_v24 = vor.u32 1.1754944e-38, %v5405_v45  ;;  %v7056_v32 = vmul.f32 -1.442695, %v3800_v30  ;;  %v801_v18 = vpop.f32.mrf.mxu2  ;;  %v53_v45 = vld [vmem:[%s16116_s0 + $0xf8] sm:$0xff] }
 0x1dc   :  { %v6551_v21 = vperm.slane %v4942_v14, %v10702_v40  ;;  %v4927_v25 = vsel %vm10718_vm15, %v4926_v52, %v4922_v1  ;;  %v5398_v56 = vadd.f32 %v7472_v16, %v5397_v42  ;;  %vm1669_vm10 = vweird.f32 %v10067_v3  ;;  %6795 = vmatmul.msk.f32.gmra.mxu0 %vm156_vm0, %v53_v45 }
 0x1dd   :  { %v6549_v50 = vperm.slane %v4927_v25, %v10518_v26  ;;  %vm1670_vm15 = vweird.f32 %v10123_v58  ;;  %v1666_v49 = vsub.f32 1.0, %v1665_v57  ;;  %v2145_v51 = vmul.f32 %v10161_v48, %v10093_v23 }
 0x1de   :  { %v5402_v5 = vsel %vm5401_vm8, %v7472_v16, %v5398_v56  ;;  %v7474_v59 = vpop.eup %7473  ;;  %7477 = vpow2.f32 %v7056_v32  ;;  %v1675_v38 = vand.u32 2147483648, %v10067_v3  ;;  %v1673_v35 = vand.u32 2147483647, %v10067_v3  ;;  %vm10801_vm13 = vmor %vm1669_vm10, %vm1670_vm15 }
 0x1df   :  { %v6550_v46 = vsel %vm16179_vm7, %v6549_v50, %v10618_v10  ;;  %v5407_v52 = vsel %vm10751_vm11, %v5406_v24, %v5402_v5  ;;  %v7476_v22 = vpop.eup %7475  ;;  %v10778_v39 = vadd.f32 1.0, %v7474_v59  ;;  %v1667_v10 = vmul.f32 %v10123_v58, %v1666_v49  ;;  %v3515_v49 = vpop.xlane.xlu2 %3514 }
 0x1e0   :  { %v6611_v63 = vperm.slane %v5407_v52, %v10518_v26  ;;  %v10775_v16 = vsel %vm16122_vm9, %v6551_v21, %v6550_v46  ;;  %v2146_v54 = vsub.f32 1.0, %v2145_v51  ;;  %7479 = vrcp.f32 %v10692_v34 }
 0x1e1   :  { %v10784_v60 = vadd.f32 1.0, %v10715_v36  ;;  %v10790_v28 = vadd.f32 1.0, %v7476_v22  ;;  %7481 = vrcp.f32 %v10778_v39  ;;  %vm2149_vm14 = vweird.f32 %v10093_v23 }
 0x1e2   :  { %v10788_v29 = vsel %vm16179_vm7, %v6611_v63, %v10446_v12  ;;  %v1676_v12 = vor.u32 1.1754944e-38, %v1675_v38  ;;  %vm2150_vm1 = vweird.f32 %v10161_v48  ;;  %v1668_v3 = vadd.f32 %v10123_v58, %v1667_v10 }
 0x1e3   :  { %7483 = vrcp.f32 %v10790_v28  ;;  %vm10813_vm3 = vcmp.eq.f32.partialorder %v1673_v35, 8.507059e+37  ;;  %v2147_v19 = vmul.f32 %v10161_v48, %v2146_v54  ;;  %v610_v61 = vadd.f32 %v10452_v41, %v609_v8  ;;  %vm10837_vm4 = vmor %vm2149_vm14, %vm2150_vm1 }
 0x1e4   :  { %7485 = vrcp.f32 %v10697_v31  ;;  %v7478_v42 = vpop.eup %7477  ;;  %v2153_v14 = vand.u32 2147483647, %v10093_v23  ;;  %v2155_v1 = vand.u32 2147483648, %v10093_v23  ;;  %v802_v21 = vadd.f32 %v10452_v41, %v801_v18 }
 0x1e5   :  { %7487 = vrcp.f32 %v10784_v60  ;;  %v10827_v25 = vadd.f32 1.0, %v7478_v42  ;;  %v1672_v56 = vsel %vm10801_vm13, %v10123_v58, %v1668_v3  ;;  %v2148_v30 = vadd.f32 %v10161_v48, %v2147_v19 }
 0x1e6   :  { %v10842_v24 = vpop.eup %7479  ;;  %v10845_v57 = vadd.f32 1.0, %v10723_v15  ;;  %v10848_v5 = vadd.f32 %v10452_v41, %v897_v43  ;;  %v1677_v58 = vsel %vm10813_vm3, %v1676_v12, %v1672_v56  ;;  %v2156_v32 = vor.u32 1.1754944e-38, %v2155_v1 }
 0x1e7   :  { %v7482_v46 = vpop.eup %7481  ;;  %v5898_v23 = vand.u32 2147483647, %v10778_v39  ;;  %v5900_v52 = vand.u32 2147483648, %v10778_v39  ;;  %7489 = vrcp.f32 %v10827_v25  ;;  %vm10855_vm0 = vcmp.eq.f32.partialorder %v2153_v14, 8.507059e+37 }
 0x1e8   :  { %v5890_v51 = vmul.f32 %v7482_v46, %v10778_v39  ;;  %v4458_v59 = vand.u32 2147483647, %v10790_v28  ;;  %v3392_v63 = vmul.f32 %v10606_v13, %v1677_v58  ;;  %v2152_v38 = vsel %vm10837_vm4, %v10161_v48, %v2148_v30 }
 0x1e9   :  { %v7484_v15 = vpop.eup %7483  ;;  %v10867_v10 = vmul.f32 -1.442695, %v610_v61  ;;  %v10869_v35 = vmul.f32 -1.442695, %v802_v21  ;;  %v4460_v8 = vand.u32 2147483648, %v10790_v28  ;;  %vm5894_vm5 = vweird.f32 %v10778_v39 }
 0x1ea   :  { %v10865_v22 = vpop.eup %7485  ;;  %v4450_v54 = vmul.f32 %v7484_v15, %v10790_v28  ;;  %v5891_v18 = vsub.f32 1.0, %v5890_v51  ;;  %vm4454_vm6 = vweird.f32 %v10790_v28  ;;  %3534 = vadd.xlane.f32.xlu2 %v3392_v63  ;;  %v2157_v48 = vsel %vm10855_vm0, %v2156_v32, %v2152_v38 }
 0x1eb   :  { %v10873_v9 = vpop.eup %7487  ;;  %vm10879_vm12 = vcmp.eq.f32.partialorder %v5898_v23, 8.507059e+37  ;;  %v5901_v12 = vor.u32 1.1754944e-38, %v5900_v52  ;;  %v3424_v43 = vmul.f32 %v10606_v13, %v2157_v48  ;;  %vm5895_vm11 = vweird.f32 %v7482_v46 }
 0x1ec   :  { %v4451_v45 = vsub.f32 1.0, %v4450_v54  ;;  %v5892_v3 = vmul.f32 %v7482_v46, %v5891_v18  ;;  %vm10884_vm8 = vcmp.eq.f32.partialorder %v4458_v59, 8.507059e+37  ;;  %v1680_v19 = vmul.f32 %v10238_v33, %v10166_v53  ;;  %vm5896_vm13 = vmor %vm5894_vm5, %vm5895_vm11 }
 0x1ed   :  { %v7490_v42 = vpop.eup %7489  ;;  %vm4455_vm10 = vweird.f32 %v7484_v15  ;;  %v4461_v14 = vor.u32 1.1754944e-38, %v4460_v8  ;;  %v4953_v1 = vand.u32 2147483647, %v10827_v25  ;;  %3598 = vadd.xlane.f32.xlu1 %v3424_v43  ;;  %vm1684_vm15 = vweird.f32 %v10166_v53  ;;  %v3641_v43 = vpop.xlane.xlu1 %3640 }
 0x1ee   :  { %v4452_v61 = vmul.f32 %v7484_v15, %v4451_v45  ;;  %v5893_v62 = vadd.f32 %v7482_v46, %v5892_v3  ;;  %v4945_v21 = vmul.f32 %v7490_v42, %v10827_v25  ;;  %v1681_v56 = vsub.f32 1.0, %v1680_v19  ;;  %vm4456_vm1 = vmor %vm4454_vm6, %vm4455_vm10 }
 0x1ef   :  { %v4955_v50 = vand.u32 2147483648, %v10827_v25  ;;  %vm1685_vm14 = vweird.f32 %v10238_v33  ;;  %v1688_v58 = vand.u32 2147483647, %v10166_v53  ;;  %vm4950_vm3 = vweird.f32 %v7490_v42 }
 0x1f0   :  { %v4453_v30 = vadd.f32 %v7484_v15, %v4452_v61  ;;  %v5897_v32 = vsel %vm5896_vm13, %v7482_v46, %v5893_v62  ;;  %v4946_v23 = vsub.f32 1.0, %v4945_v21  ;;  %v1682_v52 = vmul.f32 %v10238_v33, %v1681_v56  ;;  %vm10903_vm4 = vmor %vm1684_vm15, %vm1685_vm14  ;;  %v3645_v61 = vpop.xlane.xlu0 %3644 }
 0x1f1   :  { %v5902_v39 = vsel %vm10879_vm12, %v5901_v12, %v5897_v32  ;;  %vm10907_vm0 = vcmp.eq.f32.partialorder %v1688_v58, 8.507059e+37  ;;  %v1690_v28 = vand.u32 2147483648, %v10166_v53  ;;  %v10918_v18 = vadd.s32 4294967264, %v10128_v47 }
 0x1f2   :  { %v4457_v51 = vsel %vm4456_vm1, %v7484_v15, %v4453_v30  ;;  %v6675_v46 = vperm.slane %v5902_v39, %v10702_v40  ;;  %v4947_v54 = vmul.f32 %v7490_v42, %v4946_v23  ;;  %v1683_v8 = vadd.f32 %v10238_v33, %v1682_v52 }
 0x1f3   :  { %v4462_v38 = vsel %vm10884_vm8, %v4461_v14, %v4457_v51  ;;  %16381 = vst [vmem:[#allocation8_spill] sm:$0xff] %v10918_v18  ;;  %v1691_v48 = vor.u32 1.1754944e-38, %v1690_v28  ;;  %v3768_v36 = vadd.f32 %v9913_v2, %v3515_v49  ;;  %vm4949_vm5 = vweird.f32 %v10827_v25  ;;  %v804_v28 = vpop.f32.mrf.mxu2 }
 0x1f4   :  { %v6464_v15 = vperm.slane %v4462_v38, %v10702_v40  ;;  %v10923_v12 = vsel %vm16122_vm9, %v6675_v46, %v10593_v0  ;;  %v4948_v53 = vadd.f32 %v7490_v42, %v4947_v54  ;;  %v1687_v45 = vsel %vm10903_vm4, %v10238_v33, %v1683_v8  ;;  %vm4951_vm6 = vmor %vm4949_vm5, %vm4950_vm3 }
 0x1f5   :  { %v4956_v11 = vor.u32 1.1754944e-38, %v4955_v50  ;;  %v1692_v19 = vsel %vm10907_vm0, %v1691_v48, %v1687_v45  ;;  %v7024_v0 = vmul.f32 -1.442695, %v3768_v36  ;;  %7491 = vrcp.f32 %v10845_v57 }
 0x1f6   :  { %v10931_v3 = vsel %vm16122_vm9, %v6464_v15, %v10598_v55  ;;  %v4952_v25 = vsel %vm4951_vm6, %v7490_v42, %v4948_v53  ;;  %vm4954_vm12 = vcmp.eq.f32.partialorder %v4953_v1, 8.507059e+37  ;;  %v3393_v14 = vmul.f32 %v10606_v13, %v1692_v19  ;;  %v612_v42 = vpop.f32.mrf.mxu0  ;;  %v708_v1 = vpop.f32.mrf.mxu1 }
 0x1f7   :  { %vm16178_vm11 = vcmask 326912   ;;  %v4957_v33 = vsel %vm4954_vm12, %v4956_v11, %v4952_v25  ;;  %7493 = vpow2.f32 %v7024_v0  ;;  %v3831_v55 = vadd.f32 %v9913_v2, %v3641_v43 }
 0x1f8   :  { %7495 = vpow2.f32 %v10867_v10  ;;  %v7005_v62 = vmul.f32 -1.442695, %v10848_v5  ;;  %v6553_v21 = vperm.slane %v4957_v33, %v10918_v18  ;;  %3536 = vadd.xlane.f32.xlu0 %v3393_v14  ;;  %v3833_v56 = vadd.f32 %v9913_v2, %v3645_v61 }
 0x1f9   :  { %7497 = vpow2.f32 %v10869_v35  ;;  %v7087_v30 = vmul.f32 -1.442695, %v3831_v55  ;;  %v2160_v50 = vmul.f32 %v10250_v4, %v10172_v20  ;;  %vm2164_vm8 = vweird.f32 %v10172_v20 }
 0x1fa   :  { %v10949_v10 = vsel %vm16178_vm11, %v6553_v21, %v10775_v16  ;;  %v7089_v5 = vmul.f32 -1.442695, %v3833_v56  ;;  %vm2165_vm10 = vweird.f32 %v10250_v4  ;;  %v2168_v58 = vand.u32 2147483647, %v10172_v20 }
 0x1fb   :  { %7499 = vpow2.f32 %v7087_v30  ;;  %v2161_v32 = vsub.f32 1.0, %v2160_v50  ;;  %v2170_v35 = vand.u32 2147483648, %v10172_v20  ;;  %v2640_v23 = vmul.f32 %v10526_v37, %v10220_v17  ;;  %v10956_v52 = vpop.eup %7491  ;;  %vm10969_vm14 = vmor %vm2164_vm8, %vm2165_vm10  ;;  %v3709_v20 = vpop.xlane.xlu0 %3708 }
 0x1fc   :  { %7501 = vpow2.f32 %v7005_v62  ;;  %v613_v49 = vadd.f32 %v10452_v41, %v612_v42  ;;  %v709_v16 = vadd.f32 %v10452_v41, %v708_v1  ;;  %vm2644_vm15 = vweird.f32 %v10220_v17 }
 0x1fd   :  { %v7494_v39 = vpop.eup %7493  ;;  %v2162_v51 = vmul.f32 %v10250_v4, %v2161_v32  ;;  %v2641_v59 = vsub.f32 1.0, %v2640_v23  ;;  %vm2645_vm13 = vweird.f32 %v10526_v37  ;;  %7503 = vpow2.f32 %v7089_v5  ;;  %v3707_v32 = vpop.xlane.xlu1 %3706 }
 0x1fe   :  { %v7496_v63 = vpop.eup %7495  ;;  %v10963_v46 = vadd.f32 1.0, %v7494_v39  ;;  %v2171_v54 = vor.u32 1.1754944e-38, %v2170_v35  ;;  %v2650_v8 = vand.u32 2147483648, %v10220_v17  ;;  %vm2169_vm1 = vcmp.eq.f32.partialorder %v2168_v58, 8.507059e+37  ;;  %vm10980_vm3 = vmor %vm2644_vm15, %vm2645_vm13  ;;  %v3643_v58 = vpop.xlane.xlu2 %3642 }
 0x1ff   :  { %v7498_v15 = vpop.eup %7497  ;;  %v2163_v48 = vadd.f32 %v10250_v4, %v2162_v51  ;;  %v2642_v36 = vmul.f32 %v10526_v37, %v2641_v59  ;;  %v2648_v53 = vand.u32 2147483647, %v10220_v17  ;;  %v10984_v43 = vadd.f32 1.0, %v7496_v63 }
 0x200   :  { %7505 = vrcp.f32 %v10963_v46  ;;  %v805_v11 = vadd.f32 %v10452_v41, %v804_v28  ;;  %v6910_v25 = vmul.f32 -1.442695, %v613_v49  ;;  %v2651_v33 = vor.u32 1.1754944e-38, %v2650_v8 }
 0x201   :  { %v7500_v45 = vpop.eup %7499  ;;  %v2167_v19 = vsel %vm10969_vm14, %v10250_v4, %v2163_v48  ;;  %v2643_v0 = vadd.f32 %v10526_v37, %v2642_v36  ;;  %v6942_v55 = vmul.f32 -1.442695, %v709_v16  ;;  %vm2649_vm4 = vcmp.eq.f32.partialorder %v2648_v53, 8.507059e+37 }
 0x202   :  { %v10991_v61 = vpop.eup %7501  ;;  %v10993_v14 = vadd.f32 1.0, %v7500_v45  ;;  %v2172_v17 = vsel %vm2169_vm1, %v2171_v54, %v2167_v19  ;;  %v2175_v4 = vmul.f32 %v10681_v6, %v10600_v44  ;;  %v11003_v56 = vadd.f32 1.0, %v7498_v15 }
 0x203   :  { %v3425_v62 = vmul.f32 %v10606_v13, %v2172_v17  ;;  %v2647_v41 = vsel %vm10980_vm3, %v10526_v37, %v2643_v0  ;;  %v7504_v21 = vpop.eup %7503  ;;  %v6974_v1 = vmul.f32 -1.442695, %v805_v11  ;;  %v4473_v30 = vand.u32 2147483647, %v10963_v46 }
 0x204   :  { %7507 = vrcp.f32 %v10993_v14  ;;  %v2652_v50 = vsel %vm2649_vm4, %v2651_v33, %v2647_v41  ;;  %vm4469_vm0 = vweird.f32 %v10963_v46  ;;  %v4475_v5 = vand.u32 2147483648, %v10963_v46 }
 0x205   :  { %7509 = vrcp.f32 %v10984_v43  ;;  %3600 = vadd.xlane.f32.xlu2 %v3425_v62  ;;  %v11009_v35 = vadd.f32 1.0, %v7504_v21  ;;  %v3457_v23 = vmul.f32 %v10606_v13, %v2652_v50  ;;  %v2176_v49 = vsub.f32 1.0, %v2175_v4 }
 0x206   :  { %v7506_v42 = vpop.eup %7505  ;;  %7511 = vpow2.f32 %v6910_v25  ;;  %vm2179_vm5 = vweird.f32 %v10600_v44  ;;  %vm2180_vm6 = vweird.f32 %v10681_v6  ;;  %v2183_v39 = vand.u32 2147483647, %v10600_v44 }
 0x207   :  { %7513 = vpow2.f32 %v6942_v55  ;;  %v4465_v37 = vmul.f32 %v7506_v42, %v10963_v46  ;;  %v2185_v51 = vand.u32 2147483648, %v10600_v44  ;;  %vm11016_vm12 = vcmp.eq.f32.partialorder %v4473_v30, 8.507059e+37  ;;  %3664 = vadd.xlane.f32.xlu1 %v3457_v23  ;;  %vm11028_vm10 = vmor %vm2179_vm5, %vm2180_vm6 }
 0x208   :  { %v2177_v28 = vmul.f32 %v10681_v6, %v2176_v49  ;;  %v3832_v38 = vadd.f32 %v9913_v2, %v3643_v58  ;;  %v3864_v54 = vadd.f32 %v9913_v2, %v3707_v32  ;;  %vm4470_vm8 = vweird.f32 %v7506_v42 }
 0x209   :  { %v4466_v16 = vsub.f32 1.0, %v4465_v37  ;;  %v4476_v48 = vor.u32 1.1754944e-38, %v4475_v5  ;;  %v5418_v11 = vand.u32 2147483647, %v10993_v14  ;;  %7515 = vrcp.f32 %v11009_v35  ;;  %vm4471_vm13 = vmor %vm4469_vm0, %vm4470_vm8 }
 0x20a   :  { %v7508_v59 = vpop.eup %7507  ;;  %v2178_v19 = vadd.f32 %v10681_v6, %v2177_v28  ;;  %vm2184_vm15 = vcmp.eq.f32.partialorder %v2183_v39, 8.507059e+37  ;;  %v2186_v33 = vor.u32 1.1754944e-38, %v2185_v51  ;;  %v7088_v55 = vmul.f32 -1.442695, %v3832_v38 }
 0x20b   :  { %v11023_v8 = vpop.eup %7509  ;;  %v4467_v15 = vmul.f32 %v7506_v42, %v4466_v16  ;;  %v5410_v36 = vmul.f32 %v7508_v59, %v10993_v14  ;;  %v5420_v44 = vand.u32 2147483648, %v10993_v14  ;;  %v7120_v41 = vmul.f32 -1.442695, %v3864_v54 }
 0x20c   :  { %v7512_v45 = vpop.eup %7511  ;;  %v2182_v62 = vsel %vm11028_vm10, %v10681_v6, %v2178_v19  ;;  %v3865_v21 = vadd.f32 %v9913_v2, %v3709_v20  ;;  %vm5415_vm14 = vweird.f32 %v7508_v59  ;;  %v11046_v37 = vadd.f32 1.0, %v10991_v61 }
 0x20d   :  { %v11035_v0 = vpop.eup %7513  ;;  %v4468_v25 = vadd.f32 %v7506_v42, %v4467_v15  ;;  %v5411_v17 = vsub.f32 1.0, %v5410_v36  ;;  %v2187_v50 = vsel %vm2184_vm15, %v2186_v33, %v2182_v62  ;;  %7517 = vpow2.f32 %v7088_v55 }
 0x20e   :  { %v3426_v5 = vmul.f32 %v10606_v13, %v2187_v50  ;;  %7519 = vpow2.f32 %v6974_v1  ;;  %vm5414_vm1 = vweird.f32 %v10993_v14  ;;  %v7121_v61 = vmul.f32 -1.442695, %v3865_v21 }
 0x20f   :  { %v4472_v4 = vsel %vm4471_vm13, %v7506_v42, %v4468_v25  ;;  %v5412_v30 = vmul.f32 %v7508_v59, %v5411_v17  ;;  %v11053_v32 = vpop.eup %7515  ;;  %vm5416_vm3 = vmor %vm5414_vm1, %vm5415_vm14  ;;  %v5421_v42 = vor.u32 1.1754944e-38, %v5420_v44  ;;  %7521 = vpow2.f32 %v7120_v41  ;;  %v807_v17 = vpop.f32.mrf.mxu2 }
 0x210   :  { %v4477_v46 = vsel %vm11016_vm12, %v4476_v48, %v4472_v4  ;;  %3602 = vadd.xlane.f32.xlu0 %v3426_v5  ;;  %v2655_v23 = vmul.f32 %v10865_v22, %v10697_v31  ;;  %vm5419_vm4 = vcmp.eq.f32.partialorder %v5418_v11, 8.507059e+37  ;;  %vm2659_vm0 = vweird.f32 %v10697_v31 }
 0x211   :  { %v6468_v58 = vperm.slane %v4477_v46, %v10918_v18  ;;  %v5413_v6 = vadd.f32 %v7508_v59, %v5412_v30  ;;  %7523 = vpow2.f32 %v7121_v61  ;;  %vm2660_vm5 = vweird.f32 %v10865_v22  ;;  %v11112_v30 = vld [vmem:[%s16118_s2] ss:$0 sm:$0xff] }
 0x212   :  { %v2656_v14 = vsub.f32 1.0, %v2655_v23  ;;  %v5440_v51 = vmul.f32 %v11053_v32, %v11009_v35  ;;  %v2663_v63 = vand.u32 2147483647, %v10697_v31  ;;  %v2665_v28 = vand.u32 2147483648, %v10697_v31  ;;  %vm11082_vm6 = vmor %vm2659_vm0, %vm2660_vm5 }
 0x213   :  { %v11059_v49 = vsel %vm16178_vm11, %v6468_v58, %v10931_v3  ;;  %v5417_v1 = vsel %vm5416_vm3, %v7508_v59, %v5413_v6  ;;  %v7518_v3 = vpop.eup %7517  ;;  %7525 = vrcp.f32 %v11003_v56  ;;  %v1695_v38 = vmul.f32 %v10842_v24, %v10692_v34 }
 0x214   :  { %v5422_v16 = vsel %vm5419_vm4, %v5421_v42, %v5417_v1  ;;  %v2657_v59 = vmul.f32 %v10865_v22, %v2656_v14  ;;  %v7520_v54 = vpop.eup %7519  ;;  %v11072_v15 = vadd.f32 1.0, %v7512_v45  ;;  %v11078_v36 = vadd.f32 1.0, %v7518_v3 }
 0x215   :  { %v6613_v39 = vperm.slane %v5422_v16, %v10702_v40  ;;  %v2666_v20 = vor.u32 1.1754944e-38, %v2665_v28  ;;  %v7522_v11 = vpop.eup %7521  ;;  %7527 = vrcp.f32 %v11046_v37  ;;  %vm2664_vm12 = vcmp.eq.f32.partialorder %v2663_v63, 8.507059e+37 }
 0x216   :  { %v2658_v19 = vadd.f32 %v10865_v22, %v2657_v59  ;;  %v1696_v45 = vsub.f32 1.0, %v1695_v38  ;;  %v5441_v25 = vsub.f32 1.0, %v5440_v51  ;;  %7529 = vrcp.f32 %v11078_v36 }
 0x217   :  { %v11076_v48 = vsel %vm16122_vm9, %v6613_v39, %v10788_v29  ;;  %vm1699_vm8 = vweird.f32 %v10692_v34  ;;  %v7524_v29 = vpop.eup %7523  ;;  %v11090_v31 = vadd.f32 1.0, %v7522_v11  ;;  %vm1700_vm10 = vweird.f32 %v10842_v24 }
 0x218   :  { %v2662_v33 = vsel %vm11082_vm6, %v10865_v22, %v2658_v19  ;;  %v1697_v55 = vmul.f32 %v10842_v24, %v1696_v45  ;;  %7531 = vrcp.f32 %v11072_v15  ;;  %v11098_v44 = vadd.f32 1.0, %v7524_v29  ;;  %vm11122_vm15 = vmor %vm1699_vm8, %vm1700_vm10 }
 0x219   :  { %v2667_v62 = vsel %vm2664_vm12, %v2666_v20, %v2662_v33  ;;  %v11100_v41 = vpop.eup %7525  ;;  %v11103_v21 = vadd.f32 1.0, %v11035_v0  ;;  %v11105_v4 = vadd.f32 1.0, %v7520_v54  ;;  %7533 = vrcp.f32 %v11090_v31 }
 0x21a   :  { %v1703_v22 = vand.u32 2147483647, %v10692_v34  ;;  %v11115_v50 = vadd.f32 %v11112_v30, %v807_v17  ;;  %v5433_v46 = vand.u32 2147483647, %v11078_v36  ;;  %v5435_v5 = vand.u32 2147483648, %v11078_v36 }
 0x21b   :  { %7535 = vrcp.f32 %v11098_v44  ;;  %v11126_v58 = vpop.eup %7527  ;;  %v11129_v6 = vadd.s32 4294967256, %v10128_v47  ;;  %v11132_v42 = vmul.f32 %v11053_v32, %v5441_v25  ;;  %v3458_v61 = vmul.f32 %v10606_v13, %v2667_v62 }
 0x21c   :  { %v1698_v23 = vadd.f32 %v10842_v24, %v1697_v55  ;;  %v7530_v1 = vpop.eup %7529  ;;  %vm5429_vm13 = vweird.f32 %v11078_v36  ;;  %v5913_v16 = vand.u32 2147483647, %v11090_v31  ;;  %v5915_v14 = vand.u32 2147483648, %v11090_v31 }
 0x21d   :  { %16394 = vst [vmem:[#allocation9_spill] sm:$0xff] %v11129_v6  ;;  %v1705_v39 = vand.u32 2147483648, %v10692_v34  ;;  %v5425_v51 = vmul.f32 %v7530_v1, %v11078_v36  ;;  %v5928_v63 = vand.u32 2147483647, %v11098_v44  ;;  %3666 = vadd.xlane.f32.xlu2 %v3458_v61  ;;  %vm1704_vm14 = vcmp.eq.f32.partialorder %v1703_v22, 8.507059e+37  ;;  %v3517_v22 = vpop.xlane.xlu2 %3516 }
 0x21e   :  { %v1702_v28 = vsel %vm11122_vm15, %v10842_v24, %v1698_v23  ;;  %v11145_v3 = vpop.eup %7531  ;;  %vm11147_vm1 = vcmp.eq.f32.partialorder %v5433_v46, 8.507059e+37  ;;  %v5436_v38 = vor.u32 1.1754944e-38, %v5435_v5  ;;  %v3135_v34 = vmul.f32 %v10873_v9, %v10784_v60 }
 0x21f   :  { %v1706_v54 = vor.u32 1.1754944e-38, %v1705_v39  ;;  %v7534_v53 = vpop.eup %7533  ;;  %v5426_v20 = vsub.f32 1.0, %v5425_v51  ;;  %vm5909_vm3 = vweird.f32 %v11090_v31  ;;  %vm5924_vm4 = vweird.f32 %v11098_v44  ;;  %v3581_v51 = vpop.xlane.xlu1 %3580 }
 0x220   :  { %v5930_v24 = vand.u32 2147483648, %v11098_v44  ;;  %v5905_v19 = vmul.f32 %v7534_v53, %v11090_v31  ;;  %vm11157_vm0 = vcmp.eq.f32.partialorder %v5913_v16, 8.507059e+37  ;;  %v5916_v25 = vor.u32 1.1754944e-38, %v5915_v14 }
 0x221   :  { %v7536_v11 = vpop.eup %7535  ;;  %v1707_v29 = vsel %vm1704_vm14, %v1706_v54, %v1702_v28  ;;  %v5427_v17 = vmul.f32 %v7530_v1, %v5426_v20  ;;  %vm5430_vm5 = vweird.f32 %v7530_v1  ;;  %vm11162_vm6 = vcmp.eq.f32.partialorder %v5928_v63, 8.507059e+37 }
 0x222   :  { %v5920_v33 = vmul.f32 %v7536_v11, %v11098_v44  ;;  %v3394_v62 = vmul.f32 %v10606_v13, %v1707_v29  ;;  %v5906_v46 = vsub.f32 1.0, %v5905_v19  ;;  %v3136_v5 = vsub.f32 1.0, %v3135_v34  ;;  %vm5431_vm10 = vmor %vm5429_vm13, %vm5430_vm5 }
 0x223   :  { %vm3139_vm12 = vweird.f32 %v10784_v60  ;;  %vm3140_vm8 = vweird.f32 %v10873_v9  ;;  %v5428_v0 = vadd.f32 %v7530_v1, %v5427_v17  ;;  %v3143_v23 = vand.u32 2147483647, %v10784_v60  ;;  %v3519_v17 = vpop.xlane.xlu0 %3518 }
 0x224   :  { %v5921_v61 = vsub.f32 1.0, %v5920_v33  ;;  %3538 = vadd.xlane.f32.xlu1 %v3394_v62  ;;  %v3145_v16 = vand.u32 2147483648, %v10784_v60  ;;  %v5907_v14 = vmul.f32 %v7534_v53, %v5906_v46  ;;  %vm5910_vm15 = vweird.f32 %v7534_v53  ;;  %vm11179_vm9 = vmor %vm3139_vm12, %vm3140_vm8 }
 0x225   :  { %v3137_v13 = vmul.f32 %v10873_v9, %v3136_v5  ;;  %v3769_v39 = vadd.f32 %v9913_v2, %v3517_v22  ;;  %v5432_v63 = vsel %vm5431_vm10, %v7530_v1, %v5428_v0  ;;  %vm5925_vm14 = vweird.f32 %v7536_v11  ;;  %vm5911_vm13 = vmor %vm5909_vm3, %vm5910_vm15  ;;  %v900_v22 = vpop.f32.mrf.mxu3 }
 0x226   :  { %v5922_v28 = vmul.f32 %v7536_v11, %v5921_v61  ;;  %v3146_v36 = vor.u32 1.1754944e-38, %v3145_v16  ;;  %v5437_v34 = vsel %vm11147_vm1, %v5436_v38, %v5432_v63  ;;  %v5908_v20 = vadd.f32 %v7534_v53, %v5907_v14  ;;  %vm5926_vm12 = vmor %vm5924_vm4, %vm5925_vm14 }
 0x227   :  { %v3138_v19 = vadd.f32 %v10873_v9, %v3137_v13  ;;  %v7025_v29 = vmul.f32 -1.442695, %v3769_v39  ;;  %v6615_v1 = vperm.slane %v5437_v34, %v10918_v18  ;;  %vm3144_vm5 = vcmp.eq.f32.partialorder %v3143_v23, 8.507059e+37  ;;  %v615_v23 = vpop.f32.mrf.mxu0 }
 0x228   :  { %v5923_v60 = vadd.f32 %v7536_v11, %v5922_v28  ;;  %v3801_v33 = vadd.f32 %v9913_v2, %v3581_v51  ;;  %v5912_v62 = vsel %vm5911_vm13, %v7534_v53, %v5908_v20  ;;  %v5931_v59 = vor.u32 1.1754944e-38, %v5930_v24 }
 0x229   :  { %v3142_v38 = vsel %vm11179_vm9, %v10873_v9, %v3138_v19  ;;  %7537 = vpow2.f32 %v7025_v29  ;;  %v11198_v46 = vsel %vm16178_vm11, %v6615_v1, %v11076_v48  ;;  %v5917_v31 = vsel %vm11157_vm0, %v5916_v25, %v5912_v62  ;;  %v11211_v48 = vld [vmem:[%s16119_s3] ss:$0 sm:$0xff] }
 0x22a   :  { %v5927_v5 = vsel %vm5926_vm12, %v7536_v11, %v5923_v60  ;;  %v3770_v53 = vadd.f32 %v9913_v2, %v3519_v17  ;;  %v6677_v44 = vperm.slane %v5917_v31, %v10918_v18  ;;  %vm16160_vm1 = vcmask 392512  }
 0x22b   :  { %v5932_v24 = vsel %vm11162_vm6, %v5931_v59, %v5927_v5  ;;  %v3147_v0 = vsel %vm3144_vm5, %v3146_v36, %v3142_v38  ;;  %7539 = vrcp.f32 %v11103_v21  ;;  %v7057_v45 = vmul.f32 -1.442695, %v3801_v33  ;;  %v711_v5 = vpop.f32.mrf.mxu1 }
 0x22c   :  { %v6679_v9 = vperm.slane %v5932_v24, %v11129_v6  ;;  %v3490_v11 = vmul.f32 %v11211_v48, %v3147_v0  ;;  %7541 = vrcp.f32 %v11105_v4  ;;  %v901_v25 = vadd.f32 %v11112_v30, %v900_v22 }
 0x22d   :  { %v6678_v55 = vsel %vm16178_vm11, %v6677_v44, %v10923_v12  ;;  %v6975_v61 = vmul.f32 -1.442695, %v11115_v50  ;;  %v7026_v14 = vmul.f32 -1.442695, %v3770_v53  ;;  %v1710_v13 = vmul.f32 %v11023_v8, %v10984_v43 }
 0x22e   :  { %v11220_v16 = vsel %vm16160_vm1, %v6679_v9, %v6678_v55  ;;  %3730 = vadd.xlane.f32.xlu0 %v3490_v11  ;;  %v5443_v51 = vadd.f32 %v11053_v32, %v11132_v42  ;;  %vm5445_vm9 = vweird.f32 %v11053_v32  ;;  %v5448_v63 = vand.u32 2147483647, %v11009_v35 }
 0x22f   :  { %v7538_v39 = vpop.eup %7537  ;;  %7543 = vpow2.f32 %v7057_v45  ;;  %v5450_v12 = vand.u32 2147483648, %v11009_v35  ;;  %v1711_v28 = vsub.f32 1.0, %v1710_v13  ;;  %v11231_v54 = vmul.f32 -1.442695, %v901_v25 }
 0x230   :  { %v11229_v50 = vadd.f32 1.0, %v7538_v39  ;;  %7545 = vpow2.f32 %v7026_v14  ;;  %v616_v36 = vadd.f32 %v11112_v30, %v615_v23  ;;  %vm5444_vm3 = vweird.f32 %v11009_v35 }
 0x231   :  { %v2190_v42 = vmul.f32 %v10956_v52, %v10845_v57  ;;  %v11237_v34 = vpop.eup %7539  ;;  %vm11239_vm4 = vmor %vm5444_vm3, %vm5445_vm9  ;;  %vm1714_vm0 = vweird.f32 %v10984_v43  ;;  %vm1715_vm6 = vweird.f32 %v11023_v8  ;;  %v1718_v19 = vand.u32 2147483647, %v10984_v43 }
 0x232   :  { %7547 = vrcp.f32 %v11229_v50  ;;  %v11247_v29 = vpop.eup %7541  ;;  %v5447_v35 = vsel %vm11239_vm4, %v11053_v32, %v5443_v51  ;;  %v1712_v17 = vmul.f32 %v11023_v8, %v1711_v28  ;;  %v1720_v1 = vand.u32 2147483648, %v10984_v43  ;;  %vm11257_vm15 = vmor %vm1714_vm0, %vm1715_vm6 }
 0x233   :  { %v2191_v60 = vsub.f32 1.0, %v2190_v42  ;;  %vm5449_vm8 = vcmp.eq.f32.partialorder %v5448_v63, 8.507059e+37  ;;  %v5451_v33 = vor.u32 1.1754944e-38, %v5450_v12  ;;  %vm2194_vm10 = vweird.f32 %v10845_v57 }
 0x234   :  { %v2200_v62 = vand.u32 2147483648, %v10845_v57  ;;  %v1713_v38 = vadd.f32 %v11023_v8, %v1712_v17  ;;  %vm2195_vm14 = vweird.f32 %v10956_v52  ;;  %v2198_v43 = vand.u32 2147483647, %v10845_v57 }
 0x235   :  { %v7544_v59 = vpop.eup %7543  ;;  %v2192_v32 = vmul.f32 %v10956_v52, %v2191_v60  ;;  %7549 = vpow2.f32 %v6975_v61  ;;  %v11264_v53 = vsel %vm5449_vm8, %v5451_v33, %v5447_v35  ;;  %vm11268_vm13 = vcmp.eq.f32.partialorder %v1718_v19, 8.507059e+37  ;;  %vm11285_vm5 = vmor %vm2194_vm10, %vm2195_vm14 }
 0x236   :  { %v7546_v31 = vpop.eup %7545  ;;  %v11266_v44 = vadd.f32 1.0, %v7544_v59  ;;  %v4488_v0 = vand.u32 2147483647, %v11229_v50  ;;  %v1721_v11 = vor.u32 1.1754944e-38, %v1720_v1  ;;  %v4490_v55 = vand.u32 2147483648, %v11229_v50 }
 0x237   :  { %v11273_v9 = vadd.f32 1.0, %v7546_v31  ;;  %v2193_v45 = vadd.f32 %v10956_v52, %v2192_v32  ;;  %v1717_v61 = vsel %vm11257_vm15, %v11023_v8, %v1713_v38  ;;  %v2201_v14 = vor.u32 1.1754944e-38, %v2200_v62  ;;  %v3583_v38 = vpop.xlane.xlu2 %3582 }
 0x238   :  { %v7548_v25 = vpop.eup %7547  ;;  %7551 = vrcp.f32 %v11266_v44  ;;  %v11290_v13 = vadd.f32 %v11112_v30, %v711_v5  ;;  %vm2199_vm12 = vcmp.eq.f32.partialorder %v2198_v43, 8.507059e+37  ;;  %v11294_v51 = vmul.f32 -1.442695, %v616_v36 }
 0x239   :  { %v4480_v39 = vmul.f32 %v7548_v25, %v11229_v50  ;;  %7553 = vrcp.f32 %v11273_v9  ;;  %v6617_v8 = vperm.slane %v11264_v53, %v11129_v6  ;;  %vm4484_vm9 = vweird.f32 %v11229_v50 }
 0x23a   :  { %v11300_v57 = vadd.s32 4294967248, %v10128_v47  ;;  %v4968_v12 = vand.u32 2147483647, %v11266_v44  ;;  %v1722_v28 = vsel %vm11268_vm13, %v1721_v11, %v1717_v61  ;;  %v2197_v42 = vsel %vm11285_vm5, %v10956_v52, %v2193_v45 }
 0x23b   :  { %v4481_v63 = vsub.f32 1.0, %v4480_v39  ;;  %v11308_v36 = vpop.eup %7549  ;;  %vm11310_vm3 = vcmp.eq.f32.partialorder %v4488_v0, 8.507059e+37  ;;  %v4491_v19 = vor.u32 1.1754944e-38, %v4490_v55  ;;  %v3395_v35 = vmul.f32 %v11211_v48, %v1722_v28 }
 0x23c   :  { %16411 = vst [vmem:[#allocation10_spill] sm:$0xff] %v11300_v57  ;;  %v2202_v17 = vsel %vm2199_vm12, %v2201_v14, %v2197_v42  ;;  %vm4485_vm4 = vweird.f32 %v7548_v25  ;;  %vm4964_vm0 = vweird.f32 %v11266_v44  ;;  %v4970_v62 = vand.u32 2147483648, %v11266_v44 }
 0x23d   :  { %v4482_v1 = vmul.f32 %v7548_v25, %v4481_v63  ;;  %v3427_v60 = vmul.f32 %v11211_v48, %v2202_v17  ;;  %vm4499_vm6 = vweird.f32 %v11273_v9  ;;  %v4503_v52 = vand.u32 2147483647, %v11273_v9  ;;  %3540 = vadd.xlane.f32.xlu2 %v3395_v35  ;;  %vm4486_vm15 = vmor %vm4484_vm9, %vm4485_vm4  ;;  %v3647_v63 = vpop.xlane.xlu1 %3646 }
 0x23e   :  { %v7552_v33 = vpop.eup %7551  ;;  %v2670_v59 = vmul.f32 %v11100_v41, %v11003_v56  ;;  %vm11323_vm8 = vcmp.eq.f32.partialorder %v4968_v12, 8.507059e+37  ;;  %v4505_v5 = vand.u32 2147483648, %v11273_v9  ;;  %vm2674_vm10 = vweird.f32 %v11003_v56 }
 0x23f   :  { %v7554_v22 = vpop.eup %7553  ;;  %v4483_v32 = vadd.f32 %v7548_v25, %v4482_v1  ;;  %v4960_v43 = vmul.f32 %v7552_v33, %v11266_v44  ;;  %3604 = vadd.xlane.f32.xlu1 %v3427_v60  ;;  %vm2675_vm14 = vweird.f32 %v11100_v41  ;;  %v2678_v11 = vand.u32 2147483647, %v11003_v56 }
 0x240   :  { %v4495_v24 = vmul.f32 %v7554_v22, %v11273_v9  ;;  %v2671_v0 = vsub.f32 1.0, %v2670_v59  ;;  %v2680_v61 = vand.u32 2147483648, %v11003_v56  ;;  %v3802_v23 = vadd.f32 %v9913_v2, %v3583_v38  ;;  %vm11343_vm5 = vmor %vm2674_vm10, %vm2675_vm14 }
 0x241   :  { %v4487_v45 = vsel %vm4486_vm15, %v7548_v25, %v4483_v32  ;;  %v4961_v55 = vsub.f32 1.0, %v4960_v43  ;;  %vm4965_vm13 = vweird.f32 %v7552_v33  ;;  %vm4500_vm12 = vweird.f32 %v7554_v22 }
 0x242   :  { %v4492_v14 = vsel %vm11310_vm3, %v4491_v19, %v4487_v45  ;;  %v4496_v39 = vsub.f32 1.0, %v4495_v24  ;;  %v2672_v50 = vmul.f32 %v11100_v41, %v2671_v0  ;;  %v2681_v42 = vor.u32 1.1754944e-38, %v2680_v61  ;;  %vm4966_vm3 = vmor %vm4964_vm0, %vm4965_vm13 }
 0x243   :  { %v6472_v12 = vperm.slane %v4492_v14, %v11129_v6  ;;  %v4962_v28 = vmul.f32 %v7552_v33, %v4961_v55  ;;  %v7058_v35 = vmul.f32 -1.442695, %v3802_v23  ;;  %vm2679_vm9 = vcmp.eq.f32.partialorder %v2678_v11, 8.507059e+37  ;;  %vm4501_vm4 = vmor %vm4499_vm6, %vm4500_vm12 }
 0x244   :  { %v4497_v17 = vmul.f32 %v7554_v22, %v4496_v39  ;;  %v2673_v20 = vadd.f32 %v11100_v41, %v2672_v50  ;;  %v3834_v60 = vadd.f32 %v9913_v2, %v3647_v63  ;;  %v4971_v56 = vor.u32 1.1754944e-38, %v4970_v62  ;;  %v3585_v62 = vpop.xlane.xlu0 %3584 }
 0x245   :  { %v6474_v19 = vsel %vm16160_vm1, %v6472_v12, %v11059_v49  ;;  %v4963_v1 = vadd.f32 %v7552_v33, %v4962_v28  ;;  %7555 = vpow2.f32 %v7058_v35  ;;  %v4506_v38 = vor.u32 1.1754944e-38, %v4505_v5 }
 0x246   :  { %v4498_v59 = vadd.f32 %v7554_v22, %v4497_v17  ;;  %v2677_v32 = vsel %vm11343_vm5, %v11100_v41, %v2673_v20  ;;  %v7090_v24 = vmul.f32 -1.442695, %v3834_v60  ;;  %v11364_v44 = vsel %vm16160_vm1, %v6617_v8, %v11198_v46 }
 0x247   :  { %v4967_v43 = vsel %vm4966_vm3, %v7552_v33, %v4963_v1  ;;  %v2682_v49 = vsel %vm2679_vm9, %v2681_v42, %v2677_v32  ;;  %vm4504_vm0 = vcmp.eq.f32.partialorder %v4503_v52, 8.507059e+37  ;;  %vm16125_vm6 = vcmask 458112   ;;  %v903_v1 = vpop.f32.mrf.mxu3 }
 0x248   :  { %v4972_v5 = vsel %vm11323_vm8, %v4971_v56, %v4967_v43  ;;  %v4502_v0 = vsel %vm4501_vm4, %v7554_v22, %v4498_v59  ;;  %v3459_v41 = vmul.f32 %v11211_v48, %v2682_v49  ;;  %7557 = vpow2.f32 %v7090_v24 }
 0x249   :  { %v6555_v9 = vperm.slane %v4972_v5, %v11129_v6  ;;  %v4507_v33 = vsel %vm4504_vm0, %v4506_v38, %v4502_v0  ;;  %7559 = vpow2.f32 %v11231_v54  ;;  %v3803_v46 = vadd.f32 %v9913_v2, %v3585_v62 }
 0x24a   :  { %v6476_v53 = vperm.slane %v4507_v33, %v11300_v57  ;;  %3668 = vadd.xlane.f32.xlu0 %v3459_v41  ;;  %v2205_v8 = vmul.f32 %v11237_v34, %v11103_v21  ;;  %7561 = vpow2.f32 %v11294_v51  ;;  %v2213_v22 = vand.u32 2147483647, %v11103_v21 }
 0x24b   :  { %v7556_v31 = vpop.eup %7555  ;;  %v11378_v52 = vsel %vm16160_vm1, %v6555_v9, %v10949_v10  ;;  %v7059_v45 = vmul.f32 -1.442695, %v3803_v46  ;;  %vm2209_vm8 = vweird.f32 %v11103_v21  ;;  %vm2210_vm10 = vweird.f32 %v11237_v34 }
 0x24c   :  { %v11382_v11 = vsel %vm16125_vm6, %v6476_v53, %v6474_v19  ;;  %v11384_v54 = vadd.f32 1.0, %v7556_v31  ;;  %v2206_v55 = vsub.f32 1.0, %v2205_v8  ;;  %v2215_v61 = vand.u32 2147483648, %v11103_v21  ;;  %vm11397_vm14 = vmor %vm2209_vm8, %vm2210_vm10 }
 0x24d   :  { %v3150_v51 = vmul.f32 %v11126_v58, %v11046_v37  ;;  %v6943_v10 = vmul.f32 -1.442695, %v11290_v13  ;;  %vm3154_vm15 = vweird.f32 %v11046_v37  ;;  %vm11401_vm13 = vcmp.eq.f32.partialorder %v2213_v22, 8.507059e+37 }
 0x24e   :  { %7563 = vrcp.f32 %v11384_v54  ;;  %v7558_v23 = vpop.eup %7557  ;;  %v2207_v14 = vmul.f32 %v11237_v34, %v2206_v55  ;;  %v2216_v13 = vor.u32 1.1754944e-38, %v2215_v61  ;;  %vm3155_vm5 = vweird.f32 %v11126_v58 }
 0x24f   :  { %7565 = vpow2.f32 %v7059_v45  ;;  %v3151_v39 = vsub.f32 1.0, %v3150_v51  ;;  %v7560_v50 = vpop.eup %7559  ;;  %v11395_v63 = vadd.f32 1.0, %v7558_v23  ;;  %v3158_v35 = vand.u32 2147483647, %v11046_v37  ;;  %vm11414_vm12 = vmor %vm3154_vm15, %vm3155_vm5 }
 0x250   :  { %v7562_v28 = vpop.eup %7561  ;;  %v2208_v25 = vadd.f32 %v11237_v34, %v2207_v14  ;;  %v3160_v17 = vand.u32 2147483648, %v11046_v37  ;;  %v11411_v20 = vadd.f32 1.0, %v11308_v36  ;;  %v11424_v32 = vadd.f32 1.0, %v7560_v50 }
 0x251   :  { %v3152_v42 = vmul.f32 %v11126_v58, %v3151_v39  ;;  %7567 = vrcp.f32 %v11395_v63  ;;  %vm3159_vm9 = vcmp.eq.f32.partialorder %v3158_v35, 8.507059e+37  ;;  %v11431_v24 = vadd.f32 1.0, %v7562_v28  ;;  %v3521_v35 = vpop.xlane.xlu1 %3520 }
 0x252   :  { %v2212_v60 = vsel %vm11397_vm14, %v11237_v34, %v2208_v25  ;;  %v3161_v59 = vor.u32 1.1754944e-38, %v3160_v17  ;;  %7569 = vpow2.f32 %v6943_v10  ;;  %v904_v62 = vadd.f32 %v11112_v30, %v903_v1 }
 0x253   :  { %v3153_v56 = vadd.f32 %v11126_v58, %v3152_v42  ;;  %v2217_v37 = vsel %vm11401_vm13, %v2216_v13, %v2212_v60  ;;  %7571 = vrcp.f32 %v11411_v20  ;;  %v4983_v9 = vand.u32 2147483647, %v11384_v54  ;;  %v3711_v13 = vpop.xlane.xlu2 %3710 }
 0x254   :  { %v7564_v38 = vpop.eup %7563  ;;  %v3428_v49 = vmul.f32 %v11211_v48, %v2217_v37  ;;  %v4985_v46 = vand.u32 2147483648, %v11384_v54  ;;  %v5465_v8 = vand.u32 2147483648, %v11395_v63  ;;  %v7007_v55 = vmul.f32 -1.442695, %v904_v62 }
 0x255   :  { %v7566_v36 = vpop.eup %7565  ;;  %v4975_v43 = vmul.f32 %v7564_v38, %v11384_v54  ;;  %v3157_v34 = vsel %vm11414_vm12, %v11126_v58, %v3153_v56  ;;  %v5463_v58 = vand.u32 2147483647, %v11395_v63  ;;  %vm4980_vm3 = vweird.f32 %v7564_v38 }
 0x256   :  { %v11434_v5 = vadd.f32 1.0, %v7566_v36  ;;  %v3162_v0 = vsel %vm3159_vm9, %v3161_v59, %v3157_v34  ;;  %3606 = vadd.xlane.f32.xlu2 %v3428_v49  ;;  %vm4979_vm4 = vweird.f32 %v11384_v54  ;;  %vm4984_vm0 = vcmp.eq.f32.partialorder %v4983_v9, 8.507059e+37  ;;  %v714_v49 = vpop.f32.mrf.mxu1 }
 0x257   :  { %v4976_v41 = vsub.f32 1.0, %v4975_v43  ;;  %v3491_v33 = vmul.f32 %v11211_v48, %v3162_v0  ;;  %v7568_v53 = vpop.eup %7567  ;;  %v1725_v10 = vmul.f32 %v11145_v3, %v11072_v15  ;;  %vm4981_vm8 = vmor %vm4979_vm4, %vm4980_vm3  ;;  %v4986_v23 = vor.u32 1.1754944e-38, %v4985_v46 }
 0x258   :  { %7573 = vrcp.f32 %v11434_v5  ;;  %v5455_v22 = vmul.f32 %v7568_v53, %v11395_v63  ;;  %v11445_v45 = vpop.eup %7569  ;;  %vm5459_vm10 = vweird.f32 %v11395_v63  ;;  %vm11452_vm15 = vcmp.eq.f32.partialorder %v5463_v58, 8.507059e+37 }
 0x259   :  { %7575 = vrcp.f32 %v11424_v32  ;;  %v4977_v31 = vmul.f32 %v7564_v38, %v4976_v41  ;;  %3732 = vadd.xlane.f32.xlu1 %v3491_v33  ;;  %v5466_v39 = vor.u32 1.1754944e-38, %v5465_v8  ;;  %v11456_v50 = vpop.eup %7571  ;;  %vm5460_vm14 = vweird.f32 %v7568_v53 }
 0x25a   :  { %7577 = vrcp.f32 %v11431_v24  ;;  %v5456_v51 = vsub.f32 1.0, %v5455_v22  ;;  %v1726_v54 = vsub.f32 1.0, %v1725_v10  ;;  %vm1729_vm13 = vweird.f32 %v11072_v15  ;;  %vm5461_vm12 = vmor %vm5459_vm10, %vm5460_vm14 }
 0x25b   :  { %v4978_v61 = vadd.f32 %v7564_v38, %v4977_v31  ;;  %vm1730_vm5 = vweird.f32 %v11145_v3  ;;  %v1735_v42 = vand.u32 2147483648, %v11072_v15  ;;  %v1733_v56 = vand.u32 2147483647, %v11072_v15 }
 0x25c   :  { %v5457_v21 = vmul.f32 %v7568_v53, %v5456_v51  ;;  %v5000_v37 = vand.u32 2147483648, %v11434_v5  ;;  %v1727_v36 = vmul.f32 %v11145_v3, %v1726_v54  ;;  %v3866_v43 = vadd.f32 %v9913_v2, %v3711_v13  ;;  %vm11481_vm9 = vmor %vm1729_vm13, %vm1730_vm5 }
 0x25d   :  { %v4982_v12 = vsel %vm4981_vm8, %v7564_v38, %v4978_v61  ;;  %v4998_v38 = vand.u32 2147483647, %v11434_v5  ;;  %v3771_v41 = vadd.f32 %v9913_v2, %v3521_v35  ;;  %v1736_v46 = vor.u32 1.1754944e-38, %v1735_v42 }
 0x25e   :  { %v7574_v28 = vpop.eup %7573  ;;  %v4987_v25 = vsel %vm4984_vm0, %v4986_v23, %v4982_v12  ;;  %v5458_v1 = vadd.f32 %v7568_v53, %v5457_v21  ;;  %v1728_v33 = vadd.f32 %v11145_v3, %v1727_v36  ;;  %v7122_v58 = vmul.f32 -1.442695, %v3866_v43 }
 0x25f   :  { %v11461_v17 = vpop.eup %7575  ;;  %v6557_v19 = vperm.slane %v4987_v25, %v11300_v57  ;;  %v4990_v60 = vmul.f32 %v7574_v28, %v11434_v5  ;;  %vm4995_vm3 = vweird.f32 %v7574_v28  ;;  %vm1734_vm4 = vcmp.eq.f32.partialorder %v1733_v56, 8.507059e+37  ;;  %v810_v25 = vpop.f32.mrf.mxu2 }
 0x260   :  { %v11466_v59 = vpop.eup %7577  ;;  %v5462_v62 = vsel %vm5461_vm12, %v7568_v53, %v5458_v1  ;;  %v715_v15 = vadd.f32 %v11112_v30, %v714_v49  ;;  %v1732_v8 = vsel %vm11481_vm9, %v11145_v3, %v1728_v33  ;;  %7579 = vpow2.f32 %v7122_v58  ;;  %v618_v3 = vpop.f32.mrf.mxu0 }
 0x261   :  { %v6558_v34 = vsel %vm16125_vm6, %v6557_v19, %v11378_v52  ;;  %v4991_v0 = vsub.f32 1.0, %v4990_v60  ;;  %v5467_v9 = vsel %vm11452_vm15, %v5466_v39, %v5462_v62  ;;  %v7027_v31 = vmul.f32 -1.442695, %v3771_v41  ;;  %v3651_v60 = vpop.xlane.xlu0 %3650 }
 0x262   :  { %v6619_v52 = vperm.slane %v5467_v9, %v11300_v57  ;;  %v11499_v61 = vadd.s32 4294967240, %v10128_v47  ;;  %vm4994_vm0 = vweird.f32 %v11434_v5  ;;  %7581 = vpow2.f32 %v7007_v55 }
 0x263   :  { %v4992_v53 = vmul.f32 %v7574_v28, %v4991_v0  ;;  %vm4996_vm8 = vmor %vm4994_vm0, %vm4995_vm3  ;;  %v5001_v10 = vor.u32 1.1754944e-38, %v5000_v37  ;;  %v1737_v23 = vsel %vm1734_vm4, %v1736_v46, %v1732_v8  ;;  %v2700_v14 = vmul.f32 %v11456_v50, %v11411_v20 }
 0x264   :  { %v11496_v22 = vsel %vm16125_vm6, %v6619_v52, %v11364_v44  ;;  %16428 = vst [vmem:[#allocation11_spill] sm:$0xff] %v11499_v61  ;;  %vm16124_vm10 = vcmask 523712   ;;  %vm4999_vm15 = vcmp.eq.f32.partialorder %v4998_v38, 8.507059e+37  ;;  %v3396_v44 = vmul.f32 %v11211_v48, %v1737_v23  ;;  %v906_v52 = vpop.f32.mrf.mxu3 }
 0x265   :  { %v4993_v51 = vadd.f32 %v7574_v28, %v4992_v53  ;;  %7583 = vpow2.f32 %v7027_v31  ;;  %v2701_v21 = vsub.f32 1.0, %v2700_v14  ;;  %vm2704_vm14 = vweird.f32 %v11411_v20 }
 0x266   :  { %3542 = vadd.xlane.f32.xlu0 %v3396_v44  ;;  %vm2705_vm13 = vweird.f32 %v11456_v50  ;;  %v2708_v55 = vand.u32 2147483647, %v11411_v20  ;;  %v2710_v54 = vand.u32 2147483648, %v11411_v20  ;;  %v7580_v13 = vpop.eup %7579  ;;  %v2685_v35 = vmul.f32 %v11247_v29, %v11105_v4 }
 0x267   :  { %v4997_v39 = vsel %vm4996_vm8, %v7574_v28, %v4993_v51  ;;  %v619_v28 = vadd.f32 %v11112_v30, %v618_v3  ;;  %v2702_v42 = vmul.f32 %v11456_v50, %v2701_v21  ;;  %vm2689_vm5 = vweird.f32 %v11105_v4  ;;  %vm11522_vm12 = vmor %vm2704_vm14, %vm2705_vm13 }
 0x268   :  { %v5002_v12 = vsel %vm4999_vm15, %v5001_v10, %v4997_v39  ;;  %v11518_v1 = vadd.f32 1.0, %v7580_v13  ;;  %vm11526_vm9 = vcmp.eq.f32.partialorder %v2708_v55, 8.507059e+37  ;;  %v2711_v37 = vor.u32 1.1754944e-38, %v2710_v54  ;;  %v7582_v36 = vpop.eup %7581 }
 0x269   :  { %v6559_v5 = vperm.slane %v5002_v12, %v11499_v61  ;;  %v2703_v43 = vadd.f32 %v11456_v50, %v2702_v42  ;;  %v2686_v49 = vsub.f32 1.0, %v2685_v35  ;;  %vm2690_vm3 = vweird.f32 %v11247_v29  ;;  %v3713_v42 = vpop.xlane.xlu1 %3712 }
 0x26a   :  { %v6944_v62 = vmul.f32 -1.442695, %v715_v15  ;;  %v811_v20 = vadd.f32 %v11112_v30, %v810_v25  ;;  %7585 = vrcp.f32 %v11518_v1  ;;  %v3836_v63 = vadd.f32 %v9913_v2, %v3651_v60  ;;  %vm2691_vm4 = vmor %vm2689_vm5, %vm2690_vm3 }
 0x26b   :  { %v11516_v19 = vsel %vm16124_vm10, %v6559_v5, %v6558_v34  ;;  %v2693_v34 = vand.u32 2147483647, %v11105_v4  ;;  %v7584_v0 = vpop.eup %7583  ;;  %v2707_v41 = vsel %vm11522_vm12, %v11456_v50, %v2703_v43  ;;  %v2687_v9 = vmul.f32 %v11247_v29, %v2686_v49 }
 0x26c   :  { %v2695_v33 = vand.u32 2147483648, %v11105_v4  ;;  %v11541_v46 = vadd.f32 1.0, %v7582_v36  ;;  %v6912_v58 = vmul.f32 -1.442695, %v619_v28  ;;  %v11543_v53 = vadd.f32 1.0, %v7584_v0  ;;  %v3649_v28 = vpop.xlane.xlu2 %3648 }
 0x26d   :  { %v2712_v15 = vsel %vm11526_vm9, %v2711_v37, %v2707_v41  ;;  %v2688_v8 = vadd.f32 %v11247_v29, %v2687_v9  ;;  %vm2694_vm0 = vcmp.eq.f32.partialorder %v2693_v34, 8.507059e+37  ;;  %v6976_v51 = vmul.f32 -1.442695, %v811_v20  ;;  %v717_v20 = vpop.f32.mrf.mxu1 }
 0x26e   :  { %v3461_v50 = vmul.f32 %v11211_v48, %v2712_v15  ;;  %v2696_v31 = vor.u32 1.1754944e-38, %v2695_v33  ;;  %7587 = vrcp.f32 %v11543_v53  ;;  %v907_v10 = vadd.f32 %v11112_v30, %v906_v52 }
 0x26f   :  { %7589 = vpow2.f32 %v6944_v62  ;;  %v7092_v23 = vmul.f32 -1.442695, %v3836_v63  ;;  %v2692_v14 = vsel %vm2691_vm4, %v11247_v29, %v2688_v8  ;;  %v3165_v39 = vmul.f32 %v11461_v17, %v11424_v32 }
 0x270   :  { %3672 = vadd.xlane.f32.xlu2 %v3461_v50  ;;  %v7586_v3 = vpop.eup %7585  ;;  %7591 = vrcp.f32 %v11541_v46  ;;  %v2697_v4 = vsel %vm2694_vm0, %v2696_v31, %v2692_v14  ;;  %v5943_v12 = vand.u32 2147483647, %v11518_v1  ;;  %v11562_v21 = vadd.f32 1.0, %v11445_v45 }
 0x271   :  { %7593 = vpow2.f32 %v6912_v58  ;;  %v5935_v44 = vmul.f32 %v7586_v3, %v11518_v1  ;;  %v5945_v5 = vand.u32 2147483648, %v11518_v1  ;;  %v3460_v29 = vmul.f32 %v11211_v48, %v2697_v4 }
 0x272   :  { %7595 = vpow2.f32 %v6976_v51  ;;  %v7008_v55 = vmul.f32 -1.442695, %v907_v10  ;;  %v3166_v13 = vsub.f32 1.0, %v3165_v39  ;;  %vm5939_vm8 = vweird.f32 %v11518_v1 }
 0x273   :  { %v5936_v54 = vsub.f32 1.0, %v5935_v44  ;;  %7597 = vpow2.f32 %v7092_v23  ;;  %3670 = vadd.xlane.f32.xlu1 %v3460_v29  ;;  %vm3169_vm15 = vweird.f32 %v11424_v32  ;;  %vm3170_vm14 = vweird.f32 %v11461_v17 }
 0x274   :  { %v7588_v25 = vpop.eup %7587  ;;  %v3173_v45 = vand.u32 2147483647, %v11424_v32  ;;  %vm5940_vm13 = vweird.f32 %v7586_v3  ;;  %vm11570_vm5 = vcmp.eq.f32.partialorder %v5943_v12, 8.507059e+37  ;;  %v5946_v36 = vor.u32 1.1754944e-38, %v5945_v5  ;;  %vm11585_vm12 = vmor %vm3169_vm15, %vm3170_vm14 }
 0x275   :  { %v7590_v35 = vpop.eup %7589  ;;  %v5937_v60 = vmul.f32 %v7586_v3, %v5936_v54  ;;  %v4510_v38 = vmul.f32 %v7588_v25, %v11543_v53  ;;  %v3167_v43 = vmul.f32 %v11461_v17, %v3166_v13  ;;  %v3175_v49 = vand.u32 2147483648, %v11424_v32  ;;  %vm5941_vm9 = vmor %vm5939_vm8, %vm5940_vm13  ;;  %v813_v13 = vpop.f32.mrf.mxu2 }
 0x276   :  { %v11575_v37 = vpop.eup %7591  ;;  %v3835_v34 = vadd.f32 %v9913_v2, %v3649_v28  ;;  %v4518_v41 = vand.u32 2147483647, %v11543_v53  ;;  %v3867_v33 = vadd.f32 %v9913_v2, %v3713_v42  ;;  %v4520_v52 = vand.u32 2147483648, %v11543_v53 }
 0x277   :  { %v7594_v62 = vpop.eup %7593  ;;  %v5938_v0 = vadd.f32 %v7586_v3, %v5937_v60  ;;  %v4511_v63 = vsub.f32 1.0, %v4510_v38  ;;  %v3168_v15 = vadd.f32 %v11461_v17, %v3167_v43  ;;  %vm3174_vm3 = vcmp.eq.f32.partialorder %v3173_v45, 8.507059e+37 }
 0x278   :  { %v7596_v58 = vpop.eup %7595  ;;  %v3176_v50 = vor.u32 1.1754944e-38, %v3175_v49  ;;  %vm4515_vm4 = vweird.f32 %v7588_v25  ;;  %v7091_v51 = vmul.f32 -1.442695, %v3835_v34  ;;  %v718_v10 = vadd.f32 %v11112_v30, %v717_v20  ;;  %v621_v49 = vpop.f32.mrf.mxu0 }
 0x279   :  { %v7598_v8 = vpop.eup %7597  ;;  %v5942_v31 = vsel %vm5941_vm9, %v7586_v3, %v5938_v0  ;;  %v4512_v32 = vmul.f32 %v7588_v25, %v4511_v63  ;;  %v3172_v1 = vsel %vm11585_vm12, %v11461_v17, %v3168_v15  ;;  %v7123_v14 = vmul.f32 -1.442695, %v3867_v33 }
 0x27a   :  { %v5947_v23 = vsel %vm11570_vm5, %v5946_v36, %v5942_v31  ;;  %vm4514_vm0 = vweird.f32 %v11543_v53  ;;  %v3177_v44 = vsel %vm3174_vm3, %v3176_v50, %v3172_v1  ;;  %v11603_v3 = vadd.f32 1.0, %v7590_v35 }
 0x27b   :  { %v6681_v4 = vperm.slane %v5947_v23, %v11300_v57  ;;  %v4513_v39 = vadd.f32 %v7588_v25, %v4512_v32  ;;  %vm4516_vm8 = vmor %vm4514_vm0, %vm4515_vm4  ;;  %v4521_v12 = vor.u32 1.1754944e-38, %v4520_v52  ;;  %v3492_v30 = vmul.f32 %v11211_v48, %v3177_v44 }
 0x27c   :  { %7599 = vpow2.f32 %v7091_v51  ;;  %vm4519_vm15 = vcmp.eq.f32.partialorder %v4518_v41, 8.507059e+37  ;;  %v6945_v17 = vmul.f32 -1.442695, %v718_v10  ;;  %v3180_v53 = vmul.f32 %v11575_v37, %v11541_v46 }
 0x27d   :  { %v11608_v5 = vsel %vm16125_vm6, %v6681_v4, %v11220_v16  ;;  %v4517_v29 = vsel %vm4516_vm8, %v7588_v25, %v4513_v39  ;;  %7601 = vpow2.f32 %v7123_v14  ;;  %3734 = vadd.xlane.f32.xlu0 %v3492_v30  ;;  %v11614_v45 = vadd.f32 1.0, %v7598_v8  ;;  %v816_v1 = vpop.f32.mrf.mxu2 }
 0x27e   :  { %7603 = vpow2.f32 %v7008_v55  ;;  %v4522_v54 = vsel %vm4519_vm15, %v4521_v12, %v4517_v29  ;;  %v3181_v16 = vsub.f32 1.0, %v3180_v53  ;;  %vm3184_vm14 = vweird.f32 %v11541_v46 }
 0x27f   :  { %7605 = vrcp.f32 %v11562_v21  ;;  %v6480_v28 = vperm.slane %v4522_v54, %v11499_v61  ;;  %v3190_v55 = vand.u32 2147483648, %v11541_v46  ;;  %vm3185_vm13 = vweird.f32 %v11575_v37 }
 0x280   :  { %7607 = vrcp.f32 %v11603_v3  ;;  %v3188_v42 = vand.u32 2147483647, %v11541_v46  ;;  %v1740_v35 = vmul.f32 %v11466_v59, %v11431_v24  ;;  %v3182_v56 = vmul.f32 %v11575_v37, %v3181_v16  ;;  %vm11638_vm5 = vmor %vm3184_vm14, %vm3185_vm13 }
 0x281   :  { %v11621_v25 = vsel %vm16124_vm10, %v6480_v28, %v11382_v11  ;;  %7609 = vpow2.f32 %v6945_v17  ;;  %v11628_v36 = vadd.f32 1.0, %v7594_v62  ;;  %v3191_v63 = vor.u32 1.1754944e-38, %v3190_v55 }
 0x282   :  { %v7600_v60 = vpop.eup %7599  ;;  %7611 = vrcp.f32 %v11614_v45  ;;  %v3183_v20 = vadd.f32 %v11575_v37, %v3182_v56  ;;  %v1741_v41 = vsub.f32 1.0, %v1740_v35  ;;  %v11644_v9 = vadd.f32 1.0, %v7596_v58  ;;  %v11659_v58 = vld [vmem:[%s16118_s2] ss:$0 sm:$0xff] }
 0x283   :  { %v7602_v38 = vpop.eup %7601  ;;  %v11631_v43 = vadd.f32 1.0, %v7600_v60  ;;  %vm3189_vm12 = vcmp.eq.f32.partialorder %v3188_v42, 8.507059e+37  ;;  %vm1744_vm9 = vweird.f32 %v11431_v24  ;;  %vm1745_vm3 = vweird.f32 %v11466_v59 }
 0x284   :  { %v7604_v11 = vpop.eup %7603  ;;  %v11633_v34 = vadd.f32 1.0, %v7602_v38  ;;  %v1748_v46 = vand.u32 2147483647, %v11431_v24  ;;  %v1750_v52 = vand.u32 2147483648, %v11431_v24  ;;  %v622_v50 = vadd.f32 %v11659_v58, %v621_v49  ;;  %vm11675_vm4 = vmor %vm1744_vm9, %vm1745_vm3  ;;  %v11708_v38 = vpop.xlane.xlu0 %3714 }
 0x285   :  { %v11642_v62 = vpop.eup %7605  ;;  %7613 = vrcp.f32 %v11631_v43  ;;  %v11654_v15 = vadd.f32 1.0, %v7604_v11  ;;  %v814_v8 = vadd.f32 %v11659_v58, %v813_v13  ;;  %v3187_v31 = vsel %vm11638_vm5, %v11575_v37, %v3183_v20 }
 0x286   :  { %v11648_v33 = vpop.eup %7607  ;;  %7615 = vrcp.f32 %v11633_v34  ;;  %v3192_v51 = vsel %vm3189_vm12, %v3191_v63, %v3187_v31  ;;  %v1742_v10 = vmul.f32 %v11466_v59, %v1741_v41  ;;  %vm11681_vm0 = vcmp.eq.f32.partialorder %v1748_v46, 8.507059e+37  ;;  %v3523_v46 = vpop.xlane.xlu2 %3522 }
 0x287   :  { %v7610_v32 = vpop.eup %7609  ;;  %7617 = vrcp.f32 %v11628_v36  ;;  %v3493_v37 = vmul.f32 %v11211_v48, %v3192_v51  ;;  %v1751_v44 = vor.u32 1.1754944e-38, %v1750_v52  ;;  %v6913_v30 = vmul.f32 -1.442695, %v622_v50 }
 0x288   :  { %v11668_v23 = vpop.eup %7611  ;;  %7619 = vrcp.f32 %v11644_v9  ;;  %v1743_v4 = vadd.f32 %v11466_v59, %v1742_v10  ;;  %v11686_v29 = vadd.f32 1.0, %v7610_v32  ;;  %v6977_v24 = vmul.f32 -1.442695, %v814_v8 }
 0x289   :  { %7621 = vrcp.f32 %v11654_v15  ;;  %v11689_v54 = vadd.f32 %v11659_v58, %v816_v1  ;;  %v11693_v53 = vmul.f32 %v11668_v23, %v11614_v45  ;;  %3736 = vadd.xlane.f32.xlu2 %v3493_v37  ;;  %vm5474_vm8 = vweird.f32 %v11631_v43 }
 0x28a   :  { %v1747_v28 = vsel %vm11675_vm4, %v11466_v59, %v1743_v4  ;;  %v5478_v16 = vand.u32 2147483647, %v11631_v43  ;;  %v5480_v56 = vand.u32 2147483648, %v11631_v43  ;;  %vm5954_vm15 = vweird.f32 %v11633_v34 }
 0x28b   :  { %v7614_v12 = vpop.eup %7613  ;;  %v1752_v42 = vsel %vm11681_vm0, %v1751_v44, %v1747_v28  ;;  %v5958_v20 = vand.u32 2147483647, %v11633_v34  ;;  %v2220_v0 = vmul.f32 %v11642_v62, %v11562_v21  ;;  %v5960_v41 = vand.u32 2147483648, %v11633_v34 }
 0x28c   :  { %v7616_v17 = vpop.eup %7615  ;;  %v5470_v13 = vmul.f32 %v7614_v12, %v11631_v43  ;;  %v3397_v59 = vmul.f32 %v11211_v48, %v1752_v42  ;;  %vm5475_vm14 = vweird.f32 %v7614_v12  ;;  %vm2224_vm5 = vweird.f32 %v11562_v21 }
 0x28d   :  { %v5950_v55 = vmul.f32 %v7616_v17, %v11633_v34  ;;  %v11704_v35 = vpop.eup %7617  ;;  %vm5955_vm13 = vweird.f32 %v7616_v17  ;;  %v2221_v50 = vsub.f32 1.0, %v2220_v0  ;;  %vm2225_vm12 = vweird.f32 %v11642_v62  ;;  %vm5476_vm9 = vmor %vm5474_vm8, %vm5475_vm14 }
 0x28e   :  { %v5471_v60 = vsub.f32 1.0, %v5470_v13  ;;  %v11711_v11 = vpop.eup %7619  ;;  %3544 = vadd.xlane.f32.xlu1 %v3397_v59  ;;  %v2228_v8 = vand.u32 2147483647, %v11562_v21  ;;  %vm5479_vm3 = vcmp.eq.f32.partialorder %v5478_v16, 8.507059e+37  ;;  %v5481_v32 = vor.u32 1.1754944e-38, %v5480_v56  ;;  %vm11729_vm4 = vmor %vm5954_vm15, %vm5955_vm13 }
 0x28f   :  { %v5951_v49 = vsub.f32 1.0, %v5950_v55  ;;  %v11718_v52 = vpop.eup %7621  ;;  %v2230_v51 = vand.u32 2147483648, %v11562_v21  ;;  %vm5959_vm0 = vcmp.eq.f32.partialorder %v5958_v20, 8.507059e+37  ;;  %v2222_v14 = vmul.f32 %v11642_v62, %v2221_v50  ;;  %vm11737_vm8 = vmor %vm2224_vm5, %vm2225_vm12 }
 0x290   :  { %v5472_v63 = vmul.f32 %v7614_v12, %v5471_v60  ;;  %v3772_v37 = vadd.f32 %v9913_v2, %v3523_v46  ;;  %v5961_v43 = vor.u32 1.1754944e-38, %v5960_v41  ;;  %vm11741_vm14 = vcmp.eq.f32.partialorder %v2228_v8, 8.507059e+37  ;;  %v909_v60 = vpop.f32.mrf.mxu3 }
 0x291   :  { %v5952_v48 = vmul.f32 %v7616_v17, %v5951_v49  ;;  %v2231_v34 = vor.u32 1.1754944e-38, %v2230_v51  ;;  %v2223_v16 = vadd.f32 %v11642_v62, %v2222_v14  ;;  %7623 = vpow2.f32 %v6913_v30  ;;  %v3587_v49 = vpop.xlane.xlu1 %3586 }
 0x292   :  { %v5473_v31 = vadd.f32 %v7614_v12, %v5472_v63  ;;  %v7028_v55 = vmul.f32 -1.442695, %v3772_v37  ;;  %v6978_v20 = vmul.f32 -1.442695, %v11689_v54  ;;  %vm5489_vm15 = vweird.f32 %v11614_v45 }
 0x293   :  { %v5953_v10 = vadd.f32 %v7616_v17, %v5952_v48  ;;  %v2227_v59 = vsel %vm11737_vm8, %v11642_v62, %v2223_v16  ;;  %v11769_v62 = vld [vmem:[%s16119_s3] ss:$0 sm:$0xff]  ;;  %v3804_v41 = vadd.f32 %v9913_v2, %v3587_v49  ;;  %vm5490_vm13 = vweird.f32 %v11668_v23 }
 0x294   :  { %v5477_v4 = vsel %vm5476_vm9, %v7614_v12, %v5473_v31  ;;  %v5486_v12 = vsub.f32 1.0, %v11693_v53  ;;  %7625 = vpow2.f32 %v7028_v55  ;;  %v2232_v30 = vsel %vm11741_vm14, %v2231_v34, %v2227_v59  ;;  %v3525_v53 = vpop.xlane.xlu0 %3524  ;;  %vm11813_vm8 = vmor %vm5489_vm15, %vm5490_vm13 }
 0x295   :  { %v5482_v13 = vsel %vm5479_vm3, %v5481_v32, %v5477_v4  ;;  %v5957_v28 = vsel %vm11729_vm4, %v7616_v17, %v5953_v10  ;;  %7627 = vpow2.f32 %v6977_v24  ;;  %v910_v24 = vadd.f32 %v11659_v58, %v909_v60 }
 0x296   :  { %v6621_v21 = vperm.slane %v5482_v13, %v11499_v61  ;;  %v5962_v42 = vsel %vm5959_vm0, %v5961_v43, %v5957_v28  ;;  %7629 = vrcp.f32 %v11686_v29  ;;  %v5487_v63 = vmul.f32 %v11668_v23, %v5486_v12 }
 0x297   :  { %v6683_v56 = vperm.slane %v5962_v42, %v11499_v61  ;;  %v3773_v54 = vadd.f32 %v9913_v2, %v3525_v53  ;;  %v1755_v46 = vmul.f32 %v11704_v35, %v11628_v36  ;;  %v7624_v48 = vpop.eup %7623  ;;  %v7060_v50 = vmul.f32 -1.442695, %v3804_v41 }
 0x298   :  { %v11756_v17 = vsel %vm16124_vm10, %v6621_v21, %v11496_v22  ;;  %v3429_v22 = vmul.f32 %v11769_v62, %v2232_v30  ;;  %vm1759_vm5 = vweird.f32 %v11628_v36  ;;  %v1763_v8 = vand.u32 2147483647, %v11628_v36 }
 0x299   :  { %v11764_v0 = vsel %vm16124_vm10, %v6683_v56, %v11608_v5  ;;  %v5493_v5 = vand.u32 2147483647, %v11614_v45  ;;  %v1765_v31 = vand.u32 2147483648, %v11628_v36  ;;  %v7029_v51 = vmul.f32 -1.442695, %v3773_v54 }
 0x29a   :  { %16449 = vst [vmem:[#allocation12_spill] sm:$0xff] %v11764_v0  ;;  %3608 = vadd.xlane.f32.xlu0 %v3429_v22  ;;  %v7626_v32 = vpop.eup %7625  ;;  %v1756_v10 = vsub.f32 1.0, %v1755_v46  ;;  %vm1760_vm12 = vweird.f32 %v11704_v35  ;;  %v2235_v1 = vmul.f32 %v11648_v33, %v11603_v3  ;;  %v5488_v37 = vadd.f32 %v11668_v23, %v5487_v63 }
 0x29b   :  { %v11787_v14 = vpop.eup %7627  ;;  %v11790_v4 = vadd.f32 1.0, %v7626_v32  ;;  %7631 = vpow2.f32 %v7060_v50  ;;  %vm2239_vm9 = vweird.f32 %v11603_v3  ;;  %vm2240_vm3 = vweird.f32 %v11648_v33  ;;  %vm11801_vm4 = vmor %vm1759_vm5, %vm1760_vm12 }
 0x29c   :  { %v11793_v43 = vpop.eup %7629  ;;  %7633 = vpow2.f32 %v7029_v51  ;;  %v1757_v39 = vmul.f32 %v11704_v35, %v1756_v10  ;;  %v2236_v44 = vsub.f32 1.0, %v2235_v1  ;;  %v5495_v34 = vand.u32 2147483648, %v11614_v45  ;;  %vm11826_vm14 = vmor %vm2239_vm9, %vm2240_vm3 }
 0x29d   :  { %7635 = vrcp.f32 %v11790_v4  ;;  %vm11805_vm0 = vcmp.eq.f32.partialorder %v1763_v8, 8.507059e+37  ;;  %v1766_v16 = vor.u32 1.1754944e-38, %v1765_v31  ;;  %v2243_v21 = vand.u32 2147483647, %v11603_v3 }
 0x29e   :  { %v1758_v12 = vadd.f32 %v11704_v35, %v1757_v39  ;;  %v2237_v36 = vmul.f32 %v11648_v33, %v2236_v44  ;;  %v2245_v42 = vand.u32 2147483648, %v11603_v3  ;;  %7637 = vpow2.f32 %v6978_v20 }
 0x29f   :  { %v5492_v60 = vsel %vm11813_vm8, %v11668_v23, %v5488_v37  ;;  %vm2244_vm15 = vcmp.eq.f32.partialorder %v2243_v21, 8.507059e+37  ;;  %v7009_v53 = vmul.f32 -1.442695, %v910_v24  ;;  %v11835_v20 = vadd.s32 4294967232, %v10128_v47 }
 0x2a0   :  { %v1762_v56 = vsel %vm11801_vm4, %v11704_v35, %v1758_v12  ;;  %v2238_v59 = vadd.f32 %v11648_v33, %v2237_v36  ;;  %v2246_v49 = vor.u32 1.1754944e-38, %v2245_v42  ;;  %v5496_v23 = vor.u32 1.1754944e-38, %v5495_v34  ;;  %v3589_v34 = vpop.xlane.xlu2 %3588 }
 0x2a1   :  { %v7632_v30 = vpop.eup %7631  ;;  %16458 = vst [vmem:[#allocation13_spill] sm:$0xff] %v11835_v20  ;;  %v1767_v3 = vsel %vm11805_vm0, %v1766_v16, %v1762_v56  ;;  %vm5494_vm13 = vcmp.eq.f32.partialorder %v5493_v5, 8.507059e+37  ;;  %v2715_v8 = vmul.f32 %v11711_v11, %v11644_v9  ;;  %v4533_v5 = vand.u32 2147483647, %v11790_v4 }
 0x2a2   :  { %v7634_v22 = vpop.eup %7633  ;;  %v11839_v63 = vadd.f32 1.0, %v7632_v30  ;;  %v3398_v41 = vmul.f32 %v11769_v62, %v1767_v3  ;;  %v2242_v35 = vsel %vm11826_vm14, %v11648_v33, %v2238_v59  ;;  %v11845_v46 = vsel %vm5494_vm13, %v5496_v23, %v5492_v60 }
 0x2a3   :  { %v7636_v54 = vpop.eup %7635  ;;  %v11847_v24 = vadd.f32 1.0, %v7634_v22  ;;  %v2247_v50 = vsel %vm2244_vm15, %v2246_v49, %v2242_v35  ;;  %v4535_v32 = vand.u32 2147483648, %v11790_v4  ;;  %v11857_v33 = vadd.f32 1.0, %v7624_v48  ;;  %v3653_v22 = vpop.xlane.xlu1 %3652 }
 0x2a4   :  { %v4525_v31 = vmul.f32 %v7636_v54, %v11790_v4  ;;  %7639 = vrcp.f32 %v11839_v63  ;;  %3546 = vadd.xlane.f32.xlu2 %v3398_v41  ;;  %v11855_v51 = vpop.eup %7637  ;;  %v6623_v10 = vperm.slane %v11845_v46, %v11835_v20  ;;  %v3430_v37 = vmul.f32 %v11769_v62, %v2247_v50 }
 0x2a5   :  { %7641 = vrcp.f32 %v11847_v24  ;;  %vm16123_vm5 = vcmask 589312   ;;  %vm4529_vm12 = vweird.f32 %v11790_v4  ;;  %v11865_v39 = vadd.s32 4294967224, %v10128_v47 }
 0x2a6   :  { %7643 = vpow2.f32 %v7009_v53  ;;  %v4526_v1 = vsub.f32 1.0, %v4525_v31  ;;  %v2716_v44 = vsub.f32 1.0, %v2715_v8  ;;  %vm4530_vm9 = vweird.f32 %v7636_v54  ;;  %3610 = vadd.xlane.f32.xlu1 %v3430_v37 }
 0x2a7   :  { %16459 = vst [vmem:[#allocation14_spill] sm:$0xff] %v11865_v39  ;;  %vm11867_vm3 = vcmp.eq.f32.partialorder %v4533_v5, 8.507059e+37  ;;  %v4536_v28 = vor.u32 1.1754944e-38, %v4535_v32  ;;  %vm5009_vm4 = vweird.f32 %v11839_v63  ;;  %vm2719_vm0 = vweird.f32 %v11644_v9  ;;  %vm4531_vm15 = vmor %vm4529_vm12, %vm4530_vm9 }
 0x2a8   :  { %v4527_v13 = vmul.f32 %v7636_v54, %v4526_v1  ;;  %v2717_v16 = vmul.f32 %v11711_v11, %v2716_v44  ;;  %vm2720_vm8 = vweird.f32 %v11711_v11  ;;  %v2723_v55 = vand.u32 2147483647, %v11644_v9 }
 0x2a9   :  { %v5013_v21 = vand.u32 2147483647, %v11839_v63  ;;  %vm11877_vm14 = vmor %vm2719_vm0, %vm2720_vm8  ;;  %v2725_v60 = vand.u32 2147483648, %v11644_v9  ;;  %v3805_v45 = vadd.f32 %v9913_v2, %v3589_v34  ;;  %v5015_v49 = vand.u32 2147483648, %v11839_v63 }
 0x2aa   :  { %v7640_v12 = vpop.eup %7639  ;;  %v4528_v36 = vadd.f32 %v7636_v54, %v4527_v13  ;;  %vm4544_vm13 = vweird.f32 %v11847_v24  ;;  %v2718_v30 = vadd.f32 %v11711_v11, %v2717_v16  ;;  %v4548_v3 = vand.u32 2147483647, %v11847_v24 }
 0x2ab   :  { %v7642_v56 = vpop.eup %7641  ;;  %v5005_v59 = vmul.f32 %v7640_v12, %v11839_v63  ;;  %vm2724_vm0 = vcmp.eq.f32.partialorder %v2723_v55, 8.507059e+37  ;;  %vm16131_vm12 = vcmask 654912   ;;  %v2726_v46 = vor.u32 1.1754944e-38, %v2725_v60 }
 0x2ac   :  { %v11890_v53 = vpop.eup %7643  ;;  %v4532_v23 = vsel %vm4531_vm15, %v7636_v54, %v4528_v36  ;;  %v4540_v9 = vmul.f32 %v7642_v56, %v11847_v24  ;;  %v2722_v35 = vsel %vm11877_vm14, %v11711_v11, %v2718_v30  ;;  %v4550_v54 = vand.u32 2147483648, %v11847_v24  ;;  %v3591_v11 = vpop.xlane.xlu0 %3590 }
 0x2ad   :  { %v4537_v4 = vsel %vm11867_vm3, %v4536_v28, %v4532_v23  ;;  %v5006_v41 = vsub.f32 1.0, %v5005_v59  ;;  %v7061_v31 = vmul.f32 -1.442695, %v3805_v45  ;;  %vm5010_vm9 = vweird.f32 %v7640_v12 }
 0x2ae   :  { %v6484_v50 = vperm.slane %v4537_v4, %v11835_v20  ;;  %v4541_v8 = vsub.f32 1.0, %v4540_v9  ;;  %v2727_v32 = vsel %vm2724_vm0, %v2726_v46, %v2722_v35  ;;  %v3837_v1 = vadd.f32 %v9913_v2, %v3653_v22  ;;  %vm5011_vm14 = vmor %vm5009_vm4, %vm5010_vm9 }
 0x2af   :  { %v5007_v5 = vmul.f32 %v7640_v12, %v5006_v41  ;;  %vm4545_vm3 = vweird.f32 %v7642_v56  ;;  %v3462_v34 = vmul.f32 %v11769_v62, %v2727_v32  ;;  %vm5014_vm8 = vcmp.eq.f32.partialorder %v5013_v21, 8.507059e+37 }
 0x2b0   :  { %v6486_v37 = vsel %vm16123_vm5, %v6484_v50, %v11621_v25  ;;  %v4542_v44 = vmul.f32 %v7642_v56, %v4541_v8  ;;  %v7093_v48 = vmul.f32 -1.442695, %v3837_v1  ;;  %v11907_v28 = vsel %vm16123_vm5, %v6623_v10, %v11756_v17  ;;  %vm4546_vm15 = vmor %vm4544_vm13, %vm4545_vm3 }
 0x2b1   :  { %v5008_v13 = vadd.f32 %v7640_v12, %v5007_v5  ;;  %v5016_v16 = vor.u32 1.1754944e-38, %v5015_v49  ;;  %v4551_v36 = vor.u32 1.1754944e-38, %v4550_v54  ;;  %3674 = vadd.xlane.f32.xlu0 %v3462_v34  ;;  %7645 = vpow2.f32 %v7061_v31  ;;  %v912_v54 = vpop.f32.mrf.mxu3  ;;  %v624_v34 = vpop.f32.mrf.mxu0 }
 0x2b2   :  { %v4543_v55 = vadd.f32 %v7642_v56, %v4542_v44  ;;  %7647 = vpow2.f32 %v7093_v48  ;;  %v3806_v21 = vadd.f32 %v9913_v2, %v3591_v11  ;;  %v2250_v42 = vmul.f32 %v11793_v43, %v11686_v29 }
 0x2b3   :  { %v5012_v25 = vsel %vm5011_vm14, %v7640_v12, %v5008_v13  ;;  %vm4549_vm0 = vcmp.eq.f32.partialorder %v4548_v3, 8.507059e+37  ;;  %vm2254_vm4 = vweird.f32 %v11686_v29  ;;  %vm2255_vm13 = vweird.f32 %v11793_v43 }
 0x2b4   :  { %v5017_v17 = vsel %vm5014_vm8, %v5016_v16, %v5012_v25  ;;  %v4547_v10 = vsel %vm4546_vm15, %v7642_v56, %v4543_v55  ;;  %v7062_v45 = vmul.f32 -1.442695, %v3806_v21  ;;  %v2251_v59 = vsub.f32 1.0, %v2250_v42  ;;  %vm11947_vm8 = vmor %vm2254_vm4, %vm2255_vm13 }
 0x2b5   :  { %v6561_v63 = vperm.slane %v5017_v17, %v11835_v20  ;;  %v4552_v60 = vsel %vm4549_vm0, %v4551_v36, %v4547_v10  ;;  %v2260_v24 = vand.u32 2147483648, %v11686_v29  ;;  %v3195_v49 = vmul.f32 %v11718_v52, %v11654_v15 }
 0x2b6   :  { %v6488_v12 = vperm.slane %v4552_v60, %v11865_v39  ;;  %7649 = vpow2.f32 %v7062_v45  ;;  %v2252_v30 = vmul.f32 %v11793_v43, %v2251_v59  ;;  %v2258_v23 = vand.u32 2147483647, %v11686_v29 }
 0x2b7   :  { %v11925_v56 = vsel %vm16123_vm5, %v6561_v63, %v11516_v19  ;;  %v7646_v9 = vpop.eup %7645  ;;  %v11930_v3 = vadd.f32 1.0, %v11787_v14  ;;  %v3196_v4 = vsub.f32 1.0, %v3195_v49  ;;  %vm3199_vm9 = vweird.f32 %v11654_v15 }
 0x2b8   :  { %v11933_v22 = vsel %vm16131_vm12, %v6488_v12, %v6486_v37  ;;  %v7648_v41 = vpop.eup %7647  ;;  %v11935_v35 = vadd.f32 1.0, %v7646_v9  ;;  %v2253_v46 = vadd.f32 %v11793_v43, %v2252_v30  ;;  %vm3200_vm3 = vweird.f32 %v11718_v52 }
 0x2b9   :  { %7651 = vrcp.f32 %v11857_v33  ;;  %v11941_v19 = vadd.f32 1.0, %v7648_v41  ;;  %v2261_v50 = vor.u32 1.1754944e-38, %v2260_v24  ;;  %v3197_v8 = vmul.f32 %v11718_v52, %v3196_v4  ;;  %vm11956_vm15 = vmor %vm3199_vm9, %vm3200_vm3 }
 0x2ba   :  { %7653 = vrcp.f32 %v11935_v35  ;;  %vm2259_vm14 = vcmp.eq.f32.partialorder %v2258_v23, 8.507059e+37  ;;  %v3203_v31 = vand.u32 2147483647, %v11654_v15  ;;  %v3205_v5 = vand.u32 2147483648, %v11654_v15 }
 0x2bb   :  { %7655 = vrcp.f32 %v11941_v19  ;;  %v11962_v1 = vadd.f32 1.0, %v11855_v51  ;;  %v2257_v37 = vsel %vm11947_vm8, %v11793_v43, %v2253_v46  ;;  %v3198_v44 = vadd.f32 %v11718_v52, %v3197_v8 }
 0x2bc   :  { %v7650_v29 = vpop.eup %7649  ;;  %7657 = vrcp.f32 %v11930_v3  ;;  %v11969_v15 = vadd.f32 1.0, %v11890_v53  ;;  %v913_v11 = vadd.f32 %v11659_v58, %v912_v54  ;;  %v2262_v48 = vsel %vm2259_vm14, %v2261_v50, %v2257_v37  ;;  %v3527_v37 = vpop.xlane.xlu1 %3526 }
 0x2bd   :  { %v11972_v13 = vadd.f32 1.0, %v7650_v29  ;;  %v3431_v16 = vmul.f32 %v11769_v62, %v2262_v48  ;;  %v3202_v51 = vsel %vm11956_vm15, %v11718_v52, %v3198_v44  ;;  %vm3204_vm0 = vcmp.eq.f32.partialorder %v3203_v31, 8.507059e+37 }
 0x2be   :  { %v3206_v55 = vor.u32 1.1754944e-38, %v3205_v5  ;;  %v11982_v36 = vadd.f32 %v11659_v58, %v624_v34  ;;  %v5028_v25 = vand.u32 2147483647, %v11935_v35  ;;  %v5030_v21 = vand.u32 2147483648, %v11935_v35 }
 0x2bf   :  { %v11978_v43 = vpop.eup %7651  ;;  %7659 = vrcp.f32 %v11972_v13  ;;  %3612 = vadd.xlane.f32.xlu2 %v3431_v16  ;;  %v5508_v10 = vand.u32 2147483647, %v11941_v19  ;;  %v5510_v63 = vand.u32 2147483648, %v11941_v19  ;;  %v7010_v45 = vmul.f32 -1.442695, %v913_v11 }
 0x2c0   :  { %v7654_v53 = vpop.eup %7653  ;;  %v3207_v42 = vsel %vm3204_vm0, %v3206_v55, %v3202_v51  ;;  %7661 = vrcp.f32 %v11962_v1  ;;  %vm5024_vm4 = vweird.f32 %v11935_v35  ;;  %vm5504_vm13 = vweird.f32 %v11941_v19 }
 0x2c1   :  { %v7656_v17 = vpop.eup %7655  ;;  %v5020_v52 = vmul.f32 %v7654_v53, %v11935_v35  ;;  %7663 = vrcp.f32 %v11969_v15  ;;  %v3494_v12 = vmul.f32 %v11769_v62, %v3207_v42  ;;  %v11998_v49 = vadd.s32 4294967216, %v10128_v47 }
 0x2c2   :  { %v11990_v60 = vpop.eup %7657  ;;  %v5500_v59 = vmul.f32 %v7656_v17, %v11941_v19  ;;  %vm12000_vm9 = vcmp.eq.f32.partialorder %v5028_v25, 8.507059e+37  ;;  %v5031_v23 = vor.u32 1.1754944e-38, %v5030_v21  ;;  %v1770_v4 = vmul.f32 %v11978_v43, %v11857_v33 }
 0x2c3   :  { %v5021_v24 = vsub.f32 1.0, %v5020_v52  ;;  %16468 = vst [vmem:[#allocation15_spill] sm:$0xff] %v11998_v49  ;;  %3738 = vadd.xlane.f32.xlu1 %v3494_v12  ;;  %vm5025_vm3 = vweird.f32 %v7654_v53  ;;  %vm12006_vm8 = vcmp.eq.f32.partialorder %v5508_v10, 8.507059e+37  ;;  %v5511_v50 = vor.u32 1.1754944e-38, %v5510_v63 }
 0x2c4   :  { %v5501_v9 = vsub.f32 1.0, %v5500_v59  ;;  %vm5505_vm14 = vweird.f32 %v7656_v17  ;;  %v5043_v31 = vand.u32 2147483647, %v11972_v13  ;;  %v1771_v29 = vsub.f32 1.0, %v1770_v4  ;;  %vm5026_vm5 = vmor %vm5024_vm4, %vm5025_vm3 }
 0x2c5   :  { %v7660_v41 = vpop.eup %7659  ;;  %v5022_v46 = vmul.f32 %v7654_v53, %v5021_v24  ;;  %vm1774_vm15 = vweird.f32 %v11857_v33  ;;  %vm1775_vm0 = vweird.f32 %v11978_v43  ;;  %v1778_v48 = vand.u32 2147483647, %v11857_v33  ;;  %vm5506_vm10 = vmor %vm5504_vm13, %vm5505_vm14 }
 0x2c6   :  { %v5502_v8 = vmul.f32 %v7656_v17, %v5501_v9  ;;  %v5035_v54 = vmul.f32 %v7660_v41, %v11972_v13  ;;  %v12012_v5 = vpop.eup %7661  ;;  %v1780_v16 = vand.u32 2147483648, %v11857_v33  ;;  %vm5040_vm6 = vweird.f32 %v7660_v41  ;;  %vm12033_vm4 = vmor %vm1774_vm15, %vm1775_vm0 }
 0x2c7   :  { %v5023_v32 = vadd.f32 %v7654_v53, %v5022_v46  ;;  %v12016_v44 = vpop.eup %7663  ;;  %v5045_v55 = vand.u32 2147483648, %v11972_v13  ;;  %v1772_v25 = vmul.f32 %v11978_v43, %v1771_v29  ;;  %v3774_v19 = vadd.f32 %v9913_v2, %v3527_v37 }
 0x2c8   :  { %v5503_v34 = vadd.f32 %v7656_v17, %v5502_v8  ;;  %v5036_v11 = vsub.f32 1.0, %v5035_v54  ;;  %v1781_v59 = vor.u32 1.1754944e-38, %v1780_v16  ;;  %7665 = vpow2.f32 %v7010_v45 }
 0x2c9   :  { %v5027_v51 = vsel %vm5026_vm5, %v7654_v53, %v5023_v32  ;;  %v1773_v63 = vadd.f32 %v11978_v43, %v1772_v25  ;;  %vm1779_vm5 = vcmp.eq.f32.partialorder %v1778_v48, 8.507059e+37  ;;  %v5046_v24 = vor.u32 1.1754944e-38, %v5045_v55 }
 0x2ca   :  { %v5032_v35 = vsel %vm12000_vm9, %v5031_v23, %v5027_v51  ;;  %v5507_v21 = vsel %vm5506_vm10, %v7656_v17, %v5503_v34  ;;  %v5037_v42 = vmul.f32 %v7660_v41, %v5036_v11  ;;  %vm5039_vm10 = vweird.f32 %v11972_v13 }
 0x2cb   :  { %v6563_v52 = vperm.slane %v5032_v35, %v11865_v39  ;;  %v5512_v10 = vsel %vm12006_vm8, %v5511_v50, %v5507_v21  ;;  %vm5041_vm13 = vmor %vm5039_vm10, %vm5040_vm6  ;;  %v1777_v30 = vsel %vm12033_vm4, %v11978_v43, %v1773_v63  ;;  %vm5044_vm9 = vcmp.eq.f32.partialorder %v5043_v31, 8.507059e+37  ;;  %v720_v31 = vpop.f32.mrf.mxu1 }
 0x2cc   :  { %v6625_v17 = vperm.slane %v5512_v10, %v11865_v39  ;;  %v5038_v12 = vadd.f32 %v7660_v41, %v5037_v42  ;;  %v7030_v4 = vmul.f32 -1.442695, %v3774_v19  ;;  %vm16128_vm3 = vcmask 720512  }
 0x2cd   :  { %v6564_v33 = vsel %vm16131_vm12, %v6563_v52, %v11925_v56  ;;  %v1782_v45 = vsel %vm1779_vm5, %v1781_v59, %v1777_v30  ;;  %v2745_v14 = vmul.f32 %v12012_v5, %v11962_v1  ;;  %v6914_v50 = vmul.f32 -1.442695, %v11982_v36 }
 0x2ce   :  { %v12052_v23 = vsel %vm16131_vm12, %v6625_v17, %v11907_v28  ;;  %v5042_v9 = vsel %vm5041_vm13, %v7660_v41, %v5038_v12  ;;  %v3399_v56 = vmul.f32 %v11769_v62, %v1782_v45  ;;  %7667 = vpow2.f32 %v7030_v4  ;;  %v7666_v28 = vpop.eup %7665 }
 0x2cf   :  { %16475 = vst [vmem:[#allocation16_spill] sm:$0xff] %v12052_v23  ;;  %v5047_v13 = vsel %vm5044_vm9, %v5046_v24, %v5042_v9  ;;  %v2746_v41 = vsub.f32 1.0, %v2745_v14  ;;  %vm2749_vm6 = vweird.f32 %v11962_v1  ;;  %vm2750_vm8 = vweird.f32 %v12012_v5 }
 0x2d0   :  { %v6565_v46 = vperm.slane %v5047_v13, %v11998_v49  ;;  %3548 = vadd.xlane.f32.xlu0 %v3399_v56  ;;  %v2730_v8 = vmul.f32 %v11990_v60, %v11930_v3  ;;  %v2755_v54 = vand.u32 2147483648, %v11962_v1  ;;  %v2753_v36 = vand.u32 2147483647, %v11962_v1  ;;  %vm12071_vm14 = vmor %vm2749_vm6, %vm2750_vm8 }
 0x2d1   :  { %v2747_v32 = vmul.f32 %v12012_v5, %v2746_v41  ;;  %7669 = vpow2.f32 %v6914_v50  ;;  %v12069_v37 = vadd.f32 1.0, %v7666_v28  ;;  %vm2734_vm15 = vweird.f32 %v11930_v3 }
 0x2d2   :  { %v12060_v43 = vsel %vm16128_vm3, %v6565_v46, %v6564_v33  ;;  %v2731_v29 = vsub.f32 1.0, %v2730_v8  ;;  %vm2735_vm0 = vweird.f32 %v11990_v60  ;;  %v2740_v16 = vand.u32 2147483648, %v11930_v3  ;;  %v627_v46 = vpop.f32.mrf.mxu0 }
 0x2d3   :  { %v2748_v11 = vadd.f32 %v12012_v5, %v2747_v32  ;;  %v3210_v1 = vmul.f32 %v12016_v44, %v11969_v15  ;;  %v721_v55 = vadd.f32 %v11659_v58, %v720_v31  ;;  %v2756_v25 = vor.u32 1.1754944e-38, %v2755_v54  ;;  %vm2736_vm10 = vmor %vm2734_vm15, %vm2735_vm0  ;;  %v723_v28 = vpop.f32.mrf.mxu1  ;;  %v819_v32 = vpop.f32.mrf.mxu2 }
 0x2d4   :  { %v2732_v48 = vmul.f32 %v11990_v60, %v2731_v29  ;;  %v7668_v51 = vpop.eup %7667  ;;  %v2738_v35 = vand.u32 2147483647, %v11930_v3  ;;  %vm2754_vm4 = vcmp.eq.f32.partialorder %v2753_v36, 8.507059e+37  ;;  %7671 = vrcp.f32 %v12069_v37 }
 0x2d5   :  { %v12084_v21 = vadd.f32 1.0, %v7668_v51  ;;  %v2752_v42 = vsel %vm12071_vm14, %v12012_v5, %v2748_v11  ;;  %v2741_v19 = vor.u32 1.1754944e-38, %v2740_v16  ;;  %v3211_v52 = vsub.f32 1.0, %v3210_v1 }
 0x2d6   :  { %v2733_v53 = vadd.f32 %v11990_v60, %v2732_v48  ;;  %v6946_v63 = vmul.f32 -1.442695, %v721_v55  ;;  %v2757_v59 = vsel %vm2754_vm4, %v2756_v25, %v2752_v42  ;;  %vm2739_vm5 = vcmp.eq.f32.partialorder %v2738_v35, 8.507059e+37 }
 0x2d7   :  { %7673 = vrcp.f32 %v12084_v21  ;;  %v7670_v10 = vpop.eup %7669  ;;  %v3464_v17 = vmul.f32 %v11769_v62, %v2757_v59  ;;  %vm3214_vm13 = vweird.f32 %v11969_v15  ;;  %vm3215_vm9 = vweird.f32 %v12016_v44 }
 0x2d8   :  { %v2737_v5 = vsel %vm2736_vm10, %v11990_v60, %v2733_v53  ;;  %v3212_v3 = vmul.f32 %v12016_v44, %v3211_v52  ;;  %v3218_v33 = vand.u32 2147483647, %v11969_v15  ;;  %v12102_v30 = vadd.f32 1.0, %v7670_v10  ;;  %vm12105_vm6 = vmor %vm3214_vm13, %vm3215_vm9  ;;  %v915_v53 = vpop.f32.mrf.mxu3 }
 0x2d9   :  { %3678 = vadd.xlane.f32.xlu2 %v3464_v17  ;;  %v2742_v12 = vsel %vm2739_vm5, %v2741_v19, %v2737_v5  ;;  %7675 = vpow2.f32 %v6946_v63  ;;  %v892_v13 = vadd.f32 %v11659_v58, %v10544_v7  ;;  %v3220_v14 = vand.u32 2147483648, %v11969_v15  ;;  %v12132_v19 = vpop.xlane.xlu2 %3716 }
 0x2da   :  { %v12100_v24 = vpop.eup %7671  ;;  %v3463_v9 = vmul.f32 %v11769_v62, %v2742_v12  ;;  %v3213_v45 = vadd.f32 %v12016_v44, %v3212_v3  ;;  %vm3219_vm8 = vcmp.eq.f32.partialorder %v3218_v33, 8.507059e+37  ;;  %7677 = vrcp.f32 %v12102_v30  ;;  %v630_v17 = vpop.f32.mrf.mxu0 }
 0x2db   :  { %v3221_v8 = vor.u32 1.1754944e-38, %v3220_v14  ;;  %v3225_v7 = vmul.f32 %v12100_v24, %v12069_v37  ;;  %v7003_v54 = vmul.f32 -1.442695, %v892_v13  ;;  %v628_v31 = vadd.f32 %v11659_v58, %v627_v46  ;;  %v12138_v12 = vpop.xlane.xlu0 %3656 }
 0x2dc   :  { %3676 = vadd.xlane.f32.xlu1 %v3463_v9  ;;  %v3217_v50 = vsel %vm12105_vm6, %v12016_v44, %v3213_v45  ;;  %v4565_v36 = vand.u32 2147483648, %v12084_v21  ;;  %v4563_v44 = vand.u32 2147483647, %v12084_v21  ;;  %v724_v11 = vadd.f32 %v11659_v58, %v723_v28 }
 0x2dd   :  { %v7674_v60 = vpop.eup %7673  ;;  %v3222_v34 = vsel %vm3219_vm8, %v3221_v8, %v3217_v50  ;;  %v3868_v48 = vadd.f32 %v9913_v2, %v11708_v38  ;;  %vm4559_vm15 = vweird.f32 %v12084_v21  ;;  %v3226_v51 = vsub.f32 1.0, %v3225_v7  ;;  %v822_v50 = vpop.f32.mrf.mxu2 }
 0x2de   :  { %v4555_v56 = vmul.f32 %v7674_v60, %v12084_v21  ;;  %vm4560_vm14 = vweird.f32 %v7674_v60  ;;  %v3495_v16 = vmul.f32 %v11769_v62, %v3222_v34  ;;  %7679 = vpow2.f32 %v7003_v54 }
 0x2df   :  { %v7676_v15 = vpop.eup %7675  ;;  %v6915_v25 = vmul.f32 -1.442695, %v628_v31  ;;  %vm4561_vm0 = vmor %vm4559_vm15, %vm4560_vm14  ;;  %v4566_v35 = vor.u32 1.1754944e-38, %v4565_v36  ;;  %vm4564_vm4 = vcmp.eq.f32.partialorder %v4563_v44, 8.507059e+37  ;;  %v3227_v38 = vmul.f32 %v12100_v24, %v3226_v51  ;;  %v12169_v44 = vpop.xlane.xlu1 %3718 }
 0x2e0   :  { %v4556_v41 = vsub.f32 1.0, %v4555_v56  ;;  %v12128_v55 = vadd.f32 1.0, %v7676_v15  ;;  %3740 = vadd.xlane.f32.xlu0 %v3495_v16  ;;  %v12130_v42 = vpop.eup %7677  ;;  %vm3229_vm10 = vweird.f32 %v12069_v37  ;;  %v6947_v21 = vmul.f32 -1.442695, %v724_v11 }
 0x2e1   :  { %v7124_v10 = vmul.f32 -1.442695, %v3868_v48  ;;  %v820_v63 = vadd.f32 %v11659_v58, %v819_v32  ;;  %v3228_v3 = vadd.f32 %v12100_v24, %v3227_v38  ;;  %vm3230_vm5 = vweird.f32 %v12100_v24  ;;  %v12166_v15 = vpop.xlane.xlu2 %3654 }
 0x2e2   :  { %v4557_v29 = vmul.f32 %v7674_v60, %v4556_v41  ;;  %v3233_v33 = vand.u32 2147483647, %v12069_v37  ;;  %7681 = vpow2.f32 %v6915_v25  ;;  %v916_v9 = vadd.f32 %v11659_v58, %v915_v53  ;;  %vm12144_vm13 = vmor %vm3229_vm10, %vm3230_vm5 }
 0x2e3   :  { %v1785_v13 = vmul.f32 %v12130_v42, %v12102_v30  ;;  %7683 = vrcp.f32 %v12128_v55  ;;  %v6979_v56 = vmul.f32 -1.442695, %v820_v63  ;;  %v631_v14 = vadd.f32 %v11659_v58, %v630_v17 }
 0x2e4   :  { %v4558_v1 = vadd.f32 %v7674_v60, %v4557_v29  ;;  %v7680_v46 = vpop.eup %7679  ;;  %v3232_v28 = vsel %vm12144_vm13, %v12100_v24, %v3228_v3  ;;  %vm3234_vm9 = vcmp.eq.f32.partialorder %v3233_v33, 8.507059e+37  ;;  %7685 = vpow2.f32 %v6947_v21 }
 0x2e5   :  { %v1786_v8 = vsub.f32 1.0, %v1785_v13  ;;  %7687 = vpow2.f32 %v7124_v10  ;;  %v7011_v7 = vmul.f32 -1.442695, %v916_v9  ;;  %vm1789_vm6 = vweird.f32 %v12102_v30  ;;  %v825_v21 = vpop.f32.mrf.mxu2 }
 0x2e6   :  { %v4562_v52 = vsel %vm4561_vm0, %v7674_v60, %v4558_v1  ;;  %v3235_v60 = vand.u32 2147483648, %v12069_v37  ;;  %v726_v37 = vpop.f32.mrf.mxu1  ;;  %vm1790_vm8 = vweird.f32 %v12130_v42  ;;  %7689 = vpow2.f32 %v6979_v56 }
 0x2e7   :  { %v4567_v59 = vsel %vm4564_vm4, %v4566_v35, %v4562_v52  ;;  %v6916_v32 = vmul.f32 -1.442695, %v631_v14  ;;  %v727_v36 = vadd.f32 %v11659_v58, %v726_v37  ;;  %v1793_v29 = vand.u32 2147483647, %v12102_v30  ;;  %vm12173_vm14 = vmor %vm1789_vm6, %vm1790_vm8  ;;  %v12179_v58 = vpop.xlane.xlu0 %3720 }
 0x2e8   :  { %v6492_v5 = vperm.slane %v4567_v59, %v11998_v49  ;;  %v3236_v41 = vor.u32 1.1754944e-38, %v3235_v60  ;;  %v7682_v31 = vpop.eup %7681  ;;  %7691 = vpow2.f32 %v7011_v7  ;;  %v1795_v35 = vand.u32 2147483648, %v12102_v30  ;;  %v12197_v30 = vld [vmem:[%s16118_s2] ss:$0 sm:$0xff]  ;;  %v3593_v7 = vpop.xlane.xlu1 %3592 }
 0x2e9   :  { %v12164_v24 = vpop.eup %7683  ;;  %v12177_v1 = vadd.f32 1.0, %v7682_v31  ;;  %7693 = vpow2.f32 %v6916_v32  ;;  %v6948_v25 = vmul.f32 -1.442695, %v727_v36  ;;  %v12182_v53 = vadd.f32 1.0, %v7680_v46 }
 0x2ea   :  { %v12154_v45 = vsel %vm16128_vm3, %v6492_v5, %v11933_v22  ;;  %v3237_v54 = vsel %vm3234_vm9, %v3236_v41, %v3232_v28  ;;  %v1787_v22 = vmul.f32 %v12130_v42, %v1786_v8  ;;  %v7686_v16 = vpop.eup %7685  ;;  %vm1794_vm15 = vcmp.eq.f32.partialorder %v1793_v29, 8.507059e+37  ;;  %v3529_v28 = vpop.xlane.xlu2 %3528 }
 0x2eb   :  { %v3496_v34 = vmul.f32 %v11769_v62, %v3237_v54  ;;  %v7688_v51 = vpop.eup %7687  ;;  %16484 = vst [vmem:[#allocation17_spill] sm:$0xff] %v12182_v53  ;;  %v1796_v10 = vor.u32 1.1754944e-38, %v1795_v35  ;;  %v2265_v63 = vmul.f32 %v12164_v24, %v12128_v55  ;;  %v12189_v59 = vadd.f32 1.0, %v7686_v16  ;;  %v918_v41 = vpop.f32.mrf.mxu3 }
 0x2ec   :  { %v1788_v11 = vadd.f32 %v12130_v42, %v1787_v22  ;;  %v7690_v38 = vpop.eup %7689  ;;  %7695 = vrcp.f32 %v12177_v1  ;;  %v12192_v5 = vadd.f32 1.0, %v7688_v51  ;;  %v826_v9 = vadd.f32 %v12197_v30, %v825_v21  ;;  %v633_v51 = vpop.f32.mrf.mxu0 }
 0x2ed   :  { %3742 = vadd.xlane.f32.xlu2 %v3496_v34  ;;  %7697 = vpow2.f32 %v6948_v25  ;;  %v12201_v33 = vadd.f32 1.0, %v7690_v38  ;;  %v2266_v13 = vsub.f32 1.0, %v2265_v63  ;;  %vm2269_vm0 = vweird.f32 %v12128_v55 }
 0x2ee   :  { %v1792_v52 = vsel %vm12173_vm14, %v12130_v42, %v1788_v11  ;;  %v7692_v17 = vpop.eup %7691  ;;  %v823_v42 = vadd.f32 %v12197_v30, %v822_v50  ;;  %7699 = vrcp.f32 %v12182_v53  ;;  %vm2270_vm4 = vweird.f32 %v12164_v24 }
 0x2ef   :  { %v1797_v3 = vsel %vm1794_vm15, %v1796_v10, %v1792_v52  ;;  %v7694_v60 = vpop.eup %7693  ;;  %v2273_v46 = vand.u32 2147483647, %v12128_v55  ;;  %7701 = vrcp.f32 %v12189_v59  ;;  %v12209_v56 = vadd.f32 1.0, %v7692_v17  ;;  %vm12227_vm10 = vmor %vm2269_vm0, %vm2270_vm4  ;;  %v3531_v36 = vpop.xlane.xlu0 %3530 }
 0x2f0   :  { %v3400_v4 = vmul.f32 %v11769_v62, %v1797_v3  ;;  %v3869_v14 = vadd.f32 %v9913_v2, %v12132_v19  ;;  %v2275_v50 = vand.u32 2147483648, %v12128_v55  ;;  %7703 = vrcp.f32 %v12192_v5  ;;  %v729_v52 = vpop.f32.mrf.mxu1 }
 0x2f1   :  { %v6980_v37 = vmul.f32 -1.442695, %v823_v42  ;;  %v2267_v8 = vmul.f32 %v12164_v24, %v2266_v13  ;;  %7705 = vrcp.f32 %v12201_v33  ;;  %v12219_v22 = vadd.f32 1.0, %v7694_v60 }
 0x2f2   :  { %3550 = vadd.xlane.f32.xlu1 %v3400_v4  ;;  %v12216_v54 = vpop.eup %7695  ;;  %v3839_v19 = vadd.f32 %v9913_v2, %v12138_v12  ;;  %v2276_v32 = vor.u32 1.1754944e-38, %v2275_v50  ;;  %v6981_v34 = vmul.f32 -1.442695, %v826_v9  ;;  %vm12232_vm5 = vcmp.eq.f32.partialorder %v2273_v46, 8.507059e+37 }
 0x2f3   :  { %v7698_v29 = vpop.eup %7697  ;;  %v2268_v11 = vadd.f32 %v12164_v24, %v2267_v8  ;;  %v3775_v12 = vadd.f32 %v9913_v2, %v3529_v28  ;;  %7707 = vrcp.f32 %v12209_v56  ;;  %v919_v55 = vadd.f32 %v12197_v30, %v918_v41 }
 0x2f4   :  { %v12237_v16 = vpop.eup %7699  ;;  %v7125_v25 = vmul.f32 -1.442695, %v3869_v14  ;;  %v3807_v35 = vadd.f32 %v9913_v2, %v3593_v7  ;;  %7709 = vpow2.f32 %v6980_v37  ;;  %v3776_v21 = vadd.f32 %v9913_v2, %v3531_v36 }
 0x2f5   :  { %16489 = vst [vmem:[#allocation18_spill] sm:$0xff] %v12237_v16  ;;  %v2272_v38 = vsel %vm12227_vm10, %v12164_v24, %v2268_v11  ;;  %v1800_v10 = vmul.f32 %v12216_v54, %v12177_v1  ;;  %v12248_v63 = vpop.eup %7701  ;;  %7711 = vrcp.f32 %v12219_v22  ;;  %v12251_v17 = vadd.f32 1.0, %v7698_v29 }
 0x2f6   :  { %v7095_v42 = vmul.f32 -1.442695, %v3839_v19  ;;  %v2277_v3 = vsel %vm12232_vm5, %v2276_v32, %v2272_v38  ;;  %v12255_v9 = vpop.eup %7703  ;;  %7713 = vpow2.f32 %v6981_v34  ;;  %v634_v24 = vadd.f32 %v12197_v30, %v633_v51 }
 0x2f7   :  { %v3432_v4 = vmul.f32 %v11769_v62, %v2277_v3  ;;  %v7031_v60 = vmul.f32 -1.442695, %v3775_v12  ;;  %v12259_v13 = vpop.eup %7705  ;;  %v7012_v46 = vmul.f32 -1.442695, %v919_v55  ;;  %v730_v14 = vadd.f32 %v12197_v30, %v729_v52 }
 0x2f8   :  { %7715 = vpow2.f32 %v7125_v25  ;;  %v7063_v50 = vmul.f32 -1.442695, %v3807_v35  ;;  %v7032_v28 = vmul.f32 -1.442695, %v3776_v21  ;;  %v1801_v37 = vsub.f32 1.0, %v1800_v10 }
 0x2f9   :  { %3614 = vadd.xlane.f32.xlu0 %v3432_v4  ;;  %7717 = vpow2.f32 %v7031_v60  ;;  %vm1804_vm13 = vweird.f32 %v12177_v1  ;;  %v12263_v41 = vpop.eup %7707  ;;  %vm1805_vm9 = vweird.f32 %v12216_v54  ;;  %v1808_v62 = vand.u32 2147483647, %v12177_v1 }
 0x2fa   :  { %7719 = vpow2.f32 %v7095_v42  ;;  %v1810_v8 = vand.u32 2147483648, %v12177_v1  ;;  %v7710_v7 = vpop.eup %7709  ;;  %v1802_v19 = vmul.f32 %v12216_v54, %v1801_v37  ;;  %v2280_v31 = vmul.f32 %v12248_v63, %v12189_v59  ;;  %vm12274_vm8 = vmor %vm1804_vm13, %vm1805_vm9 }
 0x2fb   :  { %7721 = vpow2.f32 %v7063_v50  ;;  %vm2284_vm6 = vweird.f32 %v12189_v59  ;;  %v12272_v32 = vpop.eup %7711  ;;  %vm12278_vm14 = vcmp.eq.f32.partialorder %v1808_v62, 8.507059e+37  ;;  %vm2285_vm15 = vweird.f32 %v12248_v63 }
 0x2fc   :  { %7723 = vpow2.f32 %v7032_v28  ;;  %v1811_v1 = vor.u32 1.1754944e-38, %v1810_v8  ;;  %v7714_v34 = vpop.eup %7713  ;;  %v1803_v11 = vadd.f32 %v12216_v54, %v1802_v19  ;;  %v2281_v48 = vsub.f32 1.0, %v2280_v31  ;;  %vm12302_vm0 = vmor %vm2284_vm6, %vm2285_vm15 }
 0x2fd   :  { %v2288_v12 = vand.u32 2147483647, %v12189_v59  ;;  %v2290_v55 = vand.u32 2147483648, %v12189_v59  ;;  %v12288_v25 = vmul.f32 %v12255_v9, %v12192_v5  ;;  %7725 = vpow2.f32 %v7012_v46 }
 0x2fe   :  { %v7716_v51 = vpop.eup %7715  ;;  %v6917_v52 = vmul.f32 -1.442695, %v634_v24  ;;  %v6949_v38 = vmul.f32 -1.442695, %v730_v14  ;;  %v1807_v21 = vsel %vm12274_vm8, %v12216_v54, %v1803_v11  ;;  %v2282_v10 = vmul.f32 %v12248_v63, %v2281_v48  ;;  %v12312_v14 = vld [vmem:[%s16119_s3] ss:$0 sm:$0xff] }
 0x2ff   :  { %v7718_v35 = vpop.eup %7717  ;;  %v1812_v4 = vsel %vm12278_vm14, %v1811_v1, %v1807_v21  ;;  %v2291_v24 = vor.u32 1.1754944e-38, %v2290_v55  ;;  %v2760_v54 = vmul.f32 %v12259_v13, %v12201_v33  ;;  %7727 = vrcp.f32 %v12251_v17 }
 0x300   :  { %v7720_v42 = vpop.eup %7719  ;;  %v12294_v3 = vadd.f32 1.0, %v7718_v35  ;;  %v3401_v50 = vmul.f32 %v12312_v14, %v1812_v4  ;;  %v2283_v59 = vadd.f32 %v12248_v63, %v2282_v10  ;;  %vm2289_vm4 = vcmp.eq.f32.partialorder %v2288_v12, 8.507059e+37 }
 0x301   :  { %v7722_v46 = vpop.eup %7721  ;;  %v12325_v36 = vadd.f32 1.0, %v7716_v51  ;;  %v2761_v1 = vsub.f32 1.0, %v2760_v54  ;;  %v12329_v12 = vadd.f32 1.0, %v7720_v42  ;;  %v12332_v55 = vadd.f32 1.0, %v7710_v7 }
 0x302   :  { %v7724_v28 = vpop.eup %7723  ;;  %7729 = vrcp.f32 %v12294_v3  ;;  %v12318_v62 = vadd.f32 1.0, %v7722_v46  ;;  %3552 = vadd.xlane.f32.xlu2 %v3401_v50  ;;  %v2287_v19 = vsel %vm12302_vm0, %v12248_v63, %v2283_v59  ;;  %v12334_v35 = vadd.f32 1.0, %v7714_v34 }
 0x303   :  { %7731 = vpow2.f32 %v6917_v52  ;;  %v12320_v8 = vadd.f32 1.0, %v7724_v28  ;;  %v7726_v31 = vpop.eup %7725  ;;  %v2292_v29 = vsel %vm2289_vm4, %v2291_v24, %v2287_v19  ;;  %v3838_v63 = vadd.f32 %v9913_v2, %v12166_v15 }
 0x304   :  { %7733 = vpow2.f32 %v6949_v38  ;;  %v12341_v52 = vadd.f32 1.0, %v7726_v31  ;;  %v12344_v38 = vadd.s32 4294967208, %v10128_v47  ;;  %v4578_v21 = vand.u32 2147483647, %v12294_v3 }
 0x305   :  { %7735 = vrcp.f32 %v12318_v62  ;;  %v12339_v51 = vpop.eup %7727  ;;  %v3433_v10 = vmul.f32 %v12312_v14, %v2292_v29  ;;  %v4580_v34 = vand.u32 2147483648, %v12294_v3  ;;  %v2762_v15 = vmul.f32 %v12259_v13, %v2761_v1 }
 0x306   :  { %7737 = vrcp.f32 %v12320_v8  ;;  %16496 = vst [vmem:[#allocation19_spill] sm:$0xff] %v12344_v38  ;;  %vm2764_vm10 = vweird.f32 %v12201_v33  ;;  %vm2765_vm5 = vweird.f32 %v12259_v13  ;;  %v2768_v60 = vand.u32 2147483647, %v12201_v33 }
 0x307   :  { %7739 = vrcp.f32 %v12325_v36  ;;  %3616 = vadd.xlane.f32.xlu1 %v3433_v10  ;;  %v12360_v54 = vmul.f32 -1.442695, %v3838_v63  ;;  %v12364_v46 = vadd.f32 %v9913_v2, %v12169_v44  ;;  %v2763_v50 = vadd.f32 %v12259_v13, %v2762_v15  ;;  %vm12378_vm6 = vmor %vm2764_vm10, %vm2765_vm5 }
 0x308   :  { %v7730_v7 = vpop.eup %7729  ;;  %7741 = vrcp.f32 %v12329_v12  ;;  %v2770_v59 = vand.u32 2147483648, %v12201_v33  ;;  %vm4574_vm13 = vweird.f32 %v12294_v3  ;;  %vm12369_vm9 = vcmp.eq.f32.partialorder %v4578_v21, 8.507059e+37 }
 0x309   :  { %v12352_v42 = vpop.eup %7731  ;;  %v4570_v4 = vmul.f32 %v7730_v7, %v12294_v3  ;;  %v12374_v29 = vadd.s32 4294967200, %v10128_v47  ;;  %vm16156_vm8 = vcmask 786112   ;;  %vm4575_vm14 = vweird.f32 %v7730_v7 }
 0x30a   :  { %v12358_v24 = vpop.eup %7733  ;;  %v4581_v63 = vor.u32 1.1754944e-38, %v4580_v34  ;;  %vm5054_vm15 = vweird.f32 %v12318_v62  ;;  %vm12388_vm0 = vcmp.eq.f32.partialorder %v2768_v60, 8.507059e+37  ;;  %v5058_v34 = vand.u32 2147483647, %v12318_v62  ;;  %vm4576_vm5 = vmor %vm4574_vm13, %vm4575_vm14 }
 0x30b   :  { %v7736_v28 = vpop.eup %7735  ;;  %v4571_v19 = vsub.f32 1.0, %v4570_v4  ;;  %16499 = vst [vmem:[#allocation20_spill] sm:$0xff] %v12374_v29  ;;  %v2767_v4 = vsel %vm12378_vm6, %v12259_v13, %v2763_v50  ;;  %v5060_v11 = vand.u32 2147483648, %v12318_v62  ;;  %vm16159_vm4 = vcmask 851712  }
 0x30c   :  { %v7738_v1 = vpop.eup %7737  ;;  %v5050_v10 = vmul.f32 %v7736_v28, %v12318_v62  ;;  %v2771_v0 = vor.u32 1.1754944e-38, %v2770_v59  ;;  %vm4589_vm10 = vweird.f32 %v12320_v8  ;;  %v4593_v13 = vand.u32 2147483647, %v12320_v8 }
 0x30d   :  { %v4572_v21 = vmul.f32 %v7730_v7, %v4571_v19  ;;  %v4585_v15 = vmul.f32 %v7738_v1, %v12320_v8  ;;  %v12392_v48 = vpop.eup %7739  ;;  %vm5055_vm6 = vweird.f32 %v7736_v28  ;;  %v4595_v50 = vand.u32 2147483648, %v12320_v8 }
 0x30e   :  { %v5051_v37 = vsub.f32 1.0, %v5050_v10  ;;  %v12396_v19 = vpop.eup %7741  ;;  %v2772_v44 = vsel %vm12388_vm0, %v2771_v0, %v2767_v4  ;;  %vm4590_vm3 = vweird.f32 %v7738_v1  ;;  %vm12409_vm12 = vcmp.eq.f32.partialorder %v5058_v34, 8.507059e+37  ;;  %vm5056_vm13 = vmor %vm5054_vm15, %vm5055_vm6 }
 0x30f   :  { %v4573_v23 = vadd.f32 %v7730_v7, %v4572_v21  ;;  %v4586_v61 = vsub.f32 1.0, %v4585_v15  ;;  %v3465_v21 = vmul.f32 %v12312_v14, %v2772_v44  ;;  %v5061_v3 = vor.u32 1.1754944e-38, %v5060_v11  ;;  %v732_v11 = vpop.f32.mrf.mxu1 }
 0x310   :  { %v5052_v60 = vmul.f32 %v7736_v28, %v5051_v37  ;;  %vm4594_vm14 = vcmp.eq.f32.partialorder %v4593_v13, 8.507059e+37  ;;  %v4596_v31 = vor.u32 1.1754944e-38, %v4595_v50  ;;  %vm2299_vm0 = vweird.f32 %v12251_v17 }
 0x311   :  { %v4577_v59 = vsel %vm4576_vm5, %v7730_v7, %v4573_v23  ;;  %v4587_v10 = vmul.f32 %v7738_v1, %v4586_v61  ;;  %3680 = vadd.xlane.f32.xlu0 %v3465_v21  ;;  %v2295_v61 = vmul.f32 %v12339_v51, %v12251_v17  ;;  %v921_v23 = vpop.f32.mrf.mxu3  ;;  %vm2300_vm5 = vweird.f32 %v12339_v51  ;;  %v3595_v21 = vpop.xlane.xlu2 %3594 }
 0x312   :  { %v4582_v15 = vsel %vm12369_vm9, %v4581_v63, %v4577_v59  ;;  %v5053_v57 = vadd.f32 %v7736_v28, %v5052_v60  ;;  %vm4591_vm9 = vmor %vm4589_vm10, %vm4590_vm3  ;;  %v2303_v8 = vand.u32 2147483647, %v12251_v17  ;;  %v922_v13 = vadd.f32 %v12197_v30, %v921_v23 }
 0x313   :  { %v6496_v37 = vperm.slane %v4582_v15, %v12344_v38  ;;  %v4588_v0 = vadd.f32 %v7738_v1, %v4587_v10  ;;  %v2296_v33 = vsub.f32 1.0, %v2295_v61  ;;  %v5980_v6 = vmul.f32 %v12392_v48, %v12325_v36 }
 0x314   :  { %v5057_v7 = vsel %vm5056_vm13, %v7736_v28, %v5053_v57  ;;  %v2305_v28 = vand.u32 2147483648, %v12251_v17  ;;  %7743 = vpow2.f32 %v12360_v54  ;;  %v5530_v54 = vmul.f32 %v12396_v19, %v12329_v12 }
 0x315   :  { %v6498_v62 = vsel %vm16156_vm8, %v6496_v37, %v12154_v45  ;;  %v5062_v63 = vsel %vm12409_vm12, %v5061_v3, %v5057_v7  ;;  %v4592_v4 = vsel %vm4591_vm9, %v7738_v1, %v4588_v0  ;;  %v2297_v50 = vmul.f32 %v12339_v51, %v2296_v33  ;;  %vm12450_vm12 = vmor %vm2299_vm0, %vm2300_vm5 }
 0x316   :  { %v6567_v34 = vperm.slane %v5062_v63, %v12344_v38  ;;  %v4597_v57 = vsel %vm4594_vm14, %v4596_v31, %v4592_v4  ;;  %v3240_v45 = vmul.f32 %v12263_v41, %v12209_v56  ;;  %v733_v1 = vadd.f32 %v12197_v30, %v732_v11 }
 0x317   :  { %v6500_v60 = vperm.slane %v4597_v57, %v12374_v29  ;;  %v2298_v10 = vadd.f32 %v12339_v51, %v2297_v50  ;;  %v2306_v15 = vor.u32 1.1754944e-38, %v2305_v28  ;;  %v3871_v37 = vadd.f32 %v9913_v2, %v12179_v58 }
 0x318   :  { %v12440_v44 = vsel %vm16156_vm8, %v6567_v34, %v12060_v43  ;;  %v3241_v3 = vsub.f32 1.0, %v3240_v45  ;;  %v7126_v43 = vmul.f32 -1.442695, %v12364_v46  ;;  %vm2304_vm3 = vcmp.eq.f32.partialorder %v2303_v8, 8.507059e+37 }
 0x319   :  { %16506 = vst [vmem:[#allocation21_spill] sm:$0xff] %v12440_v44  ;;  %v12443_v59 = vsel %vm16159_vm4, %v6500_v60, %v6498_v62  ;;  %v16510_v0 = vsub.f32 1.0, %v12288_v25  ;;  %7745 = vrcp.f32 %v12332_v55  ;;  %vm3244_vm15 = vweird.f32 %v12209_v56 }
 0x31a   :  { %16507 = vst [vmem:[#allocation22_spill] sm:$0xff] %v12443_v59  ;;  %vm3245_vm10 = vweird.f32 %v12263_v41  ;;  %7747 = vrcp.f32 %v12334_v35  ;;  %v12467_v17 = vadd.f32 1.0, %v12352_v42  ;;  %v7013_v46 = vmul.f32 -1.442695, %v922_v13  ;;  %v7744_v31 = vpop.eup %7743 }
 0x31b   :  { %v5967_v61 = vmul.f32 %v12255_v9, %v16510_v0  ;;  %v2302_v58 = vsel %vm12450_vm12, %v12339_v51, %v2298_v10  ;;  %7749 = vrcp.f32 %v12341_v52  ;;  %v6950_v25 = vmul.f32 -1.442695, %v733_v1  ;;  %vm12476_vm6 = vmor %vm3244_vm15, %vm3245_vm10 }
 0x31c   :  { %v2307_v23 = vsel %vm2304_vm3, %v2306_v15, %v2302_v58  ;;  %v3242_v7 = vmul.f32 %v12263_v41, %v3241_v3  ;;  %v5981_v11 = vsub.f32 1.0, %v5980_v6  ;;  %v5531_v62 = vsub.f32 1.0, %v5530_v54 }
 0x31d   :  { %7751 = vpow2.f32 %v7126_v43  ;;  %v7127_v63 = vmul.f32 -1.442695, %v3871_v37  ;;  %v3434_v4 = vmul.f32 %v12312_v14, %v2307_v23  ;;  %v3248_v33 = vand.u32 2147483647, %v12209_v56 }
 0x31e   :  { %v3243_v51 = vadd.f32 %v12263_v41, %v3242_v7  ;;  %v3250_v34 = vand.u32 2147483648, %v12209_v56  ;;  %v12485_v57 = vadd.f32 %v12255_v9, %v5967_v61  ;;  %vm5970_vm13 = vweird.f32 %v12255_v9 }
 0x31f   :  { %v12489_v8 = vadd.f32 1.0, %v12358_v24  ;;  %7753 = vpow2.f32 %v7013_v46  ;;  %v12491_v28 = vpop.eup %7745  ;;  %v12493_v13 = vadd.f32 1.0, %v7744_v31  ;;  %3618 = vadd.xlane.f32.xlu2 %v3434_v4  ;;  %vm3249_vm14 = vcmp.eq.f32.partialorder %v3248_v33, 8.507059e+37  ;;  %v636_v33 = vpop.f32.mrf.mxu0 }
 0x320   :  { %7755 = vpow2.f32 %v6950_v25  ;;  %v3247_v60 = vsel %vm12476_vm6, %v12263_v41, %v3243_v51  ;;  %v12498_v56 = vpop.eup %7747  ;;  %v5982_v50 = vmul.f32 %v12392_v48, %v5981_v11  ;;  %v3251_v45 = vor.u32 1.1754944e-38, %v3250_v34 }
 0x321   :  { %7757 = vpow2.f32 %v7127_v63  ;;  %v12501_v24 = vpop.eup %7749  ;;  %vm5969_vm9 = vweird.f32 %v12192_v5  ;;  %v5532_v6 = vmul.f32 %v12396_v19, %v5531_v62  ;;  %v16515_v10 = vand.u32 2147483647, %v12192_v5 }
 0x322   :  { %7759 = vrcp.f32 %v12467_v17  ;;  %vm12508_vm0 = vmor %vm5969_vm9, %vm5970_vm13  ;;  %v16518_v15 = vand.u32 2147483648, %v12192_v5  ;;  %v3252_v54 = vsel %vm3249_vm14, %v3251_v45, %v3247_v60  ;;  %v1815_v43 = vmul.f32 %v12272_v32, %v12219_v22 }
 0x323   :  { %v7752_v1 = vpop.eup %7751  ;;  %vm12514_vm5 = vcmp.eq.f32.partialorder %v16515_v10, 8.507059e+37  ;;  %7761 = vrcp.f32 %v12489_v8  ;;  %v5972_v37 = vsel %vm12508_vm0, %v12255_v9, %v12485_v57  ;;  %vm5984_vm12 = vweird.f32 %v12325_v36 }
 0x324   :  { %v5976_v3 = vor.u32 1.1754944e-38, %v16518_v15  ;;  %7763 = vrcp.f32 %v12493_v13  ;;  %v3497_v0 = vmul.f32 %v12312_v14, %v3252_v54  ;;  %v5983_v5 = vadd.f32 %v12392_v48, %v5982_v50 }
 0x325   :  { %v7754_v61 = vpop.eup %7753  ;;  %vm5985_vm3 = vweird.f32 %v12392_v48  ;;  %v5988_v46 = vand.u32 2147483647, %v12325_v36  ;;  %v5990_v58 = vand.u32 2147483648, %v12325_v36  ;;  %v5533_v23 = vadd.f32 %v12396_v19, %v5532_v6 }
 0x326   :  { %v7756_v25 = vpop.eup %7755  ;;  %vm5535_vm15 = vweird.f32 %v12396_v19  ;;  %v5540_v9 = vand.u32 2147483648, %v12329_v12  ;;  %3744 = vadd.xlane.f32.xlu1 %v3497_v0  ;;  %v1816_v7 = vsub.f32 1.0, %v1815_v43  ;;  %v12537_v11 = vadd.f32 1.0, %v7752_v1  ;;  %vm12548_vm13 = vmor %vm5984_vm12, %vm5985_vm3 }
 0x327   :  { %v7758_v31 = vpop.eup %7757  ;;  %vm1819_vm10 = vweird.f32 %v12219_v22  ;;  %vm1820_vm6 = vweird.f32 %v12272_v32  ;;  %v1823_v62 = vand.u32 2147483647, %v12219_v22  ;;  %vm5534_vm14 = vweird.f32 %v12329_v12 }
 0x328   :  { %v12542_v63 = vpop.eup %7759  ;;  %v5538_v4 = vand.u32 2147483647, %v12329_v12  ;;  %v12554_v51 = vadd.f32 1.0, %v7754_v61  ;;  %v1817_v34 = vmul.f32 %v12272_v32, %v1816_v7  ;;  %v5987_v60 = vsel %vm12548_vm13, %v12392_v48, %v5983_v5  ;;  %vm12564_vm0 = vmor %vm5534_vm14, %vm5535_vm15 }
 0x329   :  { %v12557_v57 = vpop.eup %7761  ;;  %vm5989_vm9 = vcmp.eq.f32.partialorder %v5988_v46, 8.507059e+37  ;;  %v5991_v36 = vor.u32 1.1754944e-38, %v5990_v58  ;;  %v1825_v12 = vand.u32 2147483648, %v12219_v22  ;;  %v5537_v6 = vsel %vm12564_vm0, %v12396_v19, %v5533_v23  ;;  %vm12582_vm12 = vmor %vm1819_vm10, %vm1820_vm6 }
 0x32a   :  { %v12569_v45 = vpop.eup %7763  ;;  %v5541_v1 = vor.u32 1.1754944e-38, %v5540_v9  ;;  %v12574_v41 = vadd.f32 1.0, %v7756_v25  ;;  %v12576_v48 = vadd.f32 1.0, %v7758_v31  ;;  %7765 = vrcp.f32 %v12537_v11  ;;  %v828_v25 = vpop.f32.mrf.mxu2 }
 0x32b   :  { %v1818_v15 = vadd.f32 %v12272_v32, %v1817_v34  ;;  %vm1824_vm3 = vcmp.eq.f32.partialorder %v1823_v62, 8.507059e+37  ;;  %v1826_v54 = vor.u32 1.1754944e-38, %v1825_v12  ;;  %v12590_v19 = vsel %vm12514_vm5, %v5976_v3, %v5972_v37  ;;  %v3659_v3 = vpop.xlane.xlu1 %3658  ;;  %v924_v31 = vpop.f32.mrf.mxu3 }
 0x32c   :  { %16525 = vst [vmem:[#allocation23_spill] sm:$0xff] %v12590_v19  ;;  %v12592_v43 = vsel %vm5989_vm9, %v5991_v36, %v5987_v60  ;;  %vm5539_vm15 = vcmp.eq.f32.partialorder %v5538_v4, 8.507059e+37  ;;  %7767 = vrcp.f32 %v12554_v51  ;;  %v5515_v0 = vmul.f32 %v12569_v45, %v12493_v13  ;;  %v735_v19 = vpop.f32.mrf.mxu1 }
 0x32d   :  { %16526 = vst [vmem:[#allocation24_spill] sm:$0xff] %v12592_v43  ;;  %v12595_v22 = vsel %vm5539_vm15, %v5541_v1, %v5537_v6  ;;  %v5525_v61 = vand.u32 2147483648, %v12493_v13  ;;  %v1822_v5 = vsel %vm12582_vm12, %v12272_v32, %v1818_v15  ;;  %7769 = vrcp.f32 %v12574_v41  ;;  %v639_v6 = vpop.f32.mrf.mxu0 }
 0x32e   :  { %16527 = vst [vmem:[#allocation25_spill] sm:$0xff] %v12595_v22  ;;  %v1827_v37 = vsel %vm1824_vm3, %v1826_v54, %v1822_v5  ;;  %7771 = vrcp.f32 %v12576_v48  ;;  %v637_v7 = vadd.f32 %v12197_v30, %v636_v33  ;;  %v2790_v62 = vmul.f32 %v12498_v56, %v12334_v35 }
 0x32f   :  { %v3402_v23 = vmul.f32 %v12312_v14, %v1827_v37  ;;  %v5516_v4 = vsub.f32 1.0, %v5515_v0  ;;  %v12618_v34 = vor.u32 1.1754944e-38, %v5525_v61  ;;  %v3808_v60 = vadd.f32 %v9913_v2, %v3595_v21 }
 0x330   :  { %v12616_v42 = vpop.eup %7765  ;;  %v3840_v36 = vadd.f32 %v9913_v2, %v3659_v3  ;;  %v829_v12 = vadd.f32 %v12197_v30, %v828_v25  ;;  %v2791_v33 = vsub.f32 1.0, %v2790_v62  ;;  %v2800_v1 = vand.u32 2147483648, %v12334_v35  ;;  %v3597_v62 = vpop.xlane.xlu0 %3596 }
 0x331   :  { %3554 = vadd.xlane.f32.xlu0 %v3402_v23  ;;  %v2775_v10 = vmul.f32 %v12491_v28, %v12332_v55  ;;  %v925_v15 = vadd.f32 %v12197_v30, %v924_v31  ;;  %vm2794_vm5 = vweird.f32 %v12334_v35  ;;  %vm2795_vm10 = vweird.f32 %v12498_v56 }
 0x332   :  { %v12622_v50 = vpop.eup %7767  ;;  %v2798_v54 = vand.u32 2147483647, %v12334_v35  ;;  %v5995_v61 = vmul.f32 %v12616_v42, %v12537_v11  ;;  %v6918_v5 = vmul.f32 -1.442695, %v637_v7  ;;  %v2792_v21 = vmul.f32 %v12498_v56, %v2791_v33  ;;  %vm12644_vm13 = vmor %vm2794_vm5, %vm2795_vm10  ;;  %v831_v46 = vpop.f32.mrf.mxu2 }
 0x333   :  { %v12632_v0 = vpop.eup %7769  ;;  %v2776_v3 = vsub.f32 1.0, %v2775_v10  ;;  %v640_v25 = vadd.f32 %v12197_v30, %v639_v6  ;;  %v7064_v23 = vmul.f32 -1.442695, %v3808_v60  ;;  %v7096_v31 = vmul.f32 -1.442695, %v3840_v36 }
 0x334   :  { %v12637_v37 = vpop.eup %7771  ;;  %vm2779_vm6 = vweird.f32 %v12332_v55  ;;  %v2793_v58 = vadd.f32 %v12498_v56, %v2792_v21  ;;  %v2801_v7 = vor.u32 1.1754944e-38, %v2800_v1  ;;  %v2785_v10 = vand.u32 2147483648, %v12332_v55 }
 0x335   :  { %v2777_v33 = vmul.f32 %v12491_v28, %v2776_v3  ;;  %vm12650_vm14 = vcmp.eq.f32.partialorder %v2798_v54, 8.507059e+37  ;;  %vm2780_vm9 = vweird.f32 %v12491_v28  ;;  %v2783_v60 = vand.u32 2147483647, %v12332_v55 }
 0x336   :  { %v3255_v35 = vmul.f32 %v12501_v24, %v12341_v52  ;;  %v5517_v36 = vmul.f32 %v12569_v45, %v5516_v4  ;;  %v12661_v1 = vmul.f32 %v12637_v37, %v12576_v48  ;;  %v6982_v21 = vmul.f32 -1.442695, %v829_v12  ;;  %vm12675_vm12 = vmor %vm2779_vm6, %vm2780_vm9 }
 0x337   :  { %v3809_v3 = vadd.f32 %v9913_v2, %v3597_v62  ;;  %vm5519_vm0 = vweird.f32 %v12493_v13  ;;  %v5996_v54 = vsub.f32 1.0, %v5995_v61  ;;  %7773 = vpow2.f32 %v6918_v5 }
 0x338   :  { %v2797_v9 = vsel %vm12644_vm13, %v12498_v56, %v2793_v58  ;;  %v2778_v32 = vadd.f32 %v12491_v28, %v2777_v33  ;;  %v7014_v43 = vmul.f32 -1.442695, %v925_v15  ;;  %7775 = vpow2.f32 %v7064_v23 }
 0x339   :  { %v2802_v4 = vsel %vm12650_vm14, %v2801_v7, %v2797_v9  ;;  %v2786_v61 = vor.u32 1.1754944e-38, %v2785_v10  ;;  %v6919_v5 = vmul.f32 -1.442695, %v640_v25  ;;  %7777 = vpow2.f32 %v7096_v31 }
 0x33a   :  { %vm2784_vm3 = vcmp.eq.f32.partialorder %v2783_v60, 8.507059e+37  ;;  %v3256_v56 = vsub.f32 1.0, %v3255_v35  ;;  %v5518_v58 = vadd.f32 %v12569_v45, %v5517_v36  ;;  %vm5520_vm15 = vweird.f32 %v12569_v45 }
 0x33b   :  { %7779 = vpow2.f32 %v6982_v21  ;;  %v7065_v9 = vmul.f32 -1.442695, %v3809_v3  ;;  %v6011_v15 = vsub.f32 1.0, %v12661_v1  ;;  %v736_v55 = vadd.f32 %v12197_v30, %v735_v19  ;;  %vm12715_vm9 = vmor %vm5519_vm0, %vm5520_vm15 }
 0x33c   :  { %v3467_v23 = vmul.f32 %v12312_v14, %v2802_v4  ;;  %v2782_v25 = vsel %vm12675_vm12, %v12491_v28, %v2778_v32  ;;  %v16534_v31 = vand.u32 2147483647, %v12493_v13  ;;  %vm5999_vm10 = vweird.f32 %v12537_v11 }
 0x33d   :  { %7781 = vpow2.f32 %v7014_v43  ;;  %v832_v7 = vadd.f32 %v12197_v30, %v831_v46  ;;  %v2787_v33 = vsel %vm2784_vm3, %v2786_v61, %v2782_v25  ;;  %vm3259_vm6 = vweird.f32 %v12341_v52  ;;  %v7774_v19 = vpop.eup %7773 }
 0x33e   :  { %vm12689_vm5 = vcmp.eq.f32.partialorder %v16534_v31, 8.507059e+37  ;;  %v5997_v10 = vmul.f32 %v12616_v42, %v5996_v54  ;;  %7783 = vpow2.f32 %v6919_v5  ;;  %3684 = vadd.xlane.f32.xlu2 %v3467_v23  ;;  %v3466_v28 = vmul.f32 %v12312_v14, %v2787_v33  ;;  %v7776_v6 = vpop.eup %7775 }
 0x33f   :  { %v3257_v32 = vmul.f32 %v12501_v24, %v3256_v56  ;;  %7785 = vpow2.f32 %v7065_v9  ;;  %vm3260_vm13 = vweird.f32 %v12501_v24  ;;  %v3263_v43 = vand.u32 2147483647, %v12341_v52  ;;  %v7778_v60 = vpop.eup %7777 }
 0x340   :  { %v3265_v30 = vand.u32 2147483648, %v12341_v52  ;;  %v6003_v35 = vand.u32 2147483647, %v12537_v11  ;;  %v6005_v36 = vand.u32 2147483648, %v12537_v11  ;;  %v6951_v1 = vmul.f32 -1.442695, %v736_v55  ;;  %3682 = vadd.xlane.f32.xlu1 %v3466_v28  ;;  %vm12707_vm14 = vmor %vm3259_vm6, %vm3260_vm13 }
 0x341   :  { %v3258_v21 = vadd.f32 %v12501_v24, %v3257_v32  ;;  %v7780_v54 = vpop.eup %7779  ;;  %vm6000_vm12 = vweird.f32 %v12616_v42  ;;  %vm6014_vm3 = vweird.f32 %v12576_v48  ;;  %v6018_v12 = vand.u32 2147483647, %v12576_v48 }
 0x342   :  { %v6020_v52 = vand.u32 2147483648, %v12576_v48  ;;  %v6983_v61 = vmul.f32 -1.442695, %v832_v7  ;;  %v5522_v5 = vsel %vm12715_vm9, %v12569_v45, %v5518_v58  ;;  %v12726_v46 = vadd.f32 1.0, %v7776_v6  ;;  %vm12753_vm13 = vmor %vm5999_vm10, %vm6000_vm12 }
 0x343   :  { %v3262_v13 = vsel %vm12707_vm14, %v12501_v24, %v3258_v21  ;;  %vm3264_vm0 = vcmp.eq.f32.partialorder %v3263_v43, 8.507059e+37  ;;  %v7782_v56 = vpop.eup %7781  ;;  %v5998_v9 = vadd.f32 %v12616_v42, %v5997_v10  ;;  %v6012_v55 = vmul.f32 %v12637_v37, %v6011_v15 }
 0x344   :  { %v12733_v23 = vadd.f32 1.0, %v7778_v60  ;;  %v3266_v25 = vor.u32 1.1754944e-38, %v3265_v30  ;;  %v7784_v31 = vpop.eup %7783  ;;  %vm12735_vm15 = vcmp.eq.f32.partialorder %v6003_v35, 8.507059e+37  ;;  %v6006_v45 = vor.u32 1.1754944e-38, %v6005_v36 }
 0x345   :  { %v12739_v58 = vadd.f32 1.0, %v7774_v19  ;;  %7787 = vpow2.f32 %v6951_v1  ;;  %v7786_v33 = vpop.eup %7785  ;;  %vm6015_vm6 = vweird.f32 %v12637_v37  ;;  %v3270_v15 = vmul.f32 %v12622_v50, %v12554_v51 }
 0x346   :  { %7789 = vpow2.f32 %v6983_v61  ;;  %v3267_v24 = vsel %vm3264_vm0, %v3266_v25, %v3262_v13  ;;  %v12747_v10 = vsel %vm12689_vm5, %v12618_v34, %v5522_v5  ;;  %v12757_v28 = vadd.f32 1.0, %v7780_v54  ;;  %vm12789_vm9 = vmor %vm6014_vm3, %vm6015_vm6  ;;  %v3723_v5 = vpop.xlane.xlu2 %3722 }
 0x347   :  { %16543 = vst [vmem:[#allocation26_spill] sm:$0xff] %v12747_v10  ;;  %7791 = vrcp.f32 %v12726_v46  ;;  %v3498_v32 = vmul.f32 %v12312_v14, %v3267_v24  ;;  %v6002_v62 = vsel %vm12753_vm13, %v12616_v42, %v5998_v9  ;;  %v6013_v34 = vadd.f32 %v12637_v37, %v6012_v55 }
 0x348   :  { %v12765_v6 = vadd.f32 1.0, %v7782_v56  ;;  %7793 = vrcp.f32 %v12733_v23  ;;  %vm12768_vm5 = vcmp.eq.f32.partialorder %v6018_v12, 8.507059e+37  ;;  %v12773_v43 = vadd.f32 1.0, %v7784_v31 }
 0x349   :  { %7795 = vrcp.f32 %v12739_v58  ;;  %v12775_v30 = vadd.f32 1.0, %v7786_v33  ;;  %3746 = vadd.xlane.f32.xlu0 %v3498_v32  ;;  %v3271_v60 = vsub.f32 1.0, %v3270_v15  ;;  %vm3274_vm10 = vweird.f32 %v12554_v51  ;;  %v834_v33 = vpop.f32.mrf.mxu2 }
 0x34a   :  { %vm3275_vm14 = vweird.f32 %v12622_v50  ;;  %v3278_v42 = vand.u32 2147483647, %v12554_v51  ;;  %v3280_v35 = vand.u32 2147483648, %v12554_v51  ;;  %v12783_v1 = vsel %vm12735_vm15, %v6006_v45, %v6002_v62 }
 0x34b   :  { %v7788_v36 = vpop.eup %7787  ;;  %16548 = vst [vmem:[#allocation27_spill] sm:$0xff] %v12783_v1  ;;  %7797 = vrcp.f32 %v12757_v28  ;;  %v3272_v3 = vmul.f32 %v12622_v50, %v3271_v60  ;;  %v1830_v54 = vmul.f32 %v12542_v63, %v12467_v17  ;;  %v6017_v61 = vsel %vm12789_vm9, %v12637_v37, %v6013_v34  ;;  %vm12811_vm12 = vmor %vm3274_vm10, %vm3275_vm14 }
 0x34c   :  { %v7790_v4 = vpop.eup %7789  ;;  %v6021_v48 = vor.u32 1.1754944e-38, %v6020_v52  ;;  %7799 = vrcp.f32 %v12765_v6  ;;  %v3281_v55 = vor.u32 1.1754944e-38, %v3280_v35  ;;  %v12820_v31 = vadd.f32 1.0, %v7788_v36 }
 0x34d   :  { %v12803_v13 = vpop.eup %7791  ;;  %7801 = vrcp.f32 %v12775_v30  ;;  %v3273_v56 = vadd.f32 %v12622_v50, %v3272_v3  ;;  %v1831_v37 = vsub.f32 1.0, %v1830_v54  ;;  %vm3279_vm3 = vcmp.eq.f32.partialorder %v3278_v42, 8.507059e+37  ;;  %v12855_v3 = vld [vmem:[%s16118_s2] ss:$0 sm:$0xff] }
 0x34e   :  { %v12815_v52 = vpop.eup %7793  ;;  %7803 = vrcp.f32 %v12773_v43  ;;  %v12824_v45 = vadd.f32 1.0, %v7790_v4  ;;  %v5075_v51 = vand.u32 2147483648, %v12726_v46  ;;  %v3872_v24 = vadd.f32 %v9913_v2, %v3723_v5  ;;  %v3533_v5 = vpop.xlane.xlu1 %3532 }
 0x34f   :  { %v12822_v7 = vpop.eup %7795  ;;  %vm1834_vm0 = vweird.f32 %v12467_v17  ;;  %v3277_v15 = vsel %vm12811_vm12, %v12622_v50, %v3273_v56  ;;  %v1832_v19 = vmul.f32 %v12542_v63, %v1831_v37  ;;  %vm1835_vm15 = vweird.f32 %v12542_v63  ;;  %v927_v37 = vpop.f32.mrf.mxu3 }
 0x350   :  { %v1838_v32 = vand.u32 2147483647, %v12467_v17  ;;  %v5065_v34 = vmul.f32 %v12803_v13, %v12726_v46  ;;  %v5545_v60 = vmul.f32 %v12815_v52, %v12733_v23  ;;  %v3282_v42 = vsel %vm3279_vm3, %v3281_v55, %v3277_v15  ;;  %vm12867_vm6 = vmor %vm1834_vm0, %vm1835_vm15 }
 0x351   :  { %v12835_v62 = vpop.eup %7797  ;;  %v1840_v35 = vand.u32 2147483648, %v12467_v17  ;;  %v12846_v50 = vsel %vm12768_vm5, %v6021_v48, %v6017_v61  ;;  %7805 = vrcp.f32 %v12820_v31  ;;  %v12850_v21 = vadd.s32 4294967192, %v10128_v47 }
 0x352   :  { %v12842_v36 = vpop.eup %7799  ;;  %16553 = vst [vmem:[#allocation28_spill] sm:$0xff] %v12846_v50  ;;  %v835_v54 = vadd.f32 %v12855_v3, %v834_v33  ;;  %7807 = vrcp.f32 %v12824_v45  ;;  %v5073_v11 = vand.u32 2147483647, %v12726_v46  ;;  %v5553_v61 = vand.u32 2147483647, %v12733_v23  ;;  %v3663_v33 = vpop.xlane.xlu0 %3662 }
 0x353   :  { %16554 = vst [vmem:[#allocation29_spill] sm:$0xff] %v12850_v21  ;;  %v12858_v4 = vpop.eup %7801  ;;  %v7128_v48 = vmul.f32 -1.442695, %v3872_v24  ;;  %v5555_v55 = vand.u32 2147483648, %v12733_v23  ;;  %v3499_v15 = vmul.f32 %v12312_v14, %v3282_v42  ;;  %v1833_v25 = vadd.f32 %v12542_v63, %v1832_v19 }
 0x354   :  { %v12871_v9 = vpop.eup %7803  ;;  %vm12876_vm13 = vcmp.eq.f32.partialorder %v1838_v32, 8.507059e+37  ;;  %v5066_v12 = vsub.f32 1.0, %v5065_v34  ;;  %v12880_v17 = vor.u32 1.1754944e-38, %v5075_v51  ;;  %v5546_v1 = vsub.f32 1.0, %v5545_v60  ;;  %v642_v32 = vpop.f32.mrf.mxu0 }
 0x355   :  { %v1841_v22 = vor.u32 1.1754944e-38, %v1840_v35  ;;  %vm5069_vm5 = vweird.f32 %v12726_v46  ;;  %v5080_v10 = vmul.f32 %v12858_v4, %v12775_v30  ;;  %v6984_v49 = vmul.f32 -1.442695, %v835_v54  ;;  %3748 = vadd.xlane.f32.xlu2 %v3499_v15  ;;  %v738_v51 = vpop.f32.mrf.mxu1 }
 0x356   :  { %v3777_v39 = vadd.f32 %v9913_v2, %v3533_v5  ;;  %v1837_v19 = vsel %vm12867_vm6, %v12542_v63, %v1833_v25  ;;  %vm5549_vm10 = vweird.f32 %v12733_v23  ;;  %7809 = vpow2.f32 %v7128_v48 }
 0x357   :  { %v3842_v34 = vadd.f32 %v9913_v2, %v3663_v33  ;;  %v1842_v60 = vsel %vm12876_vm13, %v1841_v22, %v1837_v19  ;;  %v2310_v42 = vmul.f32 %v12557_v57, %v12489_v8  ;;  %v12895_v35 = vpop.eup %7805  ;;  %v5556_v54 = vor.u32 1.1754944e-38, %v5555_v55 }
 0x358   :  { %v5088_v5 = vand.u32 2147483647, %v12775_v30  ;;  %v928_v63 = vadd.f32 %v12855_v3, %v927_v37  ;;  %v3403_v25 = vmul.f32 %v12312_v14, %v1842_v60  ;;  %v12900_v56 = vpop.eup %7807  ;;  %v5067_v48 = vmul.f32 %v12803_v13, %v5066_v12 }
 0x359   :  { %v5547_v33 = vmul.f32 %v12815_v52, %v5546_v1  ;;  %v2311_v15 = vsub.f32 1.0, %v2310_v42  ;;  %vm2314_vm14 = vweird.f32 %v12489_v8  ;;  %7811 = vpow2.f32 %v6984_v49 }
 0x35a   :  { %v643_v22 = vadd.f32 %v12855_v3, %v642_v32  ;;  %v739_v55 = vadd.f32 %v12855_v3, %v738_v51  ;;  %v7033_v24 = vmul.f32 -1.442695, %v3777_v39  ;;  %3556 = vadd.xlane.f32.xlu1 %v3403_v25  ;;  %vm12907_vm9 = vcmp.eq.f32.partialorder %v5073_v11, 8.507059e+37 }
 0x35b   :  { %vm12911_vm12 = vcmp.eq.f32.partialorder %v5553_v61, 8.507059e+37  ;;  %v5081_v12 = vsub.f32 1.0, %v5080_v10  ;;  %v7098_v1 = vmul.f32 -1.442695, %v3842_v34  ;;  %v2312_v60 = vmul.f32 %v12557_v57, %v2311_v15 }
 0x35c   :  { %vm2315_vm3 = vweird.f32 %v12557_v57  ;;  %vm5070_vm0 = vweird.f32 %v12803_v13  ;;  %v7015_v49 = vmul.f32 -1.442695, %v928_v63  ;;  %v2318_v11 = vand.u32 2147483647, %v12489_v8  ;;  %v7810_v32 = vpop.eup %7809  ;;  %v930_v63 = vpop.f32.mrf.mxu3 }
 0x35d   :  { %vm12918_vm15 = vmor %vm2314_vm14, %vm2315_vm3  ;;  %v2320_v61 = vand.u32 2147483648, %v12489_v8  ;;  %v5068_v51 = vadd.f32 %v12803_v13, %v5067_v48  ;;  %v5548_v10 = vadd.f32 %v12815_v52, %v5547_v33  ;;  %vm5550_vm6 = vweird.f32 %v12815_v52 }
 0x35e   :  { %v2313_v34 = vadd.f32 %v12557_v57, %v2312_v60  ;;  %v6920_v42 = vmul.f32 -1.442695, %v643_v22  ;;  %v6952_v25 = vmul.f32 -1.442695, %v739_v55  ;;  %7813 = vpow2.f32 %v7033_v24  ;;  %vm12932_vm14 = vmor %vm5069_vm5, %vm5070_vm0  ;;  %v645_v60 = vpop.f32.mrf.mxu0 }
 0x35f   :  { %vm2319_vm13 = vcmp.eq.f32.partialorder %v2318_v11, 8.507059e+37  ;;  %v5082_v48 = vmul.f32 %v12858_v4, %v5081_v12  ;;  %7815 = vpow2.f32 %v7098_v1  ;;  %v2321_v15 = vor.u32 1.1754944e-38, %v2320_v61  ;;  %v7812_v22 = vpop.eup %7811  ;;  %vm12942_vm3 = vmor %vm5549_vm10, %vm5550_vm6 }
 0x360   :  { %v2317_v33 = vsel %vm12918_vm15, %v12557_v57, %v2313_v34  ;;  %vm5084_vm5 = vweird.f32 %v12775_v30  ;;  %v5090_v46 = vand.u32 2147483648, %v12775_v30  ;;  %7817 = vpow2.f32 %v7015_v49  ;;  %v741_v49 = vpop.f32.mrf.mxu1 }
 0x361   :  { %v12948_v24 = vadd.f32 1.0, %v7810_v32  ;;  %v5072_v12 = vsel %vm12932_vm14, %v12803_v13, %v5068_v51  ;;  %v5552_v57 = vsel %vm12942_vm3, %v12815_v52, %v5548_v10  ;;  %v931_v23 = vadd.f32 %v12855_v3, %v930_v63 }
 0x362   :  { %v2322_v1 = vsel %vm2319_vm13, %v2321_v15, %v2317_v33  ;;  %vm5085_vm10 = vweird.f32 %v12858_v4  ;;  %vm12958_vm0 = vcmp.eq.f32.partialorder %v5088_v5, 8.507059e+37  ;;  %7819 = vpow2.f32 %v6920_v42 }
 0x363   :  { %v3435_v39 = vmul.f32 %v12312_v14, %v2322_v1  ;;  %v5083_v11 = vadd.f32 %v12858_v4, %v5082_v48  ;;  %v12964_v13 = vadd.f32 1.0, %v7812_v22  ;;  %7821 = vpow2.f32 %v6952_v25 }
 0x364   :  { %v1845_v52 = vmul.f32 %v12822_v7, %v12739_v58  ;;  %v7814_v61 = vpop.eup %7813  ;;  %v12971_v5 = vsel %vm12907_vm9, %v12880_v17, %v5072_v12  ;;  %v12975_v32 = vsel %vm12911_vm12, %v5556_v54, %v5552_v57  ;;  %v5091_v51 = vor.u32 1.1754944e-38, %v5090_v46  ;;  %vm12984_vm9 = vmor %vm5084_vm5, %vm5085_vm10  ;;  %v12988_v54 = vpop.xlane.xlu0 %3726 }
 0x365   :  { %16571 = vst [vmem:[#allocation30_spill] sm:$0xff] %v12971_v5  ;;  %7823 = vrcp.f32 %v12948_v24  ;;  %3620 = vadd.xlane.f32.xlu0 %v3435_v39  ;;  %v7816_v14 = vpop.eup %7815  ;;  %v7016_v10 = vmul.f32 -1.442695, %v931_v23  ;;  %v742_v34 = vadd.f32 %v12855_v3, %v741_v49  ;;  %v1855_v25 = vand.u32 2147483648, %v12739_v58  ;;  %v3661_v17 = vpop.xlane.xlu2 %3660 }
 0x366   :  { %16572 = vst [vmem:[#allocation31_spill] sm:$0xff] %v12975_v32  ;;  %v1846_v42 = vsub.f32 1.0, %v1845_v52  ;;  %v7818_v63 = vpop.eup %7817  ;;  %vm1849_vm12 = vweird.f32 %v12739_v58  ;;  %vm1850_vm15 = vweird.f32 %v12822_v7  ;;  %v1853_v37 = vand.u32 2147483647, %v12739_v58  ;;  %v933_v32 = vpop.f32.mrf.mxu3 }
 0x367   :  { %v2325_v19 = vmul.f32 %v12632_v0, %v12574_v41  ;;  %v5087_v8 = vsel %vm12984_vm9, %v12858_v4, %v5083_v11  ;;  %7825 = vrcp.f32 %v12964_v13  ;;  %v12999_v30 = vadd.f32 1.0, %v7814_v61  ;;  %vm13009_vm13 = vmor %vm1849_vm12, %vm1850_vm15 }
 0x368   :  { %v1847_v48 = vmul.f32 %v12822_v7, %v1846_v42  ;;  %v7820_v33 = vpop.eup %7819  ;;  %v13002_v15 = vadd.f32 1.0, %v7816_v14  ;;  %vm2329_vm6 = vweird.f32 %v12574_v41  ;;  %v2335_v55 = vand.u32 2147483648, %v12574_v41 }
 0x369   :  { %v2326_v22 = vsub.f32 1.0, %v2325_v19  ;;  %v7822_v46 = vpop.eup %7821  ;;  %v1856_v57 = vor.u32 1.1754944e-38, %v1855_v25  ;;  %vm2330_vm14 = vweird.f32 %v12632_v0  ;;  %v2333_v23 = vand.u32 2147483647, %v12574_v41  ;;  %v13055_v19 = vld [vmem:[%s16119_s3] ss:$0 sm:$0xff] }
 0x36a   :  { %v1848_v12 = vadd.f32 %v12822_v7, %v1847_v48  ;;  %7827 = vpow2.f32 %v7016_v10  ;;  %v6953_v49 = vmul.f32 -1.442695, %v742_v34  ;;  %vm1854_vm3 = vcmp.eq.f32.partialorder %v1853_v37, 8.507059e+37  ;;  %vm13035_vm5 = vmor %vm2329_vm6, %vm2330_vm14 }
 0x36b   :  { %v13015_v1 = vpop.eup %7823  ;;  %v2327_v39 = vmul.f32 %v12632_v0, %v2326_v22  ;;  %v13020_v11 = vsel %vm12958_vm0, %v5091_v51, %v5087_v8  ;;  %v13022_v58 = vadd.f32 1.0, %v7818_v63  ;;  %v13024_v52 = vadd.f32 1.0, %v7820_v33  ;;  %v837_v22 = vpop.f32.mrf.mxu2 }
 0x36c   :  { %16577 = vst [vmem:[#allocation32_spill] sm:$0xff] %v13020_v11  ;;  %7829 = vrcp.f32 %v12999_v30  ;;  %v13027_v61 = vadd.f32 1.0, %v7822_v46  ;;  %v1852_v14 = vsel %vm13009_vm13, %v12822_v7, %v1848_v12  ;;  %v2336_v51 = vor.u32 1.1754944e-38, %v2335_v55  ;;  %v13064_v55 = vpop.xlane.xlu0 %3536 }
 0x36d   :  { %v2328_v10 = vadd.f32 %v12632_v0, %v2327_v39  ;;  %v13039_v34 = vpop.eup %7825  ;;  %v6025_v42 = vmul.f32 %v13015_v1, %v12948_v24  ;;  %7831 = vrcp.f32 %v13002_v15  ;;  %v1857_v25 = vsel %vm1854_vm3, %v1856_v57, %v1852_v14  ;;  %16580 = vst [vmem:[#allocation33_spill] sm:$0xff] %v13064_v55  ;;  %v648_v14 = vpop.f32.mrf.mxu0 }
 0x36e   :  { %vm2334_vm10 = vcmp.eq.f32.partialorder %v2333_v23, 8.507059e+37  ;;  %v6035_v63 = vand.u32 2147483648, %v12948_v24  ;;  %7833 = vpow2.f32 %v6953_v49  ;;  %v3404_v8 = vmul.f32 %v13055_v19, %v1857_v25  ;;  %v3725_v49 = vpop.xlane.xlu1 %3724 }
 0x36f   :  { %7835 = vrcp.f32 %v13022_v58  ;;  %v2332_v48 = vsel %vm13035_vm5, %v12632_v0, %v2328_v10  ;;  %v2805_v12 = vmul.f32 %v12835_v62, %v12757_v28  ;;  %v6026_v57 = vsub.f32 1.0, %v6025_v42 }
 0x370   :  { %v7828_v33 = vpop.eup %7827  ;;  %7837 = vrcp.f32 %v13024_v52  ;;  %v2337_v46 = vsel %vm2334_vm10, %v2336_v51, %v2332_v48  ;;  %v3841_v0 = vadd.f32 %v9913_v2, %v3661_v17  ;;  %3558 = vadd.xlane.f32.xlu2 %v3404_v8  ;;  %v13073_v39 = vor.u32 1.1754944e-38, %v6035_v63 }
 0x371   :  { %7839 = vrcp.f32 %v13027_v61  ;;  %v4610_v10 = vand.u32 2147483648, %v12999_v30  ;;  %v3436_v51 = vmul.f32 %v13055_v19, %v2337_v46  ;;  %v5585_v42 = vand.u32 2147483648, %v13002_v15 }
 0x372   :  { %v13068_v4 = vpop.eup %7829  ;;  %v13082_v7 = vadd.f32 1.0, %v7828_v33  ;;  %v2806_v17 = vsub.f32 1.0, %v2805_v12  ;;  %vm6029_vm0 = vweird.f32 %v12948_v24  ;;  %v3873_v8 = vadd.f32 %v9913_v2, %v3725_v49 }
 0x373   :  { %v13078_v25 = vpop.eup %7831  ;;  %v4600_v63 = vmul.f32 %v13068_v4, %v12999_v30  ;;  %3622 = vadd.xlane.f32.xlu1 %v3436_v51  ;;  %vm2809_vm9 = vweird.f32 %v12757_v28  ;;  %vm2810_vm12 = vweird.f32 %v12835_v62  ;;  %v6027_v33 = vmul.f32 %v13015_v1, %v6026_v57 }
 0x374   :  { %v7834_v37 = vpop.eup %7833  ;;  %v7097_v41 = vmul.f32 -1.442695, %v3841_v0  ;;  %v3874_v12 = vadd.f32 %v9913_v2, %v12988_v54  ;;  %v2807_v48 = vmul.f32 %v12835_v62, %v2806_v17  ;;  %v5575_v49 = vmul.f32 %v13078_v25, %v13002_v15  ;;  %vm13101_vm15 = vmor %vm2809_vm9, %vm2810_vm12 }
 0x375   :  { %v13090_v46 = vpop.eup %7835  ;;  %v646_v51 = vadd.f32 %v12855_v3, %v645_v60  ;;  %v2813_v50 = vand.u32 2147483647, %v12757_v28  ;;  %v2815_v57 = vand.u32 2147483648, %v12757_v28  ;;  %vm6030_vm6 = vweird.f32 %v13015_v1 }
 0x376   :  { %v13096_v23 = vpop.eup %7837  ;;  %v13110_v54 = vadd.f32 1.0, %v7834_v37  ;;  %v838_v17 = vadd.f32 %v12855_v3, %v837_v22  ;;  %v2808_v38 = vadd.f32 %v12835_v62, %v2807_v48  ;;  %v4601_v60 = vsub.f32 1.0, %v4600_v63  ;;  %v3603_v48 = vpop.xlane.xlu0 %3602  ;;  %vm13136_vm5 = vmor %vm6029_vm0, %vm6030_vm6 }
 0x377   :  { %v13107_v0 = vpop.eup %7839  ;;  %7841 = vrcp.f32 %v13082_v7  ;;  %v7129_v11 = vmul.f32 -1.442695, %v3873_v8  ;;  %vm2814_vm13 = vcmp.eq.f32.partialorder %v2813_v50, 8.507059e+37  ;;  %v7130_v59 = vmul.f32 -1.442695, %v3874_v12 }
 0x378   :  { %7843 = vpow2.f32 %v7097_v41  ;;  %v2812_v28 = vsel %vm13101_vm15, %v12835_v62, %v2808_v38  ;;  %v2816_v29 = vor.u32 1.1754944e-38, %v2815_v57  ;;  %v13119_v37 = vadd.f32 %v13015_v1, %v6027_v33  ;;  %v13129_v62 = vpop.xlane.xlu2 %3534 }
 0x379   :  { %v5576_v5 = vsub.f32 1.0, %v5575_v49  ;;  %v6921_v22 = vmul.f32 -1.442695, %v646_v51  ;;  %v934_v44 = vadd.f32 %v12855_v3, %v933_v32  ;;  %v13122_v63 = vor.u32 1.1754944e-38, %v4610_v10  ;;  %v13141_v10 = vpop.xlane.xlu1 %3598 }
 0x37a   :  { %7845 = vrcp.f32 %v13110_v54  ;;  %v6985_v50 = vmul.f32 -1.442695, %v838_v17  ;;  %v2817_v41 = vsel %vm2814_vm13, %v2816_v29, %v2812_v28  ;;  %vm4604_vm14 = vweird.f32 %v12999_v30 }
 0x37b   :  { %vm4605_vm3 = vweird.f32 %v13068_v4  ;;  %v13127_v38 = vor.u32 1.1754944e-38, %v5585_v42  ;;  %7847 = vpow2.f32 %v7129_v11  ;;  %v3468_v8 = vmul.f32 %v13055_v19, %v2817_v41  ;;  %v744_v42 = vpop.f32.mrf.mxu1 }
 0x37c   :  { %v4602_v29 = vmul.f32 %v13068_v4, %v4601_v60  ;;  %7849 = vpow2.f32 %v7130_v59  ;;  %v3812_v11 = vadd.f32 %v9913_v2, %v3603_v48  ;;  %v2340_v33 = vmul.f32 %v12895_v35, %v12820_v31  ;;  %vm13198_vm1 = vmor %vm4604_vm14, %vm4605_vm3 }
 0x37d   :  { %v13146_v12 = vpop.eup %7841  ;;  %v5577_v51 = vmul.f32 %v13078_v25, %v5576_v5  ;;  %7851 = vpow2.f32 %v6921_v22  ;;  %v7017_v57 = vmul.f32 -1.442695, %v934_v44  ;;  %3686 = vadd.xlane.f32.xlu0 %v3468_v8  ;;  %vm5580_vm10 = vweird.f32 %v13078_v25 }
 0x37e   :  { %v7844_v59 = vpop.eup %7843  ;;  %7853 = vpow2.f32 %v6985_v50  ;;  %v649_v17 = vadd.f32 %v12855_v3, %v648_v14  ;;  %v7068_v60 = vmul.f32 -1.442695, %v3812_v11  ;;  %v2341_v28 = vsub.f32 1.0, %v2340_v33  ;;  %v840_v50 = vpop.f32.mrf.mxu2 }
 0x37f   :  { %v745_v48 = vadd.f32 %v12855_v3, %v744_v42  ;;  %vm2344_vm0 = vweird.f32 %v12820_v31  ;;  %v2350_v41 = vand.u32 2147483648, %v12820_v31  ;;  %v3285_v5 = vmul.f32 %v12842_v36, %v12765_v6 }
 0x380   :  { %v13160_v22 = vpop.eup %7845  ;;  %v16586_v44 = vand.u32 2147483647, %v12999_v30  ;;  %vm5579_vm12 = vweird.f32 %v13002_v15  ;;  %7855 = vpow2.f32 %v7068_v60  ;;  %v2342_v14 = vmul.f32 %v12895_v35, %v2341_v28  ;;  %v13223_v40 = vpop.xlane.xlu2 %3600 }
 0x381   :  { %16585 = vst [vmem:[#allocation34_spill] sm:$0xff] %v13160_v22  ;;  %vm2345_vm15 = vweird.f32 %v12895_v35  ;;  %v2348_v42 = vand.u32 2147483647, %v12820_v31  ;;  %v7848_v11 = vpop.eup %7847  ;;  %v4603_v33 = vadd.f32 %v13068_v4, %v4602_v29  ;;  %v13173_v49 = vadd.f32 1.0, %v7844_v59 }
 0x382   :  { %vm13164_vm9 = vcmp.eq.f32.partialorder %v16586_v44, 8.507059e+37  ;;  %7857 = vpow2.f32 %v7017_v57  ;;  %v3286_v44 = vsub.f32 1.0, %v3285_v5  ;;  %v7850_v20 = vpop.eup %7849  ;;  %v16590_v18 = vand.u32 2147483647, %v12948_v24  ;;  %vm13189_vm4 = vmor %vm2344_vm0, %vm2345_vm15  ;;  %16604 = vst [vmem:[#allocation38_spill] sm:$0xff] %v13223_v40 }
 0x383   :  { %16589 = vst [vmem:[#allocation35_spill] sm:$0xff] %v13173_v49  ;;  %v6922_v60 = vmul.f32 -1.442695, %v649_v17  ;;  %v2343_v28 = vadd.f32 %v12895_v35, %v2342_v14  ;;  %vm3289_vm13 = vweird.f32 %v12765_v6  ;;  %vm3290_vm8 = vweird.f32 %v12842_v36  ;;  %v7852_v53 = vpop.eup %7851 }
 0x384   :  { %vm13177_vm6 = vcmp.eq.f32.partialorder %v16590_v18, 8.507059e+37  ;;  %v6954_v29 = vmul.f32 -1.442695, %v745_v48  ;;  %v841_v59 = vadd.f32 %v12855_v3, %v840_v50  ;;  %v2351_v24 = vor.u32 1.1754944e-38, %v2350_v41  ;;  %v7854_v17 = vpop.eup %7853  ;;  %vm13229_vm14 = vmor %vm3289_vm13, %vm3290_vm8 }
 0x385   :  { %v3287_v57 = vmul.f32 %v12842_v36, %v3286_v44  ;;  %v5578_v5 = vadd.f32 %v13078_v25, %v5577_v51  ;;  %v16597_v31 = vand.u32 2147483647, %v13002_v15  ;;  %vm13209_vm15 = vcmp.eq.f32.partialorder %v2348_v42, 8.507059e+37  ;;  %vm13258_vm8 = vmor %vm5579_vm12, %vm5580_vm10 }
 0x386   :  { %v3293_v14 = vand.u32 2147483647, %v12765_v6  ;;  %v3295_v30 = vand.u32 2147483648, %v12765_v6  ;;  %v4607_v44 = vsel %vm13198_vm1, %v13068_v4, %v4603_v33  ;;  %7859 = vrcp.f32 %v13173_v49  ;;  %v7856_v55 = vpop.eup %7855  ;;  %v13235_v33 = vpop.xlane.xlu1 %3664 }
 0x387   :  { %vm13205_vm0 = vcmp.eq.f32.partialorder %v16597_v31, 8.507059e+37  ;;  %v13219_v51 = vadd.f32 1.0, %v7848_v11  ;;  %v13221_v31 = vadd.f32 1.0, %v7850_v20  ;;  %v3778_v4 = vadd.f32 %v9913_v2, %v13129_v62  ;;  %16607 = vst [vmem:[#allocation39_spill] sm:$0xff] %v13235_v33 }
 0x388   :  { %7861 = vpow2.f32 %v6922_v60  ;;  %v2347_v20 = vsel %vm13189_vm4, %v12895_v35, %v2343_v28  ;;  %v3288_v11 = vadd.f32 %v12842_v36, %v3287_v57  ;;  %v7858_v48 = vpop.eup %7857  ;;  %v6986_v6 = vmul.f32 -1.442695, %v841_v59 }
 0x389   :  { %16602 = vst [vmem:[#allocation36_spill] sm:$0xff] %v13219_v51  ;;  %7863 = vpow2.f32 %v6954_v29  ;;  %v13241_v40 = vadd.f32 1.0, %v7856_v55  ;;  %v2352_v26 = vsel %vm13209_vm15, %v2351_v24, %v2347_v20  ;;  %vm3294_vm1 = vcmp.eq.f32.partialorder %v3293_v14, 8.507059e+37  ;;  %v3667_v14 = vpop.xlane.xlu2 %3666 }
 0x38a   :  { %16603 = vst [vmem:[#allocation37_spill] sm:$0xff] %v13221_v31  ;;  %v3437_v22 = vmul.f32 %v13055_v19, %v2352_v26  ;;  %v3292_v62 = vsel %vm13229_vm14, %v12842_v36, %v3288_v11  ;;  %v3296_v60 = vor.u32 1.1754944e-38, %v3295_v30  ;;  %v13252_v35 = vsel %vm13164_vm9, %v13122_v63, %v4607_v44 }
 0x38b   :  { %16608 = vst [vmem:[#allocation40_spill] sm:$0xff] %v13252_v35  ;;  %v5570_v26 = vand.u32 2147483648, %v13173_v49  ;;  %v13263_v28 = vadd.f32 1.0, %v7852_v53  ;;  %7865 = vrcp.f32 %v13241_v40  ;;  %v5582_v36 = vsel %vm13258_vm8, %v13078_v25, %v5578_v5 }
 0x38c   :  { %7867 = vrcp.f32 %v13219_v51  ;;  %v7034_v63 = vmul.f32 -1.442695, %v3778_v4  ;;  %3624 = vadd.xlane.f32.xlu2 %v3437_v22  ;;  %v3297_v8 = vsel %vm3294_vm1, %v3296_v60, %v3292_v62  ;;  %v13270_v15 = vpop.eup %7859  ;;  %v16611_v29 = vsel %vm13136_vm5, %v13015_v1, %v13119_v37 }
 0x38d   :  { %v13280_v53 = vsel %vm13177_vm6, %v13073_v39, %v16611_v29  ;;  %v13282_v59 = vadd.f32 1.0, %v7854_v17  ;;  %v3810_v25 = vadd.f32 %v9913_v2, %v13141_v10  ;;  %7869 = vpow2.f32 %v6986_v6 }
 0x38e   :  { %16612 = vst [vmem:[#allocation41_spill] sm:$0xff] %v13280_v53  ;;  %v7862_v22 = vpop.eup %7861  ;;  %7871 = vrcp.f32 %v13221_v31  ;;  %v13289_v32 = vadd.f32 1.0, %v7858_v48  ;;  %v3500_v1 = vmul.f32 %v13055_v19, %v3297_v8  ;;  %v13295_v16 = vsel %vm13205_vm0, %v13127_v38, %v5582_v36  ;;  %v3539_v20 = vpop.xlane.xlu1 %3538 }
 0x38f   :  { %v7864_v37 = vpop.eup %7863  ;;  %16613 = vst [vmem:[#allocation42_spill] sm:$0xff] %v13295_v16  ;;  %v13298_v10 = vor.u32 1.1754944e-38, %v5570_v26  ;;  %7873 = vrcp.f32 %v13263_v28  ;;  %v6050_v57 = vand.u32 2147483648, %v13219_v51  ;;  %v1860_v17 = vmul.f32 %v12871_v9, %v12773_v43  ;;  %v747_v48 = vpop.f32.mrf.mxu1 }
 0x390   :  { %7875 = vpow2.f32 %v7034_v63  ;;  %3750 = vadd.xlane.f32.xlu1 %v3500_v1  ;;  %v5560_v38 = vmul.f32 %v13270_v15, %v13173_v49  ;;  %v7066_v41 = vmul.f32 -1.442695, %v3810_v25  ;;  %v13315_v42 = vadd.f32 1.0, %v7862_v22  ;;  %v843_v36 = vpop.f32.mrf.mxu2 }
 0x391   :  { %16614 = vst [vmem:[#allocation43_spill] sm:$0xff] %v13298_v10  ;;  %v13305_v5 = vpop.eup %7865  ;;  %7877 = vrcp.f32 %v13282_v59  ;;  %v1861_v4 = vsub.f32 1.0, %v1860_v17  ;;  %vm1864_vm4 = vweird.f32 %v12773_v43  ;;  %vm1865_vm3 = vweird.f32 %v12871_v9 }
 0x392   :  { %v13311_v30 = vpop.eup %7867  ;;  %7879 = vrcp.f32 %v13289_v32  ;;  %v1868_v6 = vand.u32 2147483647, %v12773_v43  ;;  %v1870_v62 = vand.u32 2147483648, %v12773_v43  ;;  %v13323_v55 = vadd.f32 1.0, %v7864_v37  ;;  %vm13344_vm5 = vmor %vm1864_vm4, %vm1865_vm3 }
 0x393   :  { %v7870_v11 = vpop.eup %7869  ;;  %v5125_v26 = vmul.f32 %v13305_v5, %v13241_v40  ;;  %v1862_v63 = vmul.f32 %v12871_v9, %v1861_v4  ;;  %v3844_v8 = vadd.f32 %v9913_v2, %v3667_v14  ;;  %v5561_v25 = vsub.f32 1.0, %v5560_v38  ;;  %v3731_v38 = vpop.xlane.xlu0 %3730 }
 0x394   :  { %v13321_v60 = vpop.eup %7871  ;;  %v13331_v22 = vor.u32 1.1754944e-38, %v6050_v57  ;;  %7881 = vpow2.f32 %v7066_v41  ;;  %v3780_v1 = vadd.f32 %v9913_v2, %v3539_v20  ;;  %v13337_v37 = vadd.f32 1.0, %v7870_v11 }
 0x395   :  { %16615 = vst [vmem:[#allocation44_spill] sm:$0xff] %v13321_v60  ;;  %v13329_v29 = vpop.eup %7873  ;;  %7883 = vrcp.f32 %v13315_v42  ;;  %v748_v50 = vadd.f32 %v12855_v3, %v747_v48  ;;  %v1871_v57 = vor.u32 1.1754944e-38, %v1870_v62  ;;  %v844_v4 = vadd.f32 %v12855_v3, %v843_v36  ;;  %v651_v62 = vpop.f32.mrf.mxu0 }
 0x396   :  { %16616 = vst [vmem:[#allocation45_spill] sm:$0xff] %v13331_v22  ;;  %v13334_v17 = vpop.eup %7875  ;;  %v1863_v20 = vadd.f32 %v12871_v9, %v1862_v63  ;;  %vm1869_vm10 = vcmp.eq.f32.partialorder %v1868_v6, 8.507059e+37  ;;  %v7100_v11 = vmul.f32 -1.442695, %v3844_v8  ;;  %v13356_v48 = vmul.f32 %v13311_v30, %v13219_v51 }
 0x397   :  { %16617 = vst [vmem:[#allocation46_spill] sm:$0xff] %v13334_v17  ;;  %v13348_v41 = vpop.eup %7877  ;;  %7885 = vrcp.f32 %v13323_v55  ;;  %v5126_v43 = vsub.f32 1.0, %v5125_v26  ;;  %v7036_v18 = vmul.f32 -1.442695, %v3780_v1  ;;  %v3876_v36 = vadd.f32 %v9913_v2, %v3731_v38 }
 0x398   :  { %v13352_v24 = vpop.eup %7879  ;;  %v1867_v44 = vsel %vm13344_vm5, %v12871_v9, %v1863_v20  ;;  %7887 = vpow2.f32 %v7100_v11  ;;  %v2835_v6 = vmul.f32 %v13039_v34, %v12964_v13  ;;  %v13366_v63 = vmul.f32 %v13270_v15, %v5561_v25  ;;  %v936_v11 = vpop.f32.mrf.mxu3 }
 0x399   :  { %7889 = vrcp.f32 %v13337_v37  ;;  %v6955_v8 = vmul.f32 -1.442695, %v748_v50  ;;  %v1872_v39 = vsel %vm1869_vm10, %v1871_v57, %v1867_v44  ;;  %v6987_v1 = vmul.f32 -1.442695, %v844_v4 }
 0x39a   :  { %v13369_v26 = vpop.eup %7881  ;;  %v3405_v53 = vmul.f32 %v13055_v19, %v1872_v39  ;;  %7891 = vpow2.f32 %v7036_v18  ;;  %v7132_v9 = vmul.f32 -1.442695, %v3876_v36  ;;  %v5127_v38 = vmul.f32 %v13305_v5, %v5126_v43 }
 0x39b   :  { %16620 = vst [vmem:[#allocation47_spill] sm:$0xff] %v13369_v26  ;;  %v13372_v14 = vpop.eup %7883  ;;  %v652_v20 = vadd.f32 %v12855_v3, %v651_v62  ;;  %v2836_v25 = vsub.f32 1.0, %v2835_v6  ;;  %vm2839_vm9 = vweird.f32 %v12964_v13  ;;  %vm2840_vm12 = vweird.f32 %v13039_v34  ;;  %v3669_v51 = vpop.xlane.xlu0 %3668 }
 0x39c   :  { %3560 = vadd.xlane.f32.xlu0 %v3405_v53  ;;  %7893 = vpow2.f32 %v7132_v9  ;;  %v2843_v50 = vand.u32 2147483647, %v12964_v13  ;;  %v2845_v39 = vand.u32 2147483648, %v12964_v13  ;;  %vm5129_vm6 = vweird.f32 %v13241_v40  ;;  %vm13398_vm13 = vmor %vm2839_vm9, %vm2840_vm12 }
 0x39d   :  { %v13380_v18 = vpop.eup %7885  ;;  %7895 = vpow2.f32 %v6955_v8  ;;  %v2837_v44 = vmul.f32 %v13039_v34, %v2836_v25  ;;  %v2820_v57 = vmul.f32 %v12900_v56, %v12824_v45  ;;  %v5133_v53 = vand.u32 2147483647, %v13241_v40 }
 0x39e   :  { %v7888_v4 = vpop.eup %7887  ;;  %v5135_v43 = vand.u32 2147483648, %v13241_v40  ;;  %7897 = vpow2.f32 %v6987_v1  ;;  %v937_v62 = vadd.f32 %v12855_v3, %v936_v11  ;;  %v2846_v25 = vor.u32 1.1754944e-38, %v2845_v39 }
 0x39f   :  { %v13389_v36 = vpop.eup %7889  ;;  %v13391_v6 = vadd.f32 1.0, %v7888_v4  ;;  %v2838_v9 = vadd.f32 %v13039_v34, %v2837_v44  ;;  %v2821_v16 = vsub.f32 1.0, %v2820_v57  ;;  %v5128_v1 = vadd.f32 %v13305_v5, %v5127_v38  ;;  %v3605_v57 = vpop.xlane.xlu1 %3604 }
 0x3a0   :  { %16621 = vst [vmem:[#allocation48_spill] sm:$0xff] %v13389_v36  ;;  %v7892_v22 = vpop.eup %7891  ;;  %vm5130_vm0 = vweird.f32 %v13305_v5  ;;  %v6923_v3 = vmul.f32 -1.442695, %v652_v20  ;;  %vm2844_vm15 = vcmp.eq.f32.partialorder %v2843_v50, 8.507059e+37  ;;  %vm2824_vm14 = vweird.f32 %v12824_v45 }
 0x3a1   :  { %7899 = vrcp.f32 %v13391_v6  ;;  %vm2825_vm1 = vweird.f32 %v12900_v56  ;;  %v2830_v13 = vand.u32 2147483648, %v12824_v45  ;;  %v13408_v44 = vadd.f32 1.0, %v7892_v22  ;;  %vm13419_vm8 = vmor %vm5129_vm6, %vm5130_vm0 }
 0x3a2   :  { %v7894_v11 = vpop.eup %7893  ;;  %v2842_v39 = vsel %vm13398_vm13, %v13039_v34, %v2838_v9  ;;  %v2822_v38 = vmul.f32 %v12900_v56, %v2821_v16  ;;  %v2828_v20 = vand.u32 2147483647, %v12824_v45  ;;  %v7018_v4 = vmul.f32 -1.442695, %v937_v62  ;;  %vm13443_vm3 = vmor %vm2824_vm14, %vm2825_vm1  ;;  %v3541_v45 = vpop.xlane.xlu2 %3540 }
 0x3a3   :  { %v13415_v50 = vpop.eup %7895  ;;  %v13423_v35 = vadd.f32 1.0, %v7894_v11  ;;  %v2847_v22 = vsel %vm2844_vm15, %v2846_v25, %v2842_v39  ;;  %v3300_v8 = vmul.f32 %v13090_v46, %v13022_v58  ;;  %v13432_v9 = vmul.f32 %v13321_v60, %v13221_v31 }
 0x3a4   :  { %v13427_v34 = vpop.eup %7897  ;;  %v5132_v40 = vsel %vm13419_vm8, %v13305_v5, %v5128_v1  ;;  %7901 = vrcp.f32 %v13408_v44  ;;  %vm5134_vm4 = vcmp.eq.f32.partialorder %v5133_v53, 8.507059e+37  ;;  %v5136_v62 = vor.u32 1.1754944e-38, %v5135_v43 }
 0x3a5   :  { %7903 = vrcp.f32 %v13423_v35  ;;  %v2831_v11 = vor.u32 1.1754944e-38, %v2830_v13  ;;  %v3470_v39 = vmul.f32 %v13055_v19, %v2847_v22  ;;  %v2823_v5 = vadd.f32 %v12900_v56, %v2822_v38 }
 0x3a6   :  { %7905 = vpow2.f32 %v6923_v3  ;;  %vm2829_vm5 = vcmp.eq.f32.partialorder %v2828_v20, 8.507059e+37  ;;  %v13451_v53 = vsel %vm5134_vm4, %v5136_v62, %v5132_v40  ;;  %v3301_v43 = vsub.f32 1.0, %v3300_v8 }
 0x3a7   :  { %v13449_v1 = vpop.eup %7899  ;;  %7907 = vpow2.f32 %v7018_v4  ;;  %vm3304_vm10 = vweird.f32 %v13022_v58  ;;  %v5615_v3 = vand.u32 2147483648, %v13391_v6  ;;  %3690 = vadd.xlane.f32.xlu2 %v3470_v39  ;;  %v2827_v13 = vsel %vm13443_vm3, %v12900_v56, %v2823_v5 }
 0x3a8   :  { %v5605_v16 = vmul.f32 %v13449_v1, %v13391_v6  ;;  %vm3305_vm9 = vweird.f32 %v13090_v46  ;;  %v2832_v38 = vsel %vm2829_vm5, %v2831_v11, %v2827_v13  ;;  %v3302_v20 = vmul.f32 %v13090_v46, %v3301_v43 }
 0x3a9   :  { %v3308_v4 = vand.u32 2147483647, %v13022_v58  ;;  %v3310_v22 = vand.u32 2147483648, %v13022_v58  ;;  %v3469_v62 = vmul.f32 %v13055_v19, %v2832_v38  ;;  %vm13469_vm12 = vmor %vm3304_vm10, %vm3305_vm9  ;;  %v3781_v56 = vadd.f32 %v9913_v2, %v3541_v45 }
 0x3aa   :  { %v13464_v8 = vpop.eup %7901  ;;  %v5606_v40 = vsub.f32 1.0, %v5605_v16  ;;  %v3813_v25 = vadd.f32 %v9913_v2, %v3605_v57  ;;  %v3303_v43 = vadd.f32 %v13090_v46, %v3302_v20  ;;  %vm5609_vm13 = vweird.f32 %v13391_v6 }
 0x3ab   :  { %v13475_v11 = vpop.eup %7903  ;;  %v4645_v16 = vmul.f32 %v13464_v8, %v13408_v44  ;;  %vm13482_vm6 = vcmp.eq.f32.partialorder %v3308_v4, 8.507059e+37  ;;  %v5613_v45 = vand.u32 2147483647, %v13391_v6  ;;  %v13490_v57 = vor.u32 1.1754944e-38, %v5615_v3  ;;  %3688 = vadd.xlane.f32.xlu1 %v3469_v62 }
 0x3ac   :  { %v13486_v13 = vpop.eup %7905  ;;  %v6085_v38 = vmul.f32 %v13475_v11, %v13423_v35  ;;  %v3311_v5 = vor.u32 1.1754944e-38, %v3310_v22  ;;  %v3307_v4 = vsel %vm13469_vm12, %v13090_v46, %v3303_v43  ;;  %v7037_v21 = vmul.f32 -1.442695, %v3781_v56  ;;  %v3733_v56 = vpop.xlane.xlu1 %3732 }
 0x3ad   :  { %v13494_v33 = vpop.eup %7907  ;;  %v4646_v20 = vsub.f32 1.0, %v4645_v16  ;;  %v7069_v60 = vmul.f32 -1.442695, %v3813_v25  ;;  %v5607_v10 = vmul.f32 %v13449_v1, %v5606_v40  ;;  %vm4649_vm0 = vweird.f32 %v13408_v44 }
 0x3ae   :  { %16632 = vst [vmem:[#allocation49_spill] sm:$0xff] %v13494_v33  ;;  %v6086_v3 = vsub.f32 1.0, %v6085_v38  ;;  %v3312_v31 = vsel %vm13482_vm6, %v3311_v5, %v3307_v4  ;;  %7909 = vpow2.f32 %v7037_v21  ;;  %v3845_v16 = vadd.f32 %v9913_v2, %v3669_v51 }
 0x3af   :  { %v4647_v22 = vmul.f32 %v13464_v8, %v4646_v20  ;;  %v3501_v62 = vmul.f32 %v13055_v19, %v3312_v31  ;;  %vm4650_vm15 = vweird.f32 %v13464_v8  ;;  %v4653_v46 = vand.u32 2147483647, %v13408_v44 }
 0x3b0   :  { %v4655_v39 = vand.u32 2147483648, %v13408_v44  ;;  %v3315_v40 = vmul.f32 %v13146_v12, %v13082_v7  ;;  %vm13511_vm14 = vcmp.eq.f32.partialorder %v5613_v45, 8.507059e+37  ;;  %vm6089_vm1 = vweird.f32 %v13423_v35  ;;  %vm13525_vm4 = vmor %vm4649_vm0, %vm4650_vm15 }
 0x3b1   :  { %v4648_v25 = vadd.f32 %v13464_v8, %v4647_v22  ;;  %3752 = vadd.xlane.f32.xlu0 %v3501_v62  ;;  %7911 = vpow2.f32 %v7069_v60  ;;  %v7101_v51 = vmul.f32 -1.442695, %v3845_v16  ;;  %v5608_v31 = vadd.f32 %v13449_v1, %v5607_v10 }
 0x3b2   :  { %vm5610_vm8 = vweird.f32 %v13449_v1  ;;  %v6087_v5 = vmul.f32 %v13475_v11, %v6086_v3  ;;  %v3316_v43 = vsub.f32 1.0, %v3315_v40  ;;  %vm3319_vm3 = vweird.f32 %v13082_v7 }
 0x3b3   :  { %7913 = vpow2.f32 %v7101_v51  ;;  %vm3320_vm5 = vweird.f32 %v13146_v12  ;;  %v3323_v10 = vand.u32 2147483647, %v13082_v7  ;;  %v4652_v60 = vsel %vm13525_vm4, %v13464_v8, %v4648_v25  ;;  %vm13540_vm10 = vmor %vm5609_vm13, %vm5610_vm8 }
 0x3b4   :  { %v6095_v45 = vand.u32 2147483648, %v13423_v35  ;;  %v3317_v38 = vmul.f32 %v13146_v12, %v3316_v43  ;;  %v3325_v44 = vand.u32 2147483648, %v13082_v7  ;;  %v7910_v20 = vpop.eup %7909  ;;  %vm4654_vm9 = vcmp.eq.f32.partialorder %v4653_v46, 8.507059e+37  ;;  %vm13557_vm6 = vmor %vm3319_vm3, %vm3320_vm5 }
 0x3b5   :  { %v4656_v3 = vor.u32 1.1754944e-38, %v4655_v39  ;;  %vm6090_vm12 = vweird.f32 %v13475_v11  ;;  %v1875_v8 = vmul.f32 %v13096_v23, %v13024_v52  ;;  %v5612_v22 = vsel %vm13540_vm10, %v13449_v1, %v5608_v31 }
 0x3b6   :  { %v13550_v62 = vadd.f32 1.0, %v7910_v20  ;;  %v3318_v16 = vadd.f32 %v13146_v12, %v3317_v38  ;;  %v3326_v46 = vor.u32 1.1754944e-38, %v3325_v44  ;;  %v13564_v25 = vadd.f32 %v13475_v11, %v6087_v5  ;;  %vm13586_vm8 = vmor %vm6089_vm1, %vm6090_vm12 }
 0x3b7   :  { %v7912_v39 = vpop.eup %7911  ;;  %v13561_v40 = vsel %vm4654_vm9, %v4656_v3, %v4652_v60  ;;  %vm3324_vm13 = vcmp.eq.f32.partialorder %v3323_v10, 8.507059e+37  ;;  %v1876_v1 = vsub.f32 1.0, %v1875_v8  ;;  %vm1879_vm0 = vweird.f32 %v13024_v52  ;;  %v3543_v8 = vpop.xlane.xlu0 %3542 }
 0x3b8   :  { %7915 = vrcp.f32 %v13550_v62  ;;  %v4670_v51 = vand.u32 2147483648, %v13550_v62  ;;  %v1883_v7 = vand.u32 2147483647, %v13024_v52  ;;  %v13570_v43 = vadd.f32 1.0, %v7912_v39 }
 0x3b9   :  { %v7914_v31 = vpop.eup %7913  ;;  %v3322_v58 = vsel %vm13557_vm6, %v13146_v12, %v3318_v16  ;;  %v1877_v5 = vmul.f32 %v13096_v23, %v1876_v1  ;;  %vm1880_vm15 = vweird.f32 %v13096_v23  ;;  %v13580_v10 = vsel %vm13511_vm14, %v13490_v57, %v5612_v22 }
 0x3ba   :  { %v13590_v38 = vor.u32 1.1754944e-38, %v6095_v45  ;;  %v13592_v12 = vadd.f32 1.0, %v7914_v31  ;;  %v3327_v44 = vsel %vm3324_vm13, %v3326_v46, %v3322_v58  ;;  %v4668_v57 = vand.u32 2147483647, %v13550_v62  ;;  %vm13608_vm14 = vmor %vm1879_vm0, %vm1880_vm15  ;;  %v3607_v58 = vpop.xlane.xlu2 %3606 }
 0x3bb   :  { %7917 = vrcp.f32 %v13570_v43  ;;  %v5150_v20 = vand.u32 2147483648, %v13570_v43  ;;  %v13603_v3 = vor.u32 1.1754944e-38, %v4670_v51  ;;  %vm13612_vm1 = vcmp.eq.f32.partialorder %v1883_v7, 8.507059e+37 }
 0x3bc   :  { %7919 = vrcp.f32 %v13592_v12  ;;  %vm4664_vm4 = vweird.f32 %v13550_v62  ;;  %v5148_v22 = vand.u32 2147483647, %v13570_v43  ;;  %v5628_v16 = vand.u32 2147483647, %v13592_v12 }
 0x3bd   :  { %v3502_v6 = vmul.f32 %v13055_v19, %v3327_v44  ;;  %v1878_v46 = vadd.f32 %v13096_v23, %v1877_v5  ;;  %v13621_v1 = vor.u32 1.1754944e-38, %v5150_v20  ;;  %v1885_v7 = vand.u32 2147483648, %v13024_v52 }
 0x3be   :  { %v7916_v39 = vpop.eup %7915  ;;  %v2355_v31 = vmul.f32 %v13107_v0, %v13027_v61  ;;  %vm13628_vm5 = vcmp.eq.f32.partialorder %v4668_v57, 8.507059e+37  ;;  %vm2359_vm10 = vweird.f32 %v13027_v61  ;;  %vm5144_vm9 = vweird.f32 %v13570_v43 }
 0x3bf   :  { %v4660_v4 = vmul.f32 %v7916_v39, %v13550_v62  ;;  %vm4665_vm3 = vweird.f32 %v7916_v39  ;;  %3754 = vadd.xlane.f32.xlu2 %v3502_v6  ;;  %v1882_v5 = vsel %vm13608_vm14, %v13096_v23, %v1878_v46  ;;  %v1886_v52 = vor.u32 1.1754944e-38, %v1885_v7 }
 0x3c0   :  { %v2356_v44 = vsub.f32 1.0, %v2355_v31  ;;  %vm2360_vm12 = vweird.f32 %v13107_v0  ;;  %v2363_v20 = vand.u32 2147483647, %v13027_v61  ;;  %vm5624_vm6 = vweird.f32 %v13592_v12 }
 0x3c1   :  { %v7918_v51 = vpop.eup %7917  ;;  %v4661_v57 = vsub.f32 1.0, %v4660_v4  ;;  %v2365_v6 = vand.u32 2147483648, %v13027_v61  ;;  %v3814_v49 = vadd.f32 %v9913_v2, %v3607_v58  ;;  %v3877_v23 = vadd.f32 %v9913_v2, %v3733_v56  ;;  %vm13661_vm11 = vmor %vm2359_vm10, %vm2360_vm12 }
 0x3c2   :  { %v7920_v45 = vpop.eup %7919  ;;  %v5140_v46 = vmul.f32 %v7918_v51, %v13570_v43  ;;  %vm5145_vm13 = vweird.f32 %v7918_v51  ;;  %vm13644_vm0 = vcmp.eq.f32.partialorder %v5148_v22, 8.507059e+37  ;;  %v1887_v31 = vsel %vm13612_vm1, %v1886_v52, %v1882_v5  ;;  %vm4666_vm10 = vmor %vm4664_vm4, %vm4665_vm3 }
 0x3c3   :  { %v2357_v4 = vmul.f32 %v13107_v0, %v2356_v44  ;;  %v4662_v26 = vmul.f32 %v7916_v39, %v4661_v57  ;;  %v5620_v17 = vmul.f32 %v7920_v45, %v13592_v12  ;;  %vm5625_vm15 = vweird.f32 %v7920_v45 }
 0x3c4   :  { %vm13652_vm14 = vcmp.eq.f32.partialorder %v5628_v16, 8.507059e+37  ;;  %v3406_v56 = vmul.f32 %v13055_v19, %v1887_v31  ;;  %v5141_v5 = vsub.f32 1.0, %v5140_v46  ;;  %vm2364_vm1 = vcmp.eq.f32.partialorder %v2363_v20, 8.507059e+37  ;;  %vm5626_vm4 = vmor %vm5624_vm6, %vm5625_vm15 }
 0x3c5   :  { %v2358_v52 = vadd.f32 %v13107_v0, %v2357_v4  ;;  %v2366_v44 = vor.u32 1.1754944e-38, %v2365_v6  ;;  %v16655_v16 = vand.u32 2147483647, %v13423_v35  ;;  %v4663_v31 = vadd.f32 %v7916_v39, %v4662_v26 }
 0x3c6   :  { %v5621_v33 = vsub.f32 1.0, %v5620_v17  ;;  %3562 = vadd.xlane.f32.xlu1 %v3406_v56  ;;  %v7070_v61 = vmul.f32 -1.442695, %v3814_v49  ;;  %v7133_v36 = vmul.f32 -1.442695, %v3877_v23  ;;  %v5142_v46 = vmul.f32 %v7918_v51, %v5141_v5 }
 0x3c7   :  { %vm13668_vm7 = vcmp.eq.f32.partialorder %v16655_v16, 8.507059e+37  ;;  %v2362_v20 = vsel %vm13661_vm11, %v13107_v0, %v2358_v52  ;;  %v3782_v35 = vadd.f32 %v9913_v2, %v3543_v8  ;;  %v1890_v6 = vmul.f32 %v13329_v29, %v13263_v28  ;;  %vm5146_vm11 = vmor %vm5144_vm9, %vm5145_vm13 }
 0x3c8   :  { %v4667_v4 = vsel %vm4666_vm10, %v7916_v39, %v4663_v31  ;;  %v5622_v26 = vmul.f32 %v7920_v45, %v5621_v33  ;;  %v2367_v17 = vsel %vm2364_vm1, %v2366_v44, %v2362_v20  ;;  %7921 = vpow2.f32 %v7070_v61 }
 0x3c9   :  { %v4672_v49 = vsel %vm13628_vm5, %v13603_v3, %v4667_v4  ;;  %v5143_v62 = vadd.f32 %v7918_v51, %v5142_v46  ;;  %v3438_v23 = vmul.f32 %v13055_v19, %v2367_v17  ;;  %7923 = vpow2.f32 %v7133_v36 }
 0x3ca   :  { %v6516_v56 = vperm.slane %v4672_v49, %v10354_v27  ;;  %v5623_v0 = vadd.f32 %v7920_v45, %v5622_v26  ;;  %v7038_v22 = vmul.f32 -1.442695, %v3782_v35  ;;  %v1891_v39 = vsub.f32 1.0, %v1890_v6 }
 0x3cb   :  { %v5147_v33 = vsel %vm5146_vm11, %v7918_v51, %v5143_v62  ;;  %v16658_v21 = vand.u32 2147483648, %v13592_v12  ;;  %3626 = vadd.xlane.f32.xlu0 %v3438_v23  ;;  %vm1894_vm3 = vweird.f32 %v13263_v28  ;;  %vm1895_vm5 = vweird.f32 %v13329_v29 }
 0x3cc   :  { %v16659_v19 = vperm.slane %v13561_v40, %v10128_v47  ;;  %v5152_v43 = vsel %vm13644_vm0, %v13621_v1, %v5147_v33  ;;  %v5627_v51 = vsel %vm5626_vm4, %v7920_v45, %v5623_v0  ;;  %7925 = vpow2.f32 %v7038_v22  ;;  %v16660_v1 = vld [vmem:[#allocation34_spill] sm:$0xff] }
 0x3cd   :  { %v5631_v3 = vor.u32 1.1754944e-38, %v16658_v21  ;;  %v6578_v12 = vperm.slane %v5152_v43, %v10354_v27  ;;  %v1892_v5 = vmul.f32 %v13329_v29, %v1891_v39  ;;  %v1898_v52 = vand.u32 2147483647, %v13263_v28 }
 0x3ce   :  { %v13700_v36 = vsel %vm6457_vm2, %v6516_v56, %v16659_v19  ;;  %v7922_v44 = vpop.eup %7921  ;;  %v6639_v40 = vperm.slane %v13580_v10, %v10128_v47  ;;  %v1900_v7 = vand.u32 2147483648, %v13263_v28  ;;  %v2370_v45 = vmul.f32 %v16660_v1, %v13110_v54 }
 0x3cf   :  { %v5632_v8 = vsel %vm13652_vm14, %v5631_v3, %v5627_v51  ;;  %v7924_v31 = vpop.eup %7923  ;;  %v16661_v58 = vsel %vm13586_vm8, %v13475_v11, %v13564_v25  ;;  %v16662_v10 = vperm.slane %v13451_v53, %v10128_v47  ;;  %v13732_v20 = vadd.f32 1.0, %v7922_v44 }
 0x3d0   :  { %v6640_v16 = vperm.slane %v5632_v8, %v10354_v27  ;;  %v13724_v61 = vsel %vm13668_vm7, %v13590_v38, %v16661_v58  ;;  %v1893_v35 = vadd.f32 %v13329_v29, %v1892_v5  ;;  %v13738_v6 = vadd.f32 1.0, %v7924_v31  ;;  %vm13744_vm7 = vmor %vm1894_vm3, %vm1895_vm5 }
 0x3d1   :  { %v13730_v46 = vsel %vm6457_vm2, %v6578_v12, %v16662_v10  ;;  %v1901_v53 = vor.u32 1.1754944e-38, %v1900_v7  ;;  %v2371_v25 = vsub.f32 1.0, %v2370_v45  ;;  %v13749_v38 = vadd.f32 1.0, %v13415_v50 }
 0x3d2   :  { %v13736_v60 = vsel %vm6457_vm2, %v6640_v16, %v6639_v40  ;;  %7927 = vrcp.f32 %v13732_v20  ;;  %v5165_v57 = vand.u32 2147483648, %v13732_v20  ;;  %vm1899_vm8 = vcmp.eq.f32.partialorder %v1898_v52, 8.507059e+37  ;;  %v7926_v4 = vpop.eup %7925  ;;  %v3673_v16 = vpop.xlane.xlu2 %3672 }
 0x3d3   :  { %7929 = vrcp.f32 %v13738_v6  ;;  %v6110_v26 = vand.u32 2147483648, %v13738_v6  ;;  %vm2374_vm9 = vweird.f32 %v13110_v54  ;;  %vm2375_vm12 = vweird.f32 %v16660_v1 }
 0x3d4   :  { %v13758_v28 = vadd.f32 1.0, %v13427_v34  ;;  %v6701_v50 = vperm.slane %v13724_v61, %v10128_v47  ;;  %v13762_v17 = vadd.f32 1.0, %v7926_v4  ;;  %v1897_v49 = vsel %vm13744_vm7, %v13329_v29, %v1893_v35  ;;  %vm13776_vm6 = vmor %vm2374_vm9, %vm2375_vm12  ;;  %v13784_v29 = vld [vmem:[%s16119_s3] ss:$0 sm:$0xff] }
 0x3d5   :  { %v5163_v62 = vand.u32 2147483647, %v13732_v20  ;;  %v6108_v23 = vand.u32 2147483647, %v13738_v6  ;;  %v1902_v56 = vsel %vm1899_vm8, %v1901_v53, %v1897_v49  ;;  %v2372_v0 = vmul.f32 %v16660_v1, %v2371_v25 }
 0x3d6   :  { %v13770_v22 = vor.u32 1.1754944e-38, %v5165_v57  ;;  %v13772_v34 = vor.u32 1.1754944e-38, %v6110_v26  ;;  %7931 = vrcp.f32 %v13762_v17  ;;  %v4685_v39 = vand.u32 2147483648, %v13762_v17  ;;  %v3671_v26 = vpop.xlane.xlu1 %3670 }
 0x3d7   :  { %vm5159_vm13 = vweird.f32 %v13732_v20  ;;  %v3407_v21 = vmul.f32 %v13784_v29, %v1902_v56  ;;  %v2373_v3 = vadd.f32 %v16660_v1, %v2372_v0  ;;  %v2378_v19 = vand.u32 2147483647, %v13110_v54 }
 0x3d8   :  { %v2380_v43 = vand.u32 2147483648, %v13110_v54  ;;  %v7928_v51 = vpop.eup %7927  ;;  %vm6104_vm0 = vweird.f32 %v13738_v6  ;;  %v4683_v12 = vand.u32 2147483647, %v13762_v17  ;;  %v13792_v8 = vor.u32 1.1754944e-38, %v4685_v39  ;;  %v3735_v39 = vpop.xlane.xlu0 %3734 }
 0x3d9   :  { %v2850_v5 = vmul.f32 %v13348_v41, %v13282_v59  ;;  %vm2854_vm15 = vweird.f32 %v13282_v59  ;;  %v7930_v52 = vpop.eup %7929  ;;  %v5155_v44 = vmul.f32 %v7928_v51, %v13732_v20  ;;  %vm5160_vm14 = vweird.f32 %v7928_v51  ;;  %3564 = vadd.xlane.f32.xlu2 %v3407_v21 }
 0x3da   :  { %vm13798_vm1 = vcmp.eq.f32.partialorder %v5163_v62, 8.507059e+37  ;;  %v2377_v54 = vsel %vm13776_vm6, %v16660_v1, %v2373_v3  ;;  %vm2379_vm10 = vcmp.eq.f32.partialorder %v2378_v19, 8.507059e+37  ;;  %v6100_v7 = vmul.f32 %v7930_v52, %v13738_v6  ;;  %vm5161_vm6 = vmor %vm5159_vm13, %vm5160_vm14 }
 0x3db   :  { %vm6105_vm11 = vweird.f32 %v7930_v52  ;;  %vm13806_vm4 = vcmp.eq.f32.partialorder %v6108_v23, 8.507059e+37  ;;  %v2381_v31 = vor.u32 1.1754944e-38, %v2380_v43  ;;  %v2851_v58 = vsub.f32 1.0, %v2850_v5 }
 0x3dc   :  { %v5156_v10 = vsub.f32 1.0, %v5155_v44  ;;  %vm4679_vm3 = vweird.f32 %v13762_v17  ;;  %vm2855_vm5 = vweird.f32 %v13348_v41  ;;  %v2858_v35 = vand.u32 2147483647, %v13282_v59  ;;  %v7932_v11 = vpop.eup %7931 }
 0x3dd   :  { %v2860_v1 = vand.u32 2147483648, %v13282_v59  ;;  %v6101_v53 = vsub.f32 1.0, %v6100_v7  ;;  %v2382_v25 = vsel %vm2379_vm10, %v2381_v31, %v2377_v54  ;;  %v2852_v57 = vmul.f32 %v13348_v41, %v2851_v58  ;;  %vm13824_vm9 = vmor %vm2854_vm15, %vm2855_vm5 }
 0x3de   :  { %v3847_v4 = vadd.f32 %v9913_v2, %v3673_v16  ;;  %v5157_v49 = vmul.f32 %v7928_v51, %v5156_v10  ;;  %v4675_v62 = vmul.f32 %v7932_v11, %v13762_v17  ;;  %vm4680_vm7 = vweird.f32 %v7932_v11  ;;  %vm6106_vm15 = vmor %vm6104_vm0, %vm6105_vm11 }
 0x3df   :  { %vm13817_vm8 = vcmp.eq.f32.partialorder %v4683_v12, 8.507059e+37  ;;  %v3439_v56 = vmul.f32 %v13784_v29, %v2382_v25  ;;  %v6102_v33 = vmul.f32 %v7930_v52, %v6101_v53  ;;  %v2853_v21 = vadd.f32 %v13348_v41, %v2852_v57  ;;  %vm4681_vm13 = vmor %vm4679_vm3, %vm4680_vm7 }
 0x3e0   :  { %vm2859_vm12 = vcmp.eq.f32.partialorder %v2858_v35, 8.507059e+37  ;;  %v2861_v3 = vor.u32 1.1754944e-38, %v2860_v1  ;;  %v5158_v19 = vadd.f32 %v7928_v51, %v5157_v49  ;;  %v4676_v43 = vsub.f32 1.0, %v4675_v62  ;;  %v16675_v1 = vld [vmem:[#allocation6_spill] sm:$0xff] }
 0x3e1   :  { %3628 = vadd.xlane.f32.xlu1 %v3439_v56  ;;  %v7103_v12 = vmul.f32 -1.442695, %v3847_v4  ;;  %v3846_v5 = vadd.f32 %v9913_v2, %v3671_v26  ;;  %v6103_v59 = vadd.f32 %v7930_v52, %v6102_v33  ;;  %v2857_v44 = vsel %vm13824_vm9, %v13348_v41, %v2853_v21  ;;  %v8196_v33 = vld [vmem:[%s16118_s2] ss:$0 sm:$0xff]  ;;  %s8223_s2 = smov [#allocation3]  }
 0x3e2   :  { %v3878_v54 = vadd.f32 %v9913_v2, %v3735_v39  ;;  %v2385_v16 = vmul.f32 %v13380_v18, %v13323_v55  ;;  %v5162_v7 = vsel %vm5161_vm6, %v7928_v51, %v5158_v19  ;;  %v4677_v31 = vmul.f32 %v7932_v11, %v4676_v43  ;;  %s6753_s25 = sshll.u32 %s8223_s2, 4  ;;  %s6754_s25 = int_to_ptr.vmem [resolvable:$true] %s6753_s25 }
 0x3e3   :  { %v2862_v58 = vsel %vm2859_vm12, %v2861_v3, %v2857_v44  ;;  %7933 = vpow2.f32 %v7103_v12  ;;  %v5167_v20 = vsel %vm13798_vm1, %v13770_v22, %v5162_v7  ;;  %v6107_v10 = vsel %vm6106_vm15, %v7930_v52, %v6103_v59  ;;  %v16683_v7 = vld [vmem:[#allocation33_spill] sm:$0xff] }
 0x3e4   :  { %v3471_v41 = vmul.f32 %v13784_v29, %v2862_v58  ;;  %v7102_v35 = vmul.f32 -1.442695, %v3846_v5  ;;  %v6580_v53 = vperm.slane %v5167_v20, %v16675_v1  ;;  %v6112_v51 = vsel %vm13806_vm4, %v13772_v34, %v6107_v10 }
 0x3e5   :  { %v4678_v25 = vadd.f32 %v7932_v11, %v4677_v31  ;;  %v7134_v6 = vmul.f32 -1.442695, %v3878_v54  ;;  %v6702_v57 = vperm.slane %v6112_v51, %v10354_v27  ;;  %v2386_v22 = vsub.f32 1.0, %v2385_v16 }
 0x3e6   :  { %3692 = vadd.xlane.f32.xlu0 %v3471_v41  ;;  %7935 = vpow2.f32 %v7102_v35  ;;  %vm2389_vm0 = vweird.f32 %v13323_v55  ;;  %vm16676_vm14 = vcmask 195712   ;;  %vm2390_vm1 = vweird.f32 %v13380_v18 }
 0x3e7   :  { %v13857_v52 = vsel %vm16676_vm14, %v6580_v53, %v13730_v46  ;;  %v4682_v40 = vsel %vm4681_vm13, %v7932_v11, %v4678_v25  ;;  %7937 = vpow2.f32 %v7134_v6  ;;  %v13864_v27 = vsel %vm6457_vm2, %v6702_v57, %v6701_v50  ;;  %v939_v11 = vpop.f32.mrf.mxu3  ;;  %vm13887_vm2 = vmor %vm2389_vm0, %vm2390_vm1 }
 0x3e8   :  { %v4687_v17 = vsel %vm13817_vm8, %v13792_v8, %v4682_v40  ;;  %v2387_v34 = vmul.f32 %v13380_v18, %v2386_v22  ;;  %v2393_v45 = vand.u32 2147483647, %v13323_v55  ;;  %7939 = vrcp.f32 %v13749_v38  ;;  %vm16679_vm10 = vmmov %vm16676_vm14 }
 0x3e9   :  { %v7934_v46 = vpop.eup %7933  ;;  %v6518_v4 = vperm.slane %v4687_v17, %v16675_v1  ;;  %v2395_v26 = vand.u32 2147483648, %v13323_v55  ;;  %v3330_v61 = vmul.f32 %v13352_v24, %v13289_v32  ;;  %7941 = vrcp.f32 %v13758_v28  ;;  %v3737_v17 = vpop.xlane.xlu2 %3736 }
 0x3ea   :  { %v13878_v50 = vadd.f32 1.0, %v13486_v13  ;;  %v13880_v8 = vadd.f32 1.0, %v7934_v46  ;;  %v2388_v49 = vadd.f32 %v13380_v18, %v2387_v34  ;;  %vm13895_vm11 = vcmp.eq.f32.partialorder %v2393_v45, 8.507059e+37  ;;  %v3545_v34 = vpop.xlane.xlu1 %3544 }
 0x3eb   :  { %v13893_v23 = vsel %vm16679_vm10, %v6518_v4, %v13700_v36  ;;  %v2396_v13 = vor.u32 1.1754944e-38, %v2395_v26  ;;  %v3331_v0 = vsub.f32 1.0, %v3330_v61  ;;  %v940_v55 = vadd.f32 %v8196_v33, %v939_v11 }
 0x3ec   :  { %v7936_v39 = vpop.eup %7935  ;;  %7943 = vrcp.f32 %v13880_v8  ;;  %vm3334_vm4 = vweird.f32 %v13289_v32  ;;  %vm3335_vm3 = vweird.f32 %v13352_v24  ;;  %v2392_v3 = vsel %vm13887_vm2, %v13380_v18, %v2388_v49 }
 0x3ed   :  { %v7938_v36 = vpop.eup %7937  ;;  %v13905_v21 = vadd.f32 1.0, %v7936_v39  ;;  %v3332_v19 = vmul.f32 %v13352_v24, %v3331_v0  ;;  %v3338_v43 = vand.u32 2147483647, %v13289_v32  ;;  %v13914_v12 = vadd.f32 %v13270_v15, %v13366_v63  ;;  %vm13945_vm5 = vmor %vm3334_vm4, %vm3335_vm3 }
 0x3ee   :  { %7945 = vrcp.f32 %v13878_v50  ;;  %v13917_v5 = vadd.f32 1.0, %v7938_v36  ;;  %v2397_v59 = vsel %vm13895_vm11, %v2396_v13, %v2392_v3  ;;  %v13921_v44 = vpop.eup %7939  ;;  %v16682_v54 = vsub.f32 1.0, %v13356_v48  ;;  %v3609_v48 = vpop.xlane.xlu0 %3608 }
 0x3ef   :  { %v6056_v16 = vsub.f32 1.0, %v13432_v9  ;;  %v13931_v63 = vadd.f32 %v9913_v2, %v16683_v7  ;;  %7947 = vrcp.f32 %v13905_v21  ;;  %v13934_v31 = vpop.eup %7941  ;;  %v13936_v58 = vmul.f32 -1.442695, %v940_v55 }
 0x3f0   :  { %v13926_v18 = vmul.f32 %v13311_v30, %v16682_v54  ;;  %v5658_v20 = vand.u32 2147483647, %v13880_v8  ;;  %v5660_v10 = vand.u32 2147483648, %v13880_v8  ;;  %7949 = vrcp.f32 %v13917_v5 }
 0x3f1   :  { %v5643_v41 = vand.u32 2147483647, %v13905_v21  ;;  %v3440_v35 = vmul.f32 %v13784_v29, %v2397_v59  ;;  %v3333_v53 = vadd.f32 %v13352_v24, %v3332_v19  ;;  %vm13952_vm7 = vcmp.eq.f32.partialorder %v3338_v43, 8.507059e+37 }
 0x3f2   :  { %v13956_v25 = vpop.eup %7943  ;;  %v5645_v6 = vand.u32 2147483648, %v13905_v21  ;;  %v6123_v57 = vand.u32 2147483647, %v13917_v5  ;;  %v3340_v22 = vand.u32 2147483648, %v13289_v32  ;;  %v1905_v40 = vmul.f32 %v13372_v14, %v13315_v42 }
 0x3f3   :  { %v5650_v45 = vmul.f32 %v13956_v25, %v13880_v8  ;;  %v6125_v46 = vand.u32 2147483648, %v13917_v5  ;;  %3630 = vadd.xlane.f32.xlu2 %v3440_v35  ;;  %v3337_v11 = vsel %vm13945_vm5, %v13352_v24, %v3333_v53  ;;  %vm1909_vm8 = vweird.f32 %v13315_v42 }
 0x3f4   :  { %v13970_v4 = vpop.eup %7945  ;;  %vm5639_vm9 = vweird.f32 %v13905_v21  ;;  %v3341_v32 = vor.u32 1.1754944e-38, %v3340_v22  ;;  %v1906_v26 = vsub.f32 1.0, %v1905_v40  ;;  %vm1910_vm12 = vweird.f32 %v13372_v14 }
 0x3f5   :  { %v1913_v61 = vand.u32 2147483647, %v13315_v42  ;;  %v7948_v49 = vpop.eup %7947  ;;  %v5651_v62 = vsub.f32 1.0, %v5650_v45  ;;  %vm6119_vm6 = vweird.f32 %v13917_v5  ;;  %v1915_v56 = vand.u32 2147483648, %v13315_v42  ;;  %vm13998_vm1 = vmor %vm1909_vm8, %vm1910_vm12 }
 0x3f6   :  { %v3879_v24 = vadd.f32 %v9913_v2, %v3737_v17  ;;  %v3783_v13 = vadd.f32 %v9913_v2, %v3545_v34  ;;  %v7950_v0 = vpop.eup %7949  ;;  %vm5654_vm15 = vweird.f32 %v13880_v8  ;;  %v5635_v39 = vmul.f32 %v7948_v49, %v13905_v21 }
 0x3f7   :  { %vm13981_vm13 = vcmp.eq.f32.partialorder %v5643_v41, 8.507059e+37  ;;  %v5646_v55 = vor.u32 1.1754944e-38, %v5645_v6  ;;  %v3342_v36 = vsel %vm13952_vm7, %v3341_v32, %v3337_v11  ;;  %v1907_v3 = vmul.f32 %v13372_v14, %v1906_v26 }
 0x3f8   :  { %vm5640_vm0 = vweird.f32 %v7948_v49  ;;  %v6115_v19 = vmul.f32 %v7950_v0, %v13917_v5  ;;  %vm13989_vm14 = vcmp.eq.f32.partialorder %v6123_v57, 8.507059e+37  ;;  %v6126_v59 = vor.u32 1.1754944e-38, %v6125_v46 }
 0x3f9   :  { %v3503_v54 = vmul.f32 %v13784_v29, %v3342_v36  ;;  %v5636_v41 = vsub.f32 1.0, %v5635_v39  ;;  %v1908_v35 = vadd.f32 %v13372_v14, %v1907_v3  ;;  %vm1914_vm2 = vcmp.eq.f32.partialorder %v1913_v61, 8.507059e+37  ;;  %vm5641_vm3 = vmor %vm5639_vm9, %vm5640_vm0 }
 0x3fa   :  { %v1916_v53 = vor.u32 1.1754944e-38, %v1915_v56  ;;  %v5652_v51 = vmul.f32 %v13956_v25, %v5651_v62  ;;  %v6116_v6 = vsub.f32 1.0, %v6115_v19  ;;  %v7135_v57 = vmul.f32 -1.442695, %v3879_v24 }
 0x3fb   :  { %3756 = vadd.xlane.f32.xlu1 %v3503_v54  ;;  %v7039_v22 = vmul.f32 -1.442695, %v3783_v13  ;;  %v5637_v40 = vmul.f32 %v7948_v49, %v5636_v41  ;;  %v1912_v42 = vsel %vm13998_vm1, %v13372_v14, %v1908_v35  ;;  %v3815_v17 = vadd.f32 %v9913_v2, %v3609_v48 }
 0x3fc   :  { %v2880_v34 = vmul.f32 %v13934_v31, %v13758_v28  ;;  %vm14010_vm10 = vcmp.eq.f32.partialorder %v5658_v20, 8.507059e+37  ;;  %v6117_v46 = vmul.f32 %v7950_v0, %v6116_v6  ;;  %vm6120_vm11 = vweird.f32 %v7950_v0 }
 0x3fd   :  { %v1917_v11 = vsel %vm1914_vm2, %v1916_v53, %v1912_v42  ;;  %7951 = vpow2.f32 %v7135_v57  ;;  %vm5655_vm4 = vweird.f32 %v13956_v25  ;;  %v5638_v32 = vadd.f32 %v7948_v49, %v5637_v40  ;;  %vm6121_vm5 = vmor %vm6119_vm6, %vm6120_vm11  ;;  %v16706_v42 = vld [vmem:[#allocation7_spill] sm:$0xff] }
 0x3fe   :  { %v3408_v26 = vmul.f32 %v13784_v29, %v1917_v11  ;;  %7953 = vpow2.f32 %v7039_v22  ;;  %v5653_v14 = vadd.f32 %v13956_v25, %v5652_v51  ;;  %v6118_v20 = vadd.f32 %v7950_v0, %v6117_v46  ;;  %vm14029_vm12 = vmor %vm5654_vm15, %vm5655_vm4 }
 0x3ff   :  { %v7071_v61 = vmul.f32 -1.442695, %v3815_v17  ;;  %v2881_v62 = vsub.f32 1.0, %v2880_v34  ;;  %v5642_v56 = vsel %vm5641_vm3, %v7948_v49, %v5638_v32  ;;  %vm2884_vm7 = vweird.f32 %v13758_v28 }
 0x400   :  { %3566 = vadd.xlane.f32.xlu0 %v3408_v26  ;;  %vm2885_vm8 = vweird.f32 %v13934_v31  ;;  %v2888_v24 = vand.u32 2147483647, %v13758_v28  ;;  %v5647_v49 = vsel %vm13981_vm13, %v5646_v55, %v5642_v56  ;;  %v6122_v5 = vsel %vm6121_vm5, %v7950_v0, %v6118_v20 }
 0x401   :  { %7955 = vpow2.f32 %v7071_v61  ;;  %v2882_v13 = vmul.f32 %v13934_v31, %v2881_v62  ;;  %v5661_v39 = vor.u32 1.1754944e-38, %v5660_v10  ;;  %v6642_v36 = vperm.slane %v5647_v49, %v16675_v1  ;;  %vm14041_vm9 = vmor %vm2884_vm7, %vm2885_vm8  ;;  %v16700_v10 = vld [vmem:[#allocation48_spill] sm:$0xff]  ;;  %v3547_v49 = vpop.xlane.xlu2 %3546 }
 0x402   :  { %v6127_v3 = vsel %vm13989_vm14, %v6126_v59, %v6122_v5  ;;  %v2890_v54 = vand.u32 2147483648, %v13758_v28  ;;  %v5657_v0 = vsel %vm14029_vm12, %v13956_v25, %v5653_v14  ;;  %v2865_v7 = vmul.f32 %v16700_v10, %v13337_v37 }
 0x403   :  { %v7952_v33 = vpop.eup %7951  ;;  %v6704_v55 = vperm.slane %v6127_v3, %v16675_v1  ;;  %v2883_v8 = vadd.f32 %v13934_v31, %v2882_v13  ;;  %vm16701_vm6 = vcmask 195712   ;;  %vm14059_vm15 = vcmp.eq.f32.partialorder %v2888_v24, 8.507059e+37 }
 0x404   :  { %v7954_v43 = vpop.eup %7953  ;;  %v14055_v59 = vsel %vm16701_vm6, %v6642_v36, %v13736_v60  ;;  %v14057_v48 = vadd.f32 1.0, %v7952_v33  ;;  %v2891_v41 = vor.u32 1.1754944e-38, %v2890_v54  ;;  %vm16704_vm13 = vmmov %vm16701_vm6  ;;  %v2866_v53 = vsub.f32 1.0, %v2865_v7  ;;  %v3611_v36 = vpop.xlane.xlu1 %3610 }
 0x405   :  { %v14065_v1 = vsel %vm16704_vm13, %v6704_v55, %v13864_v27  ;;  %v14067_v25 = vadd.f32 1.0, %v7954_v43  ;;  %v2887_v35 = vsel %vm14041_vm9, %v13934_v31, %v2883_v8  ;;  %v14073_v60 = vmul.f32 -1.442695, %v13931_v63  ;;  %v16705_v31 = vld [vmem:[#allocation49_spill] sm:$0xff] }
 0x406   :  { %v14077_v51 = vsel %vm14010_vm10, %v5661_v39, %v5657_v0  ;;  %7957 = vrcp.f32 %v14057_v48  ;;  %v6140_v6 = vand.u32 2147483648, %v14057_v48  ;;  %vm2869_vm0 = vweird.f32 %v13337_v37 }
 0x407   :  { %v7956_v27 = vpop.eup %7955  ;;  %7959 = vrcp.f32 %v14067_v25  ;;  %v4700_v57 = vand.u32 2147483648, %v14067_v25  ;;  %vm2870_vm14 = vweird.f32 %v16700_v10  ;;  %v14086_v63 = vadd.f32 1.0, %v16705_v31 }
 0x408   :  { %7961 = vpow2.f32 %v13936_v58  ;;  %v14089_v22 = vadd.f32 1.0, %v7956_v27  ;;  %v2892_v40 = vsel %vm14059_vm15, %v2891_v41, %v2887_v35  ;;  %v6644_v17 = vperm.slane %v14077_v51, %v16706_v42  ;;  %vm14104_vm1 = vmor %vm2869_vm0, %vm2870_vm14 }
 0x409   :  { %v6138_v34 = vand.u32 2147483647, %v14057_v48  ;;  %v3473_v45 = vmul.f32 %v13784_v29, %v2892_v40  ;;  %v2867_v46 = vmul.f32 %v16700_v10, %v2866_v53  ;;  %v14098_v11 = vor.u32 1.1754944e-38, %v6140_v6  ;;  %v3675_v40 = vpop.xlane.xlu0 %3674 }
 0x40a   :  { %v4698_v32 = vand.u32 2147483647, %v14067_v25  ;;  %v14101_v26 = vor.u32 1.1754944e-38, %v4700_v57  ;;  %7963 = vrcp.f32 %v14089_v22  ;;  %vm6134_vm2 = vweird.f32 %v14057_v48 }
 0x40b   :  { %3696 = vadd.xlane.f32.xlu2 %v3473_v45  ;;  %v2868_v14 = vadd.f32 %v16700_v10, %v2867_v46  ;;  %v2873_v20 = vand.u32 2147483647, %v13337_v37  ;;  %v2875_v61 = vand.u32 2147483648, %v13337_v37  ;;  %v2400_v62 = vmul.f32 %v13921_v44, %v13749_v38  ;;  %v16717_v37 = vld [vmem:[#allocation18_spill] sm:$0xff] }
 0x40c   :  { %v7958_v56 = vpop.eup %7957  ;;  %vm4694_vm10 = vweird.f32 %v14067_v25  ;;  %v5178_v24 = vand.u32 2147483647, %v14089_v22  ;;  %v5180_v21 = vand.u32 2147483648, %v14089_v22  ;;  %vm2404_vm11 = vweird.f32 %v13749_v38 }
 0x40d   :  { %vm2405_vm4 = vweird.f32 %v13921_v44  ;;  %v7960_v5 = vpop.eup %7959  ;;  %v6130_v13 = vmul.f32 %v7958_v56, %v14057_v48  ;;  %vm6135_vm3 = vweird.f32 %v7958_v56  ;;  %vm14120_vm5 = vcmp.eq.f32.partialorder %v6138_v34, 8.507059e+37 }
 0x40e   :  { %v2872_v39 = vsel %vm14104_vm1, %v16700_v10, %v2868_v14  ;;  %vm2874_vm7 = vcmp.eq.f32.partialorder %v2873_v20, 8.507059e+37  ;;  %v14127_v3 = vpop.eup %7961  ;;  %v4690_v19 = vmul.f32 %v7960_v5, %v14067_v25  ;;  %vm4695_vm8 = vweird.f32 %v7960_v5  ;;  %vm14146_vm15 = vmor %vm2404_vm11, %vm2405_vm4 }
 0x40f   :  { %vm14130_vm12 = vcmp.eq.f32.partialorder %v4698_v32, 8.507059e+37  ;;  %v2876_v33 = vor.u32 1.1754944e-38, %v2875_v61  ;;  %v2401_v0 = vsub.f32 1.0, %v2400_v62  ;;  %v6131_v55 = vsub.f32 1.0, %v6130_v13  ;;  %vm6136_vm0 = vmor %vm6134_vm2, %vm6135_vm3 }
 0x410   :  { %vm5174_vm9 = vweird.f32 %v14089_v22  ;;  %v2408_v8 = vand.u32 2147483647, %v13749_v38  ;;  %v2410_v10 = vand.u32 2147483648, %v13749_v38  ;;  %v3784_v7 = vadd.f32 %v9913_v2, %v3547_v49  ;;  %v7964_v43 = vpop.eup %7963  ;;  %vm4696_vm1 = vmor %vm4694_vm10, %vm4695_vm8 }
 0x411   :  { %v4691_v28 = vsub.f32 1.0, %v4690_v19  ;;  %v2877_v41 = vsel %vm2874_vm7, %v2876_v33, %v2872_v39  ;;  %v2402_v35 = vmul.f32 %v13921_v44, %v2401_v0  ;;  %v3816_v53 = vadd.f32 %v9913_v2, %v3611_v36 }
 0x412   :  { %v6132_v6 = vmul.f32 %v7958_v56, %v6131_v55  ;;  %v5170_v27 = vmul.f32 %v7964_v43, %v14089_v22  ;;  %vm5175_vm6 = vweird.f32 %v7964_v43  ;;  %v3472_v57 = vmul.f32 %v13784_v29, %v2877_v41 }
 0x413   :  { %v4692_v34 = vmul.f32 %v7960_v5, %v4691_v28  ;;  %v2403_v45 = vadd.f32 %v13921_v44, %v2402_v35  ;;  %vm2409_vm13 = vcmp.eq.f32.partialorder %v2408_v8, 8.507059e+37  ;;  %v2411_v46 = vor.u32 1.1754944e-38, %v2410_v10  ;;  %vm5176_vm2 = vmor %vm5174_vm9, %vm5175_vm6  ;;  %v16721_v35 = vld [vmem:[#allocation46_spill] sm:$0xff] }
 0x414   :  { %v6133_v32 = vadd.f32 %v7958_v56, %v6132_v6  ;;  %v5171_v58 = vsub.f32 1.0, %v5170_v27  ;;  %3694 = vadd.xlane.f32.xlu1 %v3472_v57  ;;  %v7040_v14 = vmul.f32 -1.442695, %v3784_v7  ;;  %v7072_v20 = vmul.f32 -1.442695, %v3816_v53  ;;  %v16722_v6 = vld [vmem:[#allocation47_spill] sm:$0xff] }
 0x415   :  { %v4693_v38 = vadd.f32 %v7960_v5, %v4692_v34  ;;  %v2407_v61 = vsel %vm14146_vm15, %v13921_v44, %v2403_v45  ;;  %vm16715_vm14 = vcmask 261312   ;;  %v3848_v49 = vadd.f32 %v9913_v2, %v3675_v40 }
 0x416   :  { %v14162_v62 = vsel %vm16715_vm14, %v6644_v17, %v14055_v59  ;;  %v6137_v13 = vsel %vm6136_vm0, %v7958_v56, %v6133_v32  ;;  %v5172_v48 = vmul.f32 %v7964_v43, %v5171_v58  ;;  %v2412_v39 = vsel %vm2409_vm13, %v2411_v46, %v2407_v61  ;;  %vm16718_vm10 = vmmov %vm16715_vm14  ;;  %v3739_v46 = vpop.xlane.xlu1 %3738 }
 0x417   :  { %7965 = vpow2.f32 %v7040_v14  ;;  %v6142_v44 = vsel %vm14120_vm5, %v14098_v11, %v6137_v13  ;;  %v4697_v36 = vsel %vm4696_vm1, %v7960_v5, %v4693_v38  ;;  %v3441_v51 = vmul.f32 %v13784_v29, %v2412_v39  ;;  %v16716_v5 = vld [vmem:[#allocation17_spill] sm:$0xff]  ;;  %vm16719_vm4 = vmmov %vm16718_vm10 }
 0x418   :  { %7967 = vpow2.f32 %v7072_v20  ;;  %v6706_v59 = vperm.slane %v6142_v44, %v16706_v42  ;;  %v4702_v17 = vsel %vm14130_vm12, %v14101_v26, %v4697_v36  ;;  %v5173_v56 = vadd.f32 %v7964_v43, %v5172_v48  ;;  %vm16720_vm7 = vmmov %vm16719_vm4 }
 0x419   :  { %v7104_v25 = vmul.f32 -1.442695, %v3848_v49  ;;  %7969 = vpow2.f32 %v14073_v60  ;;  %v6520_v19 = vperm.slane %v4702_v17, %v16706_v42  ;;  %v5181_v11 = vor.u32 1.1754944e-38, %v5180_v21  ;;  %3632 = vadd.xlane.f32.xlu0 %v3441_v51 }
 0x41a   :  { %v3120_v33 = vmul.f32 %v16717_v37, %v16716_v5  ;;  %v14185_v0 = vsel %vm16718_vm10, %v6706_v59, %v14065_v1  ;;  %v5177_v26 = vsel %vm5176_vm2, %v7964_v43, %v5173_v56  ;;  %vm5179_vm11 = vcmp.eq.f32.partialorder %v5178_v24, 8.507059e+37 }
 0x41b   :  { %7971 = vpow2.f32 %v7104_v25  ;;  %v14192_v60 = vsel %vm16719_vm4, %v6520_v19, %v13893_v23  ;;  %v5182_v21 = vsel %vm5179_vm11, %v5181_v11, %v5177_v26  ;;  %v14195_v8 = vadd.f32 1.0, %v14127_v3  ;;  %v3613_v26 = vpop.xlane.xlu2 %3612 }
 0x41c   :  { %7973 = vrcp.f32 %v14086_v63  ;;  %v3121_v54 = vsub.f32 1.0, %v3120_v33  ;;  %v6582_v1 = vperm.slane %v5182_v21, %v16706_v42  ;;  %vm3124_vm3 = vweird.f32 %v16716_v5 }
 0x41d   :  { %v7966_v55 = vpop.eup %7965  ;;  %v1920_v22 = vmul.f32 %v13970_v4, %v13878_v50  ;;  %vm3125_vm5 = vweird.f32 %v16717_v37  ;;  %v3130_v23 = vand.u32 2147483648, %v16716_v5  ;;  %v3128_v42 = vand.u32 2147483647, %v16716_v5 }
 0x41e   :  { %v7968_v24 = vpop.eup %7967  ;;  %v14201_v10 = vadd.f32 1.0, %v7966_v55  ;;  %v3122_v7 = vmul.f32 %v16717_v37, %v3121_v54  ;;  %v14208_v3 = vsel %vm16720_vm7, %v6582_v1, %v13857_v52  ;;  %v14216_v53 = vadd.f32 1.0, %v16721_v35  ;;  %vm14236_vm9 = vmor %vm3124_vm3, %vm3125_vm5 }
 0x41f   :  { %v14210_v43 = vadd.f32 1.0, %v7968_v24  ;;  %v1921_v28 = vsub.f32 1.0, %v1920_v22  ;;  %v14213_v41 = vpop.eup %7969  ;;  %v14219_v27 = vadd.f32 1.0, %v16722_v6  ;;  %vm1924_vm8 = vweird.f32 %v13878_v50 }
 0x420   :  { %7975 = vrcp.f32 %v14201_v10  ;;  %v4715_v57 = vand.u32 2147483648, %v14201_v10  ;;  %vm1925_vm12 = vweird.f32 %v13970_v4  ;;  %v3123_v45 = vadd.f32 %v16717_v37, %v3122_v7 }
 0x421   :  { %v7972_v31 = vpop.eup %7971  ;;  %7977 = vrcp.f32 %v14210_v43  ;;  %v5195_v52 = vand.u32 2147483648, %v14210_v43  ;;  %v3131_v32 = vor.u32 1.1754944e-38, %v3130_v23  ;;  %v1928_v58 = vand.u32 2147483647, %v13878_v50  ;;  %vm14258_vm15 = vmor %vm1924_vm8, %vm1925_vm12 }
 0x422   :  { %v14227_v40 = vpop.eup %7973  ;;  %v14229_v34 = vadd.f32 1.0, %v7972_v31  ;;  %7979 = vrcp.f32 %v14195_v8  ;;  %v4713_v14 = vand.u32 2147483647, %v14201_v10  ;;  %vm14243_vm6 = vcmp.eq.f32.partialorder %v3128_v42, 8.507059e+37 }
 0x423   :  { %v1922_v38 = vmul.f32 %v13970_v4, %v1921_v28  ;;  %v14248_v61 = vor.u32 1.1754944e-38, %v4715_v57  ;;  %v5193_v49 = vand.u32 2147483647, %v14210_v43  ;;  %v14251_v13 = vor.u32 1.1754944e-38, %v5195_v52  ;;  %v3679_v5 = vpop.xlane.xlu2 %3678 }
 0x424   :  { %7981 = vrcp.f32 %v14229_v34  ;;  %vm4709_vm13 = vweird.f32 %v14201_v10  ;;  %v3127_v39 = vsel %vm14236_vm9, %v16717_v37, %v3123_v45  ;;  %v1930_v36 = vand.u32 2147483648, %v13878_v50 }
 0x425   :  { %v1923_v44 = vadd.f32 %v13970_v4, %v1922_v38  ;;  %v3345_v51 = vmul.f32 %v14227_v40, %v14086_v63  ;;  %vm5189_vm0 = vweird.f32 %v14210_v43  ;;  %v5673_v17 = vand.u32 2147483647, %v14229_v34  ;;  %v16739_v38 = vld [vmem:[#allocation35_spill] sm:$0xff] }
 0x426   :  { %v7976_v59 = vpop.eup %7975  ;;  %v5675_v56 = vand.u32 2147483648, %v14229_v34  ;;  %v3132_v25 = vsel %vm14243_vm6, %v3131_v32, %v3127_v39  ;;  %vm14275_vm14 = vcmp.eq.f32.partialorder %v1928_v58, 8.507059e+37  ;;  %vm14280_vm1 = vcmp.eq.f32.partialorder %v4713_v14, 8.507059e+37 }
 0x427   :  { %v7978_v11 = vpop.eup %7977  ;;  %v4705_v50 = vmul.f32 %v7976_v59, %v14201_v10  ;;  %v3489_v37 = vmul.f32 %v13784_v29, %v3132_v25  ;;  %v1927_v33 = vsel %vm14258_vm15, %v13970_v4, %v1923_v44  ;;  %vm3349_vm2 = vweird.f32 %v14086_v63  ;;  %v3549_v25 = vpop.xlane.xlu0 %3548 }
 0x428   :  { %vm4710_vm10 = vweird.f32 %v7976_v59  ;;  %v5185_v21 = vmul.f32 %v7978_v11, %v14210_v43  ;;  %vm14290_vm11 = vcmp.eq.f32.partialorder %v5193_v49, 8.507059e+37  ;;  %v1931_v55 = vor.u32 1.1754944e-38, %v1930_v36  ;;  %v14294_v22 = vpop.eup %7979 }
 0x429   :  { %v3346_v1 = vsub.f32 1.0, %v3345_v51  ;;  %v4706_v24 = vsub.f32 1.0, %v4705_v50  ;;  %vm5669_vm4 = vweird.f32 %v14229_v34  ;;  %3728 = vadd.xlane.f32.xlu2 %v3489_v37  ;;  %vm3350_vm3 = vweird.f32 %v14227_v40  ;;  %vm4711_vm6 = vmor %vm4709_vm13, %vm4710_vm10 }
 0x42a   :  { %v3353_v4 = vand.u32 2147483647, %v14086_v63  ;;  %v3355_v7 = vand.u32 2147483648, %v14086_v63  ;;  %v7982_v23 = vpop.eup %7981  ;;  %v5186_v42 = vsub.f32 1.0, %v5185_v21  ;;  %v1932_v28 = vsel %vm14275_vm14, %v1931_v55, %v1927_v33  ;;  %vm14309_vm8 = vmor %vm3349_vm2, %vm3350_vm3 }
 0x42b   :  { %v3347_v35 = vmul.f32 %v14227_v40, %v3346_v1  ;;  %v3817_v6 = vadd.f32 %v9913_v2, %v3613_v26  ;;  %vm5565_vm5 = vweird.f32 %v13270_v15  ;;  %v4707_v57 = vmul.f32 %v7976_v59, %v4706_v24 }
 0x42c   :  { %vm5190_vm7 = vweird.f32 %v7978_v11  ;;  %v5665_v31 = vmul.f32 %v7982_v23, %v14229_v34  ;;  %v3409_v52 = vmul.f32 %v13784_v29, %v1932_v28  ;;  %v5187_v32 = vmul.f32 %v7978_v11, %v5186_v42  ;;  %v3677_v42 = vpop.xlane.xlu1 %3676 }
 0x42d   :  { %v3348_v58 = vadd.f32 %v14227_v40, %v3347_v35  ;;  %vm14314_vm12 = vcmp.eq.f32.partialorder %v3353_v4, 8.507059e+37  ;;  %v3356_v20 = vor.u32 1.1754944e-38, %v3355_v7  ;;  %vm5564_vm9 = vweird.f32 %v16739_v38  ;;  %vm5191_vm2 = vmor %vm5189_vm0, %vm5190_vm7 }
 0x42e   :  { %v4708_v49 = vadd.f32 %v7976_v59, %v4707_v57  ;;  %v5666_v48 = vsub.f32 1.0, %v5665_v31  ;;  %3568 = vadd.xlane.f32.xlu1 %v3409_v52  ;;  %v7073_v39 = vmul.f32 -1.442695, %v3817_v6  ;;  %v3880_v63 = vadd.f32 %v9913_v2, %v3739_v46  ;;  %vm14377_vm3 = vmor %vm5564_vm9, %vm5565_vm5 }
 0x42f   :  { %v5188_v44 = vadd.f32 %v7978_v11, %v5187_v32  ;;  %vm5670_vm15 = vweird.f32 %v7982_v23  ;;  %vm14323_vm14 = vcmp.eq.f32.partialorder %v5673_v17, 8.507059e+37  ;;  %v3352_v51 = vsel %vm14309_vm8, %v14227_v40, %v3348_v58  ;;  %v16742_v40 = vld [vmem:[#allocation8_spill] sm:$0xff] }
 0x430   :  { %v4712_v19 = vsel %vm4711_vm6, %v7976_v59, %v4708_v49  ;;  %v5667_v50 = vmul.f32 %v7982_v23, %v5666_v48  ;;  %v3357_v10 = vsel %vm14314_vm12, %v3356_v20, %v3352_v51  ;;  %7983 = vpow2.f32 %v7073_v39  ;;  %vm5671_vm0 = vmor %vm5669_vm4, %vm5670_vm15 }
 0x431   :  { %v4717_v17 = vsel %vm14280_vm1, %v14248_v61, %v4712_v19  ;;  %v5192_v37 = vsel %vm5191_vm2, %v7978_v11, %v5188_v44  ;;  %v3504_v33 = vmul.f32 %v13784_v29, %v3357_v10  ;;  %v7136_v26 = vmul.f32 -1.442695, %v3880_v63  ;;  %v16754_v63 = vld [vmem:[#allocation37_spill] sm:$0xff]  ;;  %v16756_v19 = vld [vmem:[#allocation43_spill] sm:$0xff] }
 0x432   :  { %v6522_v21 = vperm.slane %v4717_v17, %v16742_v40  ;;  %v5197_v43 = vsel %vm14290_vm11, %v14251_v13, %v5192_v37  ;;  %v5668_v59 = vadd.f32 %v7982_v23, %v5667_v50  ;;  %v3785_v55 = vadd.f32 %v9913_v2, %v3549_v25  ;;  %v16757_v50 = vld [vmem:[#allocation44_spill] sm:$0xff] }
 0x433   :  { %v16743_v1 = vand.u32 2147483647, %v16739_v38  ;;  %v6584_v61 = vperm.slane %v5197_v43, %v16742_v40  ;;  %v5676_v11 = vor.u32 1.1754944e-38, %v5675_v56  ;;  %3758 = vadd.xlane.f32.xlu0 %v3504_v33  ;;  %7985 = vpow2.f32 %v7136_v26  ;;  %v16751_v38 = vld [vmem:[#allocation38_spill] sm:$0xff] }
 0x434   :  { %v3360_v13 = vmul.f32 %v14294_v22, %v14195_v8  ;;  %vm16746_vm1 = vcmask 326912   ;;  %v5672_v4 = vsel %vm5671_vm0, %v7982_v23, %v5668_v59  ;;  %v7041_v7 = vmul.f32 -1.442695, %v3785_v55  ;;  %v3743_v59 = vpop.xlane.xlu2 %3742 }
 0x435   :  { %vm14346_vm13 = vcmp.eq.f32.partialorder %v16743_v1, 8.507059e+37  ;;  %v14360_v54 = vsel %vm16746_vm1, %v6522_v21, %v14192_v60  ;;  %vm3364_vm10 = vweird.f32 %v14195_v8  ;;  %vm16747_vm11 = vmmov %vm16746_vm1  ;;  %v5677_v34 = vsel %vm14323_vm14, %v5676_v11, %v5672_v4  ;;  %v16758_v1 = vld [vmem:[#allocation29_spill] sm:$0xff] }
 0x436   :  { %v14365_v28 = vsel %vm16747_vm11, %v6584_v61, %v14208_v3  ;;  %v3361_v56 = vsub.f32 1.0, %v3360_v13  ;;  %vm3365_vm4 = vweird.f32 %v14294_v22  ;;  %v7984_v35 = vpop.eup %7983  ;;  %v6646_v6 = vperm.slane %v5677_v34, %v16742_v40  ;;  %vm16750_vm5 = vmmov %vm16746_vm1 }
 0x437   :  { %7987 = vpow2.f32 %v7041_v7  ;;  %v3370_v60 = vand.u32 2147483648, %v14195_v8  ;;  %v3850_v23 = vadd.f32 %v9913_v2, %v3679_v5  ;;  %v14381_v57 = vadd.f32 1.0, %v7984_v35  ;;  %vm14408_vm7 = vmor %vm3364_vm10, %vm3365_vm4 }
 0x438   :  { %v3362_v31 = vmul.f32 %v14294_v22, %v3361_v56  ;;  %v3368_v52 = vand.u32 2147483647, %v14195_v8  ;;  %v3849_v45 = vadd.f32 %v9913_v2, %v3677_v42  ;;  %v5567_v46 = vsel %vm14377_vm3, %v13270_v15, %v13914_v12 }
 0x439   :  { %7989 = vrcp.f32 %v14216_v53  ;;  %v14393_v32 = vsel %vm16750_vm5, %v6646_v6, %v14162_v62  ;;  %v7106_v58 = vmul.f32 -1.442695, %v3850_v23  ;;  %v7986_v14 = vpop.eup %7985  ;;  %v14396_v20 = vadd.f32 1.0, %v14213_v41  ;;  %v3741_v41 = vpop.xlane.xlu0 %3740 }
 0x43a   :  { %v3811_v49 = vadd.f32 %v9913_v2, %v16751_v38  ;;  %7991 = vrcp.f32 %v14381_v57  ;;  %v3371_v48 = vor.u32 1.1754944e-38, %v3370_v60  ;;  %v14401_v39 = vadd.f32 1.0, %v7986_v14 }
 0x43b   :  { %v3363_v15 = vadd.f32 %v14294_v22, %v3362_v31  ;;  %7993 = vpow2.f32 %v7106_v58  ;;  %v7105_v62 = vmul.f32 -1.442695, %v3849_v45  ;;  %v16755_v44 = vand.u32 2147483648, %v16754_v63 }
 0x43c   :  { %7995 = vrcp.f32 %v14219_v27  ;;  %vm3369_vm8 = vcmp.eq.f32.partialorder %v3368_v52, 8.507059e+37  ;;  %v3881_v51 = vadd.f32 %v9913_v2, %v3741_v41  ;;  %v14421_v8 = vsel %vm14346_vm13, %v16756_v19, %v5567_v46 }
 0x43d   :  { %v14414_v36 = vor.u32 1.1754944e-38, %v16755_v44  ;;  %v7988_v25 = vpop.eup %7987  ;;  %v14426_v10 = vmul.f32 %v16757_v50, %v6056_v16  ;;  %v14429_v17 = vadd.s32 4294967184, %v10128_v47  ;;  %7997 = vrcp.f32 %v14401_v39 }
 0x43e   :  { %v14432_v37 = vadd.f32 1.0, %v7988_v25  ;;  %v3367_v33 = vsel %vm14408_vm7, %v14294_v22, %v3363_v15  ;;  %7999 = vpow2.f32 %v7105_v62  ;;  %v7137_v26 = vmul.f32 -1.442695, %v3881_v51  ;;  %v16759_v22 = vld [vmem:[#allocation39_spill] sm:$0xff] }
 0x43f   :  { %v14437_v21 = vpop.eup %7989  ;;  %v14441_v9 = vadd.f32 %v13311_v30, %v13926_v18  ;;  %8001 = vrcp.f32 %v14396_v20  ;;  %v7067_v16 = vmul.f32 -1.442695, %v3811_v49  ;;  %v3372_v43 = vsel %vm3369_vm8, %v3371_v48, %v3367_v33 }
 0x440   :  { %v7992_v55 = vpop.eup %7991  ;;  %v4623_v61 = vand.u32 2147483647, %v14216_v53  ;;  %v3843_v11 = vadd.f32 %v9913_v2, %v16759_v22  ;;  %8003 = vrcp.f32 %v14432_v37  ;;  %v4625_v18 = vand.u32 2147483648, %v14216_v53 }
 0x441   :  { %v7994_v13 = vpop.eup %7993  ;;  %v5200_v5 = vmul.f32 %v7992_v55, %v14381_v57  ;;  %v3505_v4 = vmul.f32 %v13784_v29, %v3372_v43  ;;  %8005 = vpow2.f32 %v7137_v26  ;;  %v5208_v42 = vand.u32 2147483647, %v14381_v57 }
 0x442   :  { %v14453_v7 = vpop.eup %7995  ;;  %v5210_v34 = vand.u32 2147483648, %v14381_v57  ;;  %v14457_v56 = vadd.f32 1.0, %v7994_v13  ;;  %v3882_v35 = vadd.f32 %v9913_v2, %v3743_v59  ;;  %v14462_v60 = vmul.f32 %v14437_v21, %v14216_v53 }
 0x443   :  { %v7998_v6 = vpop.eup %7997  ;;  %8007 = vpow2.f32 %v7067_v16  ;;  %v5201_v23 = vsub.f32 1.0, %v5200_v5  ;;  %v6153_v29 = vand.u32 2147483647, %v14401_v39  ;;  %3760 = vadd.xlane.f32.xlu1 %v3505_v4  ;;  %v14465_v31 = vmul.f32 -1.442695, %v3843_v11  ;;  %v16764_v5 = vld [vmem:[#allocation9_spill] sm:$0xff] }
 0x444   :  { %v8000_v3 = vpop.eup %7999  ;;  %vm5204_vm12 = vweird.f32 %v14381_v57  ;;  %v6145_v52 = vmul.f32 %v7998_v6, %v14401_v39  ;;  %8009 = vrcp.f32 %v14457_v56  ;;  %vm5205_vm9 = vweird.f32 %v7992_v55 }
 0x445   :  { %v14470_v45 = vpop.eup %8001  ;;  %v5202_v46 = vmul.f32 %v7992_v55, %v5201_v23  ;;  %v6155_v58 = vand.u32 2147483648, %v14401_v39  ;;  %v14473_v14 = vadd.f32 1.0, %v8000_v3  ;;  %vm14475_vm6 = vcmp.eq.f32.partialorder %v5208_v42, 8.507059e+37  ;;  %vm5206_vm2 = vmor %vm5204_vm12, %vm5205_vm9 }
 0x446   :  { %v8004_v38 = vpop.eup %8003  ;;  %v5211_v48 = vor.u32 1.1754944e-38, %v5210_v34  ;;  %v6146_v15 = vsub.f32 1.0, %v6145_v52  ;;  %v7138_v12 = vmul.f32 -1.442695, %v3882_v35  ;;  %vm6149_vm15 = vweird.f32 %v14401_v39 }
 0x447   :  { %v8006_v62 = vpop.eup %8005  ;;  %v5203_v41 = vadd.f32 %v7992_v55, %v5202_v46  ;;  %vm14480_vm14 = vcmp.eq.f32.partialorder %v6153_v29, 8.507059e+37  ;;  %v4720_v51 = vmul.f32 %v8004_v38, %v14432_v37  ;;  %vm6150_vm13 = vweird.f32 %v7998_v6 }
 0x448   :  { %v6147_v25 = vmul.f32 %v7998_v6, %v6146_v15  ;;  %v4728_v19 = vand.u32 2147483647, %v14432_v37  ;;  %8011 = vrcp.f32 %v14473_v14  ;;  %v6156_v16 = vor.u32 1.1754944e-38, %v6155_v58  ;;  %vm6151_vm0 = vmor %vm6149_vm15, %vm6150_vm13 }
 0x449   :  { %v14489_v33 = vpop.eup %8007  ;;  %v5207_v26 = vsel %vm5206_vm2, %v7992_v55, %v5203_v41  ;;  %v4721_v43 = vsub.f32 1.0, %v4720_v51  ;;  %v4730_v59 = vand.u32 2147483648, %v14432_v37  ;;  %v14496_v13 = vadd.f32 1.0, %v8006_v62 }
 0x44a   :  { %v14492_v22 = vpop.eup %8009  ;;  %v5212_v11 = vsel %vm14475_vm6, %v5211_v48, %v5207_v26  ;;  %v6148_v57 = vadd.f32 %v7998_v6, %v6147_v25  ;;  %8013 = vpow2.f32 %v7138_v12  ;;  %vm4725_vm1 = vweird.f32 %v8004_v38  ;;  %v3551_v12 = vpop.xlane.xlu1 %3550 }
 0x44b   :  { %v6586_v4 = vperm.slane %v5212_v11, %v16764_v5  ;;  %v4722_v42 = vmul.f32 %v8004_v38, %v4721_v43  ;;  %v5695_v55 = vmul.f32 %v14492_v22, %v14457_v56  ;;  %vm4724_vm10 = vweird.f32 %v14432_v37 }
 0x44c   :  { %v6152_v34 = vsel %vm6151_vm0, %v7998_v6, %v6148_v57  ;;  %vm14504_vm11 = vcmp.eq.f32.partialorder %v4728_v19, 8.507059e+37  ;;  %8015 = vrcp.f32 %v14496_v13  ;;  %vm16767_vm4 = vcmask 392512   ;;  %vm4726_vm3 = vmor %vm4724_vm10, %vm4725_vm1 }
 0x44d   :  { %v14511_v23 = vsel %vm16767_vm4, %v6586_v4, %v14365_v28  ;;  %v6157_v39 = vsel %vm14480_vm14, %v6156_v16, %v6152_v34  ;;  %v4723_v29 = vadd.f32 %v8004_v38, %v4722_v42  ;;  %v5696_v3 = vsub.f32 1.0, %v5695_v55  ;;  %vm16770_vm9 = vmmov %vm16767_vm4  ;;  %v3615_v4 = vpop.xlane.xlu0 %3614 }
 0x44e   :  { %v8012_v52 = vpop.eup %8011  ;;  %v6708_v6 = vperm.slane %v6157_v39, %v16742_v40  ;;  %v4731_v37 = vor.u32 1.1754944e-38, %v4730_v59  ;;  %v5703_v46 = vand.u32 2147483647, %v14457_v56  ;;  %v5705_v58 = vand.u32 2147483648, %v14457_v56 }
 0x44f   :  { %v4727_v49 = vsel %vm4726_vm3, %v8004_v38, %v4723_v29  ;;  %v5697_v48 = vmul.f32 %v14492_v22, %v5696_v3  ;;  %v5680_v28 = vmul.f32 %v8012_v52, %v14473_v14  ;;  %v5688_v15 = vand.u32 2147483647, %v14473_v14 }
 0x450   :  { %v8014_v62 = vpop.eup %8013  ;;  %v14523_v41 = vsel %vm16750_vm5, %v6708_v6, %v14185_v0  ;;  %v4732_v40 = vsel %vm14504_vm11, %v4731_v37, %v4727_v49  ;;  %vm5700_vm7 = vweird.f32 %v14492_v22  ;;  %v5690_v44 = vand.u32 2147483648, %v14473_v14  ;;  %v3553_v6 = vpop.xlane.xlu2 %3552  ;;  %vm16774_vm11 = vmmov %vm16767_vm4 }
 0x451   :  { %v6524_v38 = vperm.slane %v4732_v40, %v16764_v5  ;;  %v5698_v51 = vadd.f32 %v14492_v22, %v5697_v48  ;;  %v5681_v25 = vsub.f32 1.0, %v5680_v28  ;;  %v14531_v19 = vadd.f32 1.0, %v8014_v62  ;;  %v16773_v62 = vld [vmem:[#allocation10_spill] sm:$0xff] }
 0x452   :  { %v8016_v26 = vpop.eup %8015  ;;  %8017 = vpow2.f32 %v14465_v31  ;;  %vm5699_vm8 = vweird.f32 %v14457_v56  ;;  %vm14535_vm12 = vcmp.eq.f32.partialorder %v5703_v46, 8.507059e+37  ;;  %v3786_v16 = vadd.f32 %v9913_v2, %v3551_v12 }
 0x453   :  { %v14542_v43 = vsel %vm16770_vm9, %v6524_v38, %v14360_v54  ;;  %vm14544_vm6 = vmor %vm5699_vm8, %vm5700_vm7  ;;  %v5682_v11 = vmul.f32 %v8012_v52, %v5681_v25  ;;  %vm5685_vm15 = vweird.f32 %v8012_v52  ;;  %v6160_v31 = vmul.f32 %v8016_v26, %v14496_v13 }
 0x454   :  { %v5702_v56 = vsel %vm14544_vm6, %v14492_v22, %v5698_v51  ;;  %v5706_v57 = vor.u32 1.1754944e-38, %v5705_v58  ;;  %vm5684_vm14 = vweird.f32 %v14473_v14  ;;  %8019 = vrcp.f32 %v14531_v19  ;;  %vm16776_vm7 = vmmov %vm16770_vm9 }
 0x455   :  { %v5683_v54 = vadd.f32 %v8012_v52, %v5682_v11  ;;  %vm5689_vm2 = vcmp.eq.f32.partialorder %v5688_v15, 8.507059e+37  ;;  %v5691_v42 = vor.u32 1.1754944e-38, %v5690_v44  ;;  %v6161_v55 = vsub.f32 1.0, %v6160_v31  ;;  %vm5686_vm13 = vmor %vm5684_vm14, %vm5685_vm15 }
 0x456   :  { %v6168_v34 = vand.u32 2147483647, %v14496_v13  ;;  %v6170_v35 = vand.u32 2147483648, %v14496_v13  ;;  %v7042_v39 = vmul.f32 -1.442695, %v3786_v16  ;;  %v3818_v29 = vadd.f32 %v9913_v2, %v3615_v4 }
 0x457   :  { %v5707_v22 = vsel %vm14535_vm12, %v5706_v57, %v5702_v56  ;;  %v5687_v3 = vsel %vm5686_vm13, %v8012_v52, %v5683_v54  ;;  %v6162_v14 = vmul.f32 %v8016_v26, %v6161_v55  ;;  %vm6165_vm0 = vweird.f32 %v8016_v26  ;;  %v3681_v57 = vpop.xlane.xlu0 %3680 }
 0x458   :  { %v8018_v37 = vpop.eup %8017  ;;  %v14560_v46 = vadd.f32 1.0, %v14489_v33  ;;  %v5692_v58 = vsel %vm5689_vm2, %v5691_v42, %v5687_v3  ;;  %8021 = vpow2.f32 %v7042_v39  ;;  %v7074_v49 = vmul.f32 -1.442695, %v3818_v29  ;;  %v3617_v33 = vpop.xlane.xlu1 %3616 }
 0x459   :  { %v6648_v48 = vperm.slane %v5692_v58, %v16764_v5  ;;  %v6163_v28 = vadd.f32 %v8016_v26, %v6162_v14  ;;  %vm6164_vm1 = vweird.f32 %v14496_v13  ;;  %v3787_v15 = vadd.f32 %v9913_v2, %v3553_v6  ;;  %v3619_v58 = vpop.xlane.xlu2 %3618 }
 0x45a   :  { %v8020_v12 = vpop.eup %8019  ;;  %v4616_v52 = vsub.f32 1.0, %v14462_v60  ;;  %v6650_v40 = vperm.slane %v5707_v22, %v16773_v62  ;;  %vm6166_vm10 = vmor %vm6164_vm1, %vm6165_vm0  ;;  %v6171_v44 = vor.u32 1.1754944e-38, %v6170_v35  ;;  %8023 = vpow2.f32 %v7074_v49 }
 0x45b   :  { %v6649_v38 = vsel %vm16774_vm11, %v6648_v48, %v14393_v32  ;;  %v6167_v51 = vsel %vm6166_vm10, %v8016_v26, %v6163_v28  ;;  %vm6169_vm4 = vcmp.eq.f32.partialorder %v6168_v34, 8.507059e+37  ;;  %v6175_v25 = vmul.f32 %v8020_v12, %v14531_v19 }
 0x45c   :  { %8025 = vrcp.f32 %v14560_v46  ;;  %v6172_v13 = vsel %vm6169_vm4, %v6171_v44, %v6167_v51  ;;  %v7043_v0 = vmul.f32 -1.442695, %v3787_v15  ;;  %v3819_v16 = vadd.f32 %v9913_v2, %v3617_v33 }
 0x45d   :  { %v6710_v60 = vperm.slane %v6172_v13, %v16764_v5  ;;  %v6176_v59 = vsub.f32 1.0, %v6175_v25  ;;  %v6183_v11 = vand.u32 2147483647, %v14531_v19  ;;  %v6185_v31 = vand.u32 2147483648, %v14531_v19 }
 0x45e   :  { %v8022_v56 = vpop.eup %8021  ;;  %vm6180_vm3 = vweird.f32 %v8020_v12  ;;  %8027 = vpow2.f32 %v7043_v0  ;;  %v7075_v32 = vmul.f32 -1.442695, %v3819_v16  ;;  %vm16775_vm5 = vcmask 458112  }
 0x45f   :  { %v14576_v26 = vsel %vm16775_vm5, %v6650_v40, %v6649_v38  ;;  %v6711_v4 = vsel %vm16776_vm7, %v6710_v60, %v14523_v41  ;;  %v6177_v54 = vmul.f32 %v8020_v12, %v6176_v59  ;;  %v14580_v42 = vadd.f32 1.0, %v8022_v56  ;;  %vm16777_vm6 = vmmov %vm16775_vm5 }
 0x460   :  { %v3851_v5 = vadd.f32 %v9913_v2, %v3681_v57  ;;  %v8024_v55 = vpop.eup %8023  ;;  %v14585_v34 = vor.u32 1.1754944e-38, %v4625_v18  ;;  %v5095_v35 = vmul.f32 %v14453_v7, %v14219_v27  ;;  %v5105_v39 = vand.u32 2147483648, %v14219_v27  ;;  %vm16784_vm7 = vmmov %vm16777_vm6 }
 0x461   :  { %8029 = vpow2.f32 %v7075_v32  ;;  %v4630_v29 = vmul.f32 %v14470_v45, %v14396_v20  ;;  %v6178_v41 = vadd.f32 %v8020_v12, %v6177_v54  ;;  %vm6179_vm8 = vweird.f32 %v14531_v19 }
 0x462   :  { %8031 = vrcp.f32 %v14580_v42  ;;  %v14594_v22 = vpop.eup %8025  ;;  %v5103_v3 = vand.u32 2147483647, %v14219_v27  ;;  %vm6181_vm12 = vmor %vm6179_vm8, %vm6180_vm3  ;;  %v6186_v18 = vor.u32 1.1754944e-38, %v6185_v31  ;;  %v14598_v14 = vadd.f32 1.0, %v8024_v55 }
 0x463   :  { %v7107_v6 = vmul.f32 -1.442695, %v3851_v5  ;;  %v4617_v49 = vmul.f32 %v14437_v21, %v4616_v52  ;;  %v6182_v48 = vsel %vm6181_vm12, %v8020_v12, %v6178_v41  ;;  %vm6184_vm9 = vcmp.eq.f32.partialorder %v6183_v11, 8.507059e+37  ;;  %v3745_v11 = vpop.xlane.xlu1 %3744 }
 0x464   :  { %v3820_v28 = vadd.f32 %v9913_v2, %v3619_v58  ;;  %v8028_v19 = vpop.eup %8027  ;;  %v5096_v15 = vsub.f32 1.0, %v5095_v35  ;;  %v14602_v40 = vadd.f32 1.0, %v8018_v37  ;;  %v6187_v44 = vsel %vm6184_vm9, %v6186_v18, %v6182_v48 }
 0x465   :  { %8033 = vrcp.f32 %v14598_v14  ;;  %v14605_v33 = vor.u32 1.1754944e-38, %v5105_v39  ;;  %v4631_v38 = vsub.f32 1.0, %v4630_v29  ;;  %v6712_v51 = vperm.slane %v6187_v44, %v16773_v62 }
 0x466   :  { %v14608_v25 = vadd.f32 1.0, %v8028_v19  ;;  %v4638_v12 = vand.u32 2147483647, %v14396_v20  ;;  %v4640_v52 = vand.u32 2147483648, %v14396_v20  ;;  %8035 = vpow2.f32 %v7107_v6 }
 0x467   :  { %v8030_v13 = vpop.eup %8029  ;;  %v7076_v0 = vmul.f32 -1.442695, %v3820_v28  ;;  %v14613_v37 = vadd.f32 %v14437_v21, %v4617_v49  ;;  %v14616_v60 = vsel %vm16777_vm6, %v6712_v51, %v6711_v4  ;;  %v4743_v59 = vand.u32 2147483647, %v14580_v42 }
 0x468   :  { %v8032_v16 = vpop.eup %8031  ;;  %8037 = vrcp.f32 %v14608_v25  ;;  %v14621_v31 = vmul.f32 %v14453_v7, %v5096_v15  ;;  %v4745_v32 = vand.u32 2147483648, %v14580_v42  ;;  %v14627_v57 = vmul.f32 %v14470_v45, %v4631_v38 }
 0x469   :  { %8039 = vrcp.f32 %v14602_v40  ;;  %v4735_v56 = vmul.f32 %v8032_v16, %v14580_v42  ;;  %v5223_v4 = vand.u32 2147483647, %v14598_v14  ;;  %v14630_v54 = vadd.f32 1.0, %v8030_v13 }
 0x46a   :  { %8041 = vpow2.f32 %v7076_v0  ;;  %v14634_v55 = vmul.f32 %v14594_v22, %v14560_v46  ;;  %v5225_v39 = vand.u32 2147483648, %v14598_v14  ;;  %v3883_v29 = vadd.f32 %v9913_v2, %v3745_v11 }
 0x46b   :  { %v8034_v5 = vpop.eup %8033  ;;  %v4736_v35 = vsub.f32 1.0, %v4735_v56  ;;  %vm4739_vm15 = vweird.f32 %v14580_v42  ;;  %vm14639_vm14 = vcmp.eq.f32.partialorder %v4743_v59, 8.507059e+37  ;;  %8043 = vrcp.f32 %v14630_v54 }
 0x46c   :  { %v5215_v18 = vmul.f32 %v8034_v5, %v14598_v14  ;;  %v8036_v6 = vpop.eup %8035  ;;  %vm4740_vm2 = vweird.f32 %v8032_v16  ;;  %v4746_v49 = vor.u32 1.1754944e-38, %v4745_v32  ;;  %v4758_v48 = vand.u32 2147483647, %v14608_v25 }
 0x46d   :  { %v4737_v58 = vmul.f32 %v8032_v16, %v4736_v35  ;;  %vm5219_vm13 = vweird.f32 %v14598_v14  ;;  %vm14647_vm0 = vcmp.eq.f32.partialorder %v5223_v4, 8.507059e+37  ;;  %v14651_v44 = vadd.f32 1.0, %v8036_v6  ;;  %vm4741_vm1 = vmor %vm4739_vm15, %vm4740_vm2 }
 0x46e   :  { %v8038_v28 = vpop.eup %8037  ;;  %v5216_v19 = vsub.f32 1.0, %v5215_v18  ;;  %v5226_v13 = vor.u32 1.1754944e-38, %v5225_v39  ;;  %v7139_v59 = vmul.f32 -1.442695, %v3883_v29  ;;  %vm5220_vm10 = vweird.f32 %v8034_v5 }
 0x46f   :  { %v14653_v38 = vpop.eup %8039  ;;  %v4738_v51 = vadd.f32 %v8032_v16, %v4737_v58  ;;  %v4750_v0 = vmul.f32 %v8038_v28, %v14608_v25  ;;  %v4760_v32 = vand.u32 2147483648, %v14608_v25  ;;  %8045 = vrcp.f32 %v14651_v44  ;;  %vm5221_vm5 = vmor %vm5219_vm13, %vm5220_vm10 }
 0x470   :  { %v8042_v11 = vpop.eup %8041  ;;  %v5217_v56 = vmul.f32 %v8034_v5, %v5216_v19  ;;  %vm4754_vm11 = vweird.f32 %v14608_v25  ;;  %vm14661_vm4 = vcmp.eq.f32.partialorder %v4758_v48, 8.507059e+37  ;;  %vm4755_vm3 = vweird.f32 %v8038_v28  ;;  %v3555_v48 = vpop.xlane.xlu0 %3554 }
 0x471   :  { %v4742_v4 = vsel %vm4741_vm1, %v8032_v16, %v4738_v51  ;;  %v4751_v35 = vsub.f32 1.0, %v4750_v0  ;;  %v8044_v39 = vpop.eup %8043  ;;  %v14667_v6 = vadd.f32 1.0, %v8042_v11  ;;  %8047 = vpow2.f32 %v7139_v59  ;;  %vm4756_vm8 = vmor %vm4754_vm11, %vm4755_vm3 }
 0x472   :  { %v4747_v29 = vsel %vm14639_vm14, %v4746_v49, %v4742_v4  ;;  %v5218_v42 = vadd.f32 %v8034_v5, %v5217_v56  ;;  %v5230_v19 = vmul.f32 %v8044_v39, %v14630_v54  ;;  %v4761_v0 = vor.u32 1.1754944e-38, %v4760_v32 }
 0x473   :  { %v6526_v58 = vperm.slane %v4747_v29, %v16773_v62  ;;  %v4752_v16 = vmul.f32 %v8038_v28, %v4751_v35  ;;  %v5238_v24 = vand.u32 2147483647, %v14630_v54  ;;  %8049 = vrcp.f32 %v14667_v6 }
 0x474   :  { %v5222_v51 = vsel %vm5221_vm5, %v8034_v5, %v5218_v42  ;;  %v5231_v14 = vsub.f32 1.0, %v5230_v19  ;;  %vm5234_vm12 = vweird.f32 %v14630_v54  ;;  %v5240_v5 = vand.u32 2147483648, %v14630_v54  ;;  %v16785_v42 = vld [vmem:[#allocation11_spill] sm:$0xff] }
 0x475   :  { %v6527_v41 = vsel %vm16784_vm7, %v6526_v58, %v14542_v43  ;;  %v5227_v49 = vsel %vm14647_vm0, %v5226_v13, %v5222_v51  ;;  %v4753_v11 = vadd.f32 %v8038_v28, %v4752_v16  ;;  %v8046_v56 = vpop.eup %8045  ;;  %v3788_v59 = vadd.f32 %v9913_v2, %v3555_v48  ;;  %v3685_v51 = vpop.xlane.xlu2 %3684 }
 0x476   :  { %v6588_v4 = vperm.slane %v5227_v49, %v16773_v62  ;;  %v5232_v43 = vmul.f32 %v8044_v39, %v5231_v14  ;;  %vm5235_vm9 = vweird.f32 %v8044_v39  ;;  %v5710_v15 = vmul.f32 %v8046_v56, %v14651_v44 }
 0x477   :  { %v4757_v32 = vsel %vm4756_vm8, %v8038_v28, %v4753_v11  ;;  %v5718_v25 = vand.u32 2147483647, %v14651_v44  ;;  %v5720_v35 = vand.u32 2147483648, %v14651_v44  ;;  %v8048_v29 = vpop.eup %8047  ;;  %vm4620_vm15 = vweird.f32 %v14437_v21  ;;  %vm5236_vm13 = vmor %vm5234_vm12, %vm5235_vm9 }
 0x478   :  { %v6589_v13 = vsel %vm16777_vm6, %v6588_v4, %v14511_v23  ;;  %v4762_v62 = vsel %vm14661_vm4, %v4761_v0, %v4757_v32  ;;  %v5233_v28 = vadd.f32 %v8044_v39, %v5232_v43  ;;  %vm14695_vm14 = vcmp.eq.f32.partialorder %v5238_v24, 8.507059e+37 }
 0x479   :  { %v6528_v58 = vperm.slane %v4762_v62, %v16785_v42  ;;  %v5711_v19 = vsub.f32 1.0, %v5710_v15  ;;  %v8050_v48 = vpop.eup %8049  ;;  %vm5100_vm2 = vweird.f32 %v14453_v7  ;;  %v5241_v23 = vor.u32 1.1754944e-38, %v5240_v5 }
 0x47a   :  { %vm5714_vm0 = vweird.f32 %v14651_v44  ;;  %vm5715_vm1 = vweird.f32 %v8046_v56  ;;  %v7044_v18 = vmul.f32 -1.442695, %v3788_v59  ;;  %vm4619_vm10 = vweird.f32 %v14216_v53  ;;  %v3683_v59 = vpop.xlane.xlu1 %3682 }
 0x47b   :  { %vm16788_vm11 = vcmask 523712   ;;  %v5237_v0 = vsel %vm5236_vm13, %v8044_v39, %v5233_v28  ;;  %v5712_v49 = vmul.f32 %v8046_v56, %v5711_v19  ;;  %v5245_v11 = vmul.f32 %v8050_v48, %v14667_v6  ;;  %vm5716_vm7 = vmor %vm5714_vm0, %vm5715_vm1 }
 0x47c   :  { %v14705_v24 = vsel %vm16788_vm11, %v6528_v58, %v6527_v41  ;;  %vm5099_vm4 = vweird.f32 %v14219_v27  ;;  %v5242_v54 = vsel %vm14695_vm14, %v5241_v23, %v5237_v0  ;;  %vm14711_vm3 = vcmp.eq.f32.partialorder %v5718_v25, 8.507059e+37  ;;  %vm16791_vm12 = vmmov %vm16788_vm11  ;;  %v16794_v23 = vld [vmem:[#allocation36_spill] sm:$0xff] }
 0x47d   :  { %v5721_v4 = vor.u32 1.1754944e-38, %v5720_v35  ;;  %v5253_v5 = vand.u32 2147483647, %v14667_v6  ;;  %vm4634_vm5 = vweird.f32 %v14396_v20  ;;  %v6590_v39 = vperm.slane %v5242_v54, %v16785_v42 }
 0x47e   :  { %v5713_v41 = vadd.f32 %v8046_v56, %v5712_v49  ;;  %v5246_v32 = vsub.f32 1.0, %v5245_v11  ;;  %v5255_v43 = vand.u32 2147483648, %v14667_v6  ;;  %v14722_v15 = vadd.f32 1.0, %v8048_v29  ;;  %v3749_v49 = vpop.xlane.xlu2 %3748 }
 0x47f   :  { %8051 = vpow2.f32 %v7044_v18  ;;  %v3853_v62 = vadd.f32 %v9913_v2, %v3685_v51  ;;  %v3852_v25 = vadd.f32 %v9913_v2, %v3683_v59  ;;  %vm6045_vm8 = vweird.f32 %v13311_v30  ;;  %v3747_v18 = vpop.xlane.xlu0 %3746 }
 0x480   :  { %v6591_v35 = vsel %vm16791_vm12, %v6590_v39, %v6589_v13  ;;  %v5717_v58 = vsel %vm5716_vm7, %v8046_v56, %v5713_v41  ;;  %v5247_v28 = vmul.f32 %v8050_v48, %v5246_v32  ;;  %vm5250_vm9 = vweird.f32 %v8050_v48  ;;  %vm14755_vm7 = vmor %vm4619_vm10, %vm4620_vm15 }
 0x481   :  { %vm14730_vm6 = vcmp.eq.f32.partialorder %v4623_v61, 8.507059e+37  ;;  %v5098_v44 = vadd.f32 %v14453_v7, %v14621_v31  ;;  %vm4635_vm14 = vweird.f32 %v14470_v45  ;;  %v5722_v29 = vsel %vm14711_vm3, %v5721_v4, %v5717_v58  ;;  %vm14764_vm12 = vmor %vm5099_vm4, %vm5100_vm2 }
 0x482   :  { %v7108_v19 = vmul.f32 -1.442695, %v3852_v25  ;;  %vm6044_vm13 = vweird.f32 %v16794_v23  ;;  %v6652_v56 = vperm.slane %v5722_v29, %v16785_v42  ;;  %v5248_v13 = vadd.f32 %v8050_v48, %v5247_v28  ;;  %v3557_v39 = vpop.xlane.xlu1 %3556  ;;  %vm14780_vm15 = vmor %vm4634_vm5, %vm4635_vm14 }
 0x483   :  { %vm5249_vm0 = vweird.f32 %v14667_v6  ;;  %v7109_v61 = vmul.f32 -1.442695, %v3853_v62  ;;  %v4633_v51 = vadd.f32 %v14470_v45, %v14627_v57  ;;  %v5256_v31 = vor.u32 1.1754944e-38, %v5255_v43  ;;  %vm14817_vm5 = vmor %vm6044_vm13, %vm6045_vm8 }
 0x484   :  { %vm5251_vm1 = vmor %vm5249_vm0, %vm5250_vm9  ;;  %8053 = vrcp.f32 %v14722_v15  ;;  %v3884_v0 = vadd.f32 %v9913_v2, %v3747_v18  ;;  %v5111_v11 = vsub.f32 1.0, %v14634_v55  ;;  %v14749_v54 = vsel %vm16788_vm11, %v6652_v56, %v14576_v26 }
 0x485   :  { %v5252_v14 = vsel %vm5251_vm1, %v8050_v48, %v5248_v13  ;;  %vm5254_vm3 = vcmp.eq.f32.partialorder %v5253_v5, 8.507059e+37  ;;  %v8052_v6 = vpop.eup %8051  ;;  %8055 = vpow2.f32 %v7108_v19  ;;  %v3885_v55 = vadd.f32 %v9913_v2, %v3749_v49  ;;  %v16799_v48 = vld [vmem:[#allocation13_spill] sm:$0xff] }
 0x486   :  { %v5257_v4 = vsel %vm5254_vm3, %v5256_v31, %v5252_v14  ;;  %v7140_v59 = vmul.f32 -1.442695, %v3884_v0  ;;  %v14769_v5 = vadd.f32 1.0, %v8052_v6  ;;  %8057 = vpow2.f32 %v7109_v61  ;;  %v16805_v49 = vld [vmem:[#allocation21_spill] sm:$0xff]  ;;  %v16807_v14 = vld [vmem:[#allocation20_spill] sm:$0xff] }
 0x487   :  { %v6592_v53 = vperm.slane %v5257_v4, %v16799_v48  ;;  %v3789_v41 = vadd.f32 %v9913_v2, %v3557_v39  ;;  %v4622_v32 = vsel %vm14755_vm7, %v14437_v21, %v14613_v37  ;;  %v5590_v62 = vmul.f32 %v14653_v38, %v14602_v40  ;;  %v3621_v39 = vpop.xlane.xlu0 %3620 }
 0x488   :  { %8059 = vpow2.f32 %v7140_v59  ;;  %v7141_v25 = vmul.f32 -1.442695, %v3885_v55  ;;  %v5102_v58 = vsel %vm14764_vm12, %v14453_v7, %v5098_v44  ;;  %v4637_v21 = vsel %vm14780_vm15, %v14470_v45, %v4633_v51 }
 0x489   :  { %vm16802_vm2 = vcmask 589312   ;;  %8061 = vrcp.f32 %v14769_v5  ;;  %v4641_v29 = vor.u32 1.1754944e-38, %v4640_v52  ;;  %v5112_v19 = vmul.f32 %v14594_v22, %v5111_v11  ;;  %v16806_v11 = vld [vmem:[#allocation30_spill] sm:$0xff] }
 0x48a   :  { %v14793_v37 = vsel %vm16802_vm2, %v6592_v53, %v6591_v35  ;;  %v14796_v28 = vpop.eup %8053  ;;  %8063 = vpow2.f32 %v7141_v25  ;;  %v7045_v56 = vmul.f32 -1.442695, %v3789_v41  ;;  %v14804_v7 = vsel %vm14730_vm6, %v14585_v34, %v4622_v32 }
 0x48b   :  { %vm5104_vm10 = vcmp.eq.f32.partialorder %v5103_v3, 8.507059e+37  ;;  %v14809_v45 = vadd.s32 4294967176, %v10128_v47  ;;  %vm4639_vm4 = vcmp.eq.f32.partialorder %v4638_v12, 8.507059e+37  ;;  %v8056_v35 = vpop.eup %8055  ;;  %v5591_v3 = vsub.f32 1.0, %v5590_v62 }
 0x48c   :  { %v14822_v34 = vsel %vm5104_vm10, %v14605_v33, %v5102_v58  ;;  %v14824_v27 = vsel %vm4639_vm4, %v4641_v29, %v4637_v21  ;;  %8065 = vpow2.f32 %v7045_v56  ;;  %v8058_v47 = vpop.eup %8057  ;;  %v14832_v12 = vadd.f32 %v16757_v50, %v14426_v10 }
 0x48d   :  { %v5118_v16 = vand.u32 2147483647, %v14560_v46  ;;  %v6190_v33 = vmul.f32 %v14796_v28, %v14722_v15  ;;  %v5113_v13 = vadd.f32 %v14594_v22, %v5112_v19  ;;  %vm5115_vm8 = vweird.f32 %v14594_v22 }
 0x48e   :  { %v8060_v44 = vpop.eup %8059  ;;  %v5120_v61 = vand.u32 2147483648, %v14560_v46  ;;  %v14840_v18 = vadd.f32 1.0, %v8056_v35  ;;  %v16808_v6 = vperm.slane %v16806_v11, %v16807_v14  ;;  %vm16809_vm9 = vcmask 851712  }
 0x48f   :  { %v8062_v51 = vpop.eup %8061  ;;  %vm5114_vm6 = vweird.f32 %v14560_v46  ;;  %v5592_v59 = vmul.f32 %v14653_v38, %v5591_v3  ;;  %vm14863_vm13 = vcmp.eq.f32.partialorder %v5118_v16, 8.507059e+37  ;;  %v5600_v41 = vand.u32 2147483648, %v14602_v40 }
 0x490   :  { %v14853_v57 = vsel %vm16809_vm9, %v16808_v6, %v16805_v49  ;;  %v8064_v4 = vpop.eup %8063  ;;  %v4765_v55 = vmul.f32 %v8062_v51, %v14769_v5  ;;  %8067 = vrcp.f32 %v14840_v18  ;;  %vm14859_vm14 = vmor %vm5114_vm6, %vm5115_vm8  ;;  %v6191_v32 = vsub.f32 1.0, %v6190_v33 }
 0x491   :  { %v14868_v43 = vadd.f32 1.0, %v8058_v47  ;;  %v5117_v62 = vsel %vm14859_vm14, %v14594_v22, %v5113_v13  ;;  %v5121_v25 = vor.u32 1.1754944e-38, %v5120_v61  ;;  %vm5594_vm0 = vweird.f32 %v14602_v40 }
 0x492   :  { %v8066_v46 = vpop.eup %8065  ;;  %v4766_v58 = vsub.f32 1.0, %v4765_v55  ;;  %v14874_v21 = vadd.f32 1.0, %v8060_v44  ;;  %vm5595_vm1 = vweird.f32 %v14653_v38  ;;  %v4775_v29 = vand.u32 2147483648, %v14769_v5 }
 0x493   :  { %v14878_v19 = vadd.f32 1.0, %v8064_v4  ;;  %v3821_v56 = vadd.f32 %v9913_v2, %v3621_v39  ;;  %v14882_v35 = vadd.f32 %v14653_v38, %v5592_v59  ;;  %vm4770_vm11 = vweird.f32 %v8062_v51  ;;  %v3559_v59 = vpop.xlane.xlu2 %3558  ;;  %vm14912_vm10 = vmor %vm5594_vm0, %vm5595_vm1 }
 0x494   :  { %v4767_v3 = vmul.f32 %v8062_v51, %v4766_v58  ;;  %v4773_v22 = vand.u32 2147483647, %v14769_v5  ;;  %v14887_v47 = vsel %vm14863_vm13, %v5121_v25, %v5117_v62  ;;  %v6192_v16 = vmul.f32 %v14796_v28, %v6191_v32 }
 0x495   :  { %8069 = vrcp.f32 %v14868_v43  ;;  %v14891_v33 = vadd.f32 1.0, %v8066_v46  ;;  %vm6194_vm3 = vweird.f32 %v14722_v15  ;;  %vm4769_vm7 = vweird.f32 %v14769_v5 }
 0x496   :  { %v8068_v44 = vpop.eup %8067  ;;  %v4768_v13 = vadd.f32 %v8062_v51, %v4767_v3  ;;  %8071 = vrcp.f32 %v14874_v21  ;;  %vm4771_vm12 = vmor %vm4769_vm7, %vm4770_vm11  ;;  %v4776_v61 = vor.u32 1.1754944e-38, %v4775_v29  ;;  %v7077_v11 = vmul.f32 -1.442695, %v3821_v56  ;;  %v16828_v3 = vld [vmem:[#allocation40_spill] sm:$0xff] }
 0x497   :  { %v5725_v49 = vmul.f32 %v8068_v44, %v14840_v18  ;;  %8073 = vrcp.f32 %v14878_v19  ;;  %vm6195_vm15 = vweird.f32 %v14796_v28  ;;  %v6198_v6 = vand.u32 2147483647, %v14722_v15 }
 0x498   :  { %v4772_v4 = vsel %vm4771_vm12, %v8062_v51, %v4768_v13  ;;  %vm4774_vm2 = vcmp.eq.f32.partialorder %v4773_v22, 8.507059e+37  ;;  %v6193_v55 = vadd.f32 %v14796_v28, %v6192_v16  ;;  %8075 = vrcp.f32 %v14891_v33  ;;  %vm14930_vm8 = vmor %vm6194_vm3, %vm6195_vm15 }
 0x499   :  { %v4777_v39 = vsel %vm4774_vm2, %v4776_v61, %v4772_v4  ;;  %v5726_v5 = vsub.f32 1.0, %v5725_v49  ;;  %v6200_v26 = vand.u32 2147483648, %v14722_v15  ;;  %v5733_v32 = vand.u32 2147483647, %v14840_v18  ;;  %v3623_v15 = vpop.xlane.xlu1 %3622 }
 0x49a   :  { %v6530_v53 = vperm.slane %v4777_v39, %v16799_v48  ;;  %v5735_v46 = vand.u32 2147483648, %v14840_v18  ;;  %vm5730_vm4 = vweird.f32 %v8068_v44  ;;  %8077 = vpow2.f32 %v7077_v11 }
 0x49b   :  { %v14906_v62 = vpop.eup %8069  ;;  %v5727_v25 = vmul.f32 %v8068_v44, %v5726_v5  ;;  %v3790_v58 = vadd.f32 %v9913_v2, %v3559_v59  ;;  %v14924_v22 = vor.u32 1.1754944e-38, %v5600_v41  ;;  %vm16818_vm9 = vcmask 589312  }
 0x49c   :  { %v14917_v29 = vpop.eup %8071  ;;  %v14936_v13 = vsel %vm16818_vm9, %v6530_v53, %v14705_v24  ;;  %v6197_v41 = vsel %vm14930_vm8, %v14796_v28, %v6193_v55  ;;  %vm5729_vm6 = vweird.f32 %v14840_v18  ;;  %vm6199_vm14 = vcmp.eq.f32.partialorder %v6198_v6, 8.507059e+37  ;;  %vm16820_vm1 = vmmov %vm16818_vm9 }
 0x49d   :  { %v14938_v61 = vpop.eup %8073  ;;  %v5728_v11 = vadd.f32 %v8068_v44, %v5727_v25  ;;  %v6201_v4 = vor.u32 1.1754944e-38, %v6200_v26  ;;  %v5740_v59 = vmul.f32 %v14906_v62, %v14868_v43  ;;  %vm5731_vm13 = vmor %vm5729_vm6, %vm5730_vm4  ;;  %v5736_v24 = vor.u32 1.1754944e-38, %v5735_v46 }
 0x49e   :  { %v14949_v39 = vpop.eup %8075  ;;  %vm5734_vm0 = vcmp.eq.f32.partialorder %v5733_v32, 8.507059e+37  ;;  %v6205_v53 = vmul.f32 %v14917_v29, %v14874_v21  ;;  %v7046_v28 = vmul.f32 -1.442695, %v3790_v58  ;;  %v6220_v6 = vmul.f32 %v14938_v61, %v14878_v19  ;;  %v3687_v32 = vpop.xlane.xlu0 %3686 }
 0x49f   :  { %v5732_v5 = vsel %vm5731_vm13, %v8068_v44, %v5728_v11  ;;  %v14953_v55 = vsel %vm6199_vm14, %v6201_v4, %v6197_v41  ;;  %v3822_v26 = vadd.f32 %v9913_v2, %v3623_v15  ;;  %v5750_v16 = vand.u32 2147483648, %v14868_v43 }
 0x4a0   :  { %16819 = vst [vmem:[#allocation34_spill] sm:$0xff] %v14953_v55  ;;  %v5737_v18 = vsel %vm5734_vm0, %v5736_v24, %v5732_v5  ;;  %v8078_v25 = vpop.eup %8077  ;;  %v6215_v44 = vand.u32 2147483648, %v14874_v21  ;;  %8079 = vpow2.f32 %v7046_v28  ;;  %v5741_v11 = vsub.f32 1.0, %v5740_v59  ;;  %v3625_v24 = vpop.xlane.xlu2 %3624 }
 0x4a1   :  { %v6654_v46 = vperm.slane %v5737_v18, %v16799_v48  ;;  %v4780_v58 = vmul.f32 %v14949_v39, %v14891_v33  ;;  %v14963_v41 = vadd.f32 1.0, %v8078_v25  ;;  %v7078_v4 = vmul.f32 -1.442695, %v3822_v26 }
 0x4a2   :  { %v6206_v5 = vsub.f32 1.0, %v6205_v53  ;;  %v3854_v49 = vadd.f32 %v9913_v2, %v3687_v32  ;;  %v3823_v18 = vadd.f32 %v9913_v2, %v3625_v24  ;;  %vm5744_vm11 = vweird.f32 %v14868_v43  ;;  %v3751_v53 = vpop.xlane.xlu1 %3750 }
 0x4a3   :  { %v14967_v15 = vsel %vm16820_vm1, %v6654_v46, %v14749_v54  ;;  %v5748_v59 = vand.u32 2147483647, %v14868_v43  ;;  %v6221_v25 = vsub.f32 1.0, %v6220_v6  ;;  %8081 = vrcp.f32 %v14963_v41 }
 0x4a4   :  { %vm6505_vm3 = vcmask 917312   ;;  %v14976_v26 = vor.u32 1.1754944e-38, %v5750_v16  ;;  %vm6209_vm7 = vweird.f32 %v14874_v21  ;;  %v6213_v54 = vand.u32 2147483647, %v14874_v21 }
 0x4a5   :  { %8083 = vpow2.f32 %v7078_v4  ;;  %v5742_v46 = vmul.f32 %v14906_v62, %v5741_v11  ;;  %vm5745_vm12 = vweird.f32 %v14906_v62  ;;  %v4781_v32 = vsub.f32 1.0, %v4780_v58 }
 0x4a6   :  { %v7110_v24 = vmul.f32 -1.442695, %v3854_v49  ;;  %v8080_v28 = vpop.eup %8079  ;;  %v6207_v6 = vmul.f32 %v14917_v29, %v6206_v5  ;;  %v6216_v10 = vor.u32 1.1754944e-38, %v6215_v44  ;;  %v7079_v0 = vmul.f32 -1.442695, %v3823_v18  ;;  %v3561_v18 = vpop.xlane.xlu0 %3560  ;;  %vm15018_vm14 = vmor %vm5744_vm11, %vm5745_vm12 }
 0x4a7   :  { %v3886_v16 = vadd.f32 %v9913_v2, %v3751_v53  ;;  %vm14984_vm15 = vcmp.eq.f32.partialorder %v5748_v59, 8.507059e+37  ;;  %v6222_v4 = vmul.f32 %v14938_v61, %v6221_v25  ;;  %vm6224_vm2 = vweird.f32 %v14878_v19 }
 0x4a8   :  { %v14990_v11 = vadd.f32 1.0, %v8080_v28  ;;  %8085 = vpow2.f32 %v7110_v24  ;;  %vm14992_vm4 = vcmp.eq.f32.partialorder %v6213_v54, 8.507059e+37  ;;  %v6228_v44 = vand.u32 2147483647, %v14878_v19 }
 0x4a9   :  { %v6230_v58 = vand.u32 2147483648, %v14878_v19  ;;  %8087 = vpow2.f32 %v7079_v0  ;;  %v7142_v5 = vmul.f32 -1.442695, %v3886_v16  ;;  %v14998_v59 = vpop.eup %8081  ;;  %v5743_v25 = vadd.f32 %v14906_v62, %v5742_v46 }
 0x4aa   :  { %v4782_v53 = vmul.f32 %v14949_v39, %v4781_v32  ;;  %vm4784_vm8 = vweird.f32 %v14891_v33  ;;  %8089 = vrcp.f32 %v14990_v11  ;;  %v6208_v54 = vadd.f32 %v14917_v29, %v6207_v6 }
 0x4ab   :  { %v8084_v28 = vpop.eup %8083  ;;  %vm6210_vm9 = vweird.f32 %v14917_v29  ;;  %v5260_v0 = vmul.f32 %v14998_v59, %v14963_v41  ;;  %v3791_v24 = vadd.f32 %v9913_v2, %v3561_v18  ;;  %v6223_v16 = vadd.f32 %v14938_v61, %v6222_v4  ;;  %v16827_v18 = vld [vmem:[#allocation22_spill] sm:$0xff] }
 0x4ac   :  { %vm6225_vm6 = vweird.f32 %v14938_v61  ;;  %v4790_v46 = vand.u32 2147483648, %v14891_v33  ;;  %v15012_v32 = vadd.f32 1.0, %v8084_v28  ;;  %8091 = vpow2.f32 %v7142_v5  ;;  %vm15035_vm0 = vmor %vm6209_vm7, %vm6210_vm9 }
 0x4ad   :  { %v5261_v56 = vsub.f32 1.0, %v5260_v0  ;;  %v7047_v31 = vmul.f32 -1.442695, %v3791_v24  ;;  %v16829_v4 = vperm.slane %v16828_v3, %v16758_v1  ;;  %vm6060_vm13 = vweird.f32 %v16757_v50  ;;  %vm15049_vm11 = vmor %vm6224_vm2, %vm6225_vm6 }
 0x4ae   :  { %v8086_v55 = vpop.eup %8085  ;;  %v5747_v43 = vsel %vm15018_vm14, %v14906_v62, %v5743_v25  ;;  %v4783_v28 = vadd.f32 %v14949_v39, %v4782_v53  ;;  %vm4785_vm1 = vweird.f32 %v14949_v39  ;;  %8093 = vrcp.f32 %v15012_v32 }
 0x4af   :  { %v6506_v42 = vsel %vm6505_vm3, %v16829_v4, %v16827_v18  ;;  %v8088_v3 = vpop.eup %8087  ;;  %v6212_v0 = vsel %vm15035_vm0, %v14917_v29, %v6208_v54  ;;  %v5262_v62 = vmul.f32 %v14998_v59, %v5261_v56  ;;  %8095 = vpow2.f32 %v7047_v31  ;;  %vm15090_vm14 = vmor %vm4784_vm8, %vm4785_vm1  ;;  %v3691_v4 = vpop.xlane.xlu2 %3690 }
 0x4b0   :  { %vm6509_vm7 = vcmask 982912   ;;  %v15054_v25 = vpop.eup %8089  ;;  %v16834_v53 = vand.u32 2147483647, %v16794_v23  ;;  %vm6059_vm9 = vweird.f32 %v16754_v63  ;;  %v16837_v19 = vand.u32 2147483647, %v14602_v40 }
 0x4b1   :  { %v6227_v31 = vsel %vm15049_vm11, %v14938_v61, %v6223_v16  ;;  %v4788_v56 = vand.u32 2147483647, %v14891_v33  ;;  %v15073_v54 = vadd.f32 1.0, %v8086_v55  ;;  %v16840_v23 = vperm.slane %v14804_v7, %v14429_v17 }
 0x4b2   :  { %vm15058_vm12 = vcmp.eq.f32.partialorder %v16834_v53, 8.507059e+37  ;;  %vm15065_vm2 = vcmp.eq.f32.partialorder %v16837_v19, 8.507059e+37  ;;  %v15084_v40 = vsel %vm14984_vm15, %v14976_v26, %v5747_v43  ;;  %vm6229_vm6 = vcmp.eq.f32.partialorder %v6228_v44, 8.507059e+37  ;;  %v8092_v44 = vpop.eup %8091 }
 0x4b3   :  { %v15079_v6 = vsel %vm6509_vm7, %v16840_v23, %v6506_v42  ;;  %v6231_v18 = vor.u32 1.1754944e-38, %v6230_v58  ;;  %v4795_v7 = vmul.f32 %v15054_v25, %v14990_v11  ;;  %v15098_v42 = vsel %vm14992_vm4, %v6216_v10, %v6212_v0 }
 0x4b4   :  { %v4787_v20 = vsel %vm15090_vm14, %v14949_v39, %v4783_v28  ;;  %v4791_v55 = vor.u32 1.1754944e-38, %v4790_v46  ;;  %v15103_v26 = vadd.f32 1.0, %v8088_v3  ;;  %v5263_v58 = vadd.f32 %v14998_v59, %v5262_v62  ;;  %v15109_v43 = vpop.eup %8093  ;;  %v16847_v28 = vld [vmem:[#allocation14_spill] sm:$0xff] }
 0x4b5   :  { %v15105_v33 = vsel %vm6229_vm6, %v6231_v18, %v6227_v31  ;;  %vm5265_vm15 = vweird.f32 %v14998_v59  ;;  %v4796_v16 = vsub.f32 1.0, %v4795_v7  ;;  %vm4789_vm4 = vcmp.eq.f32.partialorder %v4788_v56, 8.507059e+37  ;;  %v8096_v39 = vpop.eup %8095  ;;  %vm15151_vm6 = vmor %vm6059_vm9, %vm6060_vm13 }
 0x4b6   :  { %16843 = vst [vmem:[#allocation6_spill] sm:$0xff] %v15105_v33  ;;  %v5268_v10 = vand.u32 2147483647, %v14963_v41  ;;  %v5270_v49 = vand.u32 2147483648, %v14963_v41  ;;  %8097 = vrcp.f32 %v15073_v54  ;;  %v16844_v46 = vand.u32 2147483647, %v16754_v63 }
 0x4b7   :  { %v4792_v21 = vsel %vm4789_vm4, %v4791_v55, %v4787_v20  ;;  %vm5264_vm0 = vweird.f32 %v14963_v41  ;;  %8099 = vrcp.f32 %v15103_v26  ;;  %v15134_v19 = vadd.f32 1.0, %v8092_v44  ;;  %v3689_v55 = vpop.xlane.xlu1 %3688 }
 0x4b8   :  { %vm15116_vm8 = vcmp.eq.f32.partialorder %v16844_v46, 8.507059e+37  ;;  %vm15129_vm1 = vmor %vm5264_vm0, %vm5265_vm15  ;;  %v3856_v31 = vadd.f32 %v9913_v2, %v3691_v4  ;;  %v4797_v41 = vmul.f32 %v15054_v25, %v4796_v16  ;;  %v5275_v23 = vmul.f32 %v15109_v43, %v15012_v32  ;;  %v16854_v4 = vld [vmem:[#allocation45_spill] sm:$0xff] }
 0x4b9   :  { %v5267_v56 = vsel %vm15129_vm1, %v14998_v59, %v5263_v58  ;;  %v15143_v18 = vadd.f32 1.0, %v8096_v39  ;;  %v6532_v61 = vperm.slane %v4792_v21, %v16847_v28  ;;  %vm5269_vm11 = vcmp.eq.f32.partialorder %v5268_v10, 8.507059e+37 }
 0x4ba   :  { %v5271_v7 = vor.u32 1.1754944e-38, %v5270_v49  ;;  %v4803_v20 = vand.u32 2147483647, %v14990_v11  ;;  %v4805_v44 = vand.u32 2147483648, %v14990_v11  ;;  %8101 = vrcp.f32 %v15134_v19 }
 0x4bb   :  { %v16852_v58 = vsel %vm14912_vm10, %v14653_v38, %v14882_v35  ;;  %v16853_v63 = vsel %vm14817_vm5, %v13311_v30, %v14441_v9  ;;  %v5285_v38 = vand.u32 2147483648, %v15012_v32  ;;  %v7112_v35 = vmul.f32 -1.442695, %v3856_v31 }
 0x4bc   :  { %v15165_v16 = vsel %vm15065_vm2, %v14924_v22, %v16852_v58  ;;  %v15175_v10 = vsel %vm15058_vm12, %v16854_v4, %v16853_v63  ;;  %v15177_v49 = vpop.eup %8097  ;;  %v5272_v51 = vsel %vm5269_vm11, %v5271_v7, %v5267_v56  ;;  %v6062_v22 = vsel %vm15151_vm6, %v16757_v50, %v14832_v12  ;;  %v3753_v7 = vpop.xlane.xlu0 %3752 }
 0x4bd   :  { %v4798_v52 = vadd.f32 %v15054_v25, %v4797_v41  ;;  %vm4800_vm5 = vweird.f32 %v15054_v25  ;;  %v5276_v30 = vsub.f32 1.0, %v5275_v23  ;;  %8103 = vrcp.f32 %v15143_v18  ;;  %v15187_v9 = vpop.eup %8099  ;;  %v3755_v4 = vpop.xlane.xlu2 %3754 }
 0x4be   :  { %vm16855_vm10 = vcmask 654912   ;;  %vm4799_vm13 = vweird.f32 %v14990_v11  ;;  %vm15194_vm12 = vcmp.eq.f32.partialorder %v4803_v20, 8.507059e+37  ;;  %v5765_v50 = vand.u32 2147483648, %v15073_v54 }
 0x4bf   :  { %v15191_v24 = vsel %vm16855_vm10, %v6532_v61, %v14936_v13  ;;  %v6594_v12 = vperm.slane %v5272_v51, %v16847_v28  ;;  %v4806_v39 = vor.u32 1.1754944e-38, %v4805_v44  ;;  %v5755_v46 = vmul.f32 %v15177_v49, %v15073_v54  ;;  %vm15203_vm9 = vmor %vm4799_vm13, %vm4800_vm5  ;;  %v3563_v51 = vpop.xlane.xlu1 %3562 }
 0x4c0   :  { %v5300_v21 = vand.u32 2147483648, %v15103_v26  ;;  %vm5279_vm2 = vweird.f32 %v15012_v32  ;;  %v5283_v13 = vand.u32 2147483647, %v15012_v32  ;;  %8105 = vpow2.f32 %v7112_v35  ;;  %v15214_v31 = vpop.eup %8101  ;;  %vm16860_vm14 = vmmov %vm16855_vm10 }
 0x4c1   :  { %v15212_v11 = vsel %vm15116_vm8, %v14414_v36, %v6062_v22  ;;  %v4802_v56 = vsel %vm15203_vm9, %v15054_v25, %v4798_v52  ;;  %v5277_v41 = vmul.f32 %v15109_v43, %v5276_v30  ;;  %v15220_v23 = vor.u32 1.1754944e-38, %v5285_v38 }
 0x4c2   :  { %v5290_v61 = vmul.f32 %v15187_v9, %v15103_v26  ;;  %v5763_v20 = vand.u32 2147483647, %v15073_v54  ;;  %v15225_v59 = vor.u32 1.1754944e-38, %v5765_v50  ;;  %v5298_v36 = vand.u32 2147483647, %v15103_v26 }
 0x4c3   :  { %v3855_v5 = vadd.f32 %v9913_v2, %v3689_v55  ;;  %v15229_v44 = vpop.eup %8103  ;;  %v15233_v25 = vsel %vm16860_vm14, %v6594_v12, %v14793_v37  ;;  %vm5280_vm15 = vweird.f32 %v15109_v43  ;;  %v5756_v58 = vsub.f32 1.0, %v5755_v46 }
 0x4c4   :  { %v15236_v63 = vor.u32 1.1754944e-38, %v5300_v21  ;;  %v15240_v38 = vsel %vm15194_vm12, %v4806_v39, %v4802_v56  ;;  %vm5760_vm4 = vweird.f32 %v15177_v49  ;;  %v6235_v55 = vmul.f32 %v15214_v31, %v15134_v19  ;;  %vm15273_vm6 = vmor %vm5279_vm2, %vm5280_vm15 }
 0x4c5   :  { %v4810_v37 = vmul.f32 %v15229_v44, %v15143_v18  ;;  %v15248_v35 = vadd.f32 %v15109_v43, %v5277_v41  ;;  %v5291_v22 = vsub.f32 1.0, %v5290_v61  ;;  %v7111_v52 = vmul.f32 -1.442695, %v3855_v5 }
 0x4c6   :  { %v3887_v30 = vadd.f32 %v9913_v2, %v3753_v7  ;;  %v8106_v50 = vpop.eup %8105  ;;  %vm5759_vm8 = vweird.f32 %v15073_v54  ;;  %v3888_v12 = vadd.f32 %v9913_v2, %v3755_v4  ;;  %v3792_v39 = vadd.f32 %v9913_v2, %v3563_v51  ;;  %v16888_v54 = vld [vmem:[#allocation23_spill] sm:$0xff] }
 0x4c7   :  { %v4811_v29 = vsub.f32 1.0, %v4810_v37  ;;  %vm16186_vm0 = vcmask 1048512   ;;  %v5757_v46 = vmul.f32 %v15177_v49, %v5756_v58  ;;  %vm5295_vm1 = vweird.f32 %v15187_v9  ;;  %v16875_v58 = vld [vmem:[#allocation16_spill] sm:$0xff]  ;;  %vm15329_vm15 = vmor %vm5759_vm8, %vm5760_vm4 }
 0x4c8   :  { %v15256_v21 = vadd.f32 1.0, %v8106_v50  ;;  %8107 = vpow2.f32 %v7111_v52  ;;  %v7143_v53 = vmul.f32 -1.442695, %v3887_v30  ;;  %vm15258_vm11 = vcmp.eq.f32.partialorder %v5283_v13, 8.507059e+37  ;;  %v3627_v50 = vpop.xlane.xlu0 %3626 }
 0x4c9   :  { %v6236_v41 = vsub.f32 1.0, %v6235_v55  ;;  %v7144_v61 = vmul.f32 -1.442695, %v3888_v12  ;;  %v7048_v7 = vmul.f32 -1.442695, %v3792_v39  ;;  %v16863_v5 = vperm.slane %v14824_v27, %v14809_v45  ;;  %v16867_v27 = vld [vmem:[#allocation15_spill] sm:$0xff] }
 0x4ca   :  { %vm5294_vm5 = vweird.f32 %v15103_v26  ;;  %v6245_v51 = vand.u32 2147483648, %v15134_v19  ;;  %v4812_v55 = vmul.f32 %v15229_v44, %v4811_v29  ;;  %8109 = vrcp.f32 %v15256_v21  ;;  %v16870_v29 = vld [vmem:[#allocation32_spill] sm:$0xff] }
 0x4cb   :  { %v15267_v4 = vsel %vm16186_vm0, %v16863_v5, %v15079_v6  ;;  %v6534_v6 = vperm.slane %v15240_v38, %v16867_v27  ;;  %v5282_v32 = vsel %vm15273_vm6, %v15109_v43, %v15248_v35  ;;  %vm6239_vm10 = vweird.f32 %v15134_v19  ;;  %v3565_v5 = vpop.xlane.xlu2 %3564 }
 0x4cc   :  { %16864 = vst [vmem:[#allocation33_spill] sm:$0xff] %v15267_v4  ;;  %vm4814_vm13 = vweird.f32 %v15143_v18  ;;  %8111 = vpow2.f32 %v7143_v53  ;;  %vm15290_vm12 = vcmp.eq.f32.partialorder %v5763_v20, 8.507059e+37  ;;  %v5292_v52 = vmul.f32 %v15187_v9, %v5291_v22 }
 0x4cd   :  { %v4818_v30 = vand.u32 2147483647, %v15143_v18  ;;  %8113 = vpow2.f32 %v7144_v61  ;;  %v16871_v12 = vperm.slane %v16870_v29, %v16758_v1  ;;  %v5758_v35 = vadd.f32 %v15177_v49, %v5757_v46 }
 0x4ce   :  { %v6237_v39 = vmul.f32 %v15214_v31, %v6236_v41  ;;  %8115 = vpow2.f32 %v7048_v7  ;;  %v3824_v20 = vadd.f32 %v9913_v2, %v3627_v50  ;;  %v8108_v53 = vpop.eup %8107  ;;  %vm15304_vm9 = vcmp.eq.f32.partialorder %v5298_v36, 8.507059e+37  ;;  %v16876_v41 = vld [vmem:[#allocation26_spill] sm:$0xff] }
 0x4cf   :  { %v6572_v43 = vsel %vm6505_vm3, %v16871_v12, %v14853_v57  ;;  %v4813_v61 = vadd.f32 %v15229_v44, %v4812_v55  ;;  %vm4815_vm2 = vweird.f32 %v15229_v44  ;;  %v16874_v57 = vperm.slane %v14822_v34, %v14429_v17 }
 0x4d0   :  { %v16877_v7 = vperm.slane %v16876_v41, %v16867_v27  ;;  %vm16878_vm14 = vcmask 720512   ;;  %v4820_v36 = vand.u32 2147483648, %v15143_v18  ;;  %v15320_v29 = vadd.f32 1.0, %v8108_v53  ;;  %v15323_v62 = vpop.eup %8109 }
 0x4d1   :  { %v6574_v46 = vsel %vm6509_vm7, %v16874_v57, %v6572_v43  ;;  %v7080_v12 = vmul.f32 -1.442695, %v3824_v20  ;;  %v3793_v55 = vadd.f32 %v9913_v2, %v3565_v5  ;;  %v5293_v43 = vadd.f32 %v15187_v9, %v5292_v52  ;;  %v16883_v20 = vld [vmem:[#allocation25_spill] sm:$0xff]  ;;  %v16884_v5 = vld [vmem:[#allocation19_spill] sm:$0xff] }
 0x4d2   :  { %v6628_v50 = vsel %vm16878_vm14, %v16877_v7, %v16875_v58  ;;  %v16881_v57 = vperm.slane %v14887_v47, %v14809_v45  ;;  %v16885_v58 = vperm.slane %v16883_v20, %v16884_v5  ;;  %vm16886_vm6 = vcmask 786112   ;;  %v16887_v7 = vld [vmem:[#allocation12_spill] sm:$0xff]  ;;  %v8112_v52 = vpop.eup %8111  ;;  %vm15359_vm14 = vmor %vm4814_vm13, %vm4815_vm2 }
 0x4d3   :  { %v16889_v0 = vperm.slane %v16888_v54, %v16799_v48  ;;  %vm16890_vm4 = vcmask 589312   ;;  %v6238_v13 = vadd.f32 %v15214_v31, %v6237_v39  ;;  %vm6240_vm8 = vweird.f32 %v15214_v31  ;;  %vm15381_vm13 = vmor %vm5294_vm5, %vm5295_vm1 }
 0x4d4   :  { %v15338_v53 = vsel %vm16186_vm0, %v16881_v57, %v6574_v46  ;;  %v15344_v41 = vsel %vm16886_vm6, %v16885_v58, %v6628_v50  ;;  %v5785_v46 = vmul.f32 %v15323_v62, %v15256_v21  ;;  %8117 = vrcp.f32 %v15320_v29  ;;  %v16903_v58 = vld [vmem:[#allocation42_spill] sm:$0xff] }
 0x4d5   :  { %16882 = vst [vmem:[#allocation48_spill] sm:$0xff] %v15338_v53  ;;  %v15351_v3 = vsel %vm16890_vm4, %v16889_v0, %v16887_v7  ;;  %v8114_v0 = vpop.eup %8113  ;;  %v5287_v39 = vsel %vm15258_vm11, %v15220_v23, %v5282_v32  ;;  %v5762_v50 = vsel %vm15329_vm15, %v15177_v49, %v5758_v35  ;;  %v4817_v18 = vsel %vm15359_vm14, %v15229_v44, %v4813_v61  ;;  %vm15394_vm11 = vmor %vm6239_vm10, %vm6240_vm8 }
 0x4d6   :  { %v15375_v57 = vadd.f32 1.0, %v8112_v52  ;;  %v8116_v20 = vpop.eup %8115  ;;  %v5786_v23 = vsub.f32 1.0, %v5785_v46  ;;  %v15385_v56 = vadd.f32 1.0, %v8114_v0  ;;  %8119 = vpow2.f32 %v7080_v12 }
 0x4d7   :  { %v7049_v49 = vmul.f32 -1.442695, %v3793_v55  ;;  %v5297_v44 = vsel %vm15381_vm13, %v15187_v9, %v5293_v43  ;;  %v6246_v26 = vor.u32 1.1754944e-38, %v6245_v51  ;;  %v4821_v35 = vor.u32 1.1754944e-38, %v4820_v36 }
 0x4d8   :  { %8121 = vrcp.f32 %v15375_v57  ;;  %v6596_v61 = vperm.slane %v5287_v39, %v16867_v27  ;;  %v15403_v12 = vsel %vm15290_vm12, %v15225_v59, %v5762_v50  ;;  %v6242_v9 = vsel %vm15394_vm11, %v15214_v31, %v6238_v13 }
 0x4d9   :  { %vm4819_vm1 = vcmp.eq.f32.partialorder %v4818_v30, 8.507059e+37  ;;  %v5787_v34 = vmul.f32 %v15323_v62, %v5786_v23  ;;  %8123 = vrcp.f32 %v15385_v56  ;;  %v15410_v51 = vadd.f32 1.0, %v8116_v20  ;;  %v3629_v20 = vpop.xlane.xlu1 %3628 }
 0x4da   :  { %v4822_v55 = vsel %vm4819_vm1, %v4821_v35, %v4817_v18  ;;  %v15412_v36 = vpop.eup %8117  ;;  %vm16897_vm5 = vcmask 720512   ;;  %v15422_v31 = vsel %vm15304_vm9, %v15236_v63, %v5297_v44  ;;  %v16898_v13 = vand.u32 2147483647, %v15134_v19 }
 0x4db   :  { %v6535_v59 = vsel %vm16897_vm5, %v6534_v6, %v15191_v24  ;;  %8125 = vpow2.f32 %v7049_v49  ;;  %v5793_v30 = vand.u32 2147483647, %v15256_v21  ;;  %v5795_v43 = vand.u32 2147483648, %v15256_v21  ;;  %vm16900_vm12 = vmmov %vm16897_vm5 }
 0x4dc   :  { %vm6244_vm10 = vcmp.eq.f32.partialorder %v16898_v13, 8.507059e+37  ;;  %v5770_v38 = vmul.f32 %v15412_v36, %v15320_v29  ;;  %v8120_v7 = vpop.eup %8119  ;;  %v15434_v24 = vsel %vm16900_vm12, %v6596_v61, %v15233_v25  ;;  %v6536_v19 = vperm.slane %v4822_v55, %v16884_v5 }
 0x4dd   :  { %v15426_v37 = vsel %vm6244_vm10, %v6246_v26, %v6242_v9  ;;  %8127 = vrcp.f32 %v15410_v51  ;;  %v5788_v22 = vadd.f32 %v15323_v62, %v5787_v34  ;;  %vm5790_vm9 = vweird.f32 %v15323_v62 }
 0x4de   :  { %16899 = vst [vmem:[#allocation49_spill] sm:$0xff] %v15426_v37  ;;  %v15440_v6 = vpop.eup %8121  ;;  %v5771_v54 = vsub.f32 1.0, %v5770_v38  ;;  %v15444_v52 = vadd.f32 1.0, %v8120_v7  ;;  %vm5789_vm2 = vweird.f32 %v15256_v21  ;;  %v5778_v46 = vand.u32 2147483647, %v15320_v29 }
 0x4df   :  { %v15452_v0 = vpop.eup %8123  ;;  %vm15454_vm15 = vcmp.eq.f32.partialorder %v5793_v30, 8.507059e+37  ;;  %v5796_v50 = vor.u32 1.1754944e-38, %v5795_v43  ;;  %v5780_v18 = vand.u32 2147483648, %v15320_v29  ;;  %v15462_v44 = vsel %vm16886_vm6, %v6536_v19, %v6535_v59  ;;  %vm15466_vm4 = vmor %vm5789_vm2, %vm5790_vm9  ;;  %v16908_v43 = vld [vmem:[#allocation31_spill] sm:$0xff] }
 0x4e0   :  { %v5772_v32 = vmul.f32 %v15412_v36, %v5771_v54  ;;  %v6250_v26 = vmul.f32 %v15440_v6, %v15375_v57  ;;  %8129 = vrcp.f32 %v15444_v52  ;;  %v5792_v35 = vsel %vm15466_vm4, %v15323_v62, %v5788_v22  ;;  %v3693_v62 = vpop.xlane.xlu0 %3692 }
 0x4e1   :  { %v8126_v49 = vpop.eup %8125  ;;  %vm5774_vm8 = vweird.f32 %v15320_v29  ;;  %v6260_v61 = vand.u32 2147483648, %v15375_v57  ;;  %vm15483_vm14 = vcmp.eq.f32.partialorder %v5778_v46, 8.507059e+37  ;;  %v6265_v59 = vmul.f32 %v15452_v0, %v15385_v56 }
 0x4e2   :  { %v15479_v9 = vadd.f32 1.0, %v8126_v49  ;;  %v6275_v13 = vand.u32 2147483648, %v15385_v56  ;;  %v3825_v30 = vadd.f32 %v9913_v2, %v3629_v20  ;;  %v16909_v38 = vperm.slane %v16908_v43, %v16807_v14 }
 0x4e3   :  { %v15481_v55 = vpop.eup %8127  ;;  %vm16910_vm13 = vcmask 851712   ;;  %vm5775_vm11 = vweird.f32 %v15412_v36  ;;  %v5781_v19 = vor.u32 1.1754944e-38, %v5780_v18  ;;  %v4835_v54 = vand.u32 2147483648, %v15410_v51 }
 0x4e4   :  { %v6632_v7 = vsel %vm16910_vm13, %v16909_v38, %v15344_v41  ;;  %v4825_v22 = vmul.f32 %v15481_v55, %v15410_v51  ;;  %v15502_v46 = vsel %vm15454_vm15, %v5796_v50, %v5792_v35  ;;  %v5773_v20 = vadd.f32 %v15412_v36, %v5772_v32  ;;  %vm15521_vm1 = vmor %vm5774_vm8, %vm5775_vm11 }
 0x4e5   :  { %v6251_v49 = vsub.f32 1.0, %v6250_v26  ;;  %8131 = vrcp.f32 %v15479_v9  ;;  %v6258_v21 = vand.u32 2147483647, %v15375_v57  ;;  %v15507_v41 = vor.u32 1.1754944e-38, %v6260_v61 }
 0x4e6   :  { %v4826_v43 = vsub.f32 1.0, %v4825_v22  ;;  %v15510_v38 = vpop.eup %8129  ;;  %v6266_v47 = vsub.f32 1.0, %v6265_v59  ;;  %v15512_v63 = vor.u32 1.1754944e-38, %v6275_v13  ;;  %v4833_v39 = vand.u32 2147483647, %v15410_v51  ;;  %v3631_v59 = vpop.xlane.xlu2 %3630 }
 0x4e7   :  { %v7081_v50 = vmul.f32 -1.442695, %v3825_v30  ;;  %vm6255_vm5 = vweird.f32 %v15440_v6  ;;  %vm4829_vm10 = vweird.f32 %v15410_v51  ;;  %v15527_v35 = vor.u32 1.1754944e-38, %v4835_v54 }
 0x4e8   :  { %v5305_v61 = vmul.f32 %v15510_v38, %v15444_v52  ;;  %v5777_v13 = vsel %vm15521_vm1, %v15412_v36, %v5773_v20  ;;  %v6252_v29 = vmul.f32 %v15440_v6, %v6251_v49  ;;  %vm6254_vm12 = vweird.f32 %v15375_v57 }
 0x4e9   :  { %v5313_v30 = vand.u32 2147483647, %v15444_v52  ;;  %8133 = vpow2.f32 %v7081_v50  ;;  %v4827_v22 = vmul.f32 %v15481_v55, %v4826_v43  ;;  %v3857_v54 = vadd.f32 %v9913_v2, %v3693_v62  ;;  %v16914_v43 = vld [vmem:[#allocation24_spill] sm:$0xff] }
 0x4ea   :  { %v5306_v32 = vsub.f32 1.0, %v5305_v61  ;;  %v3826_v25 = vadd.f32 %v9913_v2, %v3631_v59  ;;  %v6267_v23 = vmul.f32 %v15452_v0, %v6266_v47  ;;  %vm5309_vm9 = vweird.f32 %v15444_v52  ;;  %v3757_v61 = vpop.xlane.xlu1 %3756  ;;  %v3567_v59 = vpop.xlane.xlu0 %3566 }
 0x4eb   :  { %v15540_v18 = vpop.eup %8131  ;;  %v5315_v36 = vand.u32 2147483648, %v15444_v52  ;;  %v16913_v20 = vperm.slane %v14421_v8, %v16758_v1  ;;  %v16915_v50 = vperm.slane %v16914_v43, %v16847_v28  ;;  %vm16916_vm2 = vcmask 654912  }
 0x4ec   :  { %v15556_v26 = vsel %vm15483_vm14, %v5781_v19, %v5777_v13  ;;  %vm4830_vm15 = vweird.f32 %v15481_v55  ;;  %vm15559_vm6 = vcmp.eq.f32.partialorder %v4833_v39, 8.507059e+37  ;;  %v5307_v8 = vmul.f32 %v15510_v38, %v5306_v32 }
 0x4ed   :  { %v6634_v49 = vsel %vm6505_vm3, %v16913_v20, %v6632_v7  ;;  %v6688_v62 = vsel %vm16916_vm2, %v16915_v50, %v15351_v3  ;;  %v4840_v7 = vmul.f32 %v15540_v18, %v15479_v9  ;;  %v7113_v20 = vmul.f32 -1.442695, %v3857_v54  ;;  %v16924_v54 = vld [vmem:[#allocation27_spill] sm:$0xff]  ;;  %vm15598_vm2 = vmor %vm4829_vm10, %vm4830_vm15 }
 0x4ee   :  { %v7082_v43 = vmul.f32 -1.442695, %v3826_v25  ;;  %v3889_v3 = vadd.f32 %v9913_v2, %v3757_v61  ;;  %v6637_v34 = vperm.slane %v15165_v16, %v14809_v45  ;;  %v6253_v19 = vadd.f32 %v15440_v6, %v6252_v29 }
 0x4ef   :  { %v4828_v39 = vadd.f32 %v15481_v55, %v4827_v22  ;;  %v4841_v13 = vsub.f32 1.0, %v4840_v7  ;;  %v3794_v50 = vadd.f32 %v9913_v2, %v3567_v59  ;;  %v8134_v32 = vpop.eup %8133  ;;  %vm15572_vm4 = vcmp.eq.f32.partialorder %v6258_v21, 8.507059e+37 }
 0x4f0   :  { %vm6270_vm8 = vweird.f32 %v15452_v0  ;;  %vm15577_vm14 = vcmp.eq.f32.partialorder %v5313_v30, 8.507059e+37  ;;  %8135 = vpow2.f32 %v7113_v20  ;;  %v7145_v16 = vmul.f32 -1.442695, %v3889_v3  ;;  %v16932_v3 = vld [vmem:[#allocation41_spill] sm:$0xff] }
 0x4f1   :  { %v16923_v29 = vperm.slane %v16903_v58, %v14429_v17  ;;  %v16925_v7 = vperm.slane %v16924_v54, %v16867_v27  ;;  %vm16926_vm13 = vcmask 720512   ;;  %v5308_v61 = vadd.f32 %v15510_v38, %v5307_v8  ;;  %v3697_v8 = vpop.xlane.xlu2 %3696 }
 0x4f2   :  { %vm5310_vm11 = vweird.f32 %v15510_v38  ;;  %v5316_v30 = vor.u32 1.1754944e-38, %v5315_v36  ;;  %v15591_v59 = vadd.f32 1.0, %v8134_v32  ;;  %vm6269_vm1 = vweird.f32 %v15385_v56  ;;  %v16935_v32 = vld [vmem:[#allocation28_spill] sm:$0xff] }
 0x4f3   :  { %v6636_v22 = vsel %vm6509_vm7, %v16923_v29, %v6634_v49  ;;  %v6690_v21 = vsel %vm16926_vm13, %v16925_v7, %v6688_v62  ;;  %v4842_v49 = vmul.f32 %v15540_v18, %v4841_v13  ;;  %8137 = vpow2.f32 %v7082_v43  ;;  %vm15612_vm13 = vmor %vm6254_vm12, %vm6255_vm5 }
 0x4f4   :  { %v7050_v62 = vmul.f32 -1.442695, %v3794_v50  ;;  %v15604_v20 = vsel %vm16186_vm0, %v6637_v34, %v6636_v22  ;;  %v4832_v43 = vsel %vm15598_vm2, %v15481_v55, %v4828_v39  ;;  %8139 = vrcp.f32 %v15591_v59  ;;  %vm15633_vm5 = vmor %vm5309_vm9, %vm5310_vm11  ;;  %v3695_v39 = vpop.xlane.xlu1 %3694 }
 0x4f5   :  { %16929 = vst [vmem:[#allocation7_spill] sm:$0xff] %v15604_v20  ;;  %v6693_v34 = vperm.slane %v16932_v3, %v16807_v14  ;;  %v6257_v13 = vsel %vm15612_vm13, %v15440_v6, %v6253_v19  ;;  %v15626_v50 = vadd.f32 %v15452_v0, %v6267_v23  ;;  %8141 = vpow2.f32 %v7145_v16 }
 0x4f6   :  { %v3859_v57 = vadd.f32 %v9913_v2, %v3697_v8  ;;  %vm4845_vm10 = vweird.f32 %v15540_v18  ;;  %8143 = vpow2.f32 %v7050_v62  ;;  %v16936_v6 = vperm.slane %v16935_v32, %v16884_v5  ;;  %v8136_v16 = vpop.eup %8135 }
 0x4f7   :  { %vm16937_vm12 = vcmask 786112   ;;  %v6695_v19 = vperm.slane %v15175_v10, %v16758_v1  ;;  %v4837_v52 = vsel %vm15559_vm6, %v15527_v35, %v4832_v43  ;;  %v5312_v29 = vsel %vm15633_vm5, %v15510_v38, %v5308_v61 }
 0x4f8   :  { %v6692_v23 = vsel %vm16937_vm12, %v16936_v6, %v6690_v21  ;;  %v4843_v22 = vadd.f32 %v15540_v18, %v4842_v49  ;;  %v7115_v54 = vmul.f32 -1.442695, %v3859_v57  ;;  %v4850_v7 = vand.u32 2147483648, %v15479_v9 }
 0x4f9   :  { %v15652_v58 = vadd.f32 1.0, %v8136_v16  ;;  %v3858_v21 = vadd.f32 %v9913_v2, %v3695_v39  ;;  %vm16938_vm9 = vcmask 851712   ;;  %v8138_v62 = vpop.eup %8137  ;;  %vm4844_vm15 = vweird.f32 %v15479_v9 }
 0x4fa   :  { %v6694_v10 = vsel %vm16938_vm9, %v6693_v34, %v6692_v23  ;;  %v4848_v35 = vand.u32 2147483647, %v15479_v9  ;;  %8145 = vpow2.f32 %v7115_v54  ;;  %v15661_v38 = vpop.eup %8139  ;;  %v15666_v61 = vsel %vm15572_vm4, %v15507_v41, %v6257_v13  ;;  %vm15675_vm6 = vmor %vm4844_vm15, %vm4845_vm10 }
 0x4fb   :  { %v15659_v47 = vsel %vm6505_vm3, %v6695_v19, %v6694_v10  ;;  %16939 = vst [vmem:[#allocation17_spill] sm:$0xff] %v15666_v61  ;;  %v6538_v49 = vperm.slane %v4837_v52, %v16807_v14  ;;  %v15671_v8 = vsel %vm15577_vm14, %v5316_v30, %v5312_v29  ;;  %8147 = vrcp.f32 %v15652_v58  ;;  %v8142_v51 = vpop.eup %8141  ;;  %vm15692_vm4 = vmor %vm6269_vm1, %vm6270_vm8 }
 0x4fc   :  { %v4847_v53 = vsel %vm15675_vm6, %v15540_v18, %v4843_v22  ;;  %v5320_v41 = vmul.f32 %v15661_v38, %v15591_v59  ;;  %v5328_v25 = vand.u32 2147483647, %v15591_v59  ;;  %v15686_v30 = vadd.f32 1.0, %v8138_v62  ;;  %v8144_v43 = vpop.eup %8143  ;;  %vm16944_vm8 = vmmov %vm16938_vm9  ;;  %v3569_v55 = vpop.xlane.xlu1 %3568 }
 0x4fd   :  { %v4851_v34 = vor.u32 1.1754944e-38, %v4850_v7  ;;  %v5330_v13 = vand.u32 2147483648, %v15591_v59  ;;  %v15697_v18 = vadd.f32 1.0, %v8142_v51  ;;  %v7114_v57 = vmul.f32 -1.442695, %v3858_v21 }
 0x4fe   :  { %vm4849_vm14 = vcmp.eq.f32.partialorder %v4848_v35, 8.507059e+37  ;;  %v5321_v39 = vsub.f32 1.0, %v5320_v41  ;;  %8149 = vrcp.f32 %v15686_v30  ;;  %v15706_v32 = vsel %vm16944_vm8, %v6538_v49, %v15462_v44  ;;  %v3633_v35 = vpop.xlane.xlu0 %3632 }
 0x4ff   :  { %v15710_v23 = vsel %vm4849_vm14, %v4851_v34, %v4847_v53  ;;  %8151 = vrcp.f32 %v15697_v18  ;;  %vm5324_vm11 = vweird.f32 %v15591_v59  ;;  %vm15715_vm1 = vcmp.eq.f32.partialorder %v5328_v25, 8.507059e+37 }
 0x500   :  { %v8146_v19 = vpop.eup %8145  ;;  %v5322_v16 = vmul.f32 %v15661_v38, %v5321_v39  ;;  %v15719_v29 = vadd.f32 1.0, %v8144_v43  ;;  %v5331_v22 = vor.u32 1.1754944e-38, %v5330_v13  ;;  %v5810_v54 = vand.u32 2147483648, %v15652_v58 }
 0x501   :  { %v15721_v44 = vpop.eup %8147  ;;  %v15724_v7 = vadd.f32 1.0, %v8146_v19  ;;  %8153 = vpow2.f32 %v7114_v57  ;;  %vm5325_vm2 = vweird.f32 %v15661_v38  ;;  %vm5804_vm13 = vweird.f32 %v15652_v58 }
 0x502   :  { %v5323_v10 = vadd.f32 %v15661_v38, %v5322_v16  ;;  %v5800_v62 = vmul.f32 %v15721_v44, %v15652_v58  ;;  %v5345_v49 = vand.u32 2147483648, %v15686_v30  ;;  %8155 = vrcp.f32 %v15719_v29  ;;  %vm15746_vm5 = vmor %vm5324_vm11, %vm5325_vm2 }
 0x503   :  { %v5808_v41 = vand.u32 2147483647, %v15652_v58  ;;  %v6290_v25 = vand.u32 2147483648, %v15697_v18  ;;  %8157 = vrcp.f32 %v15724_v7  ;;  %v15750_v13 = vor.u32 1.1754944e-38, %v5810_v54 }
 0x504   :  { %v15737_v51 = vpop.eup %8149  ;;  %v5801_v53 = vsub.f32 1.0, %v5800_v62  ;;  %vm5339_vm10 = vweird.f32 %v15686_v30  ;;  %v3827_v39 = vadd.f32 %v9913_v2, %v3633_v35  ;;  %v5327_v19 = vsel %vm15746_vm5, %v15661_v38, %v5323_v10  ;;  %v3729_v35 = vpop.xlane.xlu2 %3728 }
 0x505   :  { %v15742_v43 = vpop.eup %8151  ;;  %v5335_v57 = vmul.f32 %v15737_v51, %v15686_v30  ;;  %v5343_v59 = vand.u32 2147483647, %v15686_v30  ;;  %v15763_v6 = vor.u32 1.1754944e-38, %v5345_v49  ;;  %v6288_v36 = vand.u32 2147483647, %v15697_v18 }
 0x506   :  { %v5802_v16 = vmul.f32 %v15721_v44, %v5801_v53  ;;  %v6280_v62 = vmul.f32 %v15742_v43, %v15697_v18  ;;  %v4863_v21 = vand.u32 2147483647, %v15719_v29  ;;  %vm5805_vm12 = vweird.f32 %v15721_v44  ;;  %v3759_v48 = vpop.xlane.xlu0 %3758 }
 0x507   :  { %v8154_v54 = vpop.eup %8153  ;;  %v5336_v9 = vsub.f32 1.0, %v5335_v57  ;;  %vm15768_vm9 = vcmp.eq.f32.partialorder %v5808_v41, 8.507059e+37  ;;  %v15772_v10 = vor.u32 1.1754944e-38, %v6290_v25  ;;  %vm4859_vm15 = vweird.f32 %v15719_v29  ;;  %vm15806_vm11 = vmor %vm5804_vm13, %vm5805_vm12 }
 0x508   :  { %v15775_v53 = vadd.f32 1.0, %v8154_v54  ;;  %v8156_v49 = vpop.eup %8155  ;;  %v15779_v34 = vsel %vm15715_vm1, %v5331_v22, %v5327_v19  ;;  %v5803_v57 = vadd.f32 %v15721_v44, %v5802_v16  ;;  %v6281_v4 = vsub.f32 1.0, %v6280_v62 }
 0x509   :  { %v5337_v20 = vmul.f32 %v15737_v51, %v5336_v9  ;;  %v15783_v41 = vpop.eup %8157  ;;  %vm15785_vm6 = vcmp.eq.f32.partialorder %v5343_v59, 8.507059e+37  ;;  %v4855_v25 = vmul.f32 %v8156_v49, %v15719_v29  ;;  %v4865_v54 = vand.u32 2147483648, %v15719_v29 }
 0x50a   :  { %v7083_v33 = vmul.f32 -1.442695, %v3827_v39  ;;  %v3875_v52 = vadd.f32 %v9913_v2, %v3729_v35  ;;  %vm5340_vm14 = vweird.f32 %v15737_v51  ;;  %vm15794_vm8 = vcmp.eq.f32.partialorder %v4863_v21, 8.507059e+37 }
 0x50b   :  { %v5338_v22 = vadd.f32 %v15737_v51, %v5337_v20  ;;  %v5830_v19 = vmul.f32 %v15783_v41, %v15724_v7  ;;  %vm6284_vm1 = vweird.f32 %v15697_v18  ;;  %v4856_v20 = vsub.f32 1.0, %v4855_v25  ;;  %vm15821_vm13 = vmor %vm5339_vm10, %vm5340_vm14 }
 0x50c   :  { %v5838_v21 = vand.u32 2147483647, %v15724_v7  ;;  %8159 = vrcp.f32 %v15775_v53  ;;  %v5807_v59 = vsel %vm15806_vm11, %v15721_v44, %v5803_v57  ;;  %v6282_v62 = vmul.f32 %v15742_v43, %v6281_v4 }
 0x50d   :  { %v5831_v35 = vsub.f32 1.0, %v5830_v19  ;;  %vm5834_vm2 = vweird.f32 %v15724_v7  ;;  %v5840_v58 = vand.u32 2147483648, %v15724_v7  ;;  %v4857_v25 = vmul.f32 %v8156_v49, %v4856_v20  ;;  %v3761_v19 = vpop.xlane.xlu1 %3760 }
 0x50e   :  { %vm4860_vm5 = vweird.f32 %v8156_v49  ;;  %8161 = vpow2.f32 %v7083_v33  ;;  %v7131_v61 = vmul.f32 -1.442695, %v3875_v52  ;;  %v5342_v4 = vsel %vm15821_vm13, %v15737_v51, %v5338_v22 }
 0x50f   :  { %vm6285_vm12 = vweird.f32 %v15742_v43  ;;  %v4866_v44 = vor.u32 1.1754944e-38, %v4865_v54  ;;  %v5832_v57 = vmul.f32 %v15783_v41, %v5831_v35  ;;  %v16959_v30 = vand.u32 2147483647, %v15385_v56  ;;  %vm15850_vm11 = vmor %vm4859_vm15, %vm4860_vm5 }
 0x510   :  { %vm15836_vm14 = vcmp.eq.f32.partialorder %v6288_v36, 8.507059e+37  ;;  %v4858_v52 = vadd.f32 %v8156_v49, %v4857_v25  ;;  %8163 = vpow2.f32 %v7131_v61  ;;  %v3795_v51 = vadd.f32 %v9913_v2, %v3569_v55 }
 0x511   :  { %vm15832_vm10 = vcmp.eq.f32.partialorder %v16959_v30, 8.507059e+37  ;;  %v3890_v22 = vadd.f32 %v9913_v2, %v3759_v48  ;;  %v15845_v54 = vsel %vm15768_vm9, %v15750_v13, %v5807_v59  ;;  %vm5835_vm13 = vweird.f32 %v15783_v41  ;;  %vm15881_vm9 = vmor %vm6284_vm1, %vm6285_vm12 }
 0x512   :  { %vm15855_vm0 = vcmp.eq.f32.partialorder %v5838_v21, 8.507059e+37  ;;  %v5841_v61 = vor.u32 1.1754944e-38, %v5840_v58  ;;  %v3891_v48 = vadd.f32 %v9913_v2, %v3761_v19  ;;  %v15860_v55 = vpop.eup %8159  ;;  %v6283_v13 = vadd.f32 %v15742_v43, %v6282_v62 }
 0x513   :  { %v4862_v29 = vsel %vm15850_vm11, %v8156_v49, %v4858_v52  ;;  %v7051_v38 = vmul.f32 -1.442695, %v3795_v51  ;;  %v7146_v16 = vmul.f32 -1.442695, %v3890_v22  ;;  %v15868_v20 = vsel %vm15785_vm6, %v15763_v6, %v5342_v4  ;;  %vm15894_vm6 = vmor %vm5834_vm2, %vm5835_vm13 }
 0x514   :  { %v5833_v21 = vadd.f32 %v15783_v41, %v5832_v57  ;;  %v5815_v59 = vmul.f32 %v15860_v55, %v15775_v53  ;;  %v7147_v2 = vmul.f32 -1.442695, %v3891_v48  ;;  %v8162_v35 = vpop.eup %8161  ;;  %v4867_v62 = vsel %vm15794_vm8, %v4866_v44, %v4862_v29 }
 0x515   :  { %v5823_v58 = vand.u32 2147483647, %v15775_v53  ;;  %v5825_v49 = vand.u32 2147483648, %v15775_v53  ;;  %8165 = vpow2.f32 %v7051_v38  ;;  %vm5819_vm15 = vweird.f32 %v15775_v53 }
 0x516   :  { %v5816_v6 = vsub.f32 1.0, %v5815_v59  ;;  %v15886_v25 = vadd.f32 1.0, %v8162_v35  ;;  %8167 = vpow2.f32 %v7146_v16  ;;  %v8164_v9 = vpop.eup %8163  ;;  %v6604_v4 = vperm.slane %v15868_v20, %v14429_v17  ;;  %v17000_v35 = vld [vmem:[#allocation34_spill] sm:$0xff] }
 0x517   :  { %8169 = vpow2.f32 %v7147_v2  ;;  %v6287_v44 = vsel %vm15881_vm9, %v15742_v43, %v6283_v13  ;;  %v16972_v57 = vperm.slane %v15084_v40, %v16847_v28  ;;  %vm16973_vm8 = vcmask 654912  }
 0x518   :  { %v6542_v30 = vperm.slane %v4867_v62, %v14429_v17  ;;  %v5817_v52 = vmul.f32 %v15860_v55, %v5816_v6  ;;  %8171 = vrcp.f32 %v15886_v25  ;;  %v5837_v7 = vsel %vm15894_vm6, %v15783_v41, %v5833_v21 }
 0x519   :  { %v6657_v19 = vsel %vm16973_vm8, %v16972_v57, %v14967_v15  ;;  %vm5820_vm1 = vweird.f32 %v15860_v55  ;;  %vm15913_vm2 = vcmp.eq.f32.partialorder %v5823_v58, 8.507059e+37  ;;  %v5826_v51 = vor.u32 1.1754944e-38, %v5825_v49 }
 0x51a   :  { %v15917_v40 = vadd.f32 1.0, %v8164_v9  ;;  %v5818_v15 = vadd.f32 %v15860_v55, %v5817_v52  ;;  %v16976_v22 = vsel %vm15692_vm4, %v15452_v0, %v15626_v50  ;;  %v15933_v56 = vsel %vm15836_vm14, %v15772_v10, %v6287_v44  ;;  %vm15949_vm4 = vmor %vm5819_vm15, %vm5820_vm1 }
 0x51b   :  { %v15928_v41 = vsel %vm15832_vm10, %v15512_v63, %v16976_v22  ;;  %v16977_v48 = vperm.slane %v15710_v23, %v16758_v1  ;;  %v8166_v3 = vpop.eup %8165  ;;  %v5358_v29 = vand.u32 2147483647, %v15886_v25  ;;  %v5360_v0 = vand.u32 2147483648, %v15886_v25 }
 0x51c   :  { %8173 = vrcp.f32 %v15917_v40  ;;  %v15945_v63 = vsel %vm15855_vm0, %v5841_v61, %v5837_v7  ;;  %v8168_v50 = vpop.eup %8167  ;;  %v15953_v23 = vadd.f32 1.0, %v8166_v3  ;;  %v16980_v39 = vperm.slane %v15422_v31, %v16884_v5 }
 0x51d   :  { %v6541_v13 = vsel %vm6505_vm3, %v16977_v48, %v15706_v32  ;;  %vm16981_vm5 = vcmask 786112   ;;  %v16982_v36 = vperm.slane %v15403_v12, %v16867_v27  ;;  %vm16983_vm0 = vcmask 720512   ;;  %v8170_v61 = vpop.eup %8169 }
 0x51e   :  { %v15956_v32 = vsel %vm6509_vm7, %v6542_v30, %v6541_v13  ;;  %v6599_v33 = vsel %vm16981_vm5, %v16980_v39, %v15434_v24  ;;  %v5822_v38 = vsel %vm15949_vm4, %v15860_v55, %v5818_v15  ;;  %vm5354_vm12 = vweird.f32 %v15886_v25  ;;  %vm16985_vm10 = vmmov %vm16981_vm5  ;;  %v8172_v24 = vpop.eup %8171 }
 0x51f   :  { %v6659_v53 = vsel %vm16983_vm0, %v16982_v36, %v6657_v19  ;;  %v15971_v16 = vadd.f32 1.0, %v8168_v50  ;;  %v16984_v20 = vperm.slane %v15556_v26, %v16884_v5  ;;  %v6078_v21 = vand.u32 2147483647, %v15917_v40 }
 0x520   :  { %v6080_v12 = vand.u32 2147483648, %v15917_v40  ;;  %8175 = vrcp.f32 %v15953_v23  ;;  %v16986_v59 = vperm.slane %v15671_v8, %v16807_v14  ;;  %vm16987_vm14 = vcmask 851712  }
 0x521   :  { %v6661_v31 = vsel %vm16985_vm10, %v16984_v20, %v6659_v53  ;;  %v5350_v2 = vmul.f32 %v8172_v24, %v15886_v25  ;;  %vm15985_vm11 = vcmp.eq.f32.partialorder %v5358_v29, 8.507059e+37  ;;  %v5361_v26 = vor.u32 1.1754944e-38, %v5360_v0  ;;  %vm16992_vm9 = vmmov %vm16987_vm14 }
 0x522   :  { %v6601_v55 = vsel %vm16987_vm14, %v16986_v59, %v6599_v33  ;;  %8177 = vrcp.f32 %v15971_v16  ;;  %v16990_v62 = vperm.slane %v15779_v34, %v16758_v1  ;;  %vm6074_vm13 = vweird.f32 %v15917_v40  ;;  %v8174_v18 = vpop.eup %8173 }
 0x523   :  { %v4880_v8 = vand.u32 2147483648, %v15953_v23  ;;  %v5827_v49 = vsel %vm15913_vm2, %v5826_v51, %v5822_v38  ;;  %v16991_v6 = vperm.slane %v15502_v46, %v16807_v14  ;;  %v5351_v44 = vsub.f32 1.0, %v5350_v2 }
 0x524   :  { %v6603_v58 = vsel %vm6505_vm3, %v16990_v62, %v6601_v55  ;;  %v4878_v34 = vand.u32 2147483647, %v15953_v23  ;;  %v6305_v57 = vand.u32 2147483648, %v15971_v16  ;;  %v16007_v19 = vadd.f32 1.0, %v8170_v61 }
 0x525   :  { %v15999_v37 = vsel %vm6509_vm7, %v6604_v4, %v6603_v58  ;;  %v6663_v9 = vsel %vm16992_vm9, %v16991_v6, %v6661_v31  ;;  %v6070_v30 = vmul.f32 %v8174_v18, %v15917_v40  ;;  %v6081_v52 = vor.u32 1.1754944e-38, %v6080_v12 }
 0x526   :  { %v6303_v7 = vand.u32 2147483647, %v15971_v16  ;;  %vm16011_vm15 = vcmp.eq.f32.partialorder %v6078_v21, 8.507059e+37  ;;  %v6664_v46 = vperm.slane %v15845_v54, %v16758_v1  ;;  %v5352_v43 = vmul.f32 %v8172_v24, %v5351_v44  ;;  %v8176_v51 = vpop.eup %8175 }
 0x527   :  { %vm5355_vm6 = vweird.f32 %v8172_v24  ;;  %vm4874_vm8 = vweird.f32 %v15953_v23  ;;  %8179 = vrcp.f32 %v16007_v19  ;;  %v6071_v15 = vsub.f32 1.0, %v6070_v30 }
 0x528   :  { %vm6075_vm1 = vweird.f32 %v8174_v18  ;;  %v4881_v22 = vor.u32 1.1754944e-38, %v4880_v8  ;;  %vm6299_vm2 = vweird.f32 %v15971_v16  ;;  %v8178_v48 = vpop.eup %8177  ;;  %v5353_v13 = vadd.f32 %v8172_v24, %v5352_v43  ;;  %vm5356_vm5 = vmor %vm5354_vm12, %vm5355_vm6  ;;  %v17010_v43 = vld [vmem:[#allocation17_spill] sm:$0xff] }
 0x529   :  { %v4870_v3 = vmul.f32 %v8176_v51, %v15953_v23  ;;  %vm16021_vm4 = vcmp.eq.f32.partialorder %v4878_v34, 8.507059e+37  ;;  %v6306_v54 = vor.u32 1.1754944e-38, %v6305_v57  ;;  %v6320_v0 = vand.u32 2147483648, %v16007_v19  ;;  %vm6076_vm14 = vmor %vm6074_vm13, %vm6075_vm1 }
 0x52a   :  { %v6072_v50 = vmul.f32 %v8174_v18, %v6071_v15  ;;  %v6295_v10 = vmul.f32 %v8178_v48, %v15971_v16  ;;  %vm16029_vm0 = vcmp.eq.f32.partialorder %v6303_v7, 8.507059e+37  ;;  %v6318_v33 = vand.u32 2147483647, %v16007_v19 }
 0x52b   :  { %v6665_v36 = vsel %vm6505_vm3, %v6664_v46, %v6663_v9  ;;  %v5357_v53 = vsel %vm5356_vm5, %v8172_v24, %v5353_v13  ;;  %v4871_v61 = vsub.f32 1.0, %v4870_v3  ;;  %vm4875_vm10 = vweird.f32 %v8176_v51  ;;  %v17006_v9 = vld [vmem:[#allocation13_spill] sm:$0xff] }
 0x52c   :  { %v6666_v38 = vperm.slane %v5827_v49, %v14429_v17  ;;  %v5362_v25 = vsel %vm15985_vm11, %v5361_v26, %v5357_v53  ;;  %v6073_v20 = vadd.f32 %v8174_v18, %v6072_v50  ;;  %v6296_v31 = vsub.f32 1.0, %v6295_v10  ;;  %v17001_v26 = vld [vmem:[#allocation11_spill] sm:$0xff]  ;;  %vm4876_vm1 = vmor %vm4874_vm8, %vm4875_vm10 }
 0x52d   :  { %vm6314_vm12 = vweird.f32 %v16007_v19  ;;  %v16999_v21 = vperm.slane %v15212_v11, %v14429_v17  ;;  %v8180_v59 = vpop.eup %8179  ;;  %v4872_v24 = vmul.f32 %v8176_v51, %v4871_v61  ;;  %v6321_v55 = vor.u32 1.1754944e-38, %v6320_v0  ;;  %v17023_v53 = vld [vmem:[#allocation7_spill] sm:$0xff] }
 0x52e   :  { %v6606_v2 = vperm.slane %v5362_v25, %v14809_v45  ;;  %v17002_v62 = vperm.slane %v17000_v35, %v17001_v26  ;;  %vm17003_vm11 = vcmask 523712   ;;  %v6297_v8 = vmul.f32 %v8178_v48, %v6296_v31 }
 0x52f   :  { %v6698_v12 = vsel %vm6509_vm7, %v16999_v21, %v15659_v47  ;;  %vm6300_vm9 = vweird.f32 %v8178_v48  ;;  %v6310_v11 = vmul.f32 %v8180_v59, %v16007_v19  ;;  %v6077_v47 = vsel %vm6076_vm14, %v8174_v18, %v6073_v20  ;;  %v17021_v19 = vld [vmem:[#allocation48_spill] sm:$0xff] }
 0x530   :  { %v6715_v58 = vsel %vm17003_vm11, %v17002_v62, %v14616_v60  ;;  %v4873_v49 = vadd.f32 %v8176_v51, %v4872_v24  ;;  %v6082_v40 = vsel %vm16011_vm15, %v6081_v52, %v6077_v47  ;;  %vm16056_vm13 = vcmp.eq.f32.partialorder %v6318_v33, 8.507059e+37  ;;  %vm6301_vm15 = vmor %vm6299_vm2, %vm6300_vm9 }
 0x531   :  { %v17007_v44 = vperm.slane %v15098_v42, %v17006_v9  ;;  %vm17008_vm6 = vcmask 589312   ;;  %v6298_v60 = vadd.f32 %v8178_v48, %v6297_v8  ;;  %v6311_v57 = vsub.f32 1.0, %v6310_v11 }
 0x532   :  { %v6667_v18 = vsel %vm6509_vm7, %v6666_v38, %v6665_v36  ;;  %v6668_v30 = vperm.slane %v15945_v63, %v14809_v45  ;;  %v4877_v52 = vsel %vm4876_vm1, %v8176_v51, %v4873_v49  ;;  %vm6315_vm5 = vweird.f32 %v8180_v59  ;;  %v17011_v51 = vld [vmem:[#allocation6_spill] sm:$0xff] }
 0x533   :  { %v6717_v34 = vsel %vm17008_vm6, %v17007_v44, %v6715_v58  ;;  %vm17009_vm14 = vcmask 1048512   ;;  %v6699_v7 = vperm.slane %v6082_v40, %v14809_v45  ;;  %v4882_v23 = vsel %vm16021_vm4, %v4881_v22, %v4877_v52  ;;  %v17014_v22 = vld [vmem:[#allocation49_spill] sm:$0xff] }
 0x534   :  { %v6607_v42 = vsel %vm17009_vm14, %v6606_v2, %v15999_v37  ;;  %v6312_v4 = vmul.f32 %v8180_v59, %v6311_v57  ;;  %v6302_v46 = vsel %vm6301_vm15, %v8178_v48, %v6298_v60  ;;  %v6722_v15 = vperm.slane %v17010_v43, %v16884_v5  ;;  %vm17017_vm10 = vmmov %vm17009_vm14 }
 0x535   :  { %v6544_v63 = vperm.slane %v4882_v23, %v14809_v45  ;;  %v6307_v16 = vsel %vm16029_vm0, %v6306_v54, %v6302_v46  ;;  %v17012_v13 = vperm.slane %v17011_v51, %v16847_v28  ;;  %vm17013_vm8 = vcmask 654912   ;;  %vm6316_vm0 = vmor %vm6314_vm12, %vm6315_vm5 }
 0x536   :  { %v6724_v3 = vperm.slane %v15928_v41, %v16807_v14  ;;  %v6313_v29 = vadd.f32 %v8180_v59, %v6312_v4  ;;  %v17015_v48 = vperm.slane %v17014_v22, %v16867_v27  ;;  %vm17016_vm2 = vcmask 720512   ;;  %v17019_v41 = vld [vmem:[#allocation33_spill] sm:$0xff]  ;;  %vm17022_vm14 = vmmov %vm17017_vm10 }
 0x537   :  { %v6719_v37 = vsel %vm17013_vm8, %v17012_v13, %v6717_v34  ;;  %v6726_v5 = vperm.slane %v15933_v56, %v16758_v1  ;;  %vm6732_vm4 = vcmask 1041409   ;;  %v6545_v28 = vsel %vm17017_vm10, %v6544_v63, %v15956_v32  ;;  %vm17024_vm8 = vmmov %vm17017_vm10 }
 0x538   :  { %v6721_v0 = vsel %vm17016_vm2, %v17015_v48, %v6719_v37  ;;  %v6728_v54 = vperm.slane %v6307_v16, %v14429_v17  ;;  %vm6734_vm11 = vcmask 1042434   ;;  %vm6736_vm9 = vcmask 1043459  }
 0x539   :  { %v6317_v14 = vsel %vm6316_vm0, %v8180_v59, %v6313_v29  ;;  %vm17018_vm6 = vcmask 786112   ;;  %v6733_v50 = vsel %vm6732_vm4, %v6545_v28, %v17019_v41  ;;  %vm6738_vm1 = vcmask 1044484  }
 0x53a   :  { %v6723_v27 = vsel %vm17018_vm6, %v6722_v15, %v6721_v0  ;;  %v6322_v1 = vsel %vm16056_vm13, %v6321_v55, %v6317_v14  ;;  %vm17020_vm15 = vcmask 851712   ;;  %v6735_v10 = vsel %vm6734_vm11, %v17021_v19, %v6733_v50 }
 0x53b   :  { %v6725_v56 = vsel %vm17020_vm15, %v6724_v3, %v6723_v27  ;;  %vm6740_vm12 = vcmask 1045509   ;;  %v6730_v17 = vperm.slane %v6322_v1, %v14809_v45  ;;  %v6737_v39 = vsel %vm6736_vm9, %v6607_v42, %v6735_v10 }
 0x53c   :  { %v6727_v32 = vsel %vm6505_vm3, %v6726_v5, %v6725_v56  ;;  %vm6742_vm5 = vcmask 1046534   ;;  %v6669_v33 = vsel %vm17022_vm14, %v6668_v30, %v6667_v18  ;;  %v6739_v61 = vsel %vm6738_vm1, %v17023_v53, %v6737_v39  ;;  %vm17025_vm3 = vmmov %vm17024_vm8 }
 0x53d   :  { %v6729_v36 = vsel %vm6509_vm7, %v6728_v54, %v6727_v32  ;;  %vm6744_vm13 = vcmask 1047559   ;;  %v6700_v38 = vsel %vm17024_vm8, %v6699_v7, %v6698_v12  ;;  %v6741_v45 = vsel %vm6740_vm12, %v6669_v33, %v6739_v61 }
 0x53e   :  { %v6731_v25 = vsel %vm17025_vm3, %v6730_v17, %v6729_v36  ;;  %v6743_v20 = vsel %vm6742_vm5, %v6700_v38, %v6741_v45 }
 0x53f   :  { %v6745_v31 = vsel %vm6744_vm13, %v6731_v25, %v6743_v20 }
 0x540   :  { %6747 = vst [vmem:[#allocation3] sm:$0xff] %v6745_v31 }
 0x541   :  { %6758 = dma.vmem_to_hbm [thread:$0]  %s6754_s25, 128, %s6756_s1, [#allocation4]  }
 0x542   :  { %8221 = dma.done.wait [#allocation4], 128  }
 0x543   :  { %8222 = vsyncadd [#allocation4], 4294967168 }
 0x544   :  { %6763 = vsyncpa [#allocation4], 1 }

</bundles_post_ra>
